<compile_context>
chip_gen: v6e
topology: v6e:2x2x1
jax: 0.10.0
libtpu: 0.0.40
codegen_flags: <defaults>
</compile_context>

<pallas_src>
import functools

import numpy as np
import jax
import jax.numpy as jnp
from jax.experimental import pallas as pl
from jax.experimental.pallas import tpu as pltpu

K = 5      # conv kernel size
PAD = 2    # padding for the 5x5 convs


# ------------------------------ fused kernel --------------------------------

def _local_res_kernel(alphas_ref,   # SMEM (6,)                 PReLU alphas
                      x_ref,        # VMEM (1, C_pad, BHW)      input block
                      w5_ref,       # VMEM (6, C_pad, 25*C_pad) im2col'd 5x5 weights
                      b_ref,        # VMEM (7, C_pad, 1)        6 conv biases + 1x1 bias
                      w1_ref,       # VMEM (C_pad, C_pad)       shared 1x1 weight
                      masks_ref,    # VMEM (25, C_pad, BHW)     pre-broadcast tap masks
                      o_ref,        # VMEM (1, C_pad, BHW)      output block
                      r_ref,        # VMEM scratch (25*C_pad, BHW) im2col buffer
                      *, C_pad, W, BHW):

    def conv5x5_prelu(inp, layer):
        # Build the im2col matrix: 25 masked, rolled copies of `inp`.
        # Each tap occupies a full 8-sublane-aligned (C_pad, BHW) slab.
        for t in range(K * K):
            ky, kx = t // K, t % K
            dy, dx = ky - PAD, kx - PAD
            s = dy * W + dx                      # tap offset in flattened HW
            if s == 0:
                tap = inp                        # center tap: no shift, mask == 1
            else:
                # rolled[p] = inp[p + s] at valid positions; the pre-broadcast
                # mask kills zero-padding, row-wrap and cross-image positions.
                rolled = pltpu.roll(inp, shift=(-s) % BHW, axis=1)
                tap = rolled * masks_ref[t]      # same-shape VPU mul, no bcast
            r_ref[C_pad * t:C_pad * (t + 1), :] = tap
        # One MXU contraction per conv: (C_pad, 25*C_pad) x (25*C_pad, BHW).
        acc = jnp.dot(w5_ref[layer], r_ref[...],
                      preferred_element_type=jnp.float32)
        acc = acc + b_ref[layer]                 # (C_pad, BHW) + (C_pad, 1)
        alpha = alphas_ref[layer]                # SMEM scalar
        return jnp.where(acc >= 0, acc, acc * alpha)

    def add_conv1x1(a, b):
        s = a + b
        y = jnp.dot(w1_ref[...], s, preferred_element_type=jnp.float32)
        return y + b_ref[6]

    x = x_ref[0]                                  # (C_pad, BHW)
    out1 = conv5x5_prelu(x, 0)
    out2 = conv5x5_prelu(out1, 1)
    out_at = add_conv1x1(out1, out2)
    out3 = conv5x5_prelu(out_at, 2)
    out_at = add_conv1x1(out_at, out3)
    out4 = conv5x5_prelu(out_at, 3)
    out_at = add_conv1x1(out_at, out4)
    out5 = conv5x5_prelu(out_at, 4)
    out_at = add_conv1x1(out_at, out5)
    out6 = conv5x5_prelu(out_at, 5)
    o_ref[0] = x + out6                           # residual add (padded rows stay 0)


# --------------------------- one-time param packing ---------------------------

def _boundary_masks(H, W, C_pad, imgs_per_block):
    """(25, C_pad, B*H*W) f32 masks: zero padding per tap, tiled per image,
    pre-broadcast over the sublane (channel) axis."""
    y = np.arange(H)[:, None]
    x = np.arange(W)[None, :]
    m = []
    for ky in range(K):
        for kx in range(K):
            dy, dx = ky - PAD, kx - PAD
            valid = ((y + dy >= 0) & (y + dy < H) &
                     (x + dx >= 0) & (x + dx < W)).reshape(H * W)
            valid = np.tile(valid, imgs_per_block)                  # (B*HW,)
            m.append(np.broadcast_to(valid, (C_pad, imgs_per_block * H * W)))
    return jnp.asarray(np.stack(m, 0).astype(np.float32))


def prepare_packed_params(p, C, H, W, imgs_per_block):
    """Hoisted out of the forward: run once, reuse the packed arrays."""
    C_pad = ((C + 7) // 8) * 8          # 8-sublane alignment for tap blocks

    def prep_w5(w):   # (Cout, Cin, K, K) -> (C_pad, K*K*C_pad), col = tap*C_pad + ci
        co, ci = w.shape[0], w.shape[1]
        w = jnp.transpose(w, (0, 2, 3, 1))                           # (Cout, K, K, Cin)
        w = jnp.pad(w, ((0, C_pad - co), (0, 0), (0, 0), (0, C_pad - ci)))
        return w.reshape(C_pad, K * K * C_pad)

    def prep_b(b):
        return jnp.pad(b, (0, C_pad - b.shape[0]))

    w5 = jnp.stack([prep_w5(p['w1']), prep_w5(p['w2']), prep_w5(p['w3']),
                    prep_w5(p['w4']), prep_w5(p['w5']), prep_w5(p['w6'])],
                   axis=0).astype(jnp.float32)                       # (6, C_pad, 25*C_pad)
    biases = jnp.stack([prep_b(p['b1']), prep_b(p['b2']), prep_b(p['b3']),
                        prep_b(p['b4']), prep_b(p['b5']), prep_b(p['b6']),
                        prep_b(p['b1x1'])],
                       axis=0).reshape(7, C_pad, 1).astype(jnp.float32)
    w1x1 = jnp.pad(p['w1x1'][:, :, 0, 0],
                   ((0, C_pad - C), (0, C_pad - C))).astype(jnp.float32)
    alphas = jnp.array([p['a1'], p['a2'], p['a3'], p['a4'], p['a5'], p['a6']],
                       jnp.float32)
    masks = _boundary_masks(H, W, C_pad, imgs_per_block)             # (25, C_pad, B*HW)
    return dict(w5=w5, biases=biases, w1x1=w1x1, alphas=alphas, masks=masks)


# ------------------------------- forward wrapper ------------------------------

def local_res_forward(x_nchw, packed, *, n_blocks, imgs_per_block):
    N, C, H, W = x_nchw.shape
    C_pad = packed['w5'].shape[1]
    HW = H * W
    B = imgs_per_block
    BHW = B * HW
    Npad = n_blocks * B

    # Pad channels to C_pad (and batch to Npad), fold B images onto the lane axis.
    x = x_nchw.reshape(N, C, HW).astype(jnp.float32)
    x = jnp.pad(x, ((0, Npad - N), (0, C_pad - C), (0, 0)))
    x = (x.reshape(n_blocks, B, C_pad, HW)
          .transpose(0, 2, 1, 3)
          .reshape(n_blocks, C_pad, BHW))

    kernel = functools.partial(_local_res_kernel, C_pad=C_pad, W=W, BHW=BHW)
    out = pl.pallas_call(
        kernel,
        out_shape=jax.ShapeDtypeStruct((n_blocks, C_pad, BHW), jnp.float32),
        grid=(n_blocks,),
        in_specs=[
            pl.BlockSpec(memory_space=pltpu.MemorySpace.SMEM),          # alphas
            pl.BlockSpec((1, C_pad, BHW), lambda n: (n, 0, 0)),         # x block
            pl.BlockSpec((6, C_pad, K * K * C_pad), lambda n: (0, 0, 0)),  # 5x5 weights
            pl.BlockSpec((7, C_pad, 1), lambda n: (0, 0, 0)),           # biases
            pl.BlockSpec((C_pad, C_pad), lambda n: (0, 0)),             # 1x1 weight
            pl.BlockSpec((K * K, C_pad, BHW), lambda n: (0, 0, 0)),     # tap masks
        ],
        out_specs=pl.BlockSpec((1, C_pad, BHW), lambda n: (n, 0, 0)),
        scratch_shapes=[pltpu.VMEM((K * K * C_pad, BHW), jnp.float32)],
        compiler_params=pltpu.CompilerParams(
            dimension_semantics=("parallel",)),
    )(packed['alphas'], x, packed['w5'], packed['biases'],
      packed['w1x1'], packed['masks'])

    out = (out.reshape(n_blocks, C_pad, B, HW)
              .transpose(0, 2, 1, 3)
              .reshape(Npad, C_pad, HW))
    return out[:N, :C].reshape(N, C, H, W)


# ------------------------------ reference ------------------------------------

def local_res_reference(x, p):
    def conv(x, w, b, pad):
        y = jax.lax.conv_general_dilated(
            x, w, window_strides=(1, 1), padding=[(pad, pad), (pad, pad)],
            dimension_numbers=('NCHW', 'OIHW', 'NCHW'))
        return y + b[None, :, None, None]

    def prelu(x, a):
        return jnp.where(x >= 0, x, a * x)

    res = x
    out1 = prelu(conv(x,      p['w1'], p['b1'], PAD), p['a1'])
    out2 = prelu(conv(out1,   p['w2'], p['b2'], PAD), p['a2'])
    out_at = conv(out1 + out2, p['w1x1'], p['b1x1'], 0)
    out3 = prelu(conv(out_at, p['w3'], p['b3'], PAD), p['a3'])
    out_at = conv(out_at + out3, p['w1x1'], p['b1x1'], 0)
    out4 = prelu(conv(out_at, p['w4'], p['b4'], PAD), p['a4'])
    out_at = conv(out_at + out4, p['w1x1'], p['b1x1'], 0)
    out5 = prelu(conv(out_at, p['w5'], p['b5'], PAD), p['a5'])
    out_at = conv(out_at + out5, p['w1x1'], p['b1x1'], 0)
    out6 = prelu(conv(out_at, p['w6'], p['b6'], PAD), p['a6'])
    return res + out6


# --------------------------- deterministic params ----------------------------

def init_params(key, cin, cout):
    ks = jax.random.split(key, 16)

    def w5(k, ci, co):
        return 0.05 * jax.random.normal(k, (co, ci, K, K), jnp.float32)

    def bias(k, co):
        return 0.05 * jax.random.normal(k, (co,), jnp.float32)

    p = {
        'w1': w5(ks[0], cin, cout),  'b1': bias(ks[1], cout),  'a1': 0.25,
        'w2': w5(ks[2], cout, cout), 'b2': bias(ks[3], cout),  'a2': 0.25,
        'w1x1': 0.05 * jax.random.normal(ks[4], (cout, cout, 1, 1), jnp.float32),
        'b1x1': bias(ks[5], cout),
        'w3': w5(ks[6], cout, cout),  'b3': bias(ks[7], cout),  'a3': 0.25,
        'w4': w5(ks[8], cout, cout),  'b4': bias(ks[9], cout),  'a4': 0.25,
        'w5': w5(ks[10], cout, cout), 'b5': bias(ks[11], cout), 'a5': 0.25,
        'w6': w5(ks[12], cout, cout), 'b6': bias(ks[13], cout), 'a6': 0.25,
    }
    # nn.PReLU() in the module is scalar (num_parameters=1) -> scalar alphas.
    # conv1x2 is defined in __init__ but never used in forward(); not built.
    return p


# ---------------------------------- main --------------------------------------

if __name__ == "__main__":
    key = jax.random.PRNGKey(0)
    kx, kp = jax.random.split(key)

    N, C, H, W = 4, 4, 16, 16      # inChannals == outChannals (required by the
                                   # final `resudial + out6` residual add)
    x = jax.random.normal(kx, (N, C, H, W), jnp.float32)
    params = init_params(kp, C, C)

    # 2 parallel blocks when N >= 2 (v7x: one per TensorCore); images within a
    # block are folded onto the lane axis.
    n_blocks = 2 if N >= 2 else 1
    imgs_per_block = -(-N // n_blocks)

    packed = prepare_packed_params(params, C, H, W, imgs_per_block)

    fwd = jax.jit(functools.partial(local_res_forward,
                                    n_blocks=n_blocks,
                                    imgs_per_block=imgs_per_block))
    out = jax.block_until_ready(fwd(x, packed))

    ref = local_res_reference(x, params)
    assert out.shape == (N, C, H, W), out.shape
    max_err = float(jnp.max(jnp.abs(out - ref)))
    assert max_err < 1e-3, f"mismatch vs reference: {max_err}"

    print("KERNEL_OK")
</pallas_src>

<mosaic_0001>
module attributes {stable_mosaic.version = 11 : i64} {
  func.func @_local_res_kernel(%arg0: i32, %arg1: memref<6xf32, #tpu.memory_space<smem>>, %arg2: memref<1x8x512xf32, #tpu.memory_space<vmem>>, %arg3: memref<6x8x200xf32, #tpu.memory_space<vmem>>, %arg4: memref<7x8x1xf32, #tpu.memory_space<vmem>>, %arg5: memref<8x8xf32, #tpu.memory_space<vmem>>, %arg6: memref<25x8x512xf32, #tpu.memory_space<vmem>>, %arg7: memref<1x8x512xf32, #tpu.memory_space<vmem>>, %arg8: memref<200x512xf32, #tpu.memory_space<vmem>>) attributes {dimension_semantics = [#tpu.dimension_semantics<parallel>], iteration_bounds = array<i64: 2>, scalar_prefetch = 0 : i64, scratch_operands = 1 : i64, tpu.core_type = #tpu.core_type<tc>, window_params = [{transform_indices = @transform_0, window_bounds = array<i64: 6>}, {transform_indices = @transform_1, window_bounds = array<i64: 1, 8, 512>}, {pipeline_mode = #tpu.pipeline_mode<synchronous>, transform_indices = @transform_2, window_bounds = array<i64: 6, 8, 200>}, {pipeline_mode = #tpu.pipeline_mode<synchronous>, transform_indices = @transform_3, window_bounds = array<i64: 7, 8, 1>}, {pipeline_mode = #tpu.pipeline_mode<synchronous>, transform_indices = @transform_4, window_bounds = array<i64: 8, 8>}, {pipeline_mode = #tpu.pipeline_mode<synchronous>, transform_indices = @transform_5, window_bounds = array<i64: 25, 8, 512>}, {transform_indices = @transform_6, window_bounds = array<i64: 1, 8, 512>}]} {
    %c0 = arith.constant 0 : index
    %c0_0 = arith.constant 0 : index
    %c0_1 = arith.constant 0 : index
    %0 = vector.load %arg2[%c0, %c0_0, %c0_1] : memref<1x8x512xf32, #tpu.memory_space<vmem>>, vector<1x8x512xf32>
    %1 = vector.shape_cast %0 : vector<1x8x512xf32> to vector<8x512xf32>
    %c34_i32 = arith.constant 34 : i32
    %2 = tpu.dynamic_rotate %1 by %c34_i32 dim 1 : vector<8x512xf32>, i32 -> vector<8x512xf32>
    %c0_2 = arith.constant 0 : index
    %c0_3 = arith.constant 0 : index
    %c0_4 = arith.constant 0 : index
    %3 = vector.load %arg6[%c0_2, %c0_3, %c0_4] : memref<25x8x512xf32, #tpu.memory_space<vmem>>, vector<1x8x512xf32>
    %4 = vector.shape_cast %3 : vector<1x8x512xf32> to vector<8x512xf32>
    %5 = arith.mulf %2, %4 : vector<8x512xf32>
    %c0_5 = arith.constant 0 : index
    %c0_6 = arith.constant 0 : index
    %6 = vector.load %arg8[%c0_5, %c0_6] : memref<200x512xf32, #tpu.memory_space<vmem>>, vector<8x512xf32>
    tpu.vector_store %arg8[%c0_5, %c0_6], %5 {strides = array<i32>} : memref<200x512xf32, #tpu.memory_space<vmem>>, vector<8x512xf32>,
    %c33_i32 = arith.constant 33 : i32
    %7 = tpu.dynamic_rotate %1 by %c33_i32 dim 1 : vector<8x512xf32>, i32 -> vector<8x512xf32>
    %c1 = arith.constant 1 : index
    %c0_7 = arith.constant 0 : index
    %c0_8 = arith.constant 0 : index
    %8 = vector.load %arg6[%c1, %c0_7, %c0_8] : memref<25x8x512xf32, #tpu.memory_space<vmem>>, vector<1x8x512xf32>
    %9 = vector.shape_cast %8 : vector<1x8x512xf32> to vector<8x512xf32>
    %10 = arith.mulf %7, %9 : vector<8x512xf32>
    %c8 = arith.constant 8 : index
    %c0_9 = arith.constant 0 : index
    %11 = vector.load %arg8[%c8, %c0_9] : memref<200x512xf32, #tpu.memory_space<vmem>>, vector<8x512xf32>
    tpu.vector_store %arg8[%c8, %c0_9], %10 {strides = array<i32>} : memref<200x512xf32, #tpu.memory_space<vmem>>, vector<8x512xf32>,
    %c32_i32 = arith.constant 32 : i32
    %12 = tpu.dynamic_rotate %1 by %c32_i32 dim 1 : vector<8x512xf32>, i32 -> vector<8x512xf32>
    %c2 = arith.constant 2 : index
    %c0_10 = arith.constant 0 : index
    %c0_11 = arith.constant 0 : index
    %13 = vector.load %arg6[%c2, %c0_10, %c0_11] : memref<25x8x512xf32, #tpu.memory_space<vmem>>, vector<1x8x512xf32>
    %14 = vector.shape_cast %13 : vector<1x8x512xf32> to vector<8x512xf32>
    %15 = arith.mulf %12, %14 : vector<8x512xf32>
    %c16 = arith.constant 16 : index
    %c0_12 = arith.constant 0 : index
    %16 = vector.load %arg8[%c16, %c0_12] : memref<200x512xf32, #tpu.memory_space<vmem>>, vector<8x512xf32>
    tpu.vector_store %arg8[%c16, %c0_12], %15 {strides = array<i32>} : memref<200x512xf32, #tpu.memory_space<vmem>>, vector<8x512xf32>,
    %c31_i32 = arith.constant 31 : i32
    %17 = tpu.dynamic_rotate %1 by %c31_i32 dim 1 : vector<8x512xf32>, i32 -> vector<8x512xf32>
    %c3 = arith.constant 3 : index
    %c0_13 = arith.constant 0 : index
    %c0_14 = arith.constant 0 : index
    %18 = vector.load %arg6[%c3, %c0_13, %c0_14] : memref<25x8x512xf32, #tpu.memory_space<vmem>>, vector<1x8x512xf32>
    %19 = vector.shape_cast %18 : vector<1x8x512xf32> to vector<8x512xf32>
    %20 = arith.mulf %17, %19 : vector<8x512xf32>
    %c24 = arith.constant 24 : index
    %c0_15 = arith.constant 0 : index
    %21 = vector.load %arg8[%c24, %c0_15] : memref<200x512xf32, #tpu.memory_space<vmem>>, vector<8x512xf32>
    tpu.vector_store %arg8[%c24, %c0_15], %20 {strides = array<i32>} : memref<200x512xf32, #tpu.memory_space<vmem>>, vector<8x512xf32>,
    %c30_i32 = arith.constant 30 : i32
    %22 = tpu.dynamic_rotate %1 by %c30_i32 dim 1 : vector<8x512xf32>, i32 -> vector<8x512xf32>
    %c4 = arith.constant 4 : index
    %c0_16 = arith.constant 0 : index
    %c0_17 = arith.constant 0 : index
    %23 = vector.load %arg6[%c4, %c0_16, %c0_17] : memref<25x8x512xf32, #tpu.memory_space<vmem>>, vector<1x8x512xf32>
    %24 = vector.shape_cast %23 : vector<1x8x512xf32> to vector<8x512xf32>
    %25 = arith.mulf %22, %24 : vector<8x512xf32>
    %c32 = arith.constant 32 : index
    %c0_18 = arith.constant 0 : index
    %26 = vector.load %arg8[%c32, %c0_18] : memref<200x512xf32, #tpu.memory_space<vmem>>, vector<8x512xf32>
    tpu.vector_store %arg8[%c32, %c0_18], %25 {strides = array<i32>} : memref<200x512xf32, #tpu.memory_space<vmem>>, vector<8x512xf32>,
    %c18_i32 = arith.constant 18 : i32
    %27 = tpu.dynamic_rotate %1 by %c18_i32 dim 1 : vector<8x512xf32>, i32 -> vector<8x512xf32>
    %c5 = arith.constant 5 : index
    %c0_19 = arith.constant 0 : index
    %c0_20 = arith.constant 0 : index
    %28 = vector.load %arg6[%c5, %c0_19, %c0_20] : memref<25x8x512xf32, #tpu.memory_space<vmem>>, vector<1x8x512xf32>
    %29 = vector.shape_cast %28 : vector<1x8x512xf32> to vector<8x512xf32>
    %30 = arith.mulf %27, %29 : vector<8x512xf32>
    %c40 = arith.constant 40 : index
    %c0_21 = arith.constant 0 : index
    %31 = vector.load %arg8[%c40, %c0_21] : memref<200x512xf32, #tpu.memory_space<vmem>>, vector<8x512xf32>
    tpu.vector_store %arg8[%c40, %c0_21], %30 {strides = array<i32>} : memref<200x512xf32, #tpu.memory_space<vmem>>, vector<8x512xf32>,
    %c17_i32 = arith.constant 17 : i32
    %32 = tpu.dynamic_rotate %1 by %c17_i32 dim 1 : vector<8x512xf32>, i32 -> vector<8x512xf32>
    %c6 = arith.constant 6 : index
    %c0_22 = arith.constant 0 : index
    %c0_23 = arith.constant 0 : index
    %33 = vector.load %arg6[%c6, %c0_22, %c0_23] : memref<25x8x512xf32, #tpu.memory_space<vmem>>, vector<1x8x512xf32>
    %34 = vector.shape_cast %33 : vector<1x8x512xf32> to vector<8x512xf32>
    %35 = arith.mulf %32, %34 : vector<8x512xf32>
    %c48 = arith.constant 48 : index
    %c0_24 = arith.constant 0 : index
    %36 = vector.load %arg8[%c48, %c0_24] : memref<200x512xf32, #tpu.memory_space<vmem>>, vector<8x512xf32>
    tpu.vector_store %arg8[%c48, %c0_24], %35 {strides = array<i32>} : memref<200x512xf32, #tpu.memory_space<vmem>>, vector<8x512xf32>,
    %c16_i32 = arith.constant 16 : i32
    %37 = tpu.dynamic_rotate %1 by %c16_i32 dim 1 : vector<8x512xf32>, i32 -> vector<8x512xf32>
    %c7 = arith.constant 7 : index
    %c0_25 = arith.constant 0 : index
    %c0_26 = arith.constant 0 : index
    %38 = vector.load %arg6[%c7, %c0_25, %c0_26] : memref<25x8x512xf32, #tpu.memory_space<vmem>>, vector<1x8x512xf32>
    %39 = vector.shape_cast %38 : vector<1x8x512xf32> to vector<8x512xf32>
    %40 = arith.mulf %37, %39 : vector<8x512xf32>
    %c56 = arith.constant 56 : index
    %c0_27 = arith.constant 0 : index
    %41 = vector.load %arg8[%c56, %c0_27] : memref<200x512xf32, #tpu.memory_space<vmem>>, vector<8x512xf32>
    tpu.vector_store %arg8[%c56, %c0_27], %40 {strides = array<i32>} : memref<200x512xf32, #tpu.memory_space<vmem>>, vector<8x512xf32>,
    %c15_i32 = arith.constant 15 : i32
    %42 = tpu.dynamic_rotate %1 by %c15_i32 dim 1 : vector<8x512xf32>, i32 -> vector<8x512xf32>
    %c8_28 = arith.constant 8 : index
    %c0_29 = arith.constant 0 : index
    %c0_30 = arith.constant 0 : index
    %43 = vector.load %arg6[%c8_28, %c0_29, %c0_30] : memref<25x8x512xf32, #tpu.memory_space<vmem>>, vector<1x8x512xf32>
    %44 = vector.shape_cast %43 : vector<1x8x512xf32> to vector<8x512xf32>
    %45 = arith.mulf %42, %44 : vector<8x512xf32>
    %c64 = arith.constant 64 : index
    %c0_31 = arith.constant 0 : index
    %46 = vector.load %arg8[%c64, %c0_31] : memref<200x512xf32, #tpu.memory_space<vmem>>, vector<8x512xf32>
    tpu.vector_store %arg8[%c64, %c0_31], %45 {strides = array<i32>} : memref<200x512xf32, #tpu.memory_space<vmem>>, vector<8x512xf32>,
    %c14_i32 = arith.constant 14 : i32
    %47 = tpu.dynamic_rotate %1 by %c14_i32 dim 1 : vector<8x512xf32>, i32 -> vector<8x512xf32>
    %c9 = arith.constant 9 : index
    %c0_32 = arith.constant 0 : index
    %c0_33 = arith.constant 0 : index
    %48 = vector.load %arg6[%c9, %c0_32, %c0_33] : memref<25x8x512xf32, #tpu.memory_space<vmem>>, vector<1x8x512xf32>
    %49 = vector.shape_cast %48 : vector<1x8x512xf32> to vector<8x512xf32>
    %50 = arith.mulf %47, %49 : vector<8x512xf32>
    %c72 = arith.constant 72 : index
    %c0_34 = arith.constant 0 : index
    %51 = vector.load %arg8[%c72, %c0_34] : memref<200x512xf32, #tpu.memory_space<vmem>>, vector<8x512xf32>
    tpu.vector_store %arg8[%c72, %c0_34], %50 {strides = array<i32>} : memref<200x512xf32, #tpu.memory_space<vmem>>, vector<8x512xf32>,
    %c2_i32 = arith.constant 2 : i32
    %52 = tpu.dynamic_rotate %1 by %c2_i32 dim 1 : vector<8x512xf32>, i32 -> vector<8x512xf32>
    %c10 = arith.constant 10 : index
    %c0_35 = arith.constant 0 : index
    %c0_36 = arith.constant 0 : index
    %53 = vector.load %arg6[%c10, %c0_35, %c0_36] : memref<25x8x512xf32, #tpu.memory_space<vmem>>, vector<1x8x512xf32>
    %54 = vector.shape_cast %53 : vector<1x8x512xf32> to vector<8x512xf32>
    %55 = arith.mulf %52, %54 : vector<8x512xf32>
    %c80 = arith.constant 80 : index
    %c0_37 = arith.constant 0 : index
    %56 = vector.load %arg8[%c80, %c0_37] : memref<200x512xf32, #tpu.memory_space<vmem>>, vector<8x512xf32>
    tpu.vector_store %arg8[%c80, %c0_37], %55 {strides = array<i32>} : memref<200x512xf32, #tpu.memory_space<vmem>>, vector<8x512xf32>,
    %c1_i32 = arith.constant 1 : i32
    %57 = tpu.dynamic_rotate %1 by %c1_i32 dim 1 : vector<8x512xf32>, i32 -> vector<8x512xf32>
    %c11 = arith.constant 11 : index
    %c0_38 = arith.constant 0 : index
    %c0_39 = arith.constant 0 : index
    %58 = vector.load %arg6[%c11, %c0_38, %c0_39] : memref<25x8x512xf32, #tpu.memory_space<vmem>>, vector<1x8x512xf32>
    %59 = vector.shape_cast %58 : vector<1x8x512xf32> to vector<8x512xf32>
    %60 = arith.mulf %57, %59 : vector<8x512xf32>
    %c88 = arith.constant 88 : index
    %c0_40 = arith.constant 0 : index
    %61 = vector.load %arg8[%c88, %c0_40] : memref<200x512xf32, #tpu.memory_space<vmem>>, vector<8x512xf32>
    tpu.vector_store %arg8[%c88, %c0_40], %60 {strides = array<i32>} : memref<200x512xf32, #tpu.memory_space<vmem>>, vector<8x512xf32>,
    %c96 = arith.constant 96 : index
    %c0_41 = arith.constant 0 : index
    %62 = vector.load %arg8[%c96, %c0_41] : memref<200x512xf32, #tpu.memory_space<vmem>>, vector<8x512xf32>
    tpu.vector_store %arg8[%c96, %c0_41], %1 {strides = array<i32>} : memref<200x512xf32, #tpu.memory_space<vmem>>, vector<8x512xf32>,
    %c511_i32 = arith.constant 511 : i32
    %63 = tpu.dynamic_rotate %1 by %c511_i32 dim 1 : vector<8x512xf32>, i32 -> vector<8x512xf32>
    %c13 = arith.constant 13 : index
    %c0_42 = arith.constant 0 : index
    %c0_43 = arith.constant 0 : index
    %64 = vector.load %arg6[%c13, %c0_42, %c0_43] : memref<25x8x512xf32, #tpu.memory_space<vmem>>, vector<1x8x512xf32>
    %65 = vector.shape_cast %64 : vector<1x8x512xf32> to vector<8x512xf32>
    %66 = arith.mulf %63, %65 : vector<8x512xf32>
    %c104 = arith.constant 104 : index
    %c0_44 = arith.constant 0 : index
    %67 = vector.load %arg8[%c104, %c0_44] : memref<200x512xf32, #tpu.memory_space<vmem>>, vector<8x512xf32>
    tpu.vector_store %arg8[%c104, %c0_44], %66 {strides = array<i32>} : memref<200x512xf32, #tpu.memory_space<vmem>>, vector<8x512xf32>,
    %c510_i32 = arith.constant 510 : i32
    %68 = tpu.dynamic_rotate %1 by %c510_i32 dim 1 : vector<8x512xf32>, i32 -> vector<8x512xf32>
    %c14 = arith.constant 14 : index
    %c0_45 = arith.constant 0 : index
    %c0_46 = arith.constant 0 : index
    %69 = vector.load %arg6[%c14, %c0_45, %c0_46] : memref<25x8x512xf32, #tpu.memory_space<vmem>>, vector<1x8x512xf32>
    %70 = vector.shape_cast %69 : vector<1x8x512xf32> to vector<8x512xf32>
    %71 = arith.mulf %68, %70 : vector<8x512xf32>
    %c112 = arith.constant 112 : index
    %c0_47 = arith.constant 0 : index
    %72 = vector.load %arg8[%c112, %c0_47] : memref<200x512xf32, #tpu.memory_space<vmem>>, vector<8x512xf32>
    tpu.vector_store %arg8[%c112, %c0_47], %71 {strides = array<i32>} : memref<200x512xf32, #tpu.memory_space<vmem>>, vector<8x512xf32>,
    %c498_i32 = arith.constant 498 : i32
    %73 = tpu.dynamic_rotate %1 by %c498_i32 dim 1 : vector<8x512xf32>, i32 -> vector<8x512xf32>
    %c15 = arith.constant 15 : index
    %c0_48 = arith.constant 0 : index
    %c0_49 = arith.constant 0 : index
    %74 = vector.load %arg6[%c15, %c0_48, %c0_49] : memref<25x8x512xf32, #tpu.memory_space<vmem>>, vector<1x8x512xf32>
    %75 = vector.shape_cast %74 : vector<1x8x512xf32> to vector<8x512xf32>
    %76 = arith.mulf %73, %75 : vector<8x512xf32>
    %c120 = arith.constant 120 : index
    %c0_50 = arith.constant 0 : index
    %77 = vector.load %arg8[%c120, %c0_50] : memref<200x512xf32, #tpu.memory_space<vmem>>, vector<8x512xf32>
    tpu.vector_store %arg8[%c120, %c0_50], %76 {strides = array<i32>} : memref<200x512xf32, #tpu.memory_space<vmem>>, vector<8x512xf32>,
    %c497_i32 = arith.constant 497 : i32
    %78 = tpu.dynamic_rotate %1 by %c497_i32 dim 1 : vector<8x512xf32>, i32 -> vector<8x512xf32>
    %c16_51 = arith.constant 16 : index
    %c0_52 = arith.constant 0 : index
    %c0_53 = arith.constant 0 : index
    %79 = vector.load %arg6[%c16_51, %c0_52, %c0_53] : memref<25x8x512xf32, #tpu.memory_space<vmem>>, vector<1x8x512xf32>
    %80 = vector.shape_cast %79 : vector<1x8x512xf32> to vector<8x512xf32>
    %81 = arith.mulf %78, %80 : vector<8x512xf32>
    %c128 = arith.constant 128 : index
    %c0_54 = arith.constant 0 : index
    %82 = vector.load %arg8[%c128, %c0_54] : memref<200x512xf32, #tpu.memory_space<vmem>>, vector<8x512xf32>
    tpu.vector_store %arg8[%c128, %c0_54], %81 {strides = array<i32>} : memref<200x512xf32, #tpu.memory_space<vmem>>, vector<8x512xf32>,
    %c496_i32 = arith.constant 496 : i32
    %83 = tpu.dynamic_rotate %1 by %c496_i32 dim 1 : vector<8x512xf32>, i32 -> vector<8x512xf32>
    %c17 = arith.constant 17 : index
    %c0_55 = arith.constant 0 : index
    %c0_56 = arith.constant 0 : index
    %84 = vector.load %arg6[%c17, %c0_55, %c0_56] : memref<25x8x512xf32, #tpu.memory_space<vmem>>, vector<1x8x512xf32>
    %85 = vector.shape_cast %84 : vector<1x8x512xf32> to vector<8x512xf32>
    %86 = arith.mulf %83, %85 : vector<8x512xf32>
    %c136 = arith.constant 136 : index
    %c0_57 = arith.constant 0 : index
    %87 = vector.load %arg8[%c136, %c0_57] : memref<200x512xf32, #tpu.memory_space<vmem>>, vector<8x512xf32>
    tpu.vector_store %arg8[%c136, %c0_57], %86 {strides = array<i32>} : memref<200x512xf32, #tpu.memory_space<vmem>>, vector<8x512xf32>,
    %c495_i32 = arith.constant 495 : i32
    %88 = tpu.dynamic_rotate %1 by %c495_i32 dim 1 : vector<8x512xf32>, i32 -> vector<8x512xf32>
    %c18 = arith.constant 18 : index
    %c0_58 = arith.constant 0 : index
    %c0_59 = arith.constant 0 : index
    %89 = vector.load %arg6[%c18, %c0_58, %c0_59] : memref<25x8x512xf32, #tpu.memory_space<vmem>>, vector<1x8x512xf32>
    %90 = vector.shape_cast %89 : vector<1x8x512xf32> to vector<8x512xf32>
    %91 = arith.mulf %88, %90 : vector<8x512xf32>
    %c144 = arith.constant 144 : index
    %c0_60 = arith.constant 0 : index
    %92 = vector.load %arg8[%c144, %c0_60] : memref<200x512xf32, #tpu.memory_space<vmem>>, vector<8x512xf32>
    tpu.vector_store %arg8[%c144, %c0_60], %91 {strides = array<i32>} : memref<200x512xf32, #tpu.memory_space<vmem>>, vector<8x512xf32>,
    %c494_i32 = arith.constant 494 : i32
    %93 = tpu.dynamic_rotate %1 by %c494_i32 dim 1 : vector<8x512xf32>, i32 -> vector<8x512xf32>
    %c19 = arith.constant 19 : index
    %c0_61 = arith.constant 0 : index
    %c0_62 = arith.constant 0 : index
    %94 = vector.load %arg6[%c19, %c0_61, %c0_62] : memref<25x8x512xf32, #tpu.memory_space<vmem>>, vector<1x8x512xf32>
    %95 = vector.shape_cast %94 : vector<1x8x512xf32> to vector<8x512xf32>
    %96 = arith.mulf %93, %95 : vector<8x512xf32>
    %c152 = arith.constant 152 : index
    %c0_63 = arith.constant 0 : index
    %97 = vector.load %arg8[%c152, %c0_63] : memref<200x512xf32, #tpu.memory_space<vmem>>, vector<8x512xf32>
    tpu.vector_store %arg8[%c152, %c0_63], %96 {strides = array<i32>} : memref<200x512xf32, #tpu.memory_space<vmem>>, vector<8x512xf32>,
    %c482_i32 = arith.constant 482 : i32
    %98 = tpu.dynamic_rotate %1 by %c482_i32 dim 1 : vector<8x512xf32>, i32 -> vector<8x512xf32>
    %c20 = arith.constant 20 : index
    %c0_64 = arith.constant 0 : index
    %c0_65 = arith.constant 0 : index
    %99 = vector.load %arg6[%c20, %c0_64, %c0_65] : memref<25x8x512xf32, #tpu.memory_space<vmem>>, vector<1x8x512xf32>
    %100 = vector.shape_cast %99 : vector<1x8x512xf32> to vector<8x512xf32>
    %101 = arith.mulf %98, %100 : vector<8x512xf32>
    %c160 = arith.constant 160 : index
    %c0_66 = arith.constant 0 : index
    %102 = vector.load %arg8[%c160, %c0_66] : memref<200x512xf32, #tpu.memory_space<vmem>>, vector<8x512xf32>
    tpu.vector_store %arg8[%c160, %c0_66], %101 {strides = array<i32>} : memref<200x512xf32, #tpu.memory_space<vmem>>, vector<8x512xf32>,
    %c481_i32 = arith.constant 481 : i32
    %103 = tpu.dynamic_rotate %1 by %c481_i32 dim 1 : vector<8x512xf32>, i32 -> vector<8x512xf32>
    %c21 = arith.constant 21 : index
    %c0_67 = arith.constant 0 : index
    %c0_68 = arith.constant 0 : index
    %104 = vector.load %arg6[%c21, %c0_67, %c0_68] : memref<25x8x512xf32, #tpu.memory_space<vmem>>, vector<1x8x512xf32>
    %105 = vector.shape_cast %104 : vector<1x8x512xf32> to vector<8x512xf32>
    %106 = arith.mulf %103, %105 : vector<8x512xf32>
    %c168 = arith.constant 168 : index
    %c0_69 = arith.constant 0 : index
    %107 = vector.load %arg8[%c168, %c0_69] : memref<200x512xf32, #tpu.memory_space<vmem>>, vector<8x512xf32>
    tpu.vector_store %arg8[%c168, %c0_69], %106 {strides = array<i32>} : memref<200x512xf32, #tpu.memory_space<vmem>>, vector<8x512xf32>,
    %c480_i32 = arith.constant 480 : i32
    %108 = tpu.dynamic_rotate %1 by %c480_i32 dim 1 : vector<8x512xf32>, i32 -> vector<8x512xf32>
    %c22 = arith.constant 22 : index
    %c0_70 = arith.constant 0 : index
    %c0_71 = arith.constant 0 : index
    %109 = vector.load %arg6[%c22, %c0_70, %c0_71] : memref<25x8x512xf32, #tpu.memory_space<vmem>>, vector<1x8x512xf32>
    %110 = vector.shape_cast %109 : vector<1x8x512xf32> to vector<8x512xf32>
    %111 = arith.mulf %108, %110 : vector<8x512xf32>
    %c176 = arith.constant 176 : index
    %c0_72 = arith.constant 0 : index
    %112 = vector.load %arg8[%c176, %c0_72] : memref<200x512xf32, #tpu.memory_space<vmem>>, vector<8x512xf32>
    tpu.vector_store %arg8[%c176, %c0_72], %111 {strides = array<i32>} : memref<200x512xf32, #tpu.memory_space<vmem>>, vector<8x512xf32>,
    %c479_i32 = arith.constant 479 : i32
    %113 = tpu.dynamic_rotate %1 by %c479_i32 dim 1 : vector<8x512xf32>, i32 -> vector<8x512xf32>
    %c23 = arith.constant 23 : index
    %c0_73 = arith.constant 0 : index
    %c0_74 = arith.constant 0 : index
    %114 = vector.load %arg6[%c23, %c0_73, %c0_74] : memref<25x8x512xf32, #tpu.memory_space<vmem>>, vector<1x8x512xf32>
    %115 = vector.shape_cast %114 : vector<1x8x512xf32> to vector<8x512xf32>
    %116 = arith.mulf %113, %115 : vector<8x512xf32>
    %c184 = arith.constant 184 : index
    %c0_75 = arith.constant 0 : index
    %117 = vector.load %arg8[%c184, %c0_75] : memref<200x512xf32, #tpu.memory_space<vmem>>, vector<8x512xf32>
    tpu.vector_store %arg8[%c184, %c0_75], %116 {strides = array<i32>} : memref<200x512xf32, #tpu.memory_space<vmem>>, vector<8x512xf32>,
    %c478_i32 = arith.constant 478 : i32
    %118 = tpu.dynamic_rotate %1 by %c478_i32 dim 1 : vector<8x512xf32>, i32 -> vector<8x512xf32>
    %c24_76 = arith.constant 24 : index
    %c0_77 = arith.constant 0 : index
    %c0_78 = arith.constant 0 : index
    %119 = vector.load %arg6[%c24_76, %c0_77, %c0_78] : memref<25x8x512xf32, #tpu.memory_space<vmem>>, vector<1x8x512xf32>
    %120 = vector.shape_cast %119 : vector<1x8x512xf32> to vector<8x512xf32>
    %121 = arith.mulf %118, %120 : vector<8x512xf32>
    %c192 = arith.constant 192 : index
    %c0_79 = arith.constant 0 : index
    %122 = vector.load %arg8[%c192, %c0_79] : memref<200x512xf32, #tpu.memory_space<vmem>>, vector<8x512xf32>
    tpu.vector_store %arg8[%c192, %c0_79], %121 {strides = array<i32>} : memref<200x512xf32, #tpu.memory_space<vmem>>, vector<8x512xf32>,
    %c0_80 = arith.constant 0 : index
    %c0_81 = arith.constant 0 : index
    %c0_82 = arith.constant 0 : index
    %123 = vector.load %arg3[%c0_80, %c0_81, %c0_82] : memref<6x8x200xf32, #tpu.memory_space<vmem>>, vector<1x8x200xf32>
    %124 = vector.shape_cast %123 : vector<1x8x200xf32> to vector<8x200xf32>
    %c0_83 = arith.constant 0 : index
    %c0_84 = arith.constant 0 : index
    %125 = vector.load %arg8[%c0_83, %c0_84] : memref<200x512xf32, #tpu.memory_space<vmem>>, vector<200x512xf32>
    %cst = arith.constant dense<0.000000e+00> : vector<8x512xf32>
    %126 = tpu.matmul %124, %125, %cst {dimension_numbers = #tpu.dot_dimension_numbers<[1], [0], [0], [1], [0, 0, 1, 1], [], []>} : vector<8x200xf32>, vector<200x512xf32>, vector<8x512xf32> -> vector<8x512xf32>
    %c0_85 = arith.constant 0 : index
    %c0_86 = arith.constant 0 : index
    %c0_87 = arith.constant 0 : index
    %127 = vector.load %arg4[%c0_85, %c0_86, %c0_87] : memref<7x8x1xf32, #tpu.memory_space<vmem>>, vector<1x8x1xf32>
    %128 = vector.shape_cast %127 : vector<1x8x1xf32> to vector<8x1xf32>
    %129 = vector.broadcast %128 : vector<8x1xf32> to vector<8x512xf32>
    %130 = arith.addf %126, %129 : vector<8x512xf32>
    %c0_88 = arith.constant 0 : index
    %131 = memref.load %arg1[%c0_88] : memref<6xf32, #tpu.memory_space<smem>>
    %cst_89 = arith.constant 0.000000e+00 : f32
    %132 = vector.broadcast %cst_89 : f32 to vector<8x512xf32>
    %133 = arith.cmpf oge, %130, %132 : vector<8x512xf32>
    %134 = vector.broadcast %131 : f32 to vector<8x512xf32>
    %135 = arith.mulf %130, %134 : vector<8x512xf32>
    %136 = arith.select %133, %130, %135 : vector<8x512xi1>, vector<8x512xf32>
    %c34_i32_90 = arith.constant 34 : i32
    %137 = tpu.dynamic_rotate %136 by %c34_i32_90 dim 1 : vector<8x512xf32>, i32 -> vector<8x512xf32>
    %c0_91 = arith.constant 0 : index
    %c0_92 = arith.constant 0 : index
    %c0_93 = arith.constant 0 : index
    %138 = vector.load %arg6[%c0_91, %c0_92, %c0_93] : memref<25x8x512xf32, #tpu.memory_space<vmem>>, vector<1x8x512xf32>
    %139 = vector.shape_cast %138 : vector<1x8x512xf32> to vector<8x512xf32>
    %140 = arith.mulf %137, %139 : vector<8x512xf32>
    %c0_94 = arith.constant 0 : index
    %c0_95 = arith.constant 0 : index
    %141 = vector.load %arg8[%c0_94, %c0_95] : memref<200x512xf32, #tpu.memory_space<vmem>>, vector<8x512xf32>
    tpu.vector_store %arg8[%c0_94, %c0_95], %140 {strides = array<i32>} : memref<200x512xf32, #tpu.memory_space<vmem>>, vector<8x512xf32>,
    %c33_i32_96 = arith.constant 33 : i32
    %142 = tpu.dynamic_rotate %136 by %c33_i32_96 dim 1 : vector<8x512xf32>, i32 -> vector<8x512xf32>
    %c1_97 = arith.constant 1 : index
    %c0_98 = arith.constant 0 : index
    %c0_99 = arith.constant 0 : index
    %143 = vector.load %arg6[%c1_97, %c0_98, %c0_99] : memref<25x8x512xf32, #tpu.memory_space<vmem>>, vector<1x8x512xf32>
    %144 = vector.shape_cast %143 : vector<1x8x512xf32> to vector<8x512xf32>
    %145 = arith.mulf %142, %144 : vector<8x512xf32>
    %c8_100 = arith.constant 8 : index
    %c0_101 = arith.constant 0 : index
    %146 = vector.load %arg8[%c8_100, %c0_101] : memref<200x512xf32, #tpu.memory_space<vmem>>, vector<8x512xf32>
    tpu.vector_store %arg8[%c8_100, %c0_101], %145 {strides = array<i32>} : memref<200x512xf32, #tpu.memory_space<vmem>>, vector<8x512xf32>,
    %c32_i32_102 = arith.constant 32 : i32
    %147 = tpu.dynamic_rotate %136 by %c32_i32_102 dim 1 : vector<8x512xf32>, i32 -> vector<8x512xf32>
    %c2_103 = arith.constant 2 : index
    %c0_104 = arith.constant 0 : index
    %c0_105 = arith.constant 0 : index
    %148 = vector.load %arg6[%c2_103, %c0_104, %c0_105] : memref<25x8x512xf32, #tpu.memory_space<vmem>>, vector<1x8x512xf32>
    %149 = vector.shape_cast %148 : vector<1x8x512xf32> to vector<8x512xf32>
    %150 = arith.mulf %147, %149 : vector<8x512xf32>
    %c16_106 = arith.constant 16 : index
    %c0_107 = arith.constant 0 : index
    %151 = vector.load %arg8[%c16_106, %c0_107] : memref<200x512xf32, #tpu.memory_space<vmem>>, vector<8x512xf32>
    tpu.vector_store %arg8[%c16_106, %c0_107], %150 {strides = array<i32>} : memref<200x512xf32, #tpu.memory_space<vmem>>, vector<8x512xf32>,
    %c31_i32_108 = arith.constant 31 : i32
    %152 = tpu.dynamic_rotate %136 by %c31_i32_108 dim 1 : vector<8x512xf32>, i32 -> vector<8x512xf32>
    %c3_109 = arith.constant 3 : index
    %c0_110 = arith.constant 0 : index
    %c0_111 = arith.constant 0 : index
    %153 = vector.load %arg6[%c3_109, %c0_110, %c0_111] : memref<25x8x512xf32, #tpu.memory_space<vmem>>, vector<1x8x512xf32>
    %154 = vector.shape_cast %153 : vector<1x8x512xf32> to vector<8x512xf32>
    %155 = arith.mulf %152, %154 : vector<8x512xf32>
    %c24_112 = arith.constant 24 : index
    %c0_113 = arith.constant 0 : index
    %156 = vector.load %arg8[%c24_112, %c0_113] : memref<200x512xf32, #tpu.memory_space<vmem>>, vector<8x512xf32>
    tpu.vector_store %arg8[%c24_112, %c0_113], %155 {strides = array<i32>} : memref<200x512xf32, #tpu.memory_space<vmem>>, vector<8x512xf32>,
    %c30_i32_114 = arith.constant 30 : i32
    %157 = tpu.dynamic_rotate %136 by %c30_i32_114 dim 1 : vector<8x512xf32>, i32 -> vector<8x512xf32>
    %c4_115 = arith.constant 4 : index
    %c0_116 = arith.constant 0 : index
    %c0_117 = arith.constant 0 : index
    %158 = vector.load %arg6[%c4_115, %c0_116, %c0_117] : memref<25x8x512xf32, #tpu.memory_space<vmem>>, vector<1x8x512xf32>
    %159 = vector.shape_cast %158 : vector<1x8x512xf32> to vector<8x512xf32>
    %160 = arith.mulf %157, %159 : vector<8x512xf32>
    %c32_118 = arith.constant 32 : index
    %c0_119 = arith.constant 0 : index
    %161 = vector.load %arg8[%c32_118, %c0_119] : memref<200x512xf32, #tpu.memory_space<vmem>>, vector<8x512xf32>
    tpu.vector_store %arg8[%c32_118, %c0_119], %160 {strides = array<i32>} : memref<200x512xf32, #tpu.memory_space<vmem>>, vector<8x512xf32>,
    %c18_i32_120 = arith.constant 18 : i32
    %162 = tpu.dynamic_rotate %136 by %c18_i32_120 dim 1 : vector<8x512xf32>, i32 -> vector<8x512xf32>
    %c5_121 = arith.constant 5 : index
    %c0_122 = arith.constant 0 : index
    %c0_123 = arith.constant 0 : index
    %163 = vector.load %arg6[%c5_121, %c0_122, %c0_123] : memref<25x8x512xf32, #tpu.memory_space<vmem>>, vector<1x8x512xf32>
    %164 = vector.shape_cast %163 : vector<1x8x512xf32> to vector<8x512xf32>
    %165 = arith.mulf %162, %164 : vector<8x512xf32>
    %c40_124 = arith.constant 40 : index
    %c0_125 = arith.constant 0 : index
    %166 = vector.load %arg8[%c40_124, %c0_125] : memref<200x512xf32, #tpu.memory_space<vmem>>, vector<8x512xf32>
    tpu.vector_store %arg8[%c40_124, %c0_125], %165 {strides = array<i32>} : memref<200x512xf32, #tpu.memory_space<vmem>>, vector<8x512xf32>,
    %c17_i32_126 = arith.constant 17 : i32
    %167 = tpu.dynamic_rotate %136 by %c17_i32_126 dim 1 : vector<8x512xf32>, i32 -> vector<8x512xf32>
    %c6_127 = arith.constant 6 : index
    %c0_128 = arith.constant 0 : index
    %c0_129 = arith.constant 0 : index
    %168 = vector.load %arg6[%c6_127, %c0_128, %c0_129] : memref<25x8x512xf32, #tpu.memory_space<vmem>>, vector<1x8x512xf32>
    %169 = vector.shape_cast %168 : vector<1x8x512xf32> to vector<8x512xf32>
    %170 = arith.mulf %167, %169 : vector<8x512xf32>
    %c48_130 = arith.constant 48 : index
    %c0_131 = arith.constant 0 : index
    %171 = vector.load %arg8[%c48_130, %c0_131] : memref<200x512xf32, #tpu.memory_space<vmem>>, vector<8x512xf32>
    tpu.vector_store %arg8[%c48_130, %c0_131], %170 {strides = array<i32>} : memref<200x512xf32, #tpu.memory_space<vmem>>, vector<8x512xf32>,
    %c16_i32_132 = arith.constant 16 : i32
    %172 = tpu.dynamic_rotate %136 by %c16_i32_132 dim 1 : vector<8x512xf32>, i32 -> vector<8x512xf32>
    %c7_133 = arith.constant 7 : index
    %c0_134 = arith.constant 0 : index
    %c0_135 = arith.constant 0 : index
    %173 = vector.load %arg6[%c7_133, %c0_134, %c0_135] : memref<25x8x512xf32, #tpu.memory_space<vmem>>, vector<1x8x512xf32>
    %174 = vector.shape_cast %173 : vector<1x8x512xf32> to vector<8x512xf32>
    %175 = arith.mulf %172, %174 : vector<8x512xf32>
    %c56_136 = arith.constant 56 : index
    %c0_137 = arith.constant 0 : index
    %176 = vector.load %arg8[%c56_136, %c0_137] : memref<200x512xf32, #tpu.memory_space<vmem>>, vector<8x512xf32>
    tpu.vector_store %arg8[%c56_136, %c0_137], %175 {strides = array<i32>} : memref<200x512xf32, #tpu.memory_space<vmem>>, vector<8x512xf32>,
    %c15_i32_138 = arith.constant 15 : i32
    %177 = tpu.dynamic_rotate %136 by %c15_i32_138 dim 1 : vector<8x512xf32>, i32 -> vector<8x512xf32>
    %c8_139 = arith.constant 8 : index
    %c0_140 = arith.constant 0 : index
    %c0_141 = arith.constant 0 : index
    %178 = vector.load %arg6[%c8_139, %c0_140, %c0_141] : memref<25x8x512xf32, #tpu.memory_space<vmem>>, vector<1x8x512xf32>
    %179 = vector.shape_cast %178 : vector<1x8x512xf32> to vector<8x512xf32>
    %180 = arith.mulf %177, %179 : vector<8x512xf32>
    %c64_142 = arith.constant 64 : index
    %c0_143 = arith.constant 0 : index
    %181 = vector.load %arg8[%c64_142, %c0_143] : memref<200x512xf32, #tpu.memory_space<vmem>>, vector<8x512xf32>
    tpu.vector_store %arg8[%c64_142, %c0_143], %180 {strides = array<i32>} : memref<200x512xf32, #tpu.memory_space<vmem>>, vector<8x512xf32>,
    %c14_i32_144 = arith.constant 14 : i32
    %182 = tpu.dynamic_rotate %136 by %c14_i32_144 dim 1 : vector<8x512xf32>, i32 -> vector<8x512xf32>
    %c9_145 = arith.constant 9 : index
    %c0_146 = arith.constant 0 : index
    %c0_147 = arith.constant 0 : index
    %183 = vector.load %arg6[%c9_145, %c0_146, %c0_147] : memref<25x8x512xf32, #tpu.memory_space<vmem>>, vector<1x8x512xf32>
    %184 = vector.shape_cast %183 : vector<1x8x512xf32> to vector<8x512xf32>
    %185 = arith.mulf %182, %184 : vector<8x512xf32>
    %c72_148 = arith.constant 72 : index
    %c0_149 = arith.constant 0 : index
    %186 = vector.load %arg8[%c72_148, %c0_149] : memref<200x512xf32, #tpu.memory_space<vmem>>, vector<8x512xf32>
    tpu.vector_store %arg8[%c72_148, %c0_149], %185 {strides = array<i32>} : memref<200x512xf32, #tpu.memory_space<vmem>>, vector<8x512xf32>,
    %c2_i32_150 = arith.constant 2 : i32
    %187 = tpu.dynamic_rotate %136 by %c2_i32_150 dim 1 : vector<8x512xf32>, i32 -> vector<8x512xf32>
    %c10_151 = arith.constant 10 : index
    %c0_152 = arith.constant 0 : index
    %c0_153 = arith.constant 0 : index
    %188 = vector.load %arg6[%c10_151, %c0_152, %c0_153] : memref<25x8x512xf32, #tpu.memory_space<vmem>>, vector<1x8x512xf32>
    %189 = vector.shape_cast %188 : vector<1x8x512xf32> to vector<8x512xf32>
    %190 = arith.mulf %187, %189 : vector<8x512xf32>
    %c80_154 = arith.constant 80 : index
    %c0_155 = arith.constant 0 : index
    %191 = vector.load %arg8[%c80_154, %c0_155] : memref<200x512xf32, #tpu.memory_space<vmem>>, vector<8x512xf32>
    tpu.vector_store %arg8[%c80_154, %c0_155], %190 {strides = array<i32>} : memref<200x512xf32, #tpu.memory_space<vmem>>, vector<8x512xf32>,
    %c1_i32_156 = arith.constant 1 : i32
    %192 = tpu.dynamic_rotate %136 by %c1_i32_156 dim 1 : vector<8x512xf32>, i32 -> vector<8x512xf32>
    %c11_157 = arith.constant 11 : index
    %c0_158 = arith.constant 0 : index
    %c0_159 = arith.constant 0 : index
    %193 = vector.load %arg6[%c11_157, %c0_158, %c0_159] : memref<25x8x512xf32, #tpu.memory_space<vmem>>, vector<1x8x512xf32>
    %194 = vector.shape_cast %193 : vector<1x8x512xf32> to vector<8x512xf32>
    %195 = arith.mulf %192, %194 : vector<8x512xf32>
    %c88_160 = arith.constant 88 : index
    %c0_161 = arith.constant 0 : index
    %196 = vector.load %arg8[%c88_160, %c0_161] : memref<200x512xf32, #tpu.memory_space<vmem>>, vector<8x512xf32>
    tpu.vector_store %arg8[%c88_160, %c0_161], %195 {strides = array<i32>} : memref<200x512xf32, #tpu.memory_space<vmem>>, vector<8x512xf32>,
    %c96_162 = arith.constant 96 : index
    %c0_163 = arith.constant 0 : index
    %197 = vector.load %arg8[%c96_162, %c0_163] : memref<200x512xf32, #tpu.memory_space<vmem>>, vector<8x512xf32>
    tpu.vector_store %arg8[%c96_162, %c0_163], %136 {strides = array<i32>} : memref<200x512xf32, #tpu.memory_space<vmem>>, vector<8x512xf32>,
    %c511_i32_164 = arith.constant 511 : i32
    %198 = tpu.dynamic_rotate %136 by %c511_i32_164 dim 1 : vector<8x512xf32>, i32 -> vector<8x512xf32>
    %c13_165 = arith.constant 13 : index
    %c0_166 = arith.constant 0 : index
    %c0_167 = arith.constant 0 : index
    %199 = vector.load %arg6[%c13_165, %c0_166, %c0_167] : memref<25x8x512xf32, #tpu.memory_space<vmem>>, vector<1x8x512xf32>
    %200 = vector.shape_cast %199 : vector<1x8x512xf32> to vector<8x512xf32>
    %201 = arith.mulf %198, %200 : vector<8x512xf32>
    %c104_168 = arith.constant 104 : index
    %c0_169 = arith.constant 0 : index
    %202 = vector.load %arg8[%c104_168, %c0_169] : memref<200x512xf32, #tpu.memory_space<vmem>>, vector<8x512xf32>
    tpu.vector_store %arg8[%c104_168, %c0_169], %201 {strides = array<i32>} : memref<200x512xf32, #tpu.memory_space<vmem>>, vector<8x512xf32>,
    %c510_i32_170 = arith.constant 510 : i32
    %203 = tpu.dynamic_rotate %136 by %c510_i32_170 dim 1 : vector<8x512xf32>, i32 -> vector<8x512xf32>
    %c14_171 = arith.constant 14 : index
    %c0_172 = arith.constant 0 : index
    %c0_173 = arith.constant 0 : index
    %204 = vector.load %arg6[%c14_171, %c0_172, %c0_173] : memref<25x8x512xf32, #tpu.memory_space<vmem>>, vector<1x8x512xf32>
    %205 = vector.shape_cast %204 : vector<1x8x512xf32> to vector<8x512xf32>
    %206 = arith.mulf %203, %205 : vector<8x512xf32>
    %c112_174 = arith.constant 112 : index
    %c0_175 = arith.constant 0 : index
    %207 = vector.load %arg8[%c112_174, %c0_175] : memref<200x512xf32, #tpu.memory_space<vmem>>, vector<8x512xf32>
    tpu.vector_store %arg8[%c112_174, %c0_175], %206 {strides = array<i32>} : memref<200x512xf32, #tpu.memory_space<vmem>>, vector<8x512xf32>,
    %c498_i32_176 = arith.constant 498 : i32
    %208 = tpu.dynamic_rotate %136 by %c498_i32_176 dim 1 : vector<8x512xf32>, i32 -> vector<8x512xf32>
    %c15_177 = arith.constant 15 : index
    %c0_178 = arith.constant 0 : index
    %c0_179 = arith.constant 0 : index
    %209 = vector.load %arg6[%c15_177, %c0_178, %c0_179] : memref<25x8x512xf32, #tpu.memory_space<vmem>>, vector<1x8x512xf32>
    %210 = vector.shape_cast %209 : vector<1x8x512xf32> to vector<8x512xf32>
    %211 = arith.mulf %208, %210 : vector<8x512xf32>
    %c120_180 = arith.constant 120 : index
    %c0_181 = arith.constant 0 : index
    %212 = vector.load %arg8[%c120_180, %c0_181] : memref<200x512xf32, #tpu.memory_space<vmem>>, vector<8x512xf32>
    tpu.vector_store %arg8[%c120_180, %c0_181], %211 {strides = array<i32>} : memref<200x512xf32, #tpu.memory_space<vmem>>, vector<8x512xf32>,
    %c497_i32_182 = arith.constant 497 : i32
    %213 = tpu.dynamic_rotate %136 by %c497_i32_182 dim 1 : vector<8x512xf32>, i32 -> vector<8x512xf32>
    %c16_183 = arith.constant 16 : index
    %c0_184 = arith.constant 0 : index
    %c0_185 = arith.constant 0 : index
    %214 = vector.load %arg6[%c16_183, %c0_184, %c0_185] : memref<25x8x512xf32, #tpu.memory_space<vmem>>, vector<1x8x512xf32>
    %215 = vector.shape_cast %214 : vector<1x8x512xf32> to vector<8x512xf32>
    %216 = arith.mulf %213, %215 : vector<8x512xf32>
    %c128_186 = arith.constant 128 : index
    %c0_187 = arith.constant 0 : index
    %217 = vector.load %arg8[%c128_186, %c0_187] : memref<200x512xf32, #tpu.memory_space<vmem>>, vector<8x512xf32>
    tpu.vector_store %arg8[%c128_186, %c0_187], %216 {strides = array<i32>} : memref<200x512xf32, #tpu.memory_space<vmem>>, vector<8x512xf32>,
    %c496_i32_188 = arith.constant 496 : i32
    %218 = tpu.dynamic_rotate %136 by %c496_i32_188 dim 1 : vector<8x512xf32>, i32 -> vector<8x512xf32>
    %c17_189 = arith.constant 17 : index
    %c0_190 = arith.constant 0 : index
    %c0_191 = arith.constant 0 : index
    %219 = vector.load %arg6[%c17_189, %c0_190, %c0_191] : memref<25x8x512xf32, #tpu.memory_space<vmem>>, vector<1x8x512xf32>
    %220 = vector.shape_cast %219 : vector<1x8x512xf32> to vector<8x512xf32>
    %221 = arith.mulf %218, %220 : vector<8x512xf32>
    %c136_192 = arith.constant 136 : index
    %c0_193 = arith.constant 0 : index
    %222 = vector.load %arg8[%c136_192, %c0_193] : memref<200x512xf32, #tpu.memory_space<vmem>>, vector<8x512xf32>
    tpu.vector_store %arg8[%c136_192, %c0_193], %221 {strides = array<i32>} : memref<200x512xf32, #tpu.memory_space<vmem>>, vector<8x512xf32>,
    %c495_i32_194 = arith.constant 495 : i32
    %223 = tpu.dynamic_rotate %136 by %c495_i32_194 dim 1 : vector<8x512xf32>, i32 -> vector<8x512xf32>
    %c18_195 = arith.constant 18 : index
    %c0_196 = arith.constant 0 : index
    %c0_197 = arith.constant 0 : index
    %224 = vector.load %arg6[%c18_195, %c0_196, %c0_197] : memref<25x8x512xf32, #tpu.memory_space<vmem>>, vector<1x8x512xf32>
    %225 = vector.shape_cast %224 : vector<1x8x512xf32> to vector<8x512xf32>
    %226 = arith.mulf %223, %225 : vector<8x512xf32>
    %c144_198 = arith.constant 144 : index
    %c0_199 = arith.constant 0 : index
    %227 = vector.load %arg8[%c144_198, %c0_199] : memref<200x512xf32, #tpu.memory_space<vmem>>, vector<8x512xf32>
    tpu.vector_store %arg8[%c144_198, %c0_199], %226 {strides = array<i32>} : memref<200x512xf32, #tpu.memory_space<vmem>>, vector<8x512xf32>,
    %c494_i32_200 = arith.constant 494 : i32
    %228 = tpu.dynamic_rotate %136 by %c494_i32_200 dim 1 : vector<8x512xf32>, i32 -> vector<8x512xf32>
    %c19_201 = arith.constant 19 : index
    %c0_202 = arith.constant 0 : index
    %c0_203 = arith.constant 0 : index
    %229 = vector.load %arg6[%c19_201, %c0_202, %c0_203] : memref<25x8x512xf32, #tpu.memory_space<vmem>>, vector<1x8x512xf32>
    %230 = vector.shape_cast %229 : vector<1x8x512xf32> to vector<8x512xf32>
    %231 = arith.mulf %228, %230 : vector<8x512xf32>
    %c152_204 = arith.constant 152 : index
    %c0_205 = arith.constant 0 : index
    %232 = vector.load %arg8[%c152_204, %c0_205] : memref<200x512xf32, #tpu.memory_space<vmem>>, vector<8x512xf32>
    tpu.vector_store %arg8[%c152_204, %c0_205], %231 {strides = array<i32>} : memref<200x512xf32, #tpu.memory_space<vmem>>, vector<8x512xf32>,
    %c482_i32_206 = arith.constant 482 : i32
    %233 = tpu.dynamic_rotate %136 by %c482_i32_206 dim 1 : vector<8x512xf32>, i32 -> vector<8x512xf32>
    %c20_207 = arith.constant 20 : index
    %c0_208 = arith.constant 0 : index
    %c0_209 = arith.constant 0 : index
    %234 = vector.load %arg6[%c20_207, %c0_208, %c0_209] : memref<25x8x512xf32, #tpu.memory_space<vmem>>, vector<1x8x512xf32>
    %235 = vector.shape_cast %234 : vector<1x8x512xf32> to vector<8x512xf32>
    %236 = arith.mulf %233, %235 : vector<8x512xf32>
    %c160_210 = arith.constant 160 : index
    %c0_211 = arith.constant 0 : index
    %237 = vector.load %arg8[%c160_210, %c0_211] : memref<200x512xf32, #tpu.memory_space<vmem>>, vector<8x512xf32>
    tpu.vector_store %arg8[%c160_210, %c0_211], %236 {strides = array<i32>} : memref<200x512xf32, #tpu.memory_space<vmem>>, vector<8x512xf32>,
    %c481_i32_212 = arith.constant 481 : i32
    %238 = tpu.dynamic_rotate %136 by %c481_i32_212 dim 1 : vector<8x512xf32>, i32 -> vector<8x512xf32>
    %c21_213 = arith.constant 21 : index
    %c0_214 = arith.constant 0 : index
    %c0_215 = arith.constant 0 : index
    %239 = vector.load %arg6[%c21_213, %c0_214, %c0_215] : memref<25x8x512xf32, #tpu.memory_space<vmem>>, vector<1x8x512xf32>
    %240 = vector.shape_cast %239 : vector<1x8x512xf32> to vector<8x512xf32>
    %241 = arith.mulf %238, %240 : vector<8x512xf32>
    %c168_216 = arith.constant 168 : index
    %c0_217 = arith.constant 0 : index
    %242 = vector.load %arg8[%c168_216, %c0_217] : memref<200x512xf32, #tpu.memory_space<vmem>>, vector<8x512xf32>
    tpu.vector_store %arg8[%c168_216, %c0_217], %241 {strides = array<i32>} : memref<200x512xf32, #tpu.memory_space<vmem>>, vector<8x512xf32>,
    %c480_i32_218 = arith.constant 480 : i32
    %243 = tpu.dynamic_rotate %136 by %c480_i32_218 dim 1 : vector<8x512xf32>, i32 -> vector<8x512xf32>
    %c22_219 = arith.constant 22 : index
    %c0_220 = arith.constant 0 : index
    %c0_221 = arith.constant 0 : index
    %244 = vector.load %arg6[%c22_219, %c0_220, %c0_221] : memref<25x8x512xf32, #tpu.memory_space<vmem>>, vector<1x8x512xf32>
    %245 = vector.shape_cast %244 : vector<1x8x512xf32> to vector<8x512xf32>
    %246 = arith.mulf %243, %245 : vector<8x512xf32>
    %c176_222 = arith.constant 176 : index
    %c0_223 = arith.constant 0 : index
    %247 = vector.load %arg8[%c176_222, %c0_223] : memref<200x512xf32, #tpu.memory_space<vmem>>, vector<8x512xf32>
    tpu.vector_store %arg8[%c176_222, %c0_223], %246 {strides = array<i32>} : memref<200x512xf32, #tpu.memory_space<vmem>>, vector<8x512xf32>,
    %c479_i32_224 = arith.constant 479 : i32
    %248 = tpu.dynamic_rotate %136 by %c479_i32_224 dim 1 : vector<8x512xf32>, i32 -> vector<8x512xf32>
    %c23_225 = arith.constant 23 : index
    %c0_226 = arith.constant 0 : index
    %c0_227 = arith.constant 0 : index
    %249 = vector.load %arg6[%c23_225, %c0_226, %c0_227] : memref<25x8x512xf32, #tpu.memory_space<vmem>>, vector<1x8x512xf32>
    %250 = vector.shape_cast %249 : vector<1x8x512xf32> to vector<8x512xf32>
    %251 = arith.mulf %248, %250 : vector<8x512xf32>
    %c184_228 = arith.constant 184 : index
    %c0_229 = arith.constant 0 : index
    %252 = vector.load %arg8[%c184_228, %c0_229] : memref<200x512xf32, #tpu.memory_space<vmem>>, vector<8x512xf32>
    tpu.vector_store %arg8[%c184_228, %c0_229], %251 {strides = array<i32>} : memref<200x512xf32, #tpu.memory_space<vmem>>, vector<8x512xf32>,
    %c478_i32_230 = arith.constant 478 : i32
    %253 = tpu.dynamic_rotate %136 by %c478_i32_230 dim 1 : vector<8x512xf32>, i32 -> vector<8x512xf32>
    %c24_231 = arith.constant 24 : index
    %c0_232 = arith.constant 0 : index
    %c0_233 = arith.constant 0 : index
    %254 = vector.load %arg6[%c24_231, %c0_232, %c0_233] : memref<25x8x512xf32, #tpu.memory_space<vmem>>, vector<1x8x512xf32>
    %255 = vector.shape_cast %254 : vector<1x8x512xf32> to vector<8x512xf32>
    %256 = arith.mulf %253, %255 : vector<8x512xf32>
    %c192_234 = arith.constant 192 : index
    %c0_235 = arith.constant 0 : index
    %257 = vector.load %arg8[%c192_234, %c0_235] : memref<200x512xf32, #tpu.memory_space<vmem>>, vector<8x512xf32>
    tpu.vector_store %arg8[%c192_234, %c0_235], %256 {strides = array<i32>} : memref<200x512xf32, #tpu.memory_space<vmem>>, vector<8x512xf32>,
    %c1_236 = arith.constant 1 : index
    %c0_237 = arith.constant 0 : index
    %c0_238 = arith.constant 0 : index
    %258 = vector.load %arg3[%c1_236, %c0_237, %c0_238] : memref<6x8x200xf32, #tpu.memory_space<vmem>>, vector<1x8x200xf32>
    %259 = vector.shape_cast %258 : vector<1x8x200xf32> to vector<8x200xf32>
    %c0_239 = arith.constant 0 : index
    %c0_240 = arith.constant 0 : index
    %260 = vector.load %arg8[%c0_239, %c0_240] : memref<200x512xf32, #tpu.memory_space<vmem>>, vector<200x512xf32>
    %cst_241 = arith.constant dense<0.000000e+00> : vector<8x512xf32>
    %261 = tpu.matmul %259, %260, %cst_241 {dimension_numbers = #tpu.dot_dimension_numbers<[1], [0], [0], [1], [0, 0, 1, 1], [], []>} : vector<8x200xf32>, vector<200x512xf32>, vector<8x512xf32> -> vector<8x512xf32>
    %c1_242 = arith.constant 1 : index
    %c0_243 = arith.constant 0 : index
    %c0_244 = arith.constant 0 : index
    %262 = vector.load %arg4[%c1_242, %c0_243, %c0_244] : memref<7x8x1xf32, #tpu.memory_space<vmem>>, vector<1x8x1xf32>
    %263 = vector.shape_cast %262 : vector<1x8x1xf32> to vector<8x1xf32>
    %264 = vector.broadcast %263 : vector<8x1xf32> to vector<8x512xf32>
    %265 = arith.addf %261, %264 : vector<8x512xf32>
    %c1_245 = arith.constant 1 : index
    %266 = memref.load %arg1[%c1_245] : memref<6xf32, #tpu.memory_space<smem>>
    %cst_246 = arith.constant 0.000000e+00 : f32
    %267 = vector.broadcast %cst_246 : f32 to vector<8x512xf32>
    %268 = arith.cmpf oge, %265, %267 : vector<8x512xf32>
    %269 = vector.broadcast %266 : f32 to vector<8x512xf32>
    %270 = arith.mulf %265, %269 : vector<8x512xf32>
    %271 = arith.select %268, %265, %270 : vector<8x512xi1>, vector<8x512xf32>
    %272 = arith.addf %136, %271 : vector<8x512xf32>
    %c0_247 = arith.constant 0 : index
    %c0_248 = arith.constant 0 : index
    %273 = vector.load %arg5[%c0_247, %c0_248] : memref<8x8xf32, #tpu.memory_space<vmem>>, vector<8x8xf32>
    %cst_249 = arith.constant dense<0.000000e+00> : vector<8x512xf32>
    %274 = tpu.matmul %273, %272, %cst_249 {dimension_numbers = #tpu.dot_dimension_numbers<[1], [0], [0], [1], [0, 0, 1, 1], [], []>} : vector<8x8xf32>, vector<8x512xf32>, vector<8x512xf32> -> vector<8x512xf32>
    %c6_250 = arith.constant 6 : index
    %c0_251 = arith.constant 0 : index
    %c0_252 = arith.constant 0 : index
    %275 = vector.load %arg4[%c6_250, %c0_251, %c0_252] : memref<7x8x1xf32, #tpu.memory_space<vmem>>, vector<1x8x1xf32>
    %276 = vector.shape_cast %275 : vector<1x8x1xf32> to vector<8x1xf32>
    %277 = vector.broadcast %276 : vector<8x1xf32> to vector<8x512xf32>
    %278 = arith.addf %274, %277 : vector<8x512xf32>
    %c34_i32_253 = arith.constant 34 : i32
    %279 = tpu.dynamic_rotate %278 by %c34_i32_253 dim 1 : vector<8x512xf32>, i32 -> vector<8x512xf32>
    %c0_254 = arith.constant 0 : index
    %c0_255 = arith.constant 0 : index
    %c0_256 = arith.constant 0 : index
    %280 = vector.load %arg6[%c0_254, %c0_255, %c0_256] : memref<25x8x512xf32, #tpu.memory_space<vmem>>, vector<1x8x512xf32>
    %281 = vector.shape_cast %280 : vector<1x8x512xf32> to vector<8x512xf32>
    %282 = arith.mulf %279, %281 : vector<8x512xf32>
    %c0_257 = arith.constant 0 : index
    %c0_258 = arith.constant 0 : index
    %283 = vector.load %arg8[%c0_257, %c0_258] : memref<200x512xf32, #tpu.memory_space<vmem>>, vector<8x512xf32>
    tpu.vector_store %arg8[%c0_257, %c0_258], %282 {strides = array<i32>} : memref<200x512xf32, #tpu.memory_space<vmem>>, vector<8x512xf32>,
    %c33_i32_259 = arith.constant 33 : i32
    %284 = tpu.dynamic_rotate %278 by %c33_i32_259 dim 1 : vector<8x512xf32>, i32 -> vector<8x512xf32>
    %c1_260 = arith.constant 1 : index
    %c0_261 = arith.constant 0 : index
    %c0_262 = arith.constant 0 : index
    %285 = vector.load %arg6[%c1_260, %c0_261, %c0_262] : memref<25x8x512xf32, #tpu.memory_space<vmem>>, vector<1x8x512xf32>
    %286 = vector.shape_cast %285 : vector<1x8x512xf32> to vector<8x512xf32>
    %287 = arith.mulf %284, %286 : vector<8x512xf32>
    %c8_263 = arith.constant 8 : index
    %c0_264 = arith.constant 0 : index
    %288 = vector.load %arg8[%c8_263, %c0_264] : memref<200x512xf32, #tpu.memory_space<vmem>>, vector<8x512xf32>
    tpu.vector_store %arg8[%c8_263, %c0_264], %287 {strides = array<i32>} : memref<200x512xf32, #tpu.memory_space<vmem>>, vector<8x512xf32>,
    %c32_i32_265 = arith.constant 32 : i32
    %289 = tpu.dynamic_rotate %278 by %c32_i32_265 dim 1 : vector<8x512xf32>, i32 -> vector<8x512xf32>
    %c2_266 = arith.constant 2 : index
    %c0_267 = arith.constant 0 : index
    %c0_268 = arith.constant 0 : index
    %290 = vector.load %arg6[%c2_266, %c0_267, %c0_268] : memref<25x8x512xf32, #tpu.memory_space<vmem>>, vector<1x8x512xf32>
    %291 = vector.shape_cast %290 : vector<1x8x512xf32> to vector<8x512xf32>
    %292 = arith.mulf %289, %291 : vector<8x512xf32>
    %c16_269 = arith.constant 16 : index
    %c0_270 = arith.constant 0 : index
    %293 = vector.load %arg8[%c16_269, %c0_270] : memref<200x512xf32, #tpu.memory_space<vmem>>, vector<8x512xf32>
    tpu.vector_store %arg8[%c16_269, %c0_270], %292 {strides = array<i32>} : memref<200x512xf32, #tpu.memory_space<vmem>>, vector<8x512xf32>,
    %c31_i32_271 = arith.constant 31 : i32
    %294 = tpu.dynamic_rotate %278 by %c31_i32_271 dim 1 : vector<8x512xf32>, i32 -> vector<8x512xf32>
    %c3_272 = arith.constant 3 : index
    %c0_273 = arith.constant 0 : index
    %c0_274 = arith.constant 0 : index
    %295 = vector.load %arg6[%c3_272, %c0_273, %c0_274] : memref<25x8x512xf32, #tpu.memory_space<vmem>>, vector<1x8x512xf32>
    %296 = vector.shape_cast %295 : vector<1x8x512xf32> to vector<8x512xf32>
    %297 = arith.mulf %294, %296 : vector<8x512xf32>
    %c24_275 = arith.constant 24 : index
    %c0_276 = arith.constant 0 : index
    %298 = vector.load %arg8[%c24_275, %c0_276] : memref<200x512xf32, #tpu.memory_space<vmem>>, vector<8x512xf32>
    tpu.vector_store %arg8[%c24_275, %c0_276], %297 {strides = array<i32>} : memref<200x512xf32, #tpu.memory_space<vmem>>, vector<8x512xf32>,
    %c30_i32_277 = arith.constant 30 : i32
    %299 = tpu.dynamic_rotate %278 by %c30_i32_277 dim 1 : vector<8x512xf32>, i32 -> vector<8x512xf32>
    %c4_278 = arith.constant 4 : index
    %c0_279 = arith.constant 0 : index
    %c0_280 = arith.constant 0 : index
    %300 = vector.load %arg6[%c4_278, %c0_279, %c0_280] : memref<25x8x512xf32, #tpu.memory_space<vmem>>, vector<1x8x512xf32>
    %301 = vector.shape_cast %300 : vector<1x8x512xf32> to vector<8x512xf32>
    %302 = arith.mulf %299, %301 : vector<8x512xf32>
    %c32_281 = arith.constant 32 : index
    %c0_282 = arith.constant 0 : index
    %303 = vector.load %arg8[%c32_281, %c0_282] : memref<200x512xf32, #tpu.memory_space<vmem>>, vector<8x512xf32>
    tpu.vector_store %arg8[%c32_281, %c0_282], %302 {strides = array<i32>} : memref<200x512xf32, #tpu.memory_space<vmem>>, vector<8x512xf32>,
    %c18_i32_283 = arith.constant 18 : i32
    %304 = tpu.dynamic_rotate %278 by %c18_i32_283 dim 1 : vector<8x512xf32>, i32 -> vector<8x512xf32>
    %c5_284 = arith.constant 5 : index
    %c0_285 = arith.constant 0 : index
    %c0_286 = arith.constant 0 : index
    %305 = vector.load %arg6[%c5_284, %c0_285, %c0_286] : memref<25x8x512xf32, #tpu.memory_space<vmem>>, vector<1x8x512xf32>
    %306 = vector.shape_cast %305 : vector<1x8x512xf32> to vector<8x512xf32>
    %307 = arith.mulf %304, %306 : vector<8x512xf32>
    %c40_287 = arith.constant 40 : index
    %c0_288 = arith.constant 0 : index
    %308 = vector.load %arg8[%c40_287, %c0_288] : memref<200x512xf32, #tpu.memory_space<vmem>>, vector<8x512xf32>
    tpu.vector_store %arg8[%c40_287, %c0_288], %307 {strides = array<i32>} : memref<200x512xf32, #tpu.memory_space<vmem>>, vector<8x512xf32>,
    %c17_i32_289 = arith.constant 17 : i32
    %309 = tpu.dynamic_rotate %278 by %c17_i32_289 dim 1 : vector<8x512xf32>, i32 -> vector<8x512xf32>
    %c6_290 = arith.constant 6 : index
    %c0_291 = arith.constant 0 : index
    %c0_292 = arith.constant 0 : index
    %310 = vector.load %arg6[%c6_290, %c0_291, %c0_292] : memref<25x8x512xf32, #tpu.memory_space<vmem>>, vector<1x8x512xf32>
    %311 = vector.shape_cast %310 : vector<1x8x512xf32> to vector<8x512xf32>
    %312 = arith.mulf %309, %311 : vector<8x512xf32>
    %c48_293 = arith.constant 48 : index
    %c0_294 = arith.constant 0 : index
    %313 = vector.load %arg8[%c48_293, %c0_294] : memref<200x512xf32, #tpu.memory_space<vmem>>, vector<8x512xf32>
    tpu.vector_store %arg8[%c48_293, %c0_294], %312 {strides = array<i32>} : memref<200x512xf32, #tpu.memory_space<vmem>>, vector<8x512xf32>,
    %c16_i32_295 = arith.constant 16 : i32
    %314 = tpu.dynamic_rotate %278 by %c16_i32_295 dim 1 : vector<8x512xf32>, i32 -> vector<8x512xf32>
    %c7_296 = arith.constant 7 : index
    %c0_297 = arith.constant 0 : index
    %c0_298 = arith.constant 0 : index
    %315 = vector.load %arg6[%c7_296, %c0_297, %c0_298] : memref<25x8x512xf32, #tpu.memory_space<vmem>>, vector<1x8x512xf32>
    %316 = vector.shape_cast %315 : vector<1x8x512xf32> to vector<8x512xf32>
    %317 = arith.mulf %314, %316 : vector<8x512xf32>
    %c56_299 = arith.constant 56 : index
    %c0_300 = arith.constant 0 : index
    %318 = vector.load %arg8[%c56_299, %c0_300] : memref<200x512xf32, #tpu.memory_space<vmem>>, vector<8x512xf32>
    tpu.vector_store %arg8[%c56_299, %c0_300], %317 {strides = array<i32>} : memref<200x512xf32, #tpu.memory_space<vmem>>, vector<8x512xf32>,
    %c15_i32_301 = arith.constant 15 : i32
    %319 = tpu.dynamic_rotate %278 by %c15_i32_301 dim 1 : vector<8x512xf32>, i32 -> vector<8x512xf32>
    %c8_302 = arith.constant 8 : index
    %c0_303 = arith.constant 0 : index
    %c0_304 = arith.constant 0 : index
    %320 = vector.load %arg6[%c8_302, %c0_303, %c0_304] : memref<25x8x512xf32, #tpu.memory_space<vmem>>, vector<1x8x512xf32>
    %321 = vector.shape_cast %320 : vector<1x8x512xf32> to vector<8x512xf32>
    %322 = arith.mulf %319, %321 : vector<8x512xf32>
    %c64_305 = arith.constant 64 : index
    %c0_306 = arith.constant 0 : index
    %323 = vector.load %arg8[%c64_305, %c0_306] : memref<200x512xf32, #tpu.memory_space<vmem>>, vector<8x512xf32>
    tpu.vector_store %arg8[%c64_305, %c0_306], %322 {strides = array<i32>} : memref<200x512xf32, #tpu.memory_space<vmem>>, vector<8x512xf32>,
    %c14_i32_307 = arith.constant 14 : i32
    %324 = tpu.dynamic_rotate %278 by %c14_i32_307 dim 1 : vector<8x512xf32>, i32 -> vector<8x512xf32>
    %c9_308 = arith.constant 9 : index
    %c0_309 = arith.constant 0 : index
    %c0_310 = arith.constant 0 : index
    %325 = vector.load %arg6[%c9_308, %c0_309, %c0_310] : memref<25x8x512xf32, #tpu.memory_space<vmem>>, vector<1x8x512xf32>
    %326 = vector.shape_cast %325 : vector<1x8x512xf32> to vector<8x512xf32>
    %327 = arith.mulf %324, %326 : vector<8x512xf32>
    %c72_311 = arith.constant 72 : index
    %c0_312 = arith.constant 0 : index
    %328 = vector.load %arg8[%c72_311, %c0_312] : memref<200x512xf32, #tpu.memory_space<vmem>>, vector<8x512xf32>
    tpu.vector_store %arg8[%c72_311, %c0_312], %327 {strides = array<i32>} : memref<200x512xf32, #tpu.memory_space<vmem>>, vector<8x512xf32>,
    %c2_i32_313 = arith.constant 2 : i32
    %329 = tpu.dynamic_rotate %278 by %c2_i32_313 dim 1 : vector<8x512xf32>, i32 -> vector<8x512xf32>
    %c10_314 = arith.constant 10 : index
    %c0_315 = arith.constant 0 : index
    %c0_316 = arith.constant 0 : index
    %330 = vector.load %arg6[%c10_314, %c0_315, %c0_316] : memref<25x8x512xf32, #tpu.memory_space<vmem>>, vector<1x8x512xf32>
    %331 = vector.shape_cast %330 : vector<1x8x512xf32> to vector<8x512xf32>
    %332 = arith.mulf %329, %331 : vector<8x512xf32>
    %c80_317 = arith.constant 80 : index
    %c0_318 = arith.constant 0 : index
    %333 = vector.load %arg8[%c80_317, %c0_318] : memref<200x512xf32, #tpu.memory_space<vmem>>, vector<8x512xf32>
    tpu.vector_store %arg8[%c80_317, %c0_318], %332 {strides = array<i32>} : memref<200x512xf32, #tpu.memory_space<vmem>>, vector<8x512xf32>,
    %c1_i32_319 = arith.constant 1 : i32
    %334 = tpu.dynamic_rotate %278 by %c1_i32_319 dim 1 : vector<8x512xf32>, i32 -> vector<8x512xf32>
    %c11_320 = arith.constant 11 : index
    %c0_321 = arith.constant 0 : index
    %c0_322 = arith.constant 0 : index
    %335 = vector.load %arg6[%c11_320, %c0_321, %c0_322] : memref<25x8x512xf32, #tpu.memory_space<vmem>>, vector<1x8x512xf32>
    %336 = vector.shape_cast %335 : vector<1x8x512xf32> to vector<8x512xf32>
    %337 = arith.mulf %334, %336 : vector<8x512xf32>
    %c88_323 = arith.constant 88 : index
    %c0_324 = arith.constant 0 : index
    %338 = vector.load %arg8[%c88_323, %c0_324] : memref<200x512xf32, #tpu.memory_space<vmem>>, vector<8x512xf32>
    tpu.vector_store %arg8[%c88_323, %c0_324], %337 {strides = array<i32>} : memref<200x512xf32, #tpu.memory_space<vmem>>, vector<8x512xf32>,
    %c96_325 = arith.constant 96 : index
    %c0_326 = arith.constant 0 : index
    %339 = vector.load %arg8[%c96_325, %c0_326] : memref<200x512xf32, #tpu.memory_space<vmem>>, vector<8x512xf32>
    tpu.vector_store %arg8[%c96_325, %c0_326], %278 {strides = array<i32>} : memref<200x512xf32, #tpu.memory_space<vmem>>, vector<8x512xf32>,
    %c511_i32_327 = arith.constant 511 : i32
    %340 = tpu.dynamic_rotate %278 by %c511_i32_327 dim 1 : vector<8x512xf32>, i32 -> vector<8x512xf32>
    %c13_328 = arith.constant 13 : index
    %c0_329 = arith.constant 0 : index
    %c0_330 = arith.constant 0 : index
    %341 = vector.load %arg6[%c13_328, %c0_329, %c0_330] : memref<25x8x512xf32, #tpu.memory_space<vmem>>, vector<1x8x512xf32>
    %342 = vector.shape_cast %341 : vector<1x8x512xf32> to vector<8x512xf32>
    %343 = arith.mulf %340, %342 : vector<8x512xf32>
    %c104_331 = arith.constant 104 : index
    %c0_332 = arith.constant 0 : index
    %344 = vector.load %arg8[%c104_331, %c0_332] : memref<200x512xf32, #tpu.memory_space<vmem>>, vector<8x512xf32>
    tpu.vector_store %arg8[%c104_331, %c0_332], %343 {strides = array<i32>} : memref<200x512xf32, #tpu.memory_space<vmem>>, vector<8x512xf32>,
    %c510_i32_333 = arith.constant 510 : i32
    %345 = tpu.dynamic_rotate %278 by %c510_i32_333 dim 1 : vector<8x512xf32>, i32 -> vector<8x512xf32>
    %c14_334 = arith.constant 14 : index
    %c0_335 = arith.constant 0 : index
    %c0_336 = arith.constant 0 : index
    %346 = vector.load %arg6[%c14_334, %c0_335, %c0_336] : memref<25x8x512xf32, #tpu.memory_space<vmem>>, vector<1x8x512xf32>
    %347 = vector.shape_cast %346 : vector<1x8x512xf32> to vector<8x512xf32>
    %348 = arith.mulf %345, %347 : vector<8x512xf32>
    %c112_337 = arith.constant 112 : index
    %c0_338 = arith.constant 0 : index
    %349 = vector.load %arg8[%c112_337, %c0_338] : memref<200x512xf32, #tpu.memory_space<vmem>>, vector<8x512xf32>
    tpu.vector_store %arg8[%c112_337, %c0_338], %348 {strides = array<i32>} : memref<200x512xf32, #tpu.memory_space<vmem>>, vector<8x512xf32>,
    %c498_i32_339 = arith.constant 498 : i32
    %350 = tpu.dynamic_rotate %278 by %c498_i32_339 dim 1 : vector<8x512xf32>, i32 -> vector<8x512xf32>
    %c15_340 = arith.constant 15 : index
    %c0_341 = arith.constant 0 : index
    %c0_342 = arith.constant 0 : index
    %351 = vector.load %arg6[%c15_340, %c0_341, %c0_342] : memref<25x8x512xf32, #tpu.memory_space<vmem>>, vector<1x8x512xf32>
    %352 = vector.shape_cast %351 : vector<1x8x512xf32> to vector<8x512xf32>
    %353 = arith.mulf %350, %352 : vector<8x512xf32>
    %c120_343 = arith.constant 120 : index
    %c0_344 = arith.constant 0 : index
    %354 = vector.load %arg8[%c120_343, %c0_344] : memref<200x512xf32, #tpu.memory_space<vmem>>, vector<8x512xf32>
    tpu.vector_store %arg8[%c120_343, %c0_344], %353 {strides = array<i32>} : memref<200x512xf32, #tpu.memory_space<vmem>>, vector<8x512xf32>,
    %c497_i32_345 = arith.constant 497 : i32
    %355 = tpu.dynamic_rotate %278 by %c497_i32_345 dim 1 : vector<8x512xf32>, i32 -> vector<8x512xf32>
    %c16_346 = arith.constant 16 : index
    %c0_347 = arith.constant 0 : index
    %c0_348 = arith.constant 0 : index
    %356 = vector.load %arg6[%c16_346, %c0_347, %c0_348] : memref<25x8x512xf32, #tpu.memory_space<vmem>>, vector<1x8x512xf32>
    %357 = vector.shape_cast %356 : vector<1x8x512xf32> to vector<8x512xf32>
    %358 = arith.mulf %355, %357 : vector<8x512xf32>
    %c128_349 = arith.constant 128 : index
    %c0_350 = arith.constant 0 : index
    %359 = vector.load %arg8[%c128_349, %c0_350] : memref<200x512xf32, #tpu.memory_space<vmem>>, vector<8x512xf32>
    tpu.vector_store %arg8[%c128_349, %c0_350], %358 {strides = array<i32>} : memref<200x512xf32, #tpu.memory_space<vmem>>, vector<8x512xf32>,
    %c496_i32_351 = arith.constant 496 : i32
    %360 = tpu.dynamic_rotate %278 by %c496_i32_351 dim 1 : vector<8x512xf32>, i32 -> vector<8x512xf32>
    %c17_352 = arith.constant 17 : index
    %c0_353 = arith.constant 0 : index
    %c0_354 = arith.constant 0 : index
    %361 = vector.load %arg6[%c17_352, %c0_353, %c0_354] : memref<25x8x512xf32, #tpu.memory_space<vmem>>, vector<1x8x512xf32>
    %362 = vector.shape_cast %361 : vector<1x8x512xf32> to vector<8x512xf32>
    %363 = arith.mulf %360, %362 : vector<8x512xf32>
    %c136_355 = arith.constant 136 : index
    %c0_356 = arith.constant 0 : index
    %364 = vector.load %arg8[%c136_355, %c0_356] : memref<200x512xf32, #tpu.memory_space<vmem>>, vector<8x512xf32>
    tpu.vector_store %arg8[%c136_355, %c0_356], %363 {strides = array<i32>} : memref<200x512xf32, #tpu.memory_space<vmem>>, vector<8x512xf32>,
    %c495_i32_357 = arith.constant 495 : i32
    %365 = tpu.dynamic_rotate %278 by %c495_i32_357 dim 1 : vector<8x512xf32>, i32 -> vector<8x512xf32>
    %c18_358 = arith.constant 18 : index
    %c0_359 = arith.constant 0 : index
    %c0_360 = arith.constant 0 : index
    %366 = vector.load %arg6[%c18_358, %c0_359, %c0_360] : memref<25x8x512xf32, #tpu.memory_space<vmem>>, vector<1x8x512xf32>
    %367 = vector.shape_cast %366 : vector<1x8x512xf32> to vector<8x512xf32>
    %368 = arith.mulf %365, %367 : vector<8x512xf32>
    %c144_361 = arith.constant 144 : index
    %c0_362 = arith.constant 0 : index
    %369 = vector.load %arg8[%c144_361, %c0_362] : memref<200x512xf32, #tpu.memory_space<vmem>>, vector<8x512xf32>
    tpu.vector_store %arg8[%c144_361, %c0_362], %368 {strides = array<i32>} : memref<200x512xf32, #tpu.memory_space<vmem>>, vector<8x512xf32>,
    %c494_i32_363 = arith.constant 494 : i32
    %370 = tpu.dynamic_rotate %278 by %c494_i32_363 dim 1 : vector<8x512xf32>, i32 -> vector<8x512xf32>
    %c19_364 = arith.constant 19 : index
    %c0_365 = arith.constant 0 : index
    %c0_366 = arith.constant 0 : index
    %371 = vector.load %arg6[%c19_364, %c0_365, %c0_366] : memref<25x8x512xf32, #tpu.memory_space<vmem>>, vector<1x8x512xf32>
    %372 = vector.shape_cast %371 : vector<1x8x512xf32> to vector<8x512xf32>
    %373 = arith.mulf %370, %372 : vector<8x512xf32>
    %c152_367 = arith.constant 152 : index
    %c0_368 = arith.constant 0 : index
    %374 = vector.load %arg8[%c152_367, %c0_368] : memref<200x512xf32, #tpu.memory_space<vmem>>, vector<8x512xf32>
    tpu.vector_store %arg8[%c152_367, %c0_368], %373 {strides = array<i32>} : memref<200x512xf32, #tpu.memory_space<vmem>>, vector<8x512xf32>,
    %c482_i32_369 = arith.constant 482 : i32
    %375 = tpu.dynamic_rotate %278 by %c482_i32_369 dim 1 : vector<8x512xf32>, i32 -> vector<8x512xf32>
    %c20_370 = arith.constant 20 : index
    %c0_371 = arith.constant 0 : index
    %c0_372 = arith.constant 0 : index
    %376 = vector.load %arg6[%c20_370, %c0_371, %c0_372] : memref<25x8x512xf32, #tpu.memory_space<vmem>>, vector<1x8x512xf32>
    %377 = vector.shape_cast %376 : vector<1x8x512xf32> to vector<8x512xf32>
    %378 = arith.mulf %375, %377 : vector<8x512xf32>
    %c160_373 = arith.constant 160 : index
    %c0_374 = arith.constant 0 : index
    %379 = vector.load %arg8[%c160_373, %c0_374] : memref<200x512xf32, #tpu.memory_space<vmem>>, vector<8x512xf32>
    tpu.vector_store %arg8[%c160_373, %c0_374], %378 {strides = array<i32>} : memref<200x512xf32, #tpu.memory_space<vmem>>, vector<8x512xf32>,
    %c481_i32_375 = arith.constant 481 : i32
    %380 = tpu.dynamic_rotate %278 by %c481_i32_375 dim 1 : vector<8x512xf32>, i32 -> vector<8x512xf32>
    %c21_376 = arith.constant 21 : index
    %c0_377 = arith.constant 0 : index
    %c0_378 = arith.constant 0 : index
    %381 = vector.load %arg6[%c21_376, %c0_377, %c0_378] : memref<25x8x512xf32, #tpu.memory_space<vmem>>, vector<1x8x512xf32>
    %382 = vector.shape_cast %381 : vector<1x8x512xf32> to vector<8x512xf32>
    %383 = arith.mulf %380, %382 : vector<8x512xf32>
    %c168_379 = arith.constant 168 : index
    %c0_380 = arith.constant 0 : index
    %384 = vector.load %arg8[%c168_379, %c0_380] : memref<200x512xf32, #tpu.memory_space<vmem>>, vector<8x512xf32>
    tpu.vector_store %arg8[%c168_379, %c0_380], %383 {strides = array<i32>} : memref<200x512xf32, #tpu.memory_space<vmem>>, vector<8x512xf32>,
    %c480_i32_381 = arith.constant 480 : i32
    %385 = tpu.dynamic_rotate %278 by %c480_i32_381 dim 1 : vector<8x512xf32>, i32 -> vector<8x512xf32>
    %c22_382 = arith.constant 22 : index
    %c0_383 = arith.constant 0 : index
    %c0_384 = arith.constant 0 : index
    %386 = vector.load %arg6[%c22_382, %c0_383, %c0_384] : memref<25x8x512xf32, #tpu.memory_space<vmem>>, vector<1x8x512xf32>
    %387 = vector.shape_cast %386 : vector<1x8x512xf32> to vector<8x512xf32>
    %388 = arith.mulf %385, %387 : vector<8x512xf32>
    %c176_385 = arith.constant 176 : index
    %c0_386 = arith.constant 0 : index
    %389 = vector.load %arg8[%c176_385, %c0_386] : memref<200x512xf32, #tpu.memory_space<vmem>>, vector<8x512xf32>
    tpu.vector_store %arg8[%c176_385, %c0_386], %388 {strides = array<i32>} : memref<200x512xf32, #tpu.memory_space<vmem>>, vector<8x512xf32>,
    %c479_i32_387 = arith.constant 479 : i32
    %390 = tpu.dynamic_rotate %278 by %c479_i32_387 dim 1 : vector<8x512xf32>, i32 -> vector<8x512xf32>
    %c23_388 = arith.constant 23 : index
    %c0_389 = arith.constant 0 : index
    %c0_390 = arith.constant 0 : index
    %391 = vector.load %arg6[%c23_388, %c0_389, %c0_390] : memref<25x8x512xf32, #tpu.memory_space<vmem>>, vector<1x8x512xf32>
    %392 = vector.shape_cast %391 : vector<1x8x512xf32> to vector<8x512xf32>
    %393 = arith.mulf %390, %392 : vector<8x512xf32>
    %c184_391 = arith.constant 184 : index
    %c0_392 = arith.constant 0 : index
    %394 = vector.load %arg8[%c184_391, %c0_392] : memref<200x512xf32, #tpu.memory_space<vmem>>, vector<8x512xf32>
    tpu.vector_store %arg8[%c184_391, %c0_392], %393 {strides = array<i32>} : memref<200x512xf32, #tpu.memory_space<vmem>>, vector<8x512xf32>,
    %c478_i32_393 = arith.constant 478 : i32
    %395 = tpu.dynamic_rotate %278 by %c478_i32_393 dim 1 : vector<8x512xf32>, i32 -> vector<8x512xf32>
    %c24_394 = arith.constant 24 : index
    %c0_395 = arith.constant 0 : index
    %c0_396 = arith.constant 0 : index
    %396 = vector.load %arg6[%c24_394, %c0_395, %c0_396] : memref<25x8x512xf32, #tpu.memory_space<vmem>>, vector<1x8x512xf32>
    %397 = vector.shape_cast %396 : vector<1x8x512xf32> to vector<8x512xf32>
    %398 = arith.mulf %395, %397 : vector<8x512xf32>
    %c192_397 = arith.constant 192 : index
    %c0_398 = arith.constant 0 : index
    %399 = vector.load %arg8[%c192_397, %c0_398] : memref<200x512xf32, #tpu.memory_space<vmem>>, vector<8x512xf32>
    tpu.vector_store %arg8[%c192_397, %c0_398], %398 {strides = array<i32>} : memref<200x512xf32, #tpu.memory_space<vmem>>, vector<8x512xf32>,
    %c2_399 = arith.constant 2 : index
    %c0_400 = arith.constant 0 : index
    %c0_401 = arith.constant 0 : index
    %400 = vector.load %arg3[%c2_399, %c0_400, %c0_401] : memref<6x8x200xf32, #tpu.memory_space<vmem>>, vector<1x8x200xf32>
    %401 = vector.shape_cast %400 : vector<1x8x200xf32> to vector<8x200xf32>
    %c0_402 = arith.constant 0 : index
    %c0_403 = arith.constant 0 : index
    %402 = vector.load %arg8[%c0_402, %c0_403] : memref<200x512xf32, #tpu.memory_space<vmem>>, vector<200x512xf32>
    %cst_404 = arith.constant dense<0.000000e+00> : vector<8x512xf32>
    %403 = tpu.matmul %401, %402, %cst_404 {dimension_numbers = #tpu.dot_dimension_numbers<[1], [0], [0], [1], [0, 0, 1, 1], [], []>} : vector<8x200xf32>, vector<200x512xf32>, vector<8x512xf32> -> vector<8x512xf32>
    %c2_405 = arith.constant 2 : index
    %c0_406 = arith.constant 0 : index
    %c0_407 = arith.constant 0 : index
    %404 = vector.load %arg4[%c2_405, %c0_406, %c0_407] : memref<7x8x1xf32, #tpu.memory_space<vmem>>, vector<1x8x1xf32>
    %405 = vector.shape_cast %404 : vector<1x8x1xf32> to vector<8x1xf32>
    %406 = vector.broadcast %405 : vector<8x1xf32> to vector<8x512xf32>
    %407 = arith.addf %403, %406 : vector<8x512xf32>
    %c2_408 = arith.constant 2 : index
    %408 = memref.load %arg1[%c2_408] : memref<6xf32, #tpu.memory_space<smem>>
    %cst_409 = arith.constant 0.000000e+00 : f32
    %409 = vector.broadcast %cst_409 : f32 to vector<8x512xf32>
    %410 = arith.cmpf oge, %407, %409 : vector<8x512xf32>
    %411 = vector.broadcast %408 : f32 to vector<8x512xf32>
    %412 = arith.mulf %407, %411 : vector<8x512xf32>
    %413 = arith.select %410, %407, %412 : vector<8x512xi1>, vector<8x512xf32>
    %414 = arith.addf %278, %413 : vector<8x512xf32>
    %c0_410 = arith.constant 0 : index
    %c0_411 = arith.constant 0 : index
    %415 = vector.load %arg5[%c0_410, %c0_411] : memref<8x8xf32, #tpu.memory_space<vmem>>, vector<8x8xf32>
    %cst_412 = arith.constant dense<0.000000e+00> : vector<8x512xf32>
    %416 = tpu.matmul %415, %414, %cst_412 {dimension_numbers = #tpu.dot_dimension_numbers<[1], [0], [0], [1], [0, 0, 1, 1], [], []>} : vector<8x8xf32>, vector<8x512xf32>, vector<8x512xf32> -> vector<8x512xf32>
    %c6_413 = arith.constant 6 : index
    %c0_414 = arith.constant 0 : index
    %c0_415 = arith.constant 0 : index
    %417 = vector.load %arg4[%c6_413, %c0_414, %c0_415] : memref<7x8x1xf32, #tpu.memory_space<vmem>>, vector<1x8x1xf32>
    %418 = vector.shape_cast %417 : vector<1x8x1xf32> to vector<8x1xf32>
    %419 = vector.broadcast %418 : vector<8x1xf32> to vector<8x512xf32>
    %420 = arith.addf %416, %419 : vector<8x512xf32>
    %c34_i32_416 = arith.constant 34 : i32
    %421 = tpu.dynamic_rotate %420 by %c34_i32_416 dim 1 : vector<8x512xf32>, i32 -> vector<8x512xf32>
    %c0_417 = arith.constant 0 : index
    %c0_418 = arith.constant 0 : index
    %c0_419 = arith.constant 0 : index
    %422 = vector.load %arg6[%c0_417, %c0_418, %c0_419] : memref<25x8x512xf32, #tpu.memory_space<vmem>>, vector<1x8x512xf32>
    %423 = vector.shape_cast %422 : vector<1x8x512xf32> to vector<8x512xf32>
    %424 = arith.mulf %421, %423 : vector<8x512xf32>
    %c0_420 = arith.constant 0 : index
    %c0_421 = arith.constant 0 : index
    %425 = vector.load %arg8[%c0_420, %c0_421] : memref<200x512xf32, #tpu.memory_space<vmem>>, vector<8x512xf32>
    tpu.vector_store %arg8[%c0_420, %c0_421], %424 {strides = array<i32>} : memref<200x512xf32, #tpu.memory_space<vmem>>, vector<8x512xf32>,
    %c33_i32_422 = arith.constant 33 : i32
    %426 = tpu.dynamic_rotate %420 by %c33_i32_422 dim 1 : vector<8x512xf32>, i32 -> vector<8x512xf32>
    %c1_423 = arith.constant 1 : index
    %c0_424 = arith.constant 0 : index
    %c0_425 = arith.constant 0 : index
    %427 = vector.load %arg6[%c1_423, %c0_424, %c0_425] : memref<25x8x512xf32, #tpu.memory_space<vmem>>, vector<1x8x512xf32>
    %428 = vector.shape_cast %427 : vector<1x8x512xf32> to vector<8x512xf32>
    %429 = arith.mulf %426, %428 : vector<8x512xf32>
    %c8_426 = arith.constant 8 : index
    %c0_427 = arith.constant 0 : index
    %430 = vector.load %arg8[%c8_426, %c0_427] : memref<200x512xf32, #tpu.memory_space<vmem>>, vector<8x512xf32>
    tpu.vector_store %arg8[%c8_426, %c0_427], %429 {strides = array<i32>} : memref<200x512xf32, #tpu.memory_space<vmem>>, vector<8x512xf32>,
    %c32_i32_428 = arith.constant 32 : i32
    %431 = tpu.dynamic_rotate %420 by %c32_i32_428 dim 1 : vector<8x512xf32>, i32 -> vector<8x512xf32>
    %c2_429 = arith.constant 2 : index
    %c0_430 = arith.constant 0 : index
    %c0_431 = arith.constant 0 : index
    %432 = vector.load %arg6[%c2_429, %c0_430, %c0_431] : memref<25x8x512xf32, #tpu.memory_space<vmem>>, vector<1x8x512xf32>
    %433 = vector.shape_cast %432 : vector<1x8x512xf32> to vector<8x512xf32>
    %434 = arith.mulf %431, %433 : vector<8x512xf32>
    %c16_432 = arith.constant 16 : index
    %c0_433 = arith.constant 0 : index
    %435 = vector.load %arg8[%c16_432, %c0_433] : memref<200x512xf32, #tpu.memory_space<vmem>>, vector<8x512xf32>
    tpu.vector_store %arg8[%c16_432, %c0_433], %434 {strides = array<i32>} : memref<200x512xf32, #tpu.memory_space<vmem>>, vector<8x512xf32>,
    %c31_i32_434 = arith.constant 31 : i32
    %436 = tpu.dynamic_rotate %420 by %c31_i32_434 dim 1 : vector<8x512xf32>, i32 -> vector<8x512xf32>
    %c3_435 = arith.constant 3 : index
    %c0_436 = arith.constant 0 : index
    %c0_437 = arith.constant 0 : index
    %437 = vector.load %arg6[%c3_435, %c0_436, %c0_437] : memref<25x8x512xf32, #tpu.memory_space<vmem>>, vector<1x8x512xf32>
    %438 = vector.shape_cast %437 : vector<1x8x512xf32> to vector<8x512xf32>
    %439 = arith.mulf %436, %438 : vector<8x512xf32>
    %c24_438 = arith.constant 24 : index
    %c0_439 = arith.constant 0 : index
    %440 = vector.load %arg8[%c24_438, %c0_439] : memref<200x512xf32, #tpu.memory_space<vmem>>, vector<8x512xf32>
    tpu.vector_store %arg8[%c24_438, %c0_439], %439 {strides = array<i32>} : memref<200x512xf32, #tpu.memory_space<vmem>>, vector<8x512xf32>,
    %c30_i32_440 = arith.constant 30 : i32
    %441 = tpu.dynamic_rotate %420 by %c30_i32_440 dim 1 : vector<8x512xf32>, i32 -> vector<8x512xf32>
    %c4_441 = arith.constant 4 : index
    %c0_442 = arith.constant 0 : index
    %c0_443 = arith.constant 0 : index
    %442 = vector.load %arg6[%c4_441, %c0_442, %c0_443] : memref<25x8x512xf32, #tpu.memory_space<vmem>>, vector<1x8x512xf32>
    %443 = vector.shape_cast %442 : vector<1x8x512xf32> to vector<8x512xf32>
    %444 = arith.mulf %441, %443 : vector<8x512xf32>
    %c32_444 = arith.constant 32 : index
    %c0_445 = arith.constant 0 : index
    %445 = vector.load %arg8[%c32_444, %c0_445] : memref<200x512xf32, #tpu.memory_space<vmem>>, vector<8x512xf32>
    tpu.vector_store %arg8[%c32_444, %c0_445], %444 {strides = array<i32>} : memref<200x512xf32, #tpu.memory_space<vmem>>, vector<8x512xf32>,
    %c18_i32_446 = arith.constant 18 : i32
    %446 = tpu.dynamic_rotate %420 by %c18_i32_446 dim 1 : vector<8x512xf32>, i32 -> vector<8x512xf32>
    %c5_447 = arith.constant 5 : index
    %c0_448 = arith.constant 0 : index
    %c0_449 = arith.constant 0 : index
    %447 = vector.load %arg6[%c5_447, %c0_448, %c0_449] : memref<25x8x512xf32, #tpu.memory_space<vmem>>, vector<1x8x512xf32>
    %448 = vector.shape_cast %447 : vector<1x8x512xf32> to vector<8x512xf32>
    %449 = arith.mulf %446, %448 : vector<8x512xf32>
    %c40_450 = arith.constant 40 : index
    %c0_451 = arith.constant 0 : index
    %450 = vector.load %arg8[%c40_450, %c0_451] : memref<200x512xf32, #tpu.memory_space<vmem>>, vector<8x512xf32>
    tpu.vector_store %arg8[%c40_450, %c0_451], %449 {strides = array<i32>} : memref<200x512xf32, #tpu.memory_space<vmem>>, vector<8x512xf32>,
    %c17_i32_452 = arith.constant 17 : i32
    %451 = tpu.dynamic_rotate %420 by %c17_i32_452 dim 1 : vector<8x512xf32>, i32 -> vector<8x512xf32>
    %c6_453 = arith.constant 6 : index
    %c0_454 = arith.constant 0 : index
    %c0_455 = arith.constant 0 : index
    %452 = vector.load %arg6[%c6_453, %c0_454, %c0_455] : memref<25x8x512xf32, #tpu.memory_space<vmem>>, vector<1x8x512xf32>
    %453 = vector.shape_cast %452 : vector<1x8x512xf32> to vector<8x512xf32>
    %454 = arith.mulf %451, %453 : vector<8x512xf32>
    %c48_456 = arith.constant 48 : index
    %c0_457 = arith.constant 0 : index
    %455 = vector.load %arg8[%c48_456, %c0_457] : memref<200x512xf32, #tpu.memory_space<vmem>>, vector<8x512xf32>
    tpu.vector_store %arg8[%c48_456, %c0_457], %454 {strides = array<i32>} : memref<200x512xf32, #tpu.memory_space<vmem>>, vector<8x512xf32>,
    %c16_i32_458 = arith.constant 16 : i32
    %456 = tpu.dynamic_rotate %420 by %c16_i32_458 dim 1 : vector<8x512xf32>, i32 -> vector<8x512xf32>
    %c7_459 = arith.constant 7 : index
    %c0_460 = arith.constant 0 : index
    %c0_461 = arith.constant 0 : index
    %457 = vector.load %arg6[%c7_459, %c0_460, %c0_461] : memref<25x8x512xf32, #tpu.memory_space<vmem>>, vector<1x8x512xf32>
    %458 = vector.shape_cast %457 : vector<1x8x512xf32> to vector<8x512xf32>
    %459 = arith.mulf %456, %458 : vector<8x512xf32>
    %c56_462 = arith.constant 56 : index
    %c0_463 = arith.constant 0 : index
    %460 = vector.load %arg8[%c56_462, %c0_463] : memref<200x512xf32, #tpu.memory_space<vmem>>, vector<8x512xf32>
    tpu.vector_store %arg8[%c56_462, %c0_463], %459 {strides = array<i32>} : memref<200x512xf32, #tpu.memory_space<vmem>>, vector<8x512xf32>,
    %c15_i32_464 = arith.constant 15 : i32
    %461 = tpu.dynamic_rotate %420 by %c15_i32_464 dim 1 : vector<8x512xf32>, i32 -> vector<8x512xf32>
    %c8_465 = arith.constant 8 : index
    %c0_466 = arith.constant 0 : index
    %c0_467 = arith.constant 0 : index
    %462 = vector.load %arg6[%c8_465, %c0_466, %c0_467] : memref<25x8x512xf32, #tpu.memory_space<vmem>>, vector<1x8x512xf32>
    %463 = vector.shape_cast %462 : vector<1x8x512xf32> to vector<8x512xf32>
    %464 = arith.mulf %461, %463 : vector<8x512xf32>
    %c64_468 = arith.constant 64 : index
    %c0_469 = arith.constant 0 : index
    %465 = vector.load %arg8[%c64_468, %c0_469] : memref<200x512xf32, #tpu.memory_space<vmem>>, vector<8x512xf32>
    tpu.vector_store %arg8[%c64_468, %c0_469], %464 {strides = array<i32>} : memref<200x512xf32, #tpu.memory_space<vmem>>, vector<8x512xf32>,
    %c14_i32_470 = arith.constant 14 : i32
    %466 = tpu.dynamic_rotate %420 by %c14_i32_470 dim 1 : vector<8x512xf32>, i32 -> vector<8x512xf32>
    %c9_471 = arith.constant 9 : index
    %c0_472 = arith.constant 0 : index
    %c0_473 = arith.constant 0 : index
    %467 = vector.load %arg6[%c9_471, %c0_472, %c0_473] : memref<25x8x512xf32, #tpu.memory_space<vmem>>, vector<1x8x512xf32>
    %468 = vector.shape_cast %467 : vector<1x8x512xf32> to vector<8x512xf32>
    %469 = arith.mulf %466, %468 : vector<8x512xf32>
    %c72_474 = arith.constant 72 : index
    %c0_475 = arith.constant 0 : index
    %470 = vector.load %arg8[%c72_474, %c0_475] : memref<200x512xf32, #tpu.memory_space<vmem>>, vector<8x512xf32>
    tpu.vector_store %arg8[%c72_474, %c0_475], %469 {strides = array<i32>} : memref<200x512xf32, #tpu.memory_space<vmem>>, vector<8x512xf32>,
    %c2_i32_476 = arith.constant 2 : i32
    %471 = tpu.dynamic_rotate %420 by %c2_i32_476 dim 1 : vector<8x512xf32>, i32 -> vector<8x512xf32>
    %c10_477 = arith.constant 10 : index
    %c0_478 = arith.constant 0 : index
    %c0_479 = arith.constant 0 : index
    %472 = vector.load %arg6[%c10_477, %c0_478, %c0_479] : memref<25x8x512xf32, #tpu.memory_space<vmem>>, vector<1x8x512xf32>
    %473 = vector.shape_cast %472 : vector<1x8x512xf32> to vector<8x512xf32>
    %474 = arith.mulf %471, %473 : vector<8x512xf32>
    %c80_480 = arith.constant 80 : index
    %c0_481 = arith.constant 0 : index
    %475 = vector.load %arg8[%c80_480, %c0_481] : memref<200x512xf32, #tpu.memory_space<vmem>>, vector<8x512xf32>
    tpu.vector_store %arg8[%c80_480, %c0_481], %474 {strides = array<i32>} : memref<200x512xf32, #tpu.memory_space<vmem>>, vector<8x512xf32>,
    %c1_i32_482 = arith.constant 1 : i32
    %476 = tpu.dynamic_rotate %420 by %c1_i32_482 dim 1 : vector<8x512xf32>, i32 -> vector<8x512xf32>
    %c11_483 = arith.constant 11 : index
    %c0_484 = arith.constant 0 : index
    %c0_485 = arith.constant 0 : index
    %477 = vector.load %arg6[%c11_483, %c0_484, %c0_485] : memref<25x8x512xf32, #tpu.memory_space<vmem>>, vector<1x8x512xf32>
    %478 = vector.shape_cast %477 : vector<1x8x512xf32> to vector<8x512xf32>
    %479 = arith.mulf %476, %478 : vector<8x512xf32>
    %c88_486 = arith.constant 88 : index
    %c0_487 = arith.constant 0 : index
    %480 = vector.load %arg8[%c88_486, %c0_487] : memref<200x512xf32, #tpu.memory_space<vmem>>, vector<8x512xf32>
    tpu.vector_store %arg8[%c88_486, %c0_487], %479 {strides = array<i32>} : memref<200x512xf32, #tpu.memory_space<vmem>>, vector<8x512xf32>,
    %c96_488 = arith.constant 96 : index
    %c0_489 = arith.constant 0 : index
    %481 = vector.load %arg8[%c96_488, %c0_489] : memref<200x512xf32, #tpu.memory_space<vmem>>, vector<8x512xf32>
    tpu.vector_store %arg8[%c96_488, %c0_489], %420 {strides = array<i32>} : memref<200x512xf32, #tpu.memory_space<vmem>>, vector<8x512xf32>,
    %c511_i32_490 = arith.constant 511 : i32
    %482 = tpu.dynamic_rotate %420 by %c511_i32_490 dim 1 : vector<8x512xf32>, i32 -> vector<8x512xf32>
    %c13_491 = arith.constant 13 : index
    %c0_492 = arith.constant 0 : index
    %c0_493 = arith.constant 0 : index
    %483 = vector.load %arg6[%c13_491, %c0_492, %c0_493] : memref<25x8x512xf32, #tpu.memory_space<vmem>>, vector<1x8x512xf32>
    %484 = vector.shape_cast %483 : vector<1x8x512xf32> to vector<8x512xf32>
    %485 = arith.mulf %482, %484 : vector<8x512xf32>
    %c104_494 = arith.constant 104 : index
    %c0_495 = arith.constant 0 : index
    %486 = vector.load %arg8[%c104_494, %c0_495] : memref<200x512xf32, #tpu.memory_space<vmem>>, vector<8x512xf32>
    tpu.vector_store %arg8[%c104_494, %c0_495], %485 {strides = array<i32>} : memref<200x512xf32, #tpu.memory_space<vmem>>, vector<8x512xf32>,
    %c510_i32_496 = arith.constant 510 : i32
    %487 = tpu.dynamic_rotate %420 by %c510_i32_496 dim 1 : vector<8x512xf32>, i32 -> vector<8x512xf32>
    %c14_497 = arith.constant 14 : index
    %c0_498 = arith.constant 0 : index
    %c0_499 = arith.constant 0 : index
    %488 = vector.load %arg6[%c14_497, %c0_498, %c0_499] : memref<25x8x512xf32, #tpu.memory_space<vmem>>, vector<1x8x512xf32>
    %489 = vector.shape_cast %488 : vector<1x8x512xf32> to vector<8x512xf32>
    %490 = arith.mulf %487, %489 : vector<8x512xf32>
    %c112_500 = arith.constant 112 : index
    %c0_501 = arith.constant 0 : index
    %491 = vector.load %arg8[%c112_500, %c0_501] : memref<200x512xf32, #tpu.memory_space<vmem>>, vector<8x512xf32>
    tpu.vector_store %arg8[%c112_500, %c0_501], %490 {strides = array<i32>} : memref<200x512xf32, #tpu.memory_space<vmem>>, vector<8x512xf32>,
    %c498_i32_502 = arith.constant 498 : i32
    %492 = tpu.dynamic_rotate %420 by %c498_i32_502 dim 1 : vector<8x512xf32>, i32 -> vector<8x512xf32>
    %c15_503 = arith.constant 15 : index
    %c0_504 = arith.constant 0 : index
    %c0_505 = arith.constant 0 : index
    %493 = vector.load %arg6[%c15_503, %c0_504, %c0_505] : memref<25x8x512xf32, #tpu.memory_space<vmem>>, vector<1x8x512xf32>
    %494 = vector.shape_cast %493 : vector<1x8x512xf32> to vector<8x512xf32>
    %495 = arith.mulf %492, %494 : vector<8x512xf32>
    %c120_506 = arith.constant 120 : index
    %c0_507 = arith.constant 0 : index
    %496 = vector.load %arg8[%c120_506, %c0_507] : memref<200x512xf32, #tpu.memory_space<vmem>>, vector<8x512xf32>
    tpu.vector_store %arg8[%c120_506, %c0_507], %495 {strides = array<i32>} : memref<200x512xf32, #tpu.memory_space<vmem>>, vector<8x512xf32>,
    %c497_i32_508 = arith.constant 497 : i32
    %497 = tpu.dynamic_rotate %420 by %c497_i32_508 dim 1 : vector<8x512xf32>, i32 -> vector<8x512xf32>
    %c16_509 = arith.constant 16 : index
    %c0_510 = arith.constant 0 : index
    %c0_511 = arith.constant 0 : index
    %498 = vector.load %arg6[%c16_509, %c0_510, %c0_511] : memref<25x8x512xf32, #tpu.memory_space<vmem>>, vector<1x8x512xf32>
    %499 = vector.shape_cast %498 : vector<1x8x512xf32> to vector<8x512xf32>
    %500 = arith.mulf %497, %499 : vector<8x512xf32>
    %c128_512 = arith.constant 128 : index
    %c0_513 = arith.constant 0 : index
    %501 = vector.load %arg8[%c128_512, %c0_513] : memref<200x512xf32, #tpu.memory_space<vmem>>, vector<8x512xf32>
    tpu.vector_store %arg8[%c128_512, %c0_513], %500 {strides = array<i32>} : memref<200x512xf32, #tpu.memory_space<vmem>>, vector<8x512xf32>,
    %c496_i32_514 = arith.constant 496 : i32
    %502 = tpu.dynamic_rotate %420 by %c496_i32_514 dim 1 : vector<8x512xf32>, i32 -> vector<8x512xf32>
    %c17_515 = arith.constant 17 : index
    %c0_516 = arith.constant 0 : index
    %c0_517 = arith.constant 0 : index
    %503 = vector.load %arg6[%c17_515, %c0_516, %c0_517] : memref<25x8x512xf32, #tpu.memory_space<vmem>>, vector<1x8x512xf32>
    %504 = vector.shape_cast %503 : vector<1x8x512xf32> to vector<8x512xf32>
    %505 = arith.mulf %502, %504 : vector<8x512xf32>
    %c136_518 = arith.constant 136 : index
    %c0_519 = arith.constant 0 : index
    %506 = vector.load %arg8[%c136_518, %c0_519] : memref<200x512xf32, #tpu.memory_space<vmem>>, vector<8x512xf32>
    tpu.vector_store %arg8[%c136_518, %c0_519], %505 {strides = array<i32>} : memref<200x512xf32, #tpu.memory_space<vmem>>, vector<8x512xf32>,
    %c495_i32_520 = arith.constant 495 : i32
    %507 = tpu.dynamic_rotate %420 by %c495_i32_520 dim 1 : vector<8x512xf32>, i32 -> vector<8x512xf32>
    %c18_521 = arith.constant 18 : index
    %c0_522 = arith.constant 0 : index
    %c0_523 = arith.constant 0 : index
    %508 = vector.load %arg6[%c18_521, %c0_522, %c0_523] : memref<25x8x512xf32, #tpu.memory_space<vmem>>, vector<1x8x512xf32>
    %509 = vector.shape_cast %508 : vector<1x8x512xf32> to vector<8x512xf32>
    %510 = arith.mulf %507, %509 : vector<8x512xf32>
    %c144_524 = arith.constant 144 : index
    %c0_525 = arith.constant 0 : index
    %511 = vector.load %arg8[%c144_524, %c0_525] : memref<200x512xf32, #tpu.memory_space<vmem>>, vector<8x512xf32>
    tpu.vector_store %arg8[%c144_524, %c0_525], %510 {strides = array<i32>} : memref<200x512xf32, #tpu.memory_space<vmem>>, vector<8x512xf32>,
    %c494_i32_526 = arith.constant 494 : i32
    %512 = tpu.dynamic_rotate %420 by %c494_i32_526 dim 1 : vector<8x512xf32>, i32 -> vector<8x512xf32>
    %c19_527 = arith.constant 19 : index
    %c0_528 = arith.constant 0 : index
    %c0_529 = arith.constant 0 : index
    %513 = vector.load %arg6[%c19_527, %c0_528, %c0_529] : memref<25x8x512xf32, #tpu.memory_space<vmem>>, vector<1x8x512xf32>
    %514 = vector.shape_cast %513 : vector<1x8x512xf32> to vector<8x512xf32>
    %515 = arith.mulf %512, %514 : vector<8x512xf32>
    %c152_530 = arith.constant 152 : index
    %c0_531 = arith.constant 0 : index
    %516 = vector.load %arg8[%c152_530, %c0_531] : memref<200x512xf32, #tpu.memory_space<vmem>>, vector<8x512xf32>
    tpu.vector_store %arg8[%c152_530, %c0_531], %515 {strides = array<i32>} : memref<200x512xf32, #tpu.memory_space<vmem>>, vector<8x512xf32>,
    %c482_i32_532 = arith.constant 482 : i32
    %517 = tpu.dynamic_rotate %420 by %c482_i32_532 dim 1 : vector<8x512xf32>, i32 -> vector<8x512xf32>
    %c20_533 = arith.constant 20 : index
    %c0_534 = arith.constant 0 : index
    %c0_535 = arith.constant 0 : index
    %518 = vector.load %arg6[%c20_533, %c0_534, %c0_535] : memref<25x8x512xf32, #tpu.memory_space<vmem>>, vector<1x8x512xf32>
    %519 = vector.shape_cast %518 : vector<1x8x512xf32> to vector<8x512xf32>
    %520 = arith.mulf %517, %519 : vector<8x512xf32>
    %c160_536 = arith.constant 160 : index
    %c0_537 = arith.constant 0 : index
    %521 = vector.load %arg8[%c160_536, %c0_537] : memref<200x512xf32, #tpu.memory_space<vmem>>, vector<8x512xf32>
    tpu.vector_store %arg8[%c160_536, %c0_537], %520 {strides = array<i32>} : memref<200x512xf32, #tpu.memory_space<vmem>>, vector<8x512xf32>,
    %c481_i32_538 = arith.constant 481 : i32
    %522 = tpu.dynamic_rotate %420 by %c481_i32_538 dim 1 : vector<8x512xf32>, i32 -> vector<8x512xf32>
    %c21_539 = arith.constant 21 : index
    %c0_540 = arith.constant 0 : index
    %c0_541 = arith.constant 0 : index
    %523 = vector.load %arg6[%c21_539, %c0_540, %c0_541] : memref<25x8x512xf32, #tpu.memory_space<vmem>>, vector<1x8x512xf32>
    %524 = vector.shape_cast %523 : vector<1x8x512xf32> to vector<8x512xf32>
    %525 = arith.mulf %522, %524 : vector<8x512xf32>
    %c168_542 = arith.constant 168 : index
    %c0_543 = arith.constant 0 : index
    %526 = vector.load %arg8[%c168_542, %c0_543] : memref<200x512xf32, #tpu.memory_space<vmem>>, vector<8x512xf32>
    tpu.vector_store %arg8[%c168_542, %c0_543], %525 {strides = array<i32>} : memref<200x512xf32, #tpu.memory_space<vmem>>, vector<8x512xf32>,
    %c480_i32_544 = arith.constant 480 : i32
    %527 = tpu.dynamic_rotate %420 by %c480_i32_544 dim 1 : vector<8x512xf32>, i32 -> vector<8x512xf32>
    %c22_545 = arith.constant 22 : index
    %c0_546 = arith.constant 0 : index
    %c0_547 = arith.constant 0 : index
    %528 = vector.load %arg6[%c22_545, %c0_546, %c0_547] : memref<25x8x512xf32, #tpu.memory_space<vmem>>, vector<1x8x512xf32>
    %529 = vector.shape_cast %528 : vector<1x8x512xf32> to vector<8x512xf32>
    %530 = arith.mulf %527, %529 : vector<8x512xf32>
    %c176_548 = arith.constant 176 : index
    %c0_549 = arith.constant 0 : index
    %531 = vector.load %arg8[%c176_548, %c0_549] : memref<200x512xf32, #tpu.memory_space<vmem>>, vector<8x512xf32>
    tpu.vector_store %arg8[%c176_548, %c0_549], %530 {strides = array<i32>} : memref<200x512xf32, #tpu.memory_space<vmem>>, vector<8x512xf32>,
    %c479_i32_550 = arith.constant 479 : i32
    %532 = tpu.dynamic_rotate %420 by %c479_i32_550 dim 1 : vector<8x512xf32>, i32 -> vector<8x512xf32>
    %c23_551 = arith.constant 23 : index
    %c0_552 = arith.constant 0 : index
    %c0_553 = arith.constant 0 : index
    %533 = vector.load %arg6[%c23_551, %c0_552, %c0_553] : memref<25x8x512xf32, #tpu.memory_space<vmem>>, vector<1x8x512xf32>
    %534 = vector.shape_cast %533 : vector<1x8x512xf32> to vector<8x512xf32>
    %535 = arith.mulf %532, %534 : vector<8x512xf32>
    %c184_554 = arith.constant 184 : index
    %c0_555 = arith.constant 0 : index
    %536 = vector.load %arg8[%c184_554, %c0_555] : memref<200x512xf32, #tpu.memory_space<vmem>>, vector<8x512xf32>
    tpu.vector_store %arg8[%c184_554, %c0_555], %535 {strides = array<i32>} : memref<200x512xf32, #tpu.memory_space<vmem>>, vector<8x512xf32>,
    %c478_i32_556 = arith.constant 478 : i32
    %537 = tpu.dynamic_rotate %420 by %c478_i32_556 dim 1 : vector<8x512xf32>, i32 -> vector<8x512xf32>
    %c24_557 = arith.constant 24 : index
    %c0_558 = arith.constant 0 : index
    %c0_559 = arith.constant 0 : index
    %538 = vector.load %arg6[%c24_557, %c0_558, %c0_559] : memref<25x8x512xf32, #tpu.memory_space<vmem>>, vector<1x8x512xf32>
    %539 = vector.shape_cast %538 : vector<1x8x512xf32> to vector<8x512xf32>
    %540 = arith.mulf %537, %539 : vector<8x512xf32>
    %c192_560 = arith.constant 192 : index
    %c0_561 = arith.constant 0 : index
    %541 = vector.load %arg8[%c192_560, %c0_561] : memref<200x512xf32, #tpu.memory_space<vmem>>, vector<8x512xf32>
    tpu.vector_store %arg8[%c192_560, %c0_561], %540 {strides = array<i32>} : memref<200x512xf32, #tpu.memory_space<vmem>>, vector<8x512xf32>,
    %c3_562 = arith.constant 3 : index
    %c0_563 = arith.constant 0 : index
    %c0_564 = arith.constant 0 : index
    %542 = vector.load %arg3[%c3_562, %c0_563, %c0_564] : memref<6x8x200xf32, #tpu.memory_space<vmem>>, vector<1x8x200xf32>
    %543 = vector.shape_cast %542 : vector<1x8x200xf32> to vector<8x200xf32>
    %c0_565 = arith.constant 0 : index
    %c0_566 = arith.constant 0 : index
    %544 = vector.load %arg8[%c0_565, %c0_566] : memref<200x512xf32, #tpu.memory_space<vmem>>, vector<200x512xf32>
    %cst_567 = arith.constant dense<0.000000e+00> : vector<8x512xf32>
    %545 = tpu.matmul %543, %544, %cst_567 {dimension_numbers = #tpu.dot_dimension_numbers<[1], [0], [0], [1], [0, 0, 1, 1], [], []>} : vector<8x200xf32>, vector<200x512xf32>, vector<8x512xf32> -> vector<8x512xf32>
    %c3_568 = arith.constant 3 : index
    %c0_569 = arith.constant 0 : index
    %c0_570 = arith.constant 0 : index
    %546 = vector.load %arg4[%c3_568, %c0_569, %c0_570] : memref<7x8x1xf32, #tpu.memory_space<vmem>>, vector<1x8x1xf32>
    %547 = vector.shape_cast %546 : vector<1x8x1xf32> to vector<8x1xf32>
    %548 = vector.broadcast %547 : vector<8x1xf32> to vector<8x512xf32>
    %549 = arith.addf %545, %548 : vector<8x512xf32>
    %c3_571 = arith.constant 3 : index
    %550 = memref.load %arg1[%c3_571] : memref<6xf32, #tpu.memory_space<smem>>
    %cst_572 = arith.constant 0.000000e+00 : f32
    %551 = vector.broadcast %cst_572 : f32 to vector<8x512xf32>
    %552 = arith.cmpf oge, %549, %551 : vector<8x512xf32>
    %553 = vector.broadcast %550 : f32 to vector<8x512xf32>
    %554 = arith.mulf %549, %553 : vector<8x512xf32>
    %555 = arith.select %552, %549, %554 : vector<8x512xi1>, vector<8x512xf32>
    %556 = arith.addf %420, %555 : vector<8x512xf32>
    %c0_573 = arith.constant 0 : index
    %c0_574 = arith.constant 0 : index
    %557 = vector.load %arg5[%c0_573, %c0_574] : memref<8x8xf32, #tpu.memory_space<vmem>>, vector<8x8xf32>
    %cst_575 = arith.constant dense<0.000000e+00> : vector<8x512xf32>
    %558 = tpu.matmul %557, %556, %cst_575 {dimension_numbers = #tpu.dot_dimension_numbers<[1], [0], [0], [1], [0, 0, 1, 1], [], []>} : vector<8x8xf32>, vector<8x512xf32>, vector<8x512xf32> -> vector<8x512xf32>
    %c6_576 = arith.constant 6 : index
    %c0_577 = arith.constant 0 : index
    %c0_578 = arith.constant 0 : index
    %559 = vector.load %arg4[%c6_576, %c0_577, %c0_578] : memref<7x8x1xf32, #tpu.memory_space<vmem>>, vector<1x8x1xf32>
    %560 = vector.shape_cast %559 : vector<1x8x1xf32> to vector<8x1xf32>
    %561 = vector.broadcast %560 : vector<8x1xf32> to vector<8x512xf32>
    %562 = arith.addf %558, %561 : vector<8x512xf32>
    %c34_i32_579 = arith.constant 34 : i32
    %563 = tpu.dynamic_rotate %562 by %c34_i32_579 dim 1 : vector<8x512xf32>, i32 -> vector<8x512xf32>
    %c0_580 = arith.constant 0 : index
    %c0_581 = arith.constant 0 : index
    %c0_582 = arith.constant 0 : index
    %564 = vector.load %arg6[%c0_580, %c0_581, %c0_582] : memref<25x8x512xf32, #tpu.memory_space<vmem>>, vector<1x8x512xf32>
    %565 = vector.shape_cast %564 : vector<1x8x512xf32> to vector<8x512xf32>
    %566 = arith.mulf %563, %565 : vector<8x512xf32>
    %c0_583 = arith.constant 0 : index
    %c0_584 = arith.constant 0 : index
    %567 = vector.load %arg8[%c0_583, %c0_584] : memref<200x512xf32, #tpu.memory_space<vmem>>, vector<8x512xf32>
    tpu.vector_store %arg8[%c0_583, %c0_584], %566 {strides = array<i32>} : memref<200x512xf32, #tpu.memory_space<vmem>>, vector<8x512xf32>,
    %c33_i32_585 = arith.constant 33 : i32
    %568 = tpu.dynamic_rotate %562 by %c33_i32_585 dim 1 : vector<8x512xf32>, i32 -> vector<8x512xf32>
    %c1_586 = arith.constant 1 : index
    %c0_587 = arith.constant 0 : index
    %c0_588 = arith.constant 0 : index
    %569 = vector.load %arg6[%c1_586, %c0_587, %c0_588] : memref<25x8x512xf32, #tpu.memory_space<vmem>>, vector<1x8x512xf32>
    %570 = vector.shape_cast %569 : vector<1x8x512xf32> to vector<8x512xf32>
    %571 = arith.mulf %568, %570 : vector<8x512xf32>
    %c8_589 = arith.constant 8 : index
    %c0_590 = arith.constant 0 : index
    %572 = vector.load %arg8[%c8_589, %c0_590] : memref<200x512xf32, #tpu.memory_space<vmem>>, vector<8x512xf32>
    tpu.vector_store %arg8[%c8_589, %c0_590], %571 {strides = array<i32>} : memref<200x512xf32, #tpu.memory_space<vmem>>, vector<8x512xf32>,
    %c32_i32_591 = arith.constant 32 : i32
    %573 = tpu.dynamic_rotate %562 by %c32_i32_591 dim 1 : vector<8x512xf32>, i32 -> vector<8x512xf32>
    %c2_592 = arith.constant 2 : index
    %c0_593 = arith.constant 0 : index
    %c0_594 = arith.constant 0 : index
    %574 = vector.load %arg6[%c2_592, %c0_593, %c0_594] : memref<25x8x512xf32, #tpu.memory_space<vmem>>, vector<1x8x512xf32>
    %575 = vector.shape_cast %574 : vector<1x8x512xf32> to vector<8x512xf32>
    %576 = arith.mulf %573, %575 : vector<8x512xf32>
    %c16_595 = arith.constant 16 : index
    %c0_596 = arith.constant 0 : index
    %577 = vector.load %arg8[%c16_595, %c0_596] : memref<200x512xf32, #tpu.memory_space<vmem>>, vector<8x512xf32>
    tpu.vector_store %arg8[%c16_595, %c0_596], %576 {strides = array<i32>} : memref<200x512xf32, #tpu.memory_space<vmem>>, vector<8x512xf32>,
    %c31_i32_597 = arith.constant 31 : i32
    %578 = tpu.dynamic_rotate %562 by %c31_i32_597 dim 1 : vector<8x512xf32>, i32 -> vector<8x512xf32>
    %c3_598 = arith.constant 3 : index
    %c0_599 = arith.constant 0 : index
    %c0_600 = arith.constant 0 : index
    %579 = vector.load %arg6[%c3_598, %c0_599, %c0_600] : memref<25x8x512xf32, #tpu.memory_space<vmem>>, vector<1x8x512xf32>
    %580 = vector.shape_cast %579 : vector<1x8x512xf32> to vector<8x512xf32>
    %581 = arith.mulf %578, %580 : vector<8x512xf32>
    %c24_601 = arith.constant 24 : index
    %c0_602 = arith.constant 0 : index
    %582 = vector.load %arg8[%c24_601, %c0_602] : memref<200x512xf32, #tpu.memory_space<vmem>>, vector<8x512xf32>
    tpu.vector_store %arg8[%c24_601, %c0_602], %581 {strides = array<i32>} : memref<200x512xf32, #tpu.memory_space<vmem>>, vector<8x512xf32>,
    %c30_i32_603 = arith.constant 30 : i32
    %583 = tpu.dynamic_rotate %562 by %c30_i32_603 dim 1 : vector<8x512xf32>, i32 -> vector<8x512xf32>
    %c4_604 = arith.constant 4 : index
    %c0_605 = arith.constant 0 : index
    %c0_606 = arith.constant 0 : index
    %584 = vector.load %arg6[%c4_604, %c0_605, %c0_606] : memref<25x8x512xf32, #tpu.memory_space<vmem>>, vector<1x8x512xf32>
    %585 = vector.shape_cast %584 : vector<1x8x512xf32> to vector<8x512xf32>
    %586 = arith.mulf %583, %585 : vector<8x512xf32>
    %c32_607 = arith.constant 32 : index
    %c0_608 = arith.constant 0 : index
    %587 = vector.load %arg8[%c32_607, %c0_608] : memref<200x512xf32, #tpu.memory_space<vmem>>, vector<8x512xf32>
    tpu.vector_store %arg8[%c32_607, %c0_608], %586 {strides = array<i32>} : memref<200x512xf32, #tpu.memory_space<vmem>>, vector<8x512xf32>,
    %c18_i32_609 = arith.constant 18 : i32
    %588 = tpu.dynamic_rotate %562 by %c18_i32_609 dim 1 : vector<8x512xf32>, i32 -> vector<8x512xf32>
    %c5_610 = arith.constant 5 : index
    %c0_611 = arith.constant 0 : index
    %c0_612 = arith.constant 0 : index
    %589 = vector.load %arg6[%c5_610, %c0_611, %c0_612] : memref<25x8x512xf32, #tpu.memory_space<vmem>>, vector<1x8x512xf32>
    %590 = vector.shape_cast %589 : vector<1x8x512xf32> to vector<8x512xf32>
    %591 = arith.mulf %588, %590 : vector<8x512xf32>
    %c40_613 = arith.constant 40 : index
    %c0_614 = arith.constant 0 : index
    %592 = vector.load %arg8[%c40_613, %c0_614] : memref<200x512xf32, #tpu.memory_space<vmem>>, vector<8x512xf32>
    tpu.vector_store %arg8[%c40_613, %c0_614], %591 {strides = array<i32>} : memref<200x512xf32, #tpu.memory_space<vmem>>, vector<8x512xf32>,
    %c17_i32_615 = arith.constant 17 : i32
    %593 = tpu.dynamic_rotate %562 by %c17_i32_615 dim 1 : vector<8x512xf32>, i32 -> vector<8x512xf32>
    %c6_616 = arith.constant 6 : index
    %c0_617 = arith.constant 0 : index
    %c0_618 = arith.constant 0 : index
    %594 = vector.load %arg6[%c6_616, %c0_617, %c0_618] : memref<25x8x512xf32, #tpu.memory_space<vmem>>, vector<1x8x512xf32>
    %595 = vector.shape_cast %594 : vector<1x8x512xf32> to vector<8x512xf32>
    %596 = arith.mulf %593, %595 : vector<8x512xf32>
    %c48_619 = arith.constant 48 : index
    %c0_620 = arith.constant 0 : index
    %597 = vector.load %arg8[%c48_619, %c0_620] : memref<200x512xf32, #tpu.memory_space<vmem>>, vector<8x512xf32>
    tpu.vector_store %arg8[%c48_619, %c0_620], %596 {strides = array<i32>} : memref<200x512xf32, #tpu.memory_space<vmem>>, vector<8x512xf32>,
    %c16_i32_621 = arith.constant 16 : i32
    %598 = tpu.dynamic_rotate %562 by %c16_i32_621 dim 1 : vector<8x512xf32>, i32 -> vector<8x512xf32>
    %c7_622 = arith.constant 7 : index
    %c0_623 = arith.constant 0 : index
    %c0_624 = arith.constant 0 : index
    %599 = vector.load %arg6[%c7_622, %c0_623, %c0_624] : memref<25x8x512xf32, #tpu.memory_space<vmem>>, vector<1x8x512xf32>
    %600 = vector.shape_cast %599 : vector<1x8x512xf32> to vector<8x512xf32>
    %601 = arith.mulf %598, %600 : vector<8x512xf32>
    %c56_625 = arith.constant 56 : index
    %c0_626 = arith.constant 0 : index
    %602 = vector.load %arg8[%c56_625, %c0_626] : memref<200x512xf32, #tpu.memory_space<vmem>>, vector<8x512xf32>
    tpu.vector_store %arg8[%c56_625, %c0_626], %601 {strides = array<i32>} : memref<200x512xf32, #tpu.memory_space<vmem>>, vector<8x512xf32>,
    %c15_i32_627 = arith.constant 15 : i32
    %603 = tpu.dynamic_rotate %562 by %c15_i32_627 dim 1 : vector<8x512xf32>, i32 -> vector<8x512xf32>
    %c8_628 = arith.constant 8 : index
    %c0_629 = arith.constant 0 : index
    %c0_630 = arith.constant 0 : index
    %604 = vector.load %arg6[%c8_628, %c0_629, %c0_630] : memref<25x8x512xf32, #tpu.memory_space<vmem>>, vector<1x8x512xf32>
    %605 = vector.shape_cast %604 : vector<1x8x512xf32> to vector<8x512xf32>
    %606 = arith.mulf %603, %605 : vector<8x512xf32>
    %c64_631 = arith.constant 64 : index
    %c0_632 = arith.constant 0 : index
    %607 = vector.load %arg8[%c64_631, %c0_632] : memref<200x512xf32, #tpu.memory_space<vmem>>, vector<8x512xf32>
    tpu.vector_store %arg8[%c64_631, %c0_632], %606 {strides = array<i32>} : memref<200x512xf32, #tpu.memory_space<vmem>>, vector<8x512xf32>,
    %c14_i32_633 = arith.constant 14 : i32
    %608 = tpu.dynamic_rotate %562 by %c14_i32_633 dim 1 : vector<8x512xf32>, i32 -> vector<8x512xf32>
    %c9_634 = arith.constant 9 : index
    %c0_635 = arith.constant 0 : index
    %c0_636 = arith.constant 0 : index
    %609 = vector.load %arg6[%c9_634, %c0_635, %c0_636] : memref<25x8x512xf32, #tpu.memory_space<vmem>>, vector<1x8x512xf32>
    %610 = vector.shape_cast %609 : vector<1x8x512xf32> to vector<8x512xf32>
    %611 = arith.mulf %608, %610 : vector<8x512xf32>
    %c72_637 = arith.constant 72 : index
    %c0_638 = arith.constant 0 : index
    %612 = vector.load %arg8[%c72_637, %c0_638] : memref<200x512xf32, #tpu.memory_space<vmem>>, vector<8x512xf32>
    tpu.vector_store %arg8[%c72_637, %c0_638], %611 {strides = array<i32>} : memref<200x512xf32, #tpu.memory_space<vmem>>, vector<8x512xf32>,
    %c2_i32_639 = arith.constant 2 : i32
    %613 = tpu.dynamic_rotate %562 by %c2_i32_639 dim 1 : vector<8x512xf32>, i32 -> vector<8x512xf32>
    %c10_640 = arith.constant 10 : index
    %c0_641 = arith.constant 0 : index
    %c0_642 = arith.constant 0 : index
    %614 = vector.load %arg6[%c10_640, %c0_641, %c0_642] : memref<25x8x512xf32, #tpu.memory_space<vmem>>, vector<1x8x512xf32>
    %615 = vector.shape_cast %614 : vector<1x8x512xf32> to vector<8x512xf32>
    %616 = arith.mulf %613, %615 : vector<8x512xf32>
    %c80_643 = arith.constant 80 : index
    %c0_644 = arith.constant 0 : index
    %617 = vector.load %arg8[%c80_643, %c0_644] : memref<200x512xf32, #tpu.memory_space<vmem>>, vector<8x512xf32>
    tpu.vector_store %arg8[%c80_643, %c0_644], %616 {strides = array<i32>} : memref<200x512xf32, #tpu.memory_space<vmem>>, vector<8x512xf32>,
    %c1_i32_645 = arith.constant 1 : i32
    %618 = tpu.dynamic_rotate %562 by %c1_i32_645 dim 1 : vector<8x512xf32>, i32 -> vector<8x512xf32>
    %c11_646 = arith.constant 11 : index
    %c0_647 = arith.constant 0 : index
    %c0_648 = arith.constant 0 : index
    %619 = vector.load %arg6[%c11_646, %c0_647, %c0_648] : memref<25x8x512xf32, #tpu.memory_space<vmem>>, vector<1x8x512xf32>
    %620 = vector.shape_cast %619 : vector<1x8x512xf32> to vector<8x512xf32>
    %621 = arith.mulf %618, %620 : vector<8x512xf32>
    %c88_649 = arith.constant 88 : index
    %c0_650 = arith.constant 0 : index
    %622 = vector.load %arg8[%c88_649, %c0_650] : memref<200x512xf32, #tpu.memory_space<vmem>>, vector<8x512xf32>
    tpu.vector_store %arg8[%c88_649, %c0_650], %621 {strides = array<i32>} : memref<200x512xf32, #tpu.memory_space<vmem>>, vector<8x512xf32>,
    %c96_651 = arith.constant 96 : index
    %c0_652 = arith.constant 0 : index
    %623 = vector.load %arg8[%c96_651, %c0_652] : memref<200x512xf32, #tpu.memory_space<vmem>>, vector<8x512xf32>
    tpu.vector_store %arg8[%c96_651, %c0_652], %562 {strides = array<i32>} : memref<200x512xf32, #tpu.memory_space<vmem>>, vector<8x512xf32>,
    %c511_i32_653 = arith.constant 511 : i32
    %624 = tpu.dynamic_rotate %562 by %c511_i32_653 dim 1 : vector<8x512xf32>, i32 -> vector<8x512xf32>
    %c13_654 = arith.constant 13 : index
    %c0_655 = arith.constant 0 : index
    %c0_656 = arith.constant 0 : index
    %625 = vector.load %arg6[%c13_654, %c0_655, %c0_656] : memref<25x8x512xf32, #tpu.memory_space<vmem>>, vector<1x8x512xf32>
    %626 = vector.shape_cast %625 : vector<1x8x512xf32> to vector<8x512xf32>
    %627 = arith.mulf %624, %626 : vector<8x512xf32>
    %c104_657 = arith.constant 104 : index
    %c0_658 = arith.constant 0 : index
    %628 = vector.load %arg8[%c104_657, %c0_658] : memref<200x512xf32, #tpu.memory_space<vmem>>, vector<8x512xf32>
    tpu.vector_store %arg8[%c104_657, %c0_658], %627 {strides = array<i32>} : memref<200x512xf32, #tpu.memory_space<vmem>>, vector<8x512xf32>,
    %c510_i32_659 = arith.constant 510 : i32
    %629 = tpu.dynamic_rotate %562 by %c510_i32_659 dim 1 : vector<8x512xf32>, i32 -> vector<8x512xf32>
    %c14_660 = arith.constant 14 : index
    %c0_661 = arith.constant 0 : index
    %c0_662 = arith.constant 0 : index
    %630 = vector.load %arg6[%c14_660, %c0_661, %c0_662] : memref<25x8x512xf32, #tpu.memory_space<vmem>>, vector<1x8x512xf32>
    %631 = vector.shape_cast %630 : vector<1x8x512xf32> to vector<8x512xf32>
    %632 = arith.mulf %629, %631 : vector<8x512xf32>
    %c112_663 = arith.constant 112 : index
    %c0_664 = arith.constant 0 : index
    %633 = vector.load %arg8[%c112_663, %c0_664] : memref<200x512xf32, #tpu.memory_space<vmem>>, vector<8x512xf32>
    tpu.vector_store %arg8[%c112_663, %c0_664], %632 {strides = array<i32>} : memref<200x512xf32, #tpu.memory_space<vmem>>, vector<8x512xf32>,
    %c498_i32_665 = arith.constant 498 : i32
    %634 = tpu.dynamic_rotate %562 by %c498_i32_665 dim 1 : vector<8x512xf32>, i32 -> vector<8x512xf32>
    %c15_666 = arith.constant 15 : index
    %c0_667 = arith.constant 0 : index
    %c0_668 = arith.constant 0 : index
    %635 = vector.load %arg6[%c15_666, %c0_667, %c0_668] : memref<25x8x512xf32, #tpu.memory_space<vmem>>, vector<1x8x512xf32>
    %636 = vector.shape_cast %635 : vector<1x8x512xf32> to vector<8x512xf32>
    %637 = arith.mulf %634, %636 : vector<8x512xf32>
    %c120_669 = arith.constant 120 : index
    %c0_670 = arith.constant 0 : index
    %638 = vector.load %arg8[%c120_669, %c0_670] : memref<200x512xf32, #tpu.memory_space<vmem>>, vector<8x512xf32>
    tpu.vector_store %arg8[%c120_669, %c0_670], %637 {strides = array<i32>} : memref<200x512xf32, #tpu.memory_space<vmem>>, vector<8x512xf32>,
    %c497_i32_671 = arith.constant 497 : i32
    %639 = tpu.dynamic_rotate %562 by %c497_i32_671 dim 1 : vector<8x512xf32>, i32 -> vector<8x512xf32>
    %c16_672 = arith.constant 16 : index
    %c0_673 = arith.constant 0 : index
    %c0_674 = arith.constant 0 : index
    %640 = vector.load %arg6[%c16_672, %c0_673, %c0_674] : memref<25x8x512xf32, #tpu.memory_space<vmem>>, vector<1x8x512xf32>
    %641 = vector.shape_cast %640 : vector<1x8x512xf32> to vector<8x512xf32>
    %642 = arith.mulf %639, %641 : vector<8x512xf32>
    %c128_675 = arith.constant 128 : index
    %c0_676 = arith.constant 0 : index
    %643 = vector.load %arg8[%c128_675, %c0_676] : memref<200x512xf32, #tpu.memory_space<vmem>>, vector<8x512xf32>
    tpu.vector_store %arg8[%c128_675, %c0_676], %642 {strides = array<i32>} : memref<200x512xf32, #tpu.memory_space<vmem>>, vector<8x512xf32>,
    %c496_i32_677 = arith.constant 496 : i32
    %644 = tpu.dynamic_rotate %562 by %c496_i32_677 dim 1 : vector<8x512xf32>, i32 -> vector<8x512xf32>
    %c17_678 = arith.constant 17 : index
    %c0_679 = arith.constant 0 : index
    %c0_680 = arith.constant 0 : index
    %645 = vector.load %arg6[%c17_678, %c0_679, %c0_680] : memref<25x8x512xf32, #tpu.memory_space<vmem>>, vector<1x8x512xf32>
    %646 = vector.shape_cast %645 : vector<1x8x512xf32> to vector<8x512xf32>
    %647 = arith.mulf %644, %646 : vector<8x512xf32>
    %c136_681 = arith.constant 136 : index
    %c0_682 = arith.constant 0 : index
    %648 = vector.load %arg8[%c136_681, %c0_682] : memref<200x512xf32, #tpu.memory_space<vmem>>, vector<8x512xf32>
    tpu.vector_store %arg8[%c136_681, %c0_682], %647 {strides = array<i32>} : memref<200x512xf32, #tpu.memory_space<vmem>>, vector<8x512xf32>,
    %c495_i32_683 = arith.constant 495 : i32
    %649 = tpu.dynamic_rotate %562 by %c495_i32_683 dim 1 : vector<8x512xf32>, i32 -> vector<8x512xf32>
    %c18_684 = arith.constant 18 : index
    %c0_685 = arith.constant 0 : index
    %c0_686 = arith.constant 0 : index
    %650 = vector.load %arg6[%c18_684, %c0_685, %c0_686] : memref<25x8x512xf32, #tpu.memory_space<vmem>>, vector<1x8x512xf32>
    %651 = vector.shape_cast %650 : vector<1x8x512xf32> to vector<8x512xf32>
    %652 = arith.mulf %649, %651 : vector<8x512xf32>
    %c144_687 = arith.constant 144 : index
    %c0_688 = arith.constant 0 : index
    %653 = vector.load %arg8[%c144_687, %c0_688] : memref<200x512xf32, #tpu.memory_space<vmem>>, vector<8x512xf32>
    tpu.vector_store %arg8[%c144_687, %c0_688], %652 {strides = array<i32>} : memref<200x512xf32, #tpu.memory_space<vmem>>, vector<8x512xf32>,
    %c494_i32_689 = arith.constant 494 : i32
    %654 = tpu.dynamic_rotate %562 by %c494_i32_689 dim 1 : vector<8x512xf32>, i32 -> vector<8x512xf32>
    %c19_690 = arith.constant 19 : index
    %c0_691 = arith.constant 0 : index
    %c0_692 = arith.constant 0 : index
    %655 = vector.load %arg6[%c19_690, %c0_691, %c0_692] : memref<25x8x512xf32, #tpu.memory_space<vmem>>, vector<1x8x512xf32>
    %656 = vector.shape_cast %655 : vector<1x8x512xf32> to vector<8x512xf32>
    %657 = arith.mulf %654, %656 : vector<8x512xf32>
    %c152_693 = arith.constant 152 : index
    %c0_694 = arith.constant 0 : index
    %658 = vector.load %arg8[%c152_693, %c0_694] : memref<200x512xf32, #tpu.memory_space<vmem>>, vector<8x512xf32>
    tpu.vector_store %arg8[%c152_693, %c0_694], %657 {strides = array<i32>} : memref<200x512xf32, #tpu.memory_space<vmem>>, vector<8x512xf32>,
    %c482_i32_695 = arith.constant 482 : i32
    %659 = tpu.dynamic_rotate %562 by %c482_i32_695 dim 1 : vector<8x512xf32>, i32 -> vector<8x512xf32>
    %c20_696 = arith.constant 20 : index
    %c0_697 = arith.constant 0 : index
    %c0_698 = arith.constant 0 : index
    %660 = vector.load %arg6[%c20_696, %c0_697, %c0_698] : memref<25x8x512xf32, #tpu.memory_space<vmem>>, vector<1x8x512xf32>
    %661 = vector.shape_cast %660 : vector<1x8x512xf32> to vector<8x512xf32>
    %662 = arith.mulf %659, %661 : vector<8x512xf32>
    %c160_699 = arith.constant 160 : index
    %c0_700 = arith.constant 0 : index
    %663 = vector.load %arg8[%c160_699, %c0_700] : memref<200x512xf32, #tpu.memory_space<vmem>>, vector<8x512xf32>
    tpu.vector_store %arg8[%c160_699, %c0_700], %662 {strides = array<i32>} : memref<200x512xf32, #tpu.memory_space<vmem>>, vector<8x512xf32>,
    %c481_i32_701 = arith.constant 481 : i32
    %664 = tpu.dynamic_rotate %562 by %c481_i32_701 dim 1 : vector<8x512xf32>, i32 -> vector<8x512xf32>
    %c21_702 = arith.constant 21 : index
    %c0_703 = arith.constant 0 : index
    %c0_704 = arith.constant 0 : index
    %665 = vector.load %arg6[%c21_702, %c0_703, %c0_704] : memref<25x8x512xf32, #tpu.memory_space<vmem>>, vector<1x8x512xf32>
    %666 = vector.shape_cast %665 : vector<1x8x512xf32> to vector<8x512xf32>
    %667 = arith.mulf %664, %666 : vector<8x512xf32>
    %c168_705 = arith.constant 168 : index
    %c0_706 = arith.constant 0 : index
    %668 = vector.load %arg8[%c168_705, %c0_706] : memref<200x512xf32, #tpu.memory_space<vmem>>, vector<8x512xf32>
    tpu.vector_store %arg8[%c168_705, %c0_706], %667 {strides = array<i32>} : memref<200x512xf32, #tpu.memory_space<vmem>>, vector<8x512xf32>,
    %c480_i32_707 = arith.constant 480 : i32
    %669 = tpu.dynamic_rotate %562 by %c480_i32_707 dim 1 : vector<8x512xf32>, i32 -> vector<8x512xf32>
    %c22_708 = arith.constant 22 : index
    %c0_709 = arith.constant 0 : index
    %c0_710 = arith.constant 0 : index
    %670 = vector.load %arg6[%c22_708, %c0_709, %c0_710] : memref<25x8x512xf32, #tpu.memory_space<vmem>>, vector<1x8x512xf32>
    %671 = vector.shape_cast %670 : vector<1x8x512xf32> to vector<8x512xf32>
    %672 = arith.mulf %669, %671 : vector<8x512xf32>
    %c176_711 = arith.constant 176 : index
    %c0_712 = arith.constant 0 : index
    %673 = vector.load %arg8[%c176_711, %c0_712] : memref<200x512xf32, #tpu.memory_space<vmem>>, vector<8x512xf32>
    tpu.vector_store %arg8[%c176_711, %c0_712], %672 {strides = array<i32>} : memref<200x512xf32, #tpu.memory_space<vmem>>, vector<8x512xf32>,
    %c479_i32_713 = arith.constant 479 : i32
    %674 = tpu.dynamic_rotate %562 by %c479_i32_713 dim 1 : vector<8x512xf32>, i32 -> vector<8x512xf32>
    %c23_714 = arith.constant 23 : index
    %c0_715 = arith.constant 0 : index
    %c0_716 = arith.constant 0 : index
    %675 = vector.load %arg6[%c23_714, %c0_715, %c0_716] : memref<25x8x512xf32, #tpu.memory_space<vmem>>, vector<1x8x512xf32>
    %676 = vector.shape_cast %675 : vector<1x8x512xf32> to vector<8x512xf32>
    %677 = arith.mulf %674, %676 : vector<8x512xf32>
    %c184_717 = arith.constant 184 : index
    %c0_718 = arith.constant 0 : index
    %678 = vector.load %arg8[%c184_717, %c0_718] : memref<200x512xf32, #tpu.memory_space<vmem>>, vector<8x512xf32>
    tpu.vector_store %arg8[%c184_717, %c0_718], %677 {strides = array<i32>} : memref<200x512xf32, #tpu.memory_space<vmem>>, vector<8x512xf32>,
    %c478_i32_719 = arith.constant 478 : i32
    %679 = tpu.dynamic_rotate %562 by %c478_i32_719 dim 1 : vector<8x512xf32>, i32 -> vector<8x512xf32>
    %c24_720 = arith.constant 24 : index
    %c0_721 = arith.constant 0 : index
    %c0_722 = arith.constant 0 : index
    %680 = vector.load %arg6[%c24_720, %c0_721, %c0_722] : memref<25x8x512xf32, #tpu.memory_space<vmem>>, vector<1x8x512xf32>
    %681 = vector.shape_cast %680 : vector<1x8x512xf32> to vector<8x512xf32>
    %682 = arith.mulf %679, %681 : vector<8x512xf32>
    %c192_723 = arith.constant 192 : index
    %c0_724 = arith.constant 0 : index
    %683 = vector.load %arg8[%c192_723, %c0_724] : memref<200x512xf32, #tpu.memory_space<vmem>>, vector<8x512xf32>
    tpu.vector_store %arg8[%c192_723, %c0_724], %682 {strides = array<i32>} : memref<200x512xf32, #tpu.memory_space<vmem>>, vector<8x512xf32>,
    %c4_725 = arith.constant 4 : index
    %c0_726 = arith.constant 0 : index
    %c0_727 = arith.constant 0 : index
    %684 = vector.load %arg3[%c4_725, %c0_726, %c0_727] : memref<6x8x200xf32, #tpu.memory_space<vmem>>, vector<1x8x200xf32>
    %685 = vector.shape_cast %684 : vector<1x8x200xf32> to vector<8x200xf32>
    %c0_728 = arith.constant 0 : index
    %c0_729 = arith.constant 0 : index
    %686 = vector.load %arg8[%c0_728, %c0_729] : memref<200x512xf32, #tpu.memory_space<vmem>>, vector<200x512xf32>
    %cst_730 = arith.constant dense<0.000000e+00> : vector<8x512xf32>
    %687 = tpu.matmul %685, %686, %cst_730 {dimension_numbers = #tpu.dot_dimension_numbers<[1], [0], [0], [1], [0, 0, 1, 1], [], []>} : vector<8x200xf32>, vector<200x512xf32>, vector<8x512xf32> -> vector<8x512xf32>
    %c4_731 = arith.constant 4 : index
    %c0_732 = arith.constant 0 : index
    %c0_733 = arith.constant 0 : index
    %688 = vector.load %arg4[%c4_731, %c0_732, %c0_733] : memref<7x8x1xf32, #tpu.memory_space<vmem>>, vector<1x8x1xf32>
    %689 = vector.shape_cast %688 : vector<1x8x1xf32> to vector<8x1xf32>
    %690 = vector.broadcast %689 : vector<8x1xf32> to vector<8x512xf32>
    %691 = arith.addf %687, %690 : vector<8x512xf32>
    %c4_734 = arith.constant 4 : index
    %692 = memref.load %arg1[%c4_734] : memref<6xf32, #tpu.memory_space<smem>>
    %cst_735 = arith.constant 0.000000e+00 : f32
    %693 = vector.broadcast %cst_735 : f32 to vector<8x512xf32>
    %694 = arith.cmpf oge, %691, %693 : vector<8x512xf32>
    %695 = vector.broadcast %692 : f32 to vector<8x512xf32>
    %696 = arith.mulf %691, %695 : vector<8x512xf32>
    %697 = arith.select %694, %691, %696 : vector<8x512xi1>, vector<8x512xf32>
    %698 = arith.addf %562, %697 : vector<8x512xf32>
    %c0_736 = arith.constant 0 : index
    %c0_737 = arith.constant 0 : index
    %699 = vector.load %arg5[%c0_736, %c0_737] : memref<8x8xf32, #tpu.memory_space<vmem>>, vector<8x8xf32>
    %cst_738 = arith.constant dense<0.000000e+00> : vector<8x512xf32>
    %700 = tpu.matmul %699, %698, %cst_738 {dimension_numbers = #tpu.dot_dimension_numbers<[1], [0], [0], [1], [0, 0, 1, 1], [], []>} : vector<8x8xf32>, vector<8x512xf32>, vector<8x512xf32> -> vector<8x512xf32>
    %c6_739 = arith.constant 6 : index
    %c0_740 = arith.constant 0 : index
    %c0_741 = arith.constant 0 : index
    %701 = vector.load %arg4[%c6_739, %c0_740, %c0_741] : memref<7x8x1xf32, #tpu.memory_space<vmem>>, vector<1x8x1xf32>
    %702 = vector.shape_cast %701 : vector<1x8x1xf32> to vector<8x1xf32>
    %703 = vector.broadcast %702 : vector<8x1xf32> to vector<8x512xf32>
    %704 = arith.addf %700, %703 : vector<8x512xf32>
    %c34_i32_742 = arith.constant 34 : i32
    %705 = tpu.dynamic_rotate %704 by %c34_i32_742 dim 1 : vector<8x512xf32>, i32 -> vector<8x512xf32>
    %c0_743 = arith.constant 0 : index
    %c0_744 = arith.constant 0 : index
    %c0_745 = arith.constant 0 : index
    %706 = vector.load %arg6[%c0_743, %c0_744, %c0_745] : memref<25x8x512xf32, #tpu.memory_space<vmem>>, vector<1x8x512xf32>
    %707 = vector.shape_cast %706 : vector<1x8x512xf32> to vector<8x512xf32>
    %708 = arith.mulf %705, %707 : vector<8x512xf32>
    %c0_746 = arith.constant 0 : index
    %c0_747 = arith.constant 0 : index
    %709 = vector.load %arg8[%c0_746, %c0_747] : memref<200x512xf32, #tpu.memory_space<vmem>>, vector<8x512xf32>
    tpu.vector_store %arg8[%c0_746, %c0_747], %708 {strides = array<i32>} : memref<200x512xf32, #tpu.memory_space<vmem>>, vector<8x512xf32>,
    %c33_i32_748 = arith.constant 33 : i32
    %710 = tpu.dynamic_rotate %704 by %c33_i32_748 dim 1 : vector<8x512xf32>, i32 -> vector<8x512xf32>
    %c1_749 = arith.constant 1 : index
    %c0_750 = arith.constant 0 : index
    %c0_751 = arith.constant 0 : index
    %711 = vector.load %arg6[%c1_749, %c0_750, %c0_751] : memref<25x8x512xf32, #tpu.memory_space<vmem>>, vector<1x8x512xf32>
    %712 = vector.shape_cast %711 : vector<1x8x512xf32> to vector<8x512xf32>
    %713 = arith.mulf %710, %712 : vector<8x512xf32>
    %c8_752 = arith.constant 8 : index
    %c0_753 = arith.constant 0 : index
    %714 = vector.load %arg8[%c8_752, %c0_753] : memref<200x512xf32, #tpu.memory_space<vmem>>, vector<8x512xf32>
    tpu.vector_store %arg8[%c8_752, %c0_753], %713 {strides = array<i32>} : memref<200x512xf32, #tpu.memory_space<vmem>>, vector<8x512xf32>,
    %c32_i32_754 = arith.constant 32 : i32
    %715 = tpu.dynamic_rotate %704 by %c32_i32_754 dim 1 : vector<8x512xf32>, i32 -> vector<8x512xf32>
    %c2_755 = arith.constant 2 : index
    %c0_756 = arith.constant 0 : index
    %c0_757 = arith.constant 0 : index
    %716 = vector.load %arg6[%c2_755, %c0_756, %c0_757] : memref<25x8x512xf32, #tpu.memory_space<vmem>>, vector<1x8x512xf32>
    %717 = vector.shape_cast %716 : vector<1x8x512xf32> to vector<8x512xf32>
    %718 = arith.mulf %715, %717 : vector<8x512xf32>
    %c16_758 = arith.constant 16 : index
    %c0_759 = arith.constant 0 : index
    %719 = vector.load %arg8[%c16_758, %c0_759] : memref<200x512xf32, #tpu.memory_space<vmem>>, vector<8x512xf32>
    tpu.vector_store %arg8[%c16_758, %c0_759], %718 {strides = array<i32>} : memref<200x512xf32, #tpu.memory_space<vmem>>, vector<8x512xf32>,
    %c31_i32_760 = arith.constant 31 : i32
    %720 = tpu.dynamic_rotate %704 by %c31_i32_760 dim 1 : vector<8x512xf32>, i32 -> vector<8x512xf32>
    %c3_761 = arith.constant 3 : index
    %c0_762 = arith.constant 0 : index
    %c0_763 = arith.constant 0 : index
    %721 = vector.load %arg6[%c3_761, %c0_762, %c0_763] : memref<25x8x512xf32, #tpu.memory_space<vmem>>, vector<1x8x512xf32>
    %722 = vector.shape_cast %721 : vector<1x8x512xf32> to vector<8x512xf32>
    %723 = arith.mulf %720, %722 : vector<8x512xf32>
    %c24_764 = arith.constant 24 : index
    %c0_765 = arith.constant 0 : index
    %724 = vector.load %arg8[%c24_764, %c0_765] : memref<200x512xf32, #tpu.memory_space<vmem>>, vector<8x512xf32>
    tpu.vector_store %arg8[%c24_764, %c0_765], %723 {strides = array<i32>} : memref<200x512xf32, #tpu.memory_space<vmem>>, vector<8x512xf32>,
    %c30_i32_766 = arith.constant 30 : i32
    %725 = tpu.dynamic_rotate %704 by %c30_i32_766 dim 1 : vector<8x512xf32>, i32 -> vector<8x512xf32>
    %c4_767 = arith.constant 4 : index
    %c0_768 = arith.constant 0 : index
    %c0_769 = arith.constant 0 : index
    %726 = vector.load %arg6[%c4_767, %c0_768, %c0_769] : memref<25x8x512xf32, #tpu.memory_space<vmem>>, vector<1x8x512xf32>
    %727 = vector.shape_cast %726 : vector<1x8x512xf32> to vector<8x512xf32>
    %728 = arith.mulf %725, %727 : vector<8x512xf32>
    %c32_770 = arith.constant 32 : index
    %c0_771 = arith.constant 0 : index
    %729 = vector.load %arg8[%c32_770, %c0_771] : memref<200x512xf32, #tpu.memory_space<vmem>>, vector<8x512xf32>
    tpu.vector_store %arg8[%c32_770, %c0_771], %728 {strides = array<i32>} : memref<200x512xf32, #tpu.memory_space<vmem>>, vector<8x512xf32>,
    %c18_i32_772 = arith.constant 18 : i32
    %730 = tpu.dynamic_rotate %704 by %c18_i32_772 dim 1 : vector<8x512xf32>, i32 -> vector<8x512xf32>
    %c5_773 = arith.constant 5 : index
    %c0_774 = arith.constant 0 : index
    %c0_775 = arith.constant 0 : index
    %731 = vector.load %arg6[%c5_773, %c0_774, %c0_775] : memref<25x8x512xf32, #tpu.memory_space<vmem>>, vector<1x8x512xf32>
    %732 = vector.shape_cast %731 : vector<1x8x512xf32> to vector<8x512xf32>
    %733 = arith.mulf %730, %732 : vector<8x512xf32>
    %c40_776 = arith.constant 40 : index
    %c0_777 = arith.constant 0 : index
    %734 = vector.load %arg8[%c40_776, %c0_777] : memref<200x512xf32, #tpu.memory_space<vmem>>, vector<8x512xf32>
    tpu.vector_store %arg8[%c40_776, %c0_777], %733 {strides = array<i32>} : memref<200x512xf32, #tpu.memory_space<vmem>>, vector<8x512xf32>,
    %c17_i32_778 = arith.constant 17 : i32
    %735 = tpu.dynamic_rotate %704 by %c17_i32_778 dim 1 : vector<8x512xf32>, i32 -> vector<8x512xf32>
    %c6_779 = arith.constant 6 : index
    %c0_780 = arith.constant 0 : index
    %c0_781 = arith.constant 0 : index
    %736 = vector.load %arg6[%c6_779, %c0_780, %c0_781] : memref<25x8x512xf32, #tpu.memory_space<vmem>>, vector<1x8x512xf32>
    %737 = vector.shape_cast %736 : vector<1x8x512xf32> to vector<8x512xf32>
    %738 = arith.mulf %735, %737 : vector<8x512xf32>
    %c48_782 = arith.constant 48 : index
    %c0_783 = arith.constant 0 : index
    %739 = vector.load %arg8[%c48_782, %c0_783] : memref<200x512xf32, #tpu.memory_space<vmem>>, vector<8x512xf32>
    tpu.vector_store %arg8[%c48_782, %c0_783], %738 {strides = array<i32>} : memref<200x512xf32, #tpu.memory_space<vmem>>, vector<8x512xf32>,
    %c16_i32_784 = arith.constant 16 : i32
    %740 = tpu.dynamic_rotate %704 by %c16_i32_784 dim 1 : vector<8x512xf32>, i32 -> vector<8x512xf32>
    %c7_785 = arith.constant 7 : index
    %c0_786 = arith.constant 0 : index
    %c0_787 = arith.constant 0 : index
    %741 = vector.load %arg6[%c7_785, %c0_786, %c0_787] : memref<25x8x512xf32, #tpu.memory_space<vmem>>, vector<1x8x512xf32>
    %742 = vector.shape_cast %741 : vector<1x8x512xf32> to vector<8x512xf32>
    %743 = arith.mulf %740, %742 : vector<8x512xf32>
    %c56_788 = arith.constant 56 : index
    %c0_789 = arith.constant 0 : index
    %744 = vector.load %arg8[%c56_788, %c0_789] : memref<200x512xf32, #tpu.memory_space<vmem>>, vector<8x512xf32>
    tpu.vector_store %arg8[%c56_788, %c0_789], %743 {strides = array<i32>} : memref<200x512xf32, #tpu.memory_space<vmem>>, vector<8x512xf32>,
    %c15_i32_790 = arith.constant 15 : i32
    %745 = tpu.dynamic_rotate %704 by %c15_i32_790 dim 1 : vector<8x512xf32>, i32 -> vector<8x512xf32>
    %c8_791 = arith.constant 8 : index
    %c0_792 = arith.constant 0 : index
    %c0_793 = arith.constant 0 : index
    %746 = vector.load %arg6[%c8_791, %c0_792, %c0_793] : memref<25x8x512xf32, #tpu.memory_space<vmem>>, vector<1x8x512xf32>
    %747 = vector.shape_cast %746 : vector<1x8x512xf32> to vector<8x512xf32>
    %748 = arith.mulf %745, %747 : vector<8x512xf32>
    %c64_794 = arith.constant 64 : index
    %c0_795 = arith.constant 0 : index
    %749 = vector.load %arg8[%c64_794, %c0_795] : memref<200x512xf32, #tpu.memory_space<vmem>>, vector<8x512xf32>
    tpu.vector_store %arg8[%c64_794, %c0_795], %748 {strides = array<i32>} : memref<200x512xf32, #tpu.memory_space<vmem>>, vector<8x512xf32>,
    %c14_i32_796 = arith.constant 14 : i32
    %750 = tpu.dynamic_rotate %704 by %c14_i32_796 dim 1 : vector<8x512xf32>, i32 -> vector<8x512xf32>
    %c9_797 = arith.constant 9 : index
    %c0_798 = arith.constant 0 : index
    %c0_799 = arith.constant 0 : index
    %751 = vector.load %arg6[%c9_797, %c0_798, %c0_799] : memref<25x8x512xf32, #tpu.memory_space<vmem>>, vector<1x8x512xf32>
    %752 = vector.shape_cast %751 : vector<1x8x512xf32> to vector<8x512xf32>
    %753 = arith.mulf %750, %752 : vector<8x512xf32>
    %c72_800 = arith.constant 72 : index
    %c0_801 = arith.constant 0 : index
    %754 = vector.load %arg8[%c72_800, %c0_801] : memref<200x512xf32, #tpu.memory_space<vmem>>, vector<8x512xf32>
    tpu.vector_store %arg8[%c72_800, %c0_801], %753 {strides = array<i32>} : memref<200x512xf32, #tpu.memory_space<vmem>>, vector<8x512xf32>,
    %c2_i32_802 = arith.constant 2 : i32
    %755 = tpu.dynamic_rotate %704 by %c2_i32_802 dim 1 : vector<8x512xf32>, i32 -> vector<8x512xf32>
    %c10_803 = arith.constant 10 : index
    %c0_804 = arith.constant 0 : index
    %c0_805 = arith.constant 0 : index
    %756 = vector.load %arg6[%c10_803, %c0_804, %c0_805] : memref<25x8x512xf32, #tpu.memory_space<vmem>>, vector<1x8x512xf32>
    %757 = vector.shape_cast %756 : vector<1x8x512xf32> to vector<8x512xf32>
    %758 = arith.mulf %755, %757 : vector<8x512xf32>
    %c80_806 = arith.constant 80 : index
    %c0_807 = arith.constant 0 : index
    %759 = vector.load %arg8[%c80_806, %c0_807] : memref<200x512xf32, #tpu.memory_space<vmem>>, vector<8x512xf32>
    tpu.vector_store %arg8[%c80_806, %c0_807], %758 {strides = array<i32>} : memref<200x512xf32, #tpu.memory_space<vmem>>, vector<8x512xf32>,
    %c1_i32_808 = arith.constant 1 : i32
    %760 = tpu.dynamic_rotate %704 by %c1_i32_808 dim 1 : vector<8x512xf32>, i32 -> vector<8x512xf32>
    %c11_809 = arith.constant 11 : index
    %c0_810 = arith.constant 0 : index
    %c0_811 = arith.constant 0 : index
    %761 = vector.load %arg6[%c11_809, %c0_810, %c0_811] : memref<25x8x512xf32, #tpu.memory_space<vmem>>, vector<1x8x512xf32>
    %762 = vector.shape_cast %761 : vector<1x8x512xf32> to vector<8x512xf32>
    %763 = arith.mulf %760, %762 : vector<8x512xf32>
    %c88_812 = arith.constant 88 : index
    %c0_813 = arith.constant 0 : index
    %764 = vector.load %arg8[%c88_812, %c0_813] : memref<200x512xf32, #tpu.memory_space<vmem>>, vector<8x512xf32>
    tpu.vector_store %arg8[%c88_812, %c0_813], %763 {strides = array<i32>} : memref<200x512xf32, #tpu.memory_space<vmem>>, vector<8x512xf32>,
    %c96_814 = arith.constant 96 : index
    %c0_815 = arith.constant 0 : index
    %765 = vector.load %arg8[%c96_814, %c0_815] : memref<200x512xf32, #tpu.memory_space<vmem>>, vector<8x512xf32>
    tpu.vector_store %arg8[%c96_814, %c0_815], %704 {strides = array<i32>} : memref<200x512xf32, #tpu.memory_space<vmem>>, vector<8x512xf32>,
    %c511_i32_816 = arith.constant 511 : i32
    %766 = tpu.dynamic_rotate %704 by %c511_i32_816 dim 1 : vector<8x512xf32>, i32 -> vector<8x512xf32>
    %c13_817 = arith.constant 13 : index
    %c0_818 = arith.constant 0 : index
    %c0_819 = arith.constant 0 : index
    %767 = vector.load %arg6[%c13_817, %c0_818, %c0_819] : memref<25x8x512xf32, #tpu.memory_space<vmem>>, vector<1x8x512xf32>
    %768 = vector.shape_cast %767 : vector<1x8x512xf32> to vector<8x512xf32>
    %769 = arith.mulf %766, %768 : vector<8x512xf32>
    %c104_820 = arith.constant 104 : index
    %c0_821 = arith.constant 0 : index
    %770 = vector.load %arg8[%c104_820, %c0_821] : memref<200x512xf32, #tpu.memory_space<vmem>>, vector<8x512xf32>
    tpu.vector_store %arg8[%c104_820, %c0_821], %769 {strides = array<i32>} : memref<200x512xf32, #tpu.memory_space<vmem>>, vector<8x512xf32>,
    %c510_i32_822 = arith.constant 510 : i32
    %771 = tpu.dynamic_rotate %704 by %c510_i32_822 dim 1 : vector<8x512xf32>, i32 -> vector<8x512xf32>
    %c14_823 = arith.constant 14 : index
    %c0_824 = arith.constant 0 : index
    %c0_825 = arith.constant 0 : index
    %772 = vector.load %arg6[%c14_823, %c0_824, %c0_825] : memref<25x8x512xf32, #tpu.memory_space<vmem>>, vector<1x8x512xf32>
    %773 = vector.shape_cast %772 : vector<1x8x512xf32> to vector<8x512xf32>
    %774 = arith.mulf %771, %773 : vector<8x512xf32>
    %c112_826 = arith.constant 112 : index
    %c0_827 = arith.constant 0 : index
    %775 = vector.load %arg8[%c112_826, %c0_827] : memref<200x512xf32, #tpu.memory_space<vmem>>, vector<8x512xf32>
    tpu.vector_store %arg8[%c112_826, %c0_827], %774 {strides = array<i32>} : memref<200x512xf32, #tpu.memory_space<vmem>>, vector<8x512xf32>,
    %c498_i32_828 = arith.constant 498 : i32
    %776 = tpu.dynamic_rotate %704 by %c498_i32_828 dim 1 : vector<8x512xf32>, i32 -> vector<8x512xf32>
    %c15_829 = arith.constant 15 : index
    %c0_830 = arith.constant 0 : index
    %c0_831 = arith.constant 0 : index
    %777 = vector.load %arg6[%c15_829, %c0_830, %c0_831] : memref<25x8x512xf32, #tpu.memory_space<vmem>>, vector<1x8x512xf32>
    %778 = vector.shape_cast %777 : vector<1x8x512xf32> to vector<8x512xf32>
    %779 = arith.mulf %776, %778 : vector<8x512xf32>
    %c120_832 = arith.constant 120 : index
    %c0_833 = arith.constant 0 : index
    %780 = vector.load %arg8[%c120_832, %c0_833] : memref<200x512xf32, #tpu.memory_space<vmem>>, vector<8x512xf32>
    tpu.vector_store %arg8[%c120_832, %c0_833], %779 {strides = array<i32>} : memref<200x512xf32, #tpu.memory_space<vmem>>, vector<8x512xf32>,
    %c497_i32_834 = arith.constant 497 : i32
    %781 = tpu.dynamic_rotate %704 by %c497_i32_834 dim 1 : vector<8x512xf32>, i32 -> vector<8x512xf32>
    %c16_835 = arith.constant 16 : index
    %c0_836 = arith.constant 0 : index
    %c0_837 = arith.constant 0 : index
    %782 = vector.load %arg6[%c16_835, %c0_836, %c0_837] : memref<25x8x512xf32, #tpu.memory_space<vmem>>, vector<1x8x512xf32>
    %783 = vector.shape_cast %782 : vector<1x8x512xf32> to vector<8x512xf32>
    %784 = arith.mulf %781, %783 : vector<8x512xf32>
    %c128_838 = arith.constant 128 : index
    %c0_839 = arith.constant 0 : index
    %785 = vector.load %arg8[%c128_838, %c0_839] : memref<200x512xf32, #tpu.memory_space<vmem>>, vector<8x512xf32>
    tpu.vector_store %arg8[%c128_838, %c0_839], %784 {strides = array<i32>} : memref<200x512xf32, #tpu.memory_space<vmem>>, vector<8x512xf32>,
    %c496_i32_840 = arith.constant 496 : i32
    %786 = tpu.dynamic_rotate %704 by %c496_i32_840 dim 1 : vector<8x512xf32>, i32 -> vector<8x512xf32>
    %c17_841 = arith.constant 17 : index
    %c0_842 = arith.constant 0 : index
    %c0_843 = arith.constant 0 : index
    %787 = vector.load %arg6[%c17_841, %c0_842, %c0_843] : memref<25x8x512xf32, #tpu.memory_space<vmem>>, vector<1x8x512xf32>
    %788 = vector.shape_cast %787 : vector<1x8x512xf32> to vector<8x512xf32>
    %789 = arith.mulf %786, %788 : vector<8x512xf32>
    %c136_844 = arith.constant 136 : index
    %c0_845 = arith.constant 0 : index
    %790 = vector.load %arg8[%c136_844, %c0_845] : memref<200x512xf32, #tpu.memory_space<vmem>>, vector<8x512xf32>
    tpu.vector_store %arg8[%c136_844, %c0_845], %789 {strides = array<i32>} : memref<200x512xf32, #tpu.memory_space<vmem>>, vector<8x512xf32>,
    %c495_i32_846 = arith.constant 495 : i32
    %791 = tpu.dynamic_rotate %704 by %c495_i32_846 dim 1 : vector<8x512xf32>, i32 -> vector<8x512xf32>
    %c18_847 = arith.constant 18 : index
    %c0_848 = arith.constant 0 : index
    %c0_849 = arith.constant 0 : index
    %792 = vector.load %arg6[%c18_847, %c0_848, %c0_849] : memref<25x8x512xf32, #tpu.memory_space<vmem>>, vector<1x8x512xf32>
    %793 = vector.shape_cast %792 : vector<1x8x512xf32> to vector<8x512xf32>
    %794 = arith.mulf %791, %793 : vector<8x512xf32>
    %c144_850 = arith.constant 144 : index
    %c0_851 = arith.constant 0 : index
    %795 = vector.load %arg8[%c144_850, %c0_851] : memref<200x512xf32, #tpu.memory_space<vmem>>, vector<8x512xf32>
    tpu.vector_store %arg8[%c144_850, %c0_851], %794 {strides = array<i32>} : memref<200x512xf32, #tpu.memory_space<vmem>>, vector<8x512xf32>,
    %c494_i32_852 = arith.constant 494 : i32
    %796 = tpu.dynamic_rotate %704 by %c494_i32_852 dim 1 : vector<8x512xf32>, i32 -> vector<8x512xf32>
    %c19_853 = arith.constant 19 : index
    %c0_854 = arith.constant 0 : index
    %c0_855 = arith.constant 0 : index
    %797 = vector.load %arg6[%c19_853, %c0_854, %c0_855] : memref<25x8x512xf32, #tpu.memory_space<vmem>>, vector<1x8x512xf32>
    %798 = vector.shape_cast %797 : vector<1x8x512xf32> to vector<8x512xf32>
    %799 = arith.mulf %796, %798 : vector<8x512xf32>
    %c152_856 = arith.constant 152 : index
    %c0_857 = arith.constant 0 : index
    %800 = vector.load %arg8[%c152_856, %c0_857] : memref<200x512xf32, #tpu.memory_space<vmem>>, vector<8x512xf32>
    tpu.vector_store %arg8[%c152_856, %c0_857], %799 {strides = array<i32>} : memref<200x512xf32, #tpu.memory_space<vmem>>, vector<8x512xf32>,
    %c482_i32_858 = arith.constant 482 : i32
    %801 = tpu.dynamic_rotate %704 by %c482_i32_858 dim 1 : vector<8x512xf32>, i32 -> vector<8x512xf32>
    %c20_859 = arith.constant 20 : index
    %c0_860 = arith.constant 0 : index
    %c0_861 = arith.constant 0 : index
    %802 = vector.load %arg6[%c20_859, %c0_860, %c0_861] : memref<25x8x512xf32, #tpu.memory_space<vmem>>, vector<1x8x512xf32>
    %803 = vector.shape_cast %802 : vector<1x8x512xf32> to vector<8x512xf32>
    %804 = arith.mulf %801, %803 : vector<8x512xf32>
    %c160_862 = arith.constant 160 : index
    %c0_863 = arith.constant 0 : index
    %805 = vector.load %arg8[%c160_862, %c0_863] : memref<200x512xf32, #tpu.memory_space<vmem>>, vector<8x512xf32>
    tpu.vector_store %arg8[%c160_862, %c0_863], %804 {strides = array<i32>} : memref<200x512xf32, #tpu.memory_space<vmem>>, vector<8x512xf32>,
    %c481_i32_864 = arith.constant 481 : i32
    %806 = tpu.dynamic_rotate %704 by %c481_i32_864 dim 1 : vector<8x512xf32>, i32 -> vector<8x512xf32>
    %c21_865 = arith.constant 21 : index
    %c0_866 = arith.constant 0 : index
    %c0_867 = arith.constant 0 : index
    %807 = vector.load %arg6[%c21_865, %c0_866, %c0_867] : memref<25x8x512xf32, #tpu.memory_space<vmem>>, vector<1x8x512xf32>
    %808 = vector.shape_cast %807 : vector<1x8x512xf32> to vector<8x512xf32>
    %809 = arith.mulf %806, %808 : vector<8x512xf32>
    %c168_868 = arith.constant 168 : index
    %c0_869 = arith.constant 0 : index
    %810 = vector.load %arg8[%c168_868, %c0_869] : memref<200x512xf32, #tpu.memory_space<vmem>>, vector<8x512xf32>
    tpu.vector_store %arg8[%c168_868, %c0_869], %809 {strides = array<i32>} : memref<200x512xf32, #tpu.memory_space<vmem>>, vector<8x512xf32>,
    %c480_i32_870 = arith.constant 480 : i32
    %811 = tpu.dynamic_rotate %704 by %c480_i32_870 dim 1 : vector<8x512xf32>, i32 -> vector<8x512xf32>
    %c22_871 = arith.constant 22 : index
    %c0_872 = arith.constant 0 : index
    %c0_873 = arith.constant 0 : index
    %812 = vector.load %arg6[%c22_871, %c0_872, %c0_873] : memref<25x8x512xf32, #tpu.memory_space<vmem>>, vector<1x8x512xf32>
    %813 = vector.shape_cast %812 : vector<1x8x512xf32> to vector<8x512xf32>
    %814 = arith.mulf %811, %813 : vector<8x512xf32>
    %c176_874 = arith.constant 176 : index
    %c0_875 = arith.constant 0 : index
    %815 = vector.load %arg8[%c176_874, %c0_875] : memref<200x512xf32, #tpu.memory_space<vmem>>, vector<8x512xf32>
    tpu.vector_store %arg8[%c176_874, %c0_875], %814 {strides = array<i32>} : memref<200x512xf32, #tpu.memory_space<vmem>>, vector<8x512xf32>,
    %c479_i32_876 = arith.constant 479 : i32
    %816 = tpu.dynamic_rotate %704 by %c479_i32_876 dim 1 : vector<8x512xf32>, i32 -> vector<8x512xf32>
    %c23_877 = arith.constant 23 : index
    %c0_878 = arith.constant 0 : index
    %c0_879 = arith.constant 0 : index
    %817 = vector.load %arg6[%c23_877, %c0_878, %c0_879] : memref<25x8x512xf32, #tpu.memory_space<vmem>>, vector<1x8x512xf32>
    %818 = vector.shape_cast %817 : vector<1x8x512xf32> to vector<8x512xf32>
    %819 = arith.mulf %816, %818 : vector<8x512xf32>
    %c184_880 = arith.constant 184 : index
    %c0_881 = arith.constant 0 : index
    %820 = vector.load %arg8[%c184_880, %c0_881] : memref<200x512xf32, #tpu.memory_space<vmem>>, vector<8x512xf32>
    tpu.vector_store %arg8[%c184_880, %c0_881], %819 {strides = array<i32>} : memref<200x512xf32, #tpu.memory_space<vmem>>, vector<8x512xf32>,
    %c478_i32_882 = arith.constant 478 : i32
    %821 = tpu.dynamic_rotate %704 by %c478_i32_882 dim 1 : vector<8x512xf32>, i32 -> vector<8x512xf32>
    %c24_883 = arith.constant 24 : index
    %c0_884 = arith.constant 0 : index
    %c0_885 = arith.constant 0 : index
    %822 = vector.load %arg6[%c24_883, %c0_884, %c0_885] : memref<25x8x512xf32, #tpu.memory_space<vmem>>, vector<1x8x512xf32>
    %823 = vector.shape_cast %822 : vector<1x8x512xf32> to vector<8x512xf32>
    %824 = arith.mulf %821, %823 : vector<8x512xf32>
    %c192_886 = arith.constant 192 : index
    %c0_887 = arith.constant 0 : index
    %825 = vector.load %arg8[%c192_886, %c0_887] : memref<200x512xf32, #tpu.memory_space<vmem>>, vector<8x512xf32>
    tpu.vector_store %arg8[%c192_886, %c0_887], %824 {strides = array<i32>} : memref<200x512xf32, #tpu.memory_space<vmem>>, vector<8x512xf32>,
    %c5_888 = arith.constant 5 : index
    %c0_889 = arith.constant 0 : index
    %c0_890 = arith.constant 0 : index
    %826 = vector.load %arg3[%c5_888, %c0_889, %c0_890] : memref<6x8x200xf32, #tpu.memory_space<vmem>>, vector<1x8x200xf32>
    %827 = vector.shape_cast %826 : vector<1x8x200xf32> to vector<8x200xf32>
    %c0_891 = arith.constant 0 : index
    %c0_892 = arith.constant 0 : index
    %828 = vector.load %arg8[%c0_891, %c0_892] : memref<200x512xf32, #tpu.memory_space<vmem>>, vector<200x512xf32>
    %cst_893 = arith.constant dense<0.000000e+00> : vector<8x512xf32>
    %829 = tpu.matmul %827, %828, %cst_893 {dimension_numbers = #tpu.dot_dimension_numbers<[1], [0], [0], [1], [0, 0, 1, 1], [], []>} : vector<8x200xf32>, vector<200x512xf32>, vector<8x512xf32> -> vector<8x512xf32>
    %c5_894 = arith.constant 5 : index
    %c0_895 = arith.constant 0 : index
    %c0_896 = arith.constant 0 : index
    %830 = vector.load %arg4[%c5_894, %c0_895, %c0_896] : memref<7x8x1xf32, #tpu.memory_space<vmem>>, vector<1x8x1xf32>
    %831 = vector.shape_cast %830 : vector<1x8x1xf32> to vector<8x1xf32>
    %832 = vector.broadcast %831 : vector<8x1xf32> to vector<8x512xf32>
    %833 = arith.addf %829, %832 : vector<8x512xf32>
    %c5_897 = arith.constant 5 : index
    %834 = memref.load %arg1[%c5_897] : memref<6xf32, #tpu.memory_space<smem>>
    %cst_898 = arith.constant 0.000000e+00 : f32
    %835 = vector.broadcast %cst_898 : f32 to vector<8x512xf32>
    %836 = arith.cmpf oge, %833, %835 : vector<8x512xf32>
    %837 = vector.broadcast %834 : f32 to vector<8x512xf32>
    %838 = arith.mulf %833, %837 : vector<8x512xf32>
    %839 = arith.select %836, %833, %838 : vector<8x512xi1>, vector<8x512xf32>
    %840 = arith.addf %1, %839 : vector<8x512xf32>
    %c0_899 = arith.constant 0 : index
    %c0_900 = arith.constant 0 : index
    %c0_901 = arith.constant 0 : index
    %841 = vector.load %arg7[%c0_899, %c0_900, %c0_901] : memref<1x8x512xf32, #tpu.memory_space<vmem>>, vector<1x8x512xf32>
    %842 = vector.shape_cast %841 : vector<1x8x512xf32> to vector<8x512xf32>
    %843 = vector.shape_cast %840 : vector<8x512xf32> to vector<1x8x512xf32>
    tpu.vector_store %arg7[%c0_899, %c0_900, %c0_901], %843 {strides = array<i32>} : memref<1x8x512xf32, #tpu.memory_space<vmem>>, vector<1x8x512xf32>,
    return
  }
  func.func @transform_0(%arg0: i32) -> i32 {
    %c0_i32 = arith.constant 0 : i32
    %c0_i32_0 = arith.constant 0 : i32
    return %c0_i32 : i32
  }
  func.func @transform_1(%arg0: i32) -> (i32, i32, i32) {
    %c0_i32 = arith.constant 0 : i32
    %c0_i32_0 = arith.constant 0 : i32
    %c0_i32_1 = arith.constant 0 : i32
    return %arg0, %c0_i32, %c0_i32_0 : i32, i32, i32
  }
  func.func @transform_2(%arg0: i32) -> (i32, i32, i32) {
    %c0_i32 = arith.constant 0 : i32
    %c0_i32_0 = arith.constant 0 : i32
    %c0_i32_1 = arith.constant 0 : i32
    %c0_i32_2 = arith.constant 0 : i32
    return %c0_i32, %c0_i32_0, %c0_i32_1 : i32, i32, i32
  }
  func.func @transform_3(%arg0: i32) -> (i32, i32, i32) {
    %c0_i32 = arith.constant 0 : i32
    %c0_i32_0 = arith.constant 0 : i32
    %c0_i32_1 = arith.constant 0 : i32
    %c0_i32_2 = arith.constant 0 : i32
    return %c0_i32, %c0_i32_0, %c0_i32_1 : i32, i32, i32
  }
  func.func @transform_4(%arg0: i32) -> (i32, i32) {
    %c0_i32 = arith.constant 0 : i32
    %c0_i32_0 = arith.constant 0 : i32
    %c0_i32_1 = arith.constant 0 : i32
    return %c0_i32, %c0_i32_0 : i32, i32
  }
  func.func @transform_5(%arg0: i32) -> (i32, i32, i32) {
    %c0_i32 = arith.constant 0 : i32
    %c0_i32_0 = arith.constant 0 : i32
    %c0_i32_1 = arith.constant 0 : i32
    %c0_i32_2 = arith.constant 0 : i32
    return %c0_i32, %c0_i32_0, %c0_i32_1 : i32, i32, i32
  }
  func.func @transform_6(%arg0: i32) -> (i32, i32, i32) {
    %c0_i32 = arith.constant 0 : i32
    %c0_i32_0 = arith.constant 0 : i32
    %c0_i32_1 = arith.constant 0 : i32
    return %arg0, %c0_i32, %c0_i32_0 : i32, i32, i32
  }
}

</mosaic_0001>

<bundles_post_ra>
// kernel: local_res_forward.1
= control target key start
LH: loop header
LB: loop body
LE: loop exit
PB: predicated region body
PF: predicated region fallthrough
CT: control target
= control target key end

     0   :  { %s8984_s0 = inlined_call_operand.vmem [shape: f32[6], index: 0, kind: input, shape index: {}]   ;;  %s8985_s1 = inlined_call_operand.vmem [shape: f32[2,8,512], index: 1, kind: input, shape index: {}]   ;;  %s8986_s2 = inlined_call_operand.vmem [shape: f32[6,8,200], index: 2, kind: input, shape index: {}]   ;;  %s8987_s3 = inlined_call_operand.vmem [shape: f32[7,8,1], index: 3, kind: input, shape index: {}]   ;;  %s8988_s4 = inlined_call_operand.vmem [shape: f32[8,8], index: 4, kind: input, shape index: {}]   ;;  %s8989_s5 = inlined_call_operand.hbm [shape: f32[25,8,512], index: 5, kind: input, shape index: {}]   ;;  %s8990_s6 = inlined_call_operand.vmem [shape: f32[2,8,512], index: 6, kind: output, shape index: {}]  }
   0x1   :  { %9060 = sst [smem:[#allocation12_spill]] %s8984_s0 }
   0x2   :  { %9061 = sst [smem:[#allocation13_spill]] %s8985_s1 }
   0x3   :  { %9062 = sst [smem:[#allocation14_spill]] %s8989_s5 }
   0x4   :  { %9063 = sst [smem:[#allocation15_spill]] %s8990_s6 }
   0x5   :  { %11 = vsyncpa [#allocation5], 0 }
   0x6   :  { %12 = vsyncpa [#allocation4], 0  ;;  %s6386_s21 = smov 0  }
   0x7 LB: > { %9064 = sst [smem:[#allocation9_spill]] %s6319_s21  ;;  %s6392_s22 = sadd.s32 4294967295, %s6319_s21   ;;  %s6319_s21 = sphi %s6386_s21, %s18_s21  }
   0x8   : > { %p6142_p0 = scmp.ge.s32.totalorder %s6319_s21, 1  ;;  %p180_p1 = scmp.lt.s32.totalorder %s6319_s21, 3 }
   0x9   : > { %p8991_p2 = scmp.eq.s32.totalorder %s6392_s22, 0  ;;  %s9065_s0 = sld [smem:[#allocation12_spill]] }
   0xa   : > { %p6400_p3 = pnand %p6142_p0, %p180_p1  ;;  %s6321_s27 = smov [#allocation6]  }
   0xb   : > { %s212_s28 = sshll.u32 %s6321_s27, 4  ;;  %s213_s28 = int_to_ptr.vmem [resolvable:$true] %s212_s28 }
   0xc   : > { %s9066_s26 = scalar_select %p6400_p3, 1, 0 }
   0xd   : > { %p6209_p4 = pneg %p6400_p3 }
   0xf   : > { %s193_s25 = sshll.u32 %s9065_s0, 4  ;;  %p6408_p5 = pnand %p8991_p2, %p6209_p4  ;;  %s194_s25 = int_to_ptr.vmem [resolvable:$true] %s193_s25 }
  0x10   : > { %s6264_s30 = scalar_lea.vmem %s194_s25, 16  ;;  %p6272_p10 = scmp.lt.s32.totalorder %s194_s25, %s194_s25 }
  0x11   : > { %p6265_p6 = scmp.ne.s32.totalorder %s194_s25, %s6264_s30  ;;  %p6266_p7 = pneg %p6408_p5 }
  0x12   : > { %p6273_p11 = scmp.lt.s32.totalorder %s6264_s30, %s6264_s30 }
  0x13   : > { %p6267_p8 = pnand %p6266_p7, %p6265_p6 }
  0x14   : > { %p6274_p12 = por %p6273_p11, %p6272_p10 }
  0x15   : > { %p6268_p9 = pneg %p6267_p8 }
  0x17   : > { %p6275_p13 = pnand %p6274_p12, %p6268_p9 }
  0x19   : > { %6278 = shalt.err (!%p6275_p13)
}
  0x1a   : > { %s6322_s7 = smov [#allocation3]   ;;  %s6290_s8 = scalar_lea.vmem %s213_s28, 12800 }
  0x1b   : > { %6212 = dma.vmem_to_smem (!%p6408_p5), %s194_s25, 16, %s6322_s7, [#allocation5]  }
  0x1c   : > { %p6291_p0 = scmp.ne.s32.totalorder %s213_s28, %s6290_s8  ;;  %p6298_p2 = scmp.lt.s32.totalorder %s213_s28, %s213_s28 }
  0x1d   : > { %p6299_p3 = scmp.lt.s32.totalorder %s6290_s8, %s6290_s8 }
  0x1e   : > { %p6293_p1 = pnand %p6291_p0, %p6266_p7 }
  0x1f   : > { %p6300_p6 = por %p6299_p3, %p6298_p2 }
  0x20   : > { %p6294_p4 = pneg %p6293_p1 }
  0x22   : > { %p6301_p8 = pnand %p6300_p6, %p6294_p4 }
  0x24   : > { %6304 = shalt.err (!%p6301_p8)
}
  0x25   : > { %s6323_s9 = smov 512   ;;  %s6324_s10 = smov 32  }
  0x26   : > { %s9068_s5 = sld [smem:[#allocation14_spill]]  ;;  %p9069_p9 = scmp.ne.s32.totalorder %s9066_s26, 0 }
  0x28   : > { %236 = sbr.rel (%p9069_p9) target bundleno = 3911 (0xf47), region = 44 }
  0x2c   : > { %6215 = dma.hbm_to_vmem [thread:$0]  (!%p6408_p5), %s9068_s5, 12800, %s213_s28, [#allocation4], %s6323_s9, %s6323_s9, %s6324_s10  }
  0x2d   : > { %p9070_p10 = scmp.eq.s32.totalorder %s6392_s22, 0 }
  0x2f   : > { %6310 = dma.done.wait (%p9070_p10), [#allocation5], 16   ;;  %p9071_p7 = pmov %p9070_p10 }
  0x31   : > { %6312 = vsyncadd (%p9071_p7), [#allocation5], 4294967280  ;;  %p9072_p2 = pmov %p9071_p7 }
  0x33   : > { %6314 = dma.done.wait (%p9072_p2), [#allocation4], 12800   ;;  %p9073_p3 = pmov %p9072_p2 }
  0x35   : > { %6316 = vsyncadd (%p9073_p3), [#allocation4], 4294954496 }
  0x36   : > { %246 = sfence }
  0x37   : > { %p271_p11 = scmp.lt.s32.totalorder %s6392_s22, 1  ;;  %s9075_s1 = sld [smem:[#allocation13_spill]]  ;;  %v293_v4 = vlaneseq  ;;  %v669_v8 = vld [vmem:[#allocation6 + $0x1e8] sm:$0xff]  ;;  %v671_v9 = vld [vmem:[#allocation6 + $0x1f8] sm:$0xff]  ;;  %v668_v10 = vld [vmem:[#allocation6 + $0x1e0] sm:$0xff]  ;;  %vm1022_vm9 = vcmask 588800  }
  0x38   : > { %s9054_s17 = smov 114   ;;  %s9052_s18 = smov 126   ;;  %v670_v13 = vld [vmem:[#allocation6 + $0x1f0] sm:$0xff]  ;;  %v643_v24 = vld [vmem:[#allocation6 + $0x1c8] sm:$0xff]  ;;  %v645_v25 = vld [vmem:[#allocation6 + $0x1d8] sm:$0xff] }
  0x39   : > { %s9383_s22 = smov (!%p271_p11, %s6392_s22), 1  ;;  %s9050_s19 = smov 127   ;;  %v6571_v5 = vand.u32 127, %v293_v4  ;;  %v644_v26 = vld [vmem:[#allocation6 + $0x1d0] sm:$0xff]  ;;  %v642_v30 = vld [vmem:[#allocation6 + $0x1c0] sm:$0xff]  ;;  %v617_v40 = vld [vmem:[#allocation6 + $0x1a8] sm:$0xff] }
  0x3a   : > { %9074 = sst [smem:[#allocation10_spill]] %s9383_s22  ;;  %s8993_s13 = sshll.u32 %s9383_s22, 5  ;;  %v619_v41 = vld [vmem:[#allocation6 + $0x1b8] sm:$0xff]  ;;  %v618_v42 = vld [vmem:[#allocation6 + $0x1b0] sm:$0xff]  ;;  %v616_v46 = vld [vmem:[#allocation6 + $0x1a0] sm:$0xff] }
  0x3b   : > { %s9048_s20 = smov 1   ;;  %s9046_s23 = smov 2   ;;  %vm662_vm0 = vcmp.lt.s32.totalorder %v6571_v5, 114  ;;  %vm636_vm1 = vcmp.lt.s32.totalorder %v6571_v5, 126  ;;  %vm610_vm2 = vcmp.lt.s32.totalorder %v6571_v5, 127  ;;  %vm580_vm3 = vcmp.lt.s32.totalorder %v6571_v5, 1 }
  0x3c   : > { %s9044_s24 = smov 14   ;;  %s9042_s25 = smov 15   ;;  %v587_v54 = vld [vmem:[#allocation6 + $0x168] sm:$0xff]  ;;  %v586_v59 = vld [vmem:[#allocation6 + $0x160] sm:$0xff]  ;;  %v589_v60 = vld [vmem:[#allocation6 + $0x178] sm:$0xff]  ;;  %vm554_vm4 = vcmp.lt.s32.totalorder %v6571_v5, 2 }
  0x3d   : > { %s6441_s16 = scalar_lea.vmem %s9075_s1, %s8993_s13  ;;  %s9040_s26 = smov 16   ;;  %v588_v61 = vld [vmem:[#allocation6 + $0x170] sm:$0xff]  ;;  %vm528_vm5 = vcmp.lt.s32.totalorder %v6571_v5, 14  ;;  %vm502_vm6 = vcmp.lt.s32.totalorder %v6571_v5, 15  ;;  %vm476_vm7 = vcmp.lt.s32.totalorder %v6571_v5, 16  ;;  %vm450_vm8 = vcmp.lt.s32.totalorder %v6571_v5, 17 }
  0x3e   : > { %9076 = sst [smem:[#allocation11_spill]] %s6441_s16  ;;  %v6444_v0 = vld [vmem:[%s6441_s16 + $0x10] sm:$0xff]  ;;  %v6447_v1 = vld [vmem:[%s6441_s16] sm:$0xff]  ;;  %v6454_v2 = vld [vmem:[%s6441_s16 + $0x18] sm:$0xff]  ;;  %s9038_s27 = smov 17   ;;  %vm424_vm10 = vcmp.lt.s32.totalorder %v6571_v5, 18 }
  0x3f   : > { %658 = vrot.lane.b32.xlu1 %v6444_v0, %s9054_s17  ;;  %654 = vrot.lane.b32.xlu0 %v6447_v1, %s9054_s17  ;;  %v6457_v3 = vld [vmem:[%s6441_s16 + $0x8] sm:$0xff]  ;;  %s9036_s28 = smov 18   ;;  %s9034_s29 = smov 30   ;;  %vm9031_vm11 = vcmp.lt.s32.totalorder %v6571_v5, 30  ;;  %vm9018_vm12 = vcmp.lt.s32.totalorder %v6571_v5, 31  ;;  %vm9017_vm13 = vcmp.lt.s32.totalorder %v6571_v5, 32 }
  0x40   : > { %s9032_s30 = smov 31   ;;  %s9029_s7 = smov 32   ;;  %vm9004_vm14 = vcmp.lt.s32.totalorder %v6571_v5, 33  ;;  %vm9005_vm15 = vcmp.lt.s32.totalorder %v6571_v5, 34 }
  0x41   : > { %s9027_s8 = smov 33   ;;  %s9025_s9 = smov 34  }
  0x42   : > { %s9023_s10 = smov 94   ;;  %s9021_s11 = smov 95  }
  0x43   : > { %660 = vrot.lane.b32.xlu1 %v6454_v2, %s9054_s17  ;;  %656 = vrot.lane.b32.xlu0 %v6457_v3, %s9054_s17  ;;  %s9019_s12 = smov 96   ;;  %s9000_s14 = smov 97  }
  0x44   : > { %s8994_s15 = smov 98   ;;  %s8996_s13 = smov 110  }
  0x45   : > { %s9262_s0 = smov 1   ;;  %s9263_s1 = smov 2  }
  0x46   : > { %s9264_s5 = smov 14   ;;  %s6187_s6 = sld [smem:[#allocation3 + $0x4]] }
  0x47   : > { %630 = vrot.lane.b32.xlu1 %v6457_v3, %s9052_s18  ;;  %628 = vrot.lane.b32.xlu0 %v6447_v1, %s9052_s18 }
  0x4b   : > { %634 = vrot.lane.b32.xlu1 %v6454_v2, %s9052_s18  ;;  %632 = vrot.lane.b32.xlu0 %v6444_v0, %s9052_s18 }
  0x4f   : > { %604 = vrot.lane.b32.xlu1 %v6457_v3, %s9050_s19  ;;  %602 = vrot.lane.b32.xlu0 %v6447_v1, %s9050_s19 }
  0x53   : > { %608 = vrot.lane.b32.xlu1 %v6454_v2, %s9050_s19  ;;  %606 = vrot.lane.b32.xlu0 %v6444_v0, %s9050_s19 }
  0x57   : > { %574 = vrot.lane.b32.xlu1 %v6457_v3, %s9048_s20  ;;  %572 = vrot.lane.b32.xlu0 %v6447_v1, %s9048_s20 }
  0x5b   : > { %578 = vrot.lane.b32.xlu1 %v6454_v2, %s9048_s20  ;;  %576 = vrot.lane.b32.xlu0 %v6444_v0, %s9048_s20 }
  0x5f   : > { %548 = vrot.lane.b32.xlu1 %v6457_v3, %s9046_s23  ;;  %546 = vrot.lane.b32.xlu0 %v6447_v1, %s9046_s23 }
  0x63   : > { %552 = vrot.lane.b32.xlu1 %v6454_v2, %s9046_s23  ;;  %550 = vrot.lane.b32.xlu0 %v6444_v0, %s9046_s23 }
  0x67   : > { %522 = vrot.lane.b32.xlu1 %v6457_v3, %s9044_s24  ;;  %520 = vrot.lane.b32.xlu0 %v6447_v1, %s9044_s24 }
  0x6b   : > { %526 = vrot.lane.b32.xlu1 %v6454_v2, %s9044_s24  ;;  %524 = vrot.lane.b32.xlu0 %v6444_v0, %s9044_s24 }
  0x6f   : > { %496 = vrot.lane.b32.xlu1 %v6457_v3, %s9042_s25  ;;  %494 = vrot.lane.b32.xlu0 %v6447_v1, %s9042_s25 }
  0x73   : > { %500 = vrot.lane.b32.xlu1 %v6454_v2, %s9042_s25  ;;  %498 = vrot.lane.b32.xlu0 %v6444_v0, %s9042_s25 }
  0x77   : > { %470 = vrot.lane.b32.xlu1 %v6457_v3, %s9040_s26  ;;  %468 = vrot.lane.b32.xlu0 %v6447_v1, %s9040_s26 }
  0x7b   : > { %474 = vrot.lane.b32.xlu1 %v6454_v2, %s9040_s26  ;;  %472 = vrot.lane.b32.xlu0 %v6444_v0, %s9040_s26 }
  0x7f   : > { %444 = vrot.lane.b32.xlu1 %v6457_v3, %s9038_s27  ;;  %442 = vrot.lane.b32.xlu0 %v6447_v1, %s9038_s27 }
  0x83   : > { %448 = vrot.lane.b32.xlu1 %v6454_v2, %s9038_s27  ;;  %446 = vrot.lane.b32.xlu0 %v6444_v0, %s9038_s27 }
  0x87   : > { %418 = vrot.lane.b32.xlu1 %v6457_v3, %s9036_s28  ;;  %416 = vrot.lane.b32.xlu0 %v6447_v1, %s9036_s28 }
  0x8b   : > { %422 = vrot.lane.b32.xlu1 %v6454_v2, %s9036_s28  ;;  %420 = vrot.lane.b32.xlu0 %v6444_v0, %s9036_s28 }
  0x8f   : > { %392 = vrot.lane.b32.xlu1 %v6457_v3, %s9034_s29  ;;  %390 = vrot.lane.b32.xlu0 %v6447_v1, %s9034_s29 }
  0x93   : > { %396 = vrot.lane.b32.xlu1 %v6454_v2, %s9034_s29  ;;  %394 = vrot.lane.b32.xlu0 %v6444_v0, %s9034_s29 }
  0x97   : > { %366 = vrot.lane.b32.xlu1 %v6457_v3, %s9032_s30  ;;  %364 = vrot.lane.b32.xlu0 %v6447_v1, %s9032_s30 }
  0x9b   : > { %370 = vrot.lane.b32.xlu1 %v6454_v2, %s9032_s30  ;;  %368 = vrot.lane.b32.xlu0 %v6444_v0, %s9032_s30 }
  0x9f   : > { %340 = vrot.lane.b32.xlu1 %v6457_v3, %s9029_s7  ;;  %338 = vrot.lane.b32.xlu0 %v6447_v1, %s9029_s7 }
  0xa3   : > { %344 = vrot.lane.b32.xlu1 %v6454_v2, %s9029_s7  ;;  %342 = vrot.lane.b32.xlu0 %v6444_v0, %s9029_s7 }
  0xa7   : > { %314 = vrot.lane.b32.xlu1 %v6457_v3, %s9027_s8  ;;  %312 = vrot.lane.b32.xlu0 %v6447_v1, %s9027_s8 }
  0xab   : > { %318 = vrot.lane.b32.xlu1 %v6454_v2, %s9027_s8  ;;  %316 = vrot.lane.b32.xlu0 %v6444_v0, %s9027_s8 }
  0xaf   : > { %287 = vrot.lane.b32.xlu1 %v6457_v3, %s9025_s9  ;;  %285 = vrot.lane.b32.xlu0 %v6447_v1, %s9025_s9 }
  0xb1   : > { %v659_v6 = vpop.permute.xlu1 %658  ;;  %v655_v7 = vpop.permute.xlu0 %654 }
  0xb3   : > { %291 = vrot.lane.b32.xlu1 %v6454_v2, %s9025_s9  ;;  %289 = vrot.lane.b32.xlu0 %v6444_v0, %s9025_s9 }
  0xb5   : > { %v661_v11 = vpop.permute.xlu1 %660  ;;  %v657_v12 = vpop.permute.xlu0 %656 }
  0xb6   : > { %v664_v14 = vsel %vm662_vm0, %v657_v12, %v659_v6  ;;  %v666_v15 = vsel %vm662_vm0, %v661_v11, %v655_v7  ;;  %v665_v16 = vsel %vm662_vm0, %v655_v7, %v657_v12  ;;  %v663_v17 = vsel %vm662_vm0, %v659_v6, %v661_v11  ;;  %v561_v11 = vld [vmem:[#allocation6 + $0x148] sm:$0xff] }
  0xb7   : > { %890 = vrot.lane.b32.xlu1 %v6457_v3, %s9023_s10  ;;  %888 = vrot.lane.b32.xlu0 %v6447_v1, %s9023_s10  ;;  %v673_v18 = vmul.f32 %v669_v8, %v664_v14  ;;  %v675_v19 = vmul.f32 %v671_v9, %v666_v15  ;;  %v672_v20 = vmul.f32 %v668_v10, %v665_v16  ;;  %v560_v16 = vld [vmem:[#allocation6 + $0x140] sm:$0xff] }
  0xb8   : > { %v674_v21 = vmul.f32 %v670_v13, %v663_v17  ;;  %v563_v17 = vld [vmem:[#allocation6 + $0x158] sm:$0xff] }
  0xb9   : > { %v631_v22 = vpop.permute.xlu1 %630  ;;  %1026 = vmatprep.subr.mxu0 %v673_v18  ;;  %1097 = vmatprep.subr.mxu1 %v675_v19  ;;  %v629_v23 = vpop.permute.xlu0 %628  ;;  %v562_v18 = vld [vmem:[#allocation6 + $0x150] sm:$0xff] }
  0xba   : > { %1027 = vmatpush1.msra.mxu0 %v672_v20  ;;  %1098 = vmatpush1.msra.mxu1 %v674_v21  ;;  %v639_v27 = vsel %vm636_vm1, %v629_v23, %v631_v22 }
  0xbb   : > { %894 = vrot.lane.b32.xlu1 %v6454_v2, %s9023_s10  ;;  %892 = vrot.lane.b32.xlu0 %v6444_v0, %s9023_s10  ;;  %v646_v37 = vmul.f32 %v642_v30, %v639_v27  ;;  %v535_v27 = vld [vmem:[#allocation6 + $0x128] sm:$0xff] }
  0xbd   : > { %v635_v28 = vpop.permute.xlu1 %634  ;;  %v633_v29 = vpop.permute.xlu0 %632 }
  0xbe   : > { %v640_v31 = vsel %vm636_vm1, %v635_v28, %v629_v23  ;;  %v637_v32 = vsel %vm636_vm1, %v633_v29, %v635_v28  ;;  %v638_v33 = vsel %vm636_vm1, %v631_v22, %v633_v29 }
  0xbf   : > { %864 = vrot.lane.b32.xlu1 %v6457_v3, %s9021_s11  ;;  %862 = vrot.lane.b32.xlu0 %v6447_v1, %s9021_s11  ;;  %v647_v34 = vmul.f32 %v643_v24, %v638_v33  ;;  %v649_v35 = vmul.f32 %v645_v25, %v640_v31  ;;  %v648_v36 = vmul.f32 %v644_v26, %v637_v32  ;;  %v534_v32 = vld [vmem:[#allocation6 + $0x120] sm:$0xff]  ;;  %v537_v33 = vld [vmem:[#allocation6 + $0x138] sm:$0xff] }
  0xc1   : > { %v605_v38 = vpop.permute.xlu1 %604  ;;  %1028 = vmatprep.subr.mxu0 %v647_v34  ;;  %1099 = vmatprep.subr.mxu1 %v649_v35  ;;  %v603_v39 = vpop.permute.xlu0 %602  ;;  %v536_v34 = vld [vmem:[#allocation6 + $0x130] sm:$0xff] }
  0xc2   : > { %1029 = vmatpush1.msra.mxu0 %v646_v37  ;;  %1100 = vmatpush1.msra.mxu1 %v648_v36  ;;  %v613_v43 = vsel %vm610_vm2, %v603_v39, %v605_v38 }
  0xc3   : > { %868 = vrot.lane.b32.xlu1 %v6454_v2, %s9021_s11  ;;  %866 = vrot.lane.b32.xlu0 %v6444_v0, %s9021_s11  ;;  %v620_v53 = vmul.f32 %v616_v46, %v613_v43  ;;  %v509_v43 = vld [vmem:[#allocation6 + $0x108] sm:$0xff] }
  0xc5   : > { %v609_v44 = vpop.permute.xlu1 %608  ;;  %v607_v45 = vpop.permute.xlu0 %606 }
  0xc6   : > { %v614_v47 = vsel %vm610_vm2, %v609_v44, %v603_v39  ;;  %v611_v48 = vsel %vm610_vm2, %v607_v45, %v609_v44  ;;  %v612_v49 = vsel %vm610_vm2, %v605_v38, %v607_v45 }
  0xc7   : > { %838 = vrot.lane.b32.xlu1 %v6457_v3, %s9019_s12  ;;  %836 = vrot.lane.b32.xlu0 %v6447_v1, %s9019_s12  ;;  %v621_v50 = vmul.f32 %v617_v40, %v612_v49  ;;  %v623_v51 = vmul.f32 %v619_v41, %v614_v47  ;;  %v622_v52 = vmul.f32 %v618_v42, %v611_v48  ;;  %v508_v48 = vld [vmem:[#allocation6 + $0x100] sm:$0xff]  ;;  %v511_v49 = vld [vmem:[#allocation6 + $0x118] sm:$0xff] }
  0xc9   : > { %v575_v55 = vpop.permute.xlu1 %574  ;;  %1030 = vmatprep.subr.mxu0 %v621_v50  ;;  %1101 = vmatprep.subr.mxu1 %v623_v51  ;;  %v573_v56 = vpop.permute.xlu0 %572  ;;  %v510_v50 = vld [vmem:[#allocation6 + $0x110] sm:$0xff] }
  0xca   : > { %v583_v57 = vsel %vm580_vm3, %v573_v56, %v575_v55  ;;  %1031 = vmatpush1.msra.mxu0 %v620_v53  ;;  %1102 = vmatpush1.msra.mxu1 %v622_v52 }
  0xcb   : > { %842 = vrot.lane.b32.xlu1 %v6454_v2, %s9019_s12  ;;  %840 = vrot.lane.b32.xlu0 %v6444_v0, %s9019_s12  ;;  %v591_v58 = vmul.f32 %v587_v54, %v583_v57 }
  0xcc   : > { %1032 = vmatprep.subr.mxu0 %v6457_v3  ;;  %1103 = vmatprep.subr.mxu1 %v6454_v2 }
  0xcd   : > { %1033 = vmatpush1.msra.mxu0 %v6447_v1  ;;  %v579_v62 = vpop.permute.xlu1 %578  ;;  %v577_v63 = vpop.permute.xlu0 %576  ;;  %1104 = vmatpush1.msra.mxu1 %v6444_v0 }
  0xce   : > { %v584_v4 = vsel %vm580_vm3, %v579_v62, %v573_v56  ;;  %1034 = vmatprep.subr.mxu0 %v591_v58  ;;  %v581_v6 = vsel %vm580_vm3, %v577_v63, %v579_v62  ;;  %v582_v7 = vsel %vm580_vm3, %v575_v55, %v577_v63 }
  0xcf   : > { %812 = vrot.lane.b32.xlu1 %v6457_v3, %s9000_s14  ;;  %810 = vrot.lane.b32.xlu0 %v6447_v1, %s9000_s14  ;;  %v590_v8 = vmul.f32 %v586_v59, %v584_v4  ;;  %v593_v9 = vmul.f32 %v589_v60, %v581_v6  ;;  %v592_v10 = vmul.f32 %v588_v61, %v582_v7  ;;  %v483_v59 = vld [vmem:[#allocation6 + $0xe8] sm:$0xff]  ;;  %v482_v4 = vld [vmem:[#allocation6 + $0xe0] sm:$0xff]  ;;  %v485_v6 = vld [vmem:[#allocation6 + $0xf8] sm:$0xff] }
  0xd0   : > { %v484_v7 = vld [vmem:[#allocation6 + $0xf0] sm:$0xff] }
  0xd1   : > { %v549_v12 = vpop.permute.xlu1 %548  ;;  %1035 = vmatpush1.msra.mxu0 %v590_v8  ;;  %1105 = vmatprep.subr.mxu1 %v593_v9  ;;  %v547_v13 = vpop.permute.xlu0 %546 }
  0xd2   : > { %v557_v14 = vsel %vm554_vm4, %v547_v13, %v549_v12  ;;  %1106 = vmatpush1.msra.mxu1 %v592_v10 }
  0xd3   : > { %816 = vrot.lane.b32.xlu1 %v6454_v2, %s9000_s14  ;;  %814 = vrot.lane.b32.xlu0 %v6444_v0, %s9000_s14  ;;  %v565_v15 = vmul.f32 %v561_v11, %v557_v14  ;;  %s9013_s14 = smov 113  }
  0xd5   : > { %v553_v19 = vpop.permute.xlu1 %552  ;;  %1036 = vmatprep.subr.mxu0 %v565_v15  ;;  %v551_v20 = vpop.permute.xlu0 %550 }
  0xd6   : > { %v558_v21 = vsel %vm554_vm4, %v553_v19, %v547_v13  ;;  %v555_v22 = vsel %vm554_vm4, %v551_v20, %v553_v19  ;;  %v556_v23 = vsel %vm554_vm4, %v549_v12, %v551_v20  ;;  %v915_v20 = vld [vmem:[%s8986_s2 + $0x8] sm:$0xff] }
  0xd7   : > { %786 = vrot.lane.b32.xlu1 %v6457_v3, %s8994_s15  ;;  %784 = vrot.lane.b32.xlu0 %v6447_v1, %s8994_s15  ;;  %v564_v24 = vmul.f32 %v560_v16, %v558_v21  ;;  %v567_v25 = vmul.f32 %v563_v17, %v555_v22  ;;  %v566_v26 = vmul.f32 %v562_v18, %v556_v23  ;;  %v457_v16 = vld [vmem:[#allocation6 + $0xc8] sm:$0xff]  ;;  %v456_v22 = vld [vmem:[#allocation6 + $0xc0] sm:$0xff]  ;;  %v459_v23 = vld [vmem:[#allocation6 + $0xd8] sm:$0xff] }
  0xd8   : > { %6153 = vmatprep.mubr.msk.f32.mxu0 %vm1022_vm9, %v915_v20  ;;  %6154 = vmatprep.mubr.msk.f32.mxu1 %vm1022_vm9, %v915_v20  ;;  %v353_v20 = vld [vmem:[#allocation6 + $0x48] sm:$0xff] }
  0xd9   : > { %v523_v28 = vpop.permute.xlu1 %522  ;;  %1037 = vmatpush1.msra.mxu0 %v564_v24  ;;  %1107 = vmatprep.subr.mxu1 %v567_v25  ;;  %v521_v29 = vpop.permute.xlu0 %520  ;;  %v458_v24 = vld [vmem:[#allocation6 + $0xd0] sm:$0xff] }
  0xda   : > { %v531_v30 = vsel %vm528_vm5, %v521_v29, %v523_v28  ;;  %1108 = vmatpush1.msra.mxu1 %v566_v26 }
  0xdb   : > { %790 = vrot.lane.b32.xlu1 %v6454_v2, %s8994_s15  ;;  %788 = vrot.lane.b32.xlu0 %v6444_v0, %s8994_s15  ;;  %v539_v31 = vmul.f32 %v535_v27, %v531_v30  ;;  %s8998_s15 = smov 111   ;;  %v6348_v27 = vmov 0  }
  0xdc   : > { %6258 = vset.pattern.permute.xlu0 %v6348_v27  ;;  %6259 = vset.pattern.permute.xlu1 %v6348_v27  ;;  %v354_v27 = vld [vmem:[#allocation6 + $0x50] sm:$0xff] }
  0xdd   : > { %v527_v35 = vpop.permute.xlu1 %526  ;;  %1038 = vmatprep.subr.mxu0 %v539_v31  ;;  %v525_v36 = vpop.permute.xlu0 %524 }
  0xde   : > { %v532_v37 = vsel %vm528_vm5, %v527_v35, %v521_v29  ;;  %v529_v38 = vsel %vm528_vm5, %v525_v36, %v527_v35  ;;  %v530_v39 = vsel %vm528_vm5, %v523_v28, %v525_v36 }
  0xdf   : > { %760 = vrot.lane.b32.xlu1 %v6457_v3, %s8996_s13  ;;  %758 = vrot.lane.b32.xlu0 %v6447_v1, %s8996_s13  ;;  %v538_v40 = vmul.f32 %v534_v32, %v532_v37  ;;  %v541_v41 = vmul.f32 %v537_v33, %v529_v38  ;;  %v540_v42 = vmul.f32 %v536_v34, %v530_v39  ;;  %v431_v34 = vld [vmem:[#allocation6 + $0xa8] sm:$0xff]  ;;  %v433_v38 = vld [vmem:[#allocation6 + $0xb8] sm:$0xff]  ;;  %v432_v39 = vld [vmem:[#allocation6 + $0xb0] sm:$0xff] }
  0xe1   : > { %v497_v44 = vpop.permute.xlu1 %496  ;;  %1039 = vmatpush1.msra.mxu0 %v538_v40  ;;  %1109 = vmatprep.subr.mxu1 %v541_v41  ;;  %v495_v45 = vpop.permute.xlu0 %494  ;;  %v1016_v40 = vld [vmem:[%s8987_s3] sm:$0xff] }
  0xe2   : > { %v505_v46 = vsel %vm502_vm6, %v495_v45, %v497_v44  ;;  %1110 = vmatpush1.msra.mxu1 %v540_v42 }
  0xe3   : > { %764 = vrot.lane.b32.xlu1 %v6454_v2, %s8996_s13  ;;  %762 = vrot.lane.b32.xlu0 %v6444_v0, %s8996_s13  ;;  %v513_v47 = vmul.f32 %v509_v43, %v505_v46  ;;  %s9002_s13 = smov 112  }
  0xe5   : > { %v501_v51 = vpop.permute.xlu1 %500  ;;  %1040 = vmatprep.subr.mxu0 %v513_v47  ;;  %v499_v52 = vpop.permute.xlu0 %498  ;;  %v405_v47 = vld [vmem:[#allocation6 + $0x88] sm:$0xff] }
  0xe6   : > { %v506_v53 = vsel %vm502_vm6, %v501_v51, %v495_v45  ;;  %v503_v54 = vsel %vm502_vm6, %v499_v52, %v501_v51  ;;  %v504_v55 = vsel %vm502_vm6, %v497_v44, %v499_v52  ;;  %v404_v52 = vld [vmem:[#allocation6 + $0x80] sm:$0xff] }
  0xe7   : > { %734 = vrot.lane.b32.xlu1 %v6457_v3, %s8998_s15  ;;  %732 = vrot.lane.b32.xlu0 %v6447_v1, %s8998_s15  ;;  %v512_v56 = vmul.f32 %v508_v48, %v506_v53  ;;  %v515_v57 = vmul.f32 %v511_v49, %v503_v54  ;;  %v514_v58 = vmul.f32 %v510_v50, %v504_v55  ;;  %v407_v53 = vld [vmem:[#allocation6 + $0x98] sm:$0xff]  ;;  %v406_v54 = vld [vmem:[#allocation6 + $0x90] sm:$0xff] }
  0xe9   : > { %v471_v60 = vpop.permute.xlu1 %470  ;;  %1041 = vmatpush1.msra.mxu0 %v512_v56  ;;  %1111 = vmatprep.subr.mxu1 %v515_v57  ;;  %v469_v61 = vpop.permute.xlu0 %468 }
  0xea   : > { %v479_v62 = vsel %vm476_vm7, %v469_v61, %v471_v60  ;;  %1112 = vmatpush1.msra.mxu1 %v514_v58 }
  0xeb   : > { %738 = vrot.lane.b32.xlu1 %v6454_v2, %s8998_s15  ;;  %736 = vrot.lane.b32.xlu0 %v6444_v0, %s8998_s15  ;;  %v487_v63 = vmul.f32 %v483_v59, %v479_v62  ;;  %s9079_s15 = smov 110  }
  0xed   : > { %v475_v8 = vpop.permute.xlu1 %474  ;;  %1042 = vmatprep.subr.mxu0 %v487_v63  ;;  %v473_v9 = vpop.permute.xlu0 %472  ;;  %v379_v63 = vld [vmem:[#allocation6 + $0x68] sm:$0xff] }
  0xee   : > { %v480_v10 = vsel %vm476_vm7, %v475_v8, %v469_v61  ;;  %v477_v11 = vsel %vm476_vm7, %v473_v9, %v475_v8  ;;  %v478_v12 = vsel %vm476_vm7, %v471_v60, %v473_v9  ;;  %v378_v9 = vld [vmem:[#allocation6 + $0x60] sm:$0xff] }
  0xef   : > { %708 = vrot.lane.b32.xlu1 %v6457_v3, %s9002_s13  ;;  %706 = vrot.lane.b32.xlu0 %v6447_v1, %s9002_s13  ;;  %v486_v13 = vmul.f32 %v482_v4, %v480_v10  ;;  %v489_v14 = vmul.f32 %v485_v6, %v477_v11  ;;  %v488_v15 = vmul.f32 %v484_v7, %v478_v12  ;;  %v381_v10 = vld [vmem:[#allocation6 + $0x78] sm:$0xff]  ;;  %v380_v11 = vld [vmem:[#allocation6 + $0x70] sm:$0xff] }
  0xf1   : > { %v445_v17 = vpop.permute.xlu1 %444  ;;  %1043 = vmatpush1.msra.mxu0 %v486_v13  ;;  %1113 = vmatprep.subr.mxu1 %v489_v14  ;;  %v443_v18 = vpop.permute.xlu0 %442 }
  0xf2   : > { %v453_v19 = vsel %vm450_vm8, %v443_v18, %v445_v17  ;;  %1114 = vmatpush1.msra.mxu1 %v488_v15 }
  0xf3   : > { %712 = vrot.lane.b32.xlu1 %v6454_v2, %s9002_s13  ;;  %710 = vrot.lane.b32.xlu0 %v6444_v0, %s9002_s13  ;;  %v461_v21 = vmul.f32 %v457_v16, %v453_v19  ;;  %s9078_s13 = smov 98  }
  0xf5   : > { %v449_v25 = vpop.permute.xlu1 %448  ;;  %1044 = vmatprep.subr.mxu0 %v461_v21  ;;  %v447_v26 = vpop.permute.xlu0 %446 }
  0xf6   : > { %v454_v28 = vsel %vm450_vm8, %v449_v25, %v443_v18  ;;  %v451_v29 = vsel %vm450_vm8, %v447_v26, %v449_v25  ;;  %v452_v30 = vsel %vm450_vm8, %v445_v17, %v447_v26  ;;  %v352_v25 = vld [vmem:[#allocation6 + $0x40] sm:$0xff]  ;;  %v355_v26 = vld [vmem:[#allocation6 + $0x58] sm:$0xff] }
  0xf7   : > { %682 = vrot.lane.b32.xlu1 %v6457_v3, %s9013_s14  ;;  %680 = vrot.lane.b32.xlu0 %v6447_v1, %s9013_s14  ;;  %v460_v31 = vmul.f32 %v456_v22, %v454_v28  ;;  %v463_v32 = vmul.f32 %v459_v23, %v451_v29  ;;  %v462_v33 = vmul.f32 %v458_v24, %v452_v30  ;;  %v430_v3 = vld [vmem:[#allocation6 + $0xa0] sm:$0xff] }
  0xf9   : > { %v419_v35 = vpop.permute.xlu1 %418  ;;  %1045 = vmatpush1.msra.mxu0 %v460_v31  ;;  %1115 = vmatprep.subr.mxu1 %v463_v32  ;;  %v417_v36 = vpop.permute.xlu0 %416 }
  0xfa   : > { %v427_v37 = vsel %vm424_vm10, %v417_v36, %v419_v35  ;;  %1116 = vmatpush1.msra.mxu1 %v462_v33 }
  0xfb   : > { %686 = vrot.lane.b32.xlu1 %v6454_v2, %s9013_s14  ;;  %684 = vrot.lane.b32.xlu0 %v6444_v0, %s9013_s14  ;;  %v435_v1 = vmul.f32 %v431_v34, %v427_v37  ;;  %s1168_s14 = sld [smem:[#allocation3]] }
  0xfd   : > { %v423_v41 = vpop.permute.xlu1 %422  ;;  %1046 = vmatprep.subr.mxu0 %v435_v1  ;;  %v421_v42 = vpop.permute.xlu0 %420 }
  0xfe   : > { %v428_v43 = vsel %vm424_vm10, %v423_v41, %v417_v36  ;;  %v425_v2 = vsel %vm424_vm10, %v421_v42, %v423_v41  ;;  %v426_v0 = vsel %vm424_vm10, %v419_v35, %v421_v42  ;;  %v327_v36 = vld [vmem:[#allocation6 + $0x28] sm:$0xff]  ;;  %v328_v41 = vld [vmem:[#allocation6 + $0x30] sm:$0xff] }
  0xff   : > { %v434_v44 = vmul.f32 %v430_v3, %v428_v43  ;;  %v437_v45 = vmul.f32 %v433_v38, %v425_v2  ;;  %v436_v46 = vmul.f32 %v432_v39, %v426_v0  ;;  %1019 = vperm.xlu0 %6258, %v1016_v40   ;;  %v326_v39 = vld [vmem:[#allocation6 + $0x20] sm:$0xff]  ;;  %v329_v40 = vld [vmem:[#allocation6 + $0x38] sm:$0xff] }
 0x101   : > { %v393_v48 = vpop.permute.xlu1 %392  ;;  %1047 = vmatpush1.msra.mxu0 %v434_v44  ;;  %1117 = vmatprep.subr.mxu1 %v437_v45  ;;  %v391_v49 = vpop.permute.xlu0 %390 }
 0x102   : > { %v401_v50 = vsel %vm9031_vm11, %v391_v49, %v393_v48  ;;  %1118 = vmatpush1.msra.mxu1 %v436_v46 }
 0x103   : > { %v409_v51 = vmul.f32 %v405_v47, %v401_v50 }
 0x105   : > { %v397_v55 = vpop.permute.xlu1 %396  ;;  %1048 = vmatprep.subr.mxu0 %v409_v51  ;;  %v395_v56 = vpop.permute.xlu0 %394 }
 0x106   : > { %v402_v57 = vsel %vm9031_vm11, %v397_v55, %v391_v49  ;;  %v399_v58 = vsel %vm9031_vm11, %v395_v56, %v397_v55  ;;  %v400_v59 = vsel %vm9031_vm11, %v393_v48, %v395_v56  ;;  %v301_v48 = vld [vmem:[#allocation6 + $0x8] sm:$0xff]  ;;  %v302_v55 = vld [vmem:[#allocation6 + $0x10] sm:$0xff] }
 0x107   : > { %v408_v60 = vmul.f32 %v404_v52, %v402_v57  ;;  %v411_v61 = vmul.f32 %v407_v53, %v399_v58  ;;  %v410_v62 = vmul.f32 %v406_v54, %v400_v59  ;;  %v300_v53 = vld [vmem:[#allocation6] sm:$0xff]  ;;  %v303_v54 = vld [vmem:[#allocation6 + $0x18] sm:$0xff] }
 0x109   : > { %v367_v4 = vpop.permute.xlu1 %366  ;;  %1049 = vmatpush1.msra.mxu0 %v408_v60  ;;  %1119 = vmatprep.subr.mxu1 %v411_v61  ;;  %v365_v6 = vpop.permute.xlu0 %364 }
 0x10a   : > { %v375_v7 = vsel %vm9018_vm12, %v365_v6, %v367_v4  ;;  %1120 = vmatpush1.msra.mxu1 %v410_v62 }
 0x10b   : > { %v383_v8 = vmul.f32 %v379_v63, %v375_v7  ;;  %v903_v7 = vld [vmem:[#allocation6 + $0x308] sm:$0xff] }
 0x10d   : > { %v371_v12 = vpop.permute.xlu1 %370  ;;  %1050 = vmatprep.subr.mxu0 %v383_v8  ;;  %v369_v13 = vpop.permute.xlu0 %368  ;;  %v905_v8 = vld [vmem:[#allocation6 + $0x318] sm:$0xff] }
 0x10e   : > { %v376_v14 = vsel %vm9018_vm12, %v371_v12, %v365_v6  ;;  %v373_v15 = vsel %vm9018_vm12, %v369_v13, %v371_v12  ;;  %v374_v16 = vsel %vm9018_vm12, %v367_v4, %v369_v13  ;;  %v902_v13 = vld [vmem:[#allocation6 + $0x300] sm:$0xff] }
 0x10f   : > { %v382_v17 = vmul.f32 %v378_v9, %v376_v14  ;;  %v385_v18 = vmul.f32 %v381_v10, %v373_v15  ;;  %v384_v19 = vmul.f32 %v380_v11, %v374_v16  ;;  %v904_v9 = vld [vmem:[#allocation6 + $0x310] sm:$0xff] }
 0x111   : > { %v341_v21 = vpop.permute.xlu1 %340  ;;  %1051 = vmatpush1.msra.mxu0 %v382_v17  ;;  %1121 = vmatprep.subr.mxu1 %v385_v18  ;;  %v339_v22 = vpop.permute.xlu0 %338 }
 0x112   : > { %v349_v23 = vsel %vm9017_vm13, %v339_v22, %v341_v21  ;;  %1122 = vmatpush1.msra.mxu1 %v384_v19 }
 0x113   : > { %v357_v24 = vmul.f32 %v353_v20, %v349_v23  ;;  %v877_v23 = vld [vmem:[#allocation6 + $0x2e8] sm:$0xff] }
 0x115   : > { %v345_v28 = vpop.permute.xlu1 %344  ;;  %1052 = vmatprep.subr.mxu0 %v357_v24  ;;  %v343_v29 = vpop.permute.xlu0 %342  ;;  %v879_v24 = vld [vmem:[#allocation6 + $0x2f8] sm:$0xff] }
 0x116   : > { %v350_v30 = vsel %vm9017_vm13, %v345_v28, %v339_v22  ;;  %v347_v31 = vsel %vm9017_vm13, %v343_v29, %v345_v28  ;;  %v348_v32 = vsel %vm9017_vm13, %v341_v21, %v343_v29  ;;  %v876_v29 = vld [vmem:[#allocation6 + $0x2e0] sm:$0xff] }
 0x117   : > { %v356_v33 = vmul.f32 %v352_v25, %v350_v30  ;;  %v359_v34 = vmul.f32 %v355_v26, %v347_v31  ;;  %v358_v35 = vmul.f32 %v354_v27, %v348_v32  ;;  %v878_v25 = vld [vmem:[#allocation6 + $0x2f0] sm:$0xff] }
 0x119   : > { %v315_v37 = vpop.permute.xlu1 %314  ;;  %1053 = vmatpush1.msra.mxu0 %v356_v33  ;;  %1123 = vmatprep.subr.mxu1 %v359_v34  ;;  %v313_v1 = vpop.permute.xlu0 %312 }
 0x11a   : > { %v323_v3 = vsel %vm9004_vm14, %v313_v1, %v315_v37  ;;  %1124 = vmatpush1.msra.mxu1 %v358_v35 }
 0x11b   : > { %v331_v38 = vmul.f32 %v327_v36, %v323_v3  ;;  %v851_v3 = vld [vmem:[#allocation6 + $0x2c8] sm:$0xff] }
 0x11d   : > { %v319_v42 = vpop.permute.xlu1 %318  ;;  %1054 = vmatprep.subr.mxu0 %v331_v38  ;;  %v317_v43 = vpop.permute.xlu0 %316  ;;  %v853_v38 = vld [vmem:[#allocation6 + $0x2d8] sm:$0xff] }
 0x11e   : > { %v324_v2 = vsel %vm9004_vm14, %v319_v42, %v313_v1  ;;  %v321_v0 = vsel %vm9004_vm14, %v317_v43, %v319_v42  ;;  %v322_v44 = vsel %vm9004_vm14, %v315_v37, %v317_v43  ;;  %vm9006_vm14 = vcmp.lt.s32.totalorder %v6571_v5, 94  ;;  %v850_v43 = vld [vmem:[#allocation6 + $0x2c0] sm:$0xff] }
 0x11f   : > { %v330_v45 = vmul.f32 %v326_v39, %v324_v2  ;;  %v333_v46 = vmul.f32 %v329_v40, %v321_v0  ;;  %v332_v47 = vmul.f32 %v328_v41, %v322_v44  ;;  %v852_v39 = vld [vmem:[#allocation6 + $0x2d0] sm:$0xff] }
 0x121   : > { %v288_v49 = vpop.permute.xlu1 %287  ;;  %1055 = vmatpush1.msra.mxu0 %v330_v45  ;;  %1125 = vmatprep.subr.mxu1 %v333_v46  ;;  %v286_v50 = vpop.permute.xlu0 %285 }
 0x122   : > { %v298_v51 = vsel %vm9005_vm15, %v286_v50, %v288_v49  ;;  %1126 = vmatpush1.msra.mxu1 %v332_v47 }
 0x123   : > { %v305_v52 = vmul.f32 %v301_v48, %v298_v51  ;;  %v825_v51 = vld [vmem:[#allocation6 + $0x2a8] sm:$0xff] }
 0x125   : > { %v292_v56 = vpop.permute.xlu1 %291  ;;  %1056 = vmatprep.subr.mxu0 %v305_v52  ;;  %v290_v57 = vpop.permute.xlu0 %289  ;;  %v827_v52 = vld [vmem:[#allocation6 + $0x2b8] sm:$0xff] }
 0x126   : > { %v299_v58 = vsel %vm9005_vm15, %v292_v56, %v286_v50  ;;  %v296_v59 = vsel %vm9005_vm15, %v290_v57, %v292_v56  ;;  %v297_v60 = vsel %vm9005_vm15, %v288_v49, %v290_v57  ;;  %vm9007_vm15 = vcmp.lt.s32.totalorder %v6571_v5, 95  ;;  %v824_v57 = vld [vmem:[#allocation6 + $0x2a0] sm:$0xff] }
 0x127   : > { %v304_v61 = vmul.f32 %v300_v53, %v299_v58  ;;  %v307_v62 = vmul.f32 %v303_v54, %v296_v59  ;;  %v306_v63 = vmul.f32 %v302_v55, %v297_v60  ;;  %v826_v53 = vld [vmem:[#allocation6 + $0x2b0] sm:$0xff] }
 0x129   : > { %v891_v4 = vpop.permute.xlu1 %890  ;;  %1057 = vmatpush1.msra.mxu0 %v304_v61  ;;  %1127 = vmatprep.subr.mxu1 %v307_v62  ;;  %v889_v6 = vpop.permute.xlu0 %888 }
 0x12a   : > { %1128 = vmatpush1.msra.mxu1 %v306_v63  ;;  %v899_v10 = vsel %vm9006_vm14, %v889_v6, %v891_v4 }
 0x12b   : > { %v906_v20 = vmul.f32 %v902_v13, %v899_v10  ;;  %v800_v10 = vld [vmem:[#allocation6 + $0x290] sm:$0xff] }
 0x12d   : > { %v895_v11 = vpop.permute.xlu1 %894  ;;  %v893_v12 = vpop.permute.xlu0 %892 }
 0x12e   : > { %v900_v14 = vsel %vm9006_vm14, %v895_v11, %v889_v6  ;;  %v897_v15 = vsel %vm9006_vm14, %v893_v12, %v895_v11  ;;  %v898_v16 = vsel %vm9006_vm14, %v891_v4, %v893_v12  ;;  %vm9008_vm14 = vcmp.lt.s32.totalorder %v6571_v5, 96 }
 0x12f   : > { %v907_v17 = vmul.f32 %v903_v7, %v898_v16  ;;  %v909_v18 = vmul.f32 %v905_v8, %v900_v14  ;;  %v908_v19 = vmul.f32 %v904_v9, %v897_v15  ;;  %v799_v8 = vld [vmem:[#allocation6 + $0x288] sm:$0xff]  ;;  %v801_v9 = vld [vmem:[#allocation6 + $0x298] sm:$0xff]  ;;  %v798_v14 = vld [vmem:[#allocation6 + $0x280] sm:$0xff] }
 0x131   : > { %v865_v21 = vpop.permute.xlu1 %864  ;;  %1072 = vmatprep.subr.mxu0 %v907_v17  ;;  %1143 = vmatprep.subr.mxu1 %v909_v18  ;;  %v863_v22 = vpop.permute.xlu0 %862 }
 0x132   : > { %1073 = vmatpush2.msra.mxu0 %v906_v20  ;;  %1144 = vmatpush2.msra.mxu1 %v908_v19  ;;  %v873_v26 = vsel %vm9007_vm15, %v863_v22, %v865_v21 }
 0x133   : > { %v880_v36 = vmul.f32 %v876_v29, %v873_v26  ;;  %v774_v26 = vld [vmem:[#allocation6 + $0x270] sm:$0xff] }
 0x135   : > { %v869_v27 = vpop.permute.xlu1 %868  ;;  %v867_v28 = vpop.permute.xlu0 %866 }
 0x136   : > { %v874_v30 = vsel %vm9007_vm15, %v869_v27, %v863_v22  ;;  %v871_v31 = vsel %vm9007_vm15, %v867_v28, %v869_v27  ;;  %v872_v32 = vsel %vm9007_vm15, %v865_v21, %v867_v28  ;;  %vm9009_vm15 = vcmp.lt.s32.totalorder %v6571_v5, 97 }
 0x137   : > { %v881_v33 = vmul.f32 %v877_v23, %v872_v32  ;;  %v883_v34 = vmul.f32 %v879_v24, %v874_v30  ;;  %v882_v35 = vmul.f32 %v878_v25, %v871_v31  ;;  %v773_v24 = vld [vmem:[#allocation6 + $0x268] sm:$0xff]  ;;  %v775_v25 = vld [vmem:[#allocation6 + $0x278] sm:$0xff]  ;;  %v772_v30 = vld [vmem:[#allocation6 + $0x260] sm:$0xff] }
 0x139   : > { %v839_v37 = vpop.permute.xlu1 %838  ;;  %1074 = vmatprep.subr.mxu0 %v881_v33  ;;  %1145 = vmatprep.subr.mxu1 %v883_v34  ;;  %v837_v1 = vpop.permute.xlu0 %836 }
 0x13a   : > { %1075 = vmatpush2.msra.mxu0 %v880_v36  ;;  %1146 = vmatpush2.msra.mxu1 %v882_v35  ;;  %v847_v40 = vsel %vm9008_vm14, %v837_v1, %v839_v37 }
 0x13b   : > { %v854_v48 = vmul.f32 %v850_v43, %v847_v40  ;;  %v748_v40 = vld [vmem:[#allocation6 + $0x250] sm:$0xff] }
 0x13d   : > { %v843_v41 = vpop.permute.xlu1 %842  ;;  %v841_v42 = vpop.permute.xlu0 %840 }
 0x13e   : > { %v848_v2 = vsel %vm9008_vm14, %v843_v41, %v837_v1  ;;  %v845_v0 = vsel %vm9008_vm14, %v841_v42, %v843_v41  ;;  %v846_v44 = vsel %vm9008_vm14, %v839_v37, %v841_v42  ;;  %vm9010_vm14 = vcmp.lt.s32.totalorder %v6571_v5, 98 }
 0x13f   : > { %v855_v45 = vmul.f32 %v851_v3, %v846_v44  ;;  %v857_v46 = vmul.f32 %v853_v38, %v848_v2  ;;  %v856_v47 = vmul.f32 %v852_v39, %v845_v0  ;;  %v747_v38 = vld [vmem:[#allocation6 + $0x248] sm:$0xff]  ;;  %v749_v39 = vld [vmem:[#allocation6 + $0x258] sm:$0xff]  ;;  %v746_v2 = vld [vmem:[#allocation6 + $0x240] sm:$0xff] }
 0x141   : > { %v813_v49 = vpop.permute.xlu1 %812  ;;  %1076 = vmatprep.subr.mxu0 %v855_v45  ;;  %1147 = vmatprep.subr.mxu1 %v857_v46  ;;  %v811_v50 = vpop.permute.xlu0 %810 }
 0x142   : > { %1077 = vmatpush2.msra.mxu0 %v854_v48  ;;  %1148 = vmatpush2.msra.mxu1 %v856_v47  ;;  %v821_v54 = vsel %vm9009_vm15, %v811_v50, %v813_v49 }
 0x143   : > { %v828_v4 = vmul.f32 %v824_v57, %v821_v54  ;;  %v722_v54 = vld [vmem:[#allocation6 + $0x230] sm:$0xff] }
 0x145   : > { %v817_v55 = vpop.permute.xlu1 %816  ;;  %v815_v56 = vpop.permute.xlu0 %814 }
 0x146   : > { %v822_v58 = vsel %vm9009_vm15, %v817_v55, %v811_v50  ;;  %v819_v59 = vsel %vm9009_vm15, %v815_v56, %v817_v55  ;;  %v820_v60 = vsel %vm9009_vm15, %v813_v49, %v815_v56  ;;  %vm9011_vm15 = vcmp.lt.s32.totalorder %v6571_v5, 110 }
 0x147   : > { %v829_v61 = vmul.f32 %v825_v51, %v820_v60  ;;  %v831_v62 = vmul.f32 %v827_v52, %v822_v58  ;;  %v830_v63 = vmul.f32 %v826_v53, %v819_v59  ;;  %v721_v52 = vld [vmem:[#allocation6 + $0x228] sm:$0xff]  ;;  %v723_v53 = vld [vmem:[#allocation6 + $0x238] sm:$0xff]  ;;  %v720_v58 = vld [vmem:[#allocation6 + $0x220] sm:$0xff] }
 0x149   : > { %v787_v6 = vpop.permute.xlu1 %786  ;;  %1078 = vmatprep.subr.mxu0 %v829_v61  ;;  %1149 = vmatprep.subr.mxu1 %v831_v62  ;;  %v785_v7 = vpop.permute.xlu0 %784 }
 0x14a   : > { %1079 = vmatpush2.msra.mxu0 %v828_v4  ;;  %1150 = vmatpush2.msra.mxu1 %v830_v63  ;;  %v795_v11 = vsel %vm9010_vm14, %v785_v7, %v787_v6 }
 0x14b   : > { %v802_v21 = vmul.f32 %v798_v14, %v795_v11  ;;  %v696_v11 = vld [vmem:[#allocation6 + $0x210] sm:$0xff] }
 0x14d   : > { %v791_v12 = vpop.permute.xlu1 %790  ;;  %v789_v13 = vpop.permute.xlu0 %788 }
 0x14e   : > { %v796_v15 = vsel %vm9010_vm14, %v791_v12, %v785_v7  ;;  %v793_v16 = vsel %vm9010_vm14, %v789_v13, %v791_v12  ;;  %v794_v17 = vsel %vm9010_vm14, %v787_v6, %v789_v13  ;;  %vm9012_vm14 = vcmp.lt.s32.totalorder %v6571_v5, 111 }
 0x14f   : > { %v803_v18 = vmul.f32 %v799_v8, %v794_v17  ;;  %v805_v19 = vmul.f32 %v801_v9, %v796_v15  ;;  %v804_v20 = vmul.f32 %v800_v10, %v793_v16  ;;  %v695_v9 = vld [vmem:[#allocation6 + $0x208] sm:$0xff]  ;;  %v697_v10 = vld [vmem:[#allocation6 + $0x218] sm:$0xff]  ;;  %v694_v15 = vld [vmem:[#allocation6 + $0x200] sm:$0xff] }
 0x151   : > { %v761_v22 = vpop.permute.xlu1 %760  ;;  %1080 = vmatprep.subr.mxu0 %v803_v18  ;;  %1151 = vmatprep.subr.mxu1 %v805_v19  ;;  %v759_v23 = vpop.permute.xlu0 %758 }
 0x152   : > { %1081 = vmatpush2.msra.mxu0 %v802_v21  ;;  %1152 = vmatpush2.msra.mxu1 %v804_v20  ;;  %v769_v27 = vsel %vm9011_vm15, %v759_v23, %v761_v22 }
 0x153   : > { %v776_v37 = vmul.f32 %v772_v30, %v769_v27  ;;  %v1173_v27 = vstv %s1168_s14  ;;  %s9077_s14 = smov 97  }
 0x155   : > { %v765_v28 = vpop.permute.xlu1 %764  ;;  %v763_v29 = vpop.permute.xlu0 %762 }
 0x156   : > { %v770_v31 = vsel %vm9011_vm15, %v765_v28, %v759_v23  ;;  %v767_v32 = vsel %vm9011_vm15, %v763_v29, %v765_v28  ;;  %v768_v33 = vsel %vm9011_vm15, %v761_v22, %v763_v29  ;;  %vm9016_vm15 = vcmp.lt.s32.totalorder %v6571_v5, 112  ;;  %v914_v23 = vld [vmem:[%s8986_s2] sm:$0xff] }
 0x157   : > { %v777_v34 = vmul.f32 %v773_v24, %v768_v33  ;;  %v779_v35 = vmul.f32 %v775_v25, %v770_v31  ;;  %v778_v36 = vmul.f32 %v774_v26, %v767_v32 }
 0x159   : > { %v735_v1 = vpop.permute.xlu1 %734  ;;  %1082 = vmatprep.subr.mxu0 %v777_v34  ;;  %1153 = vmatprep.subr.mxu1 %v779_v35  ;;  %v733_v3 = vpop.permute.xlu0 %732 }
 0x15a   : > { %1083 = vmatpush2.msra.mxu0 %v776_v37  ;;  %1154 = vmatpush2.msra.mxu1 %v778_v36  ;;  %v743_v41 = vsel %vm9012_vm14, %v733_v3, %v735_v1 }
 0x15b   : > { %v750_v49 = vmul.f32 %v746_v2, %v743_v41 }
 0x15d   : > { %v739_v42 = vpop.permute.xlu1 %738  ;;  %v737_v43 = vpop.permute.xlu0 %736 }
 0x15e   : > { %v744_v0 = vsel %vm9012_vm14, %v739_v42, %v733_v3  ;;  %v741_v44 = vsel %vm9012_vm14, %v737_v43, %v739_v42  ;;  %v742_v45 = vsel %vm9012_vm14, %v735_v1, %v737_v43  ;;  %vm9015_vm14 = vcmp.lt.s32.totalorder %v6571_v5, 113  ;;  %v1534_v42 = vld [vmem:[#allocation6 + $0x1e0] sm:$0xff]  ;;  %v1535_v43 = vld [vmem:[#allocation6 + $0x1e8] sm:$0xff] }
 0x15f   : > { %v751_v46 = vmul.f32 %v747_v38, %v742_v45  ;;  %v753_v47 = vmul.f32 %v749_v39, %v744_v0  ;;  %v752_v48 = vmul.f32 %v748_v40, %v741_v44 }
 0x161   : > { %v709_v50 = vpop.permute.xlu1 %708  ;;  %1084 = vmatprep.subr.mxu0 %v751_v46  ;;  %1155 = vmatprep.subr.mxu1 %v753_v47  ;;  %v707_v51 = vpop.permute.xlu0 %706 }
 0x162   : > { %1085 = vmatpush2.msra.mxu0 %v750_v49  ;;  %1156 = vmatpush2.msra.mxu1 %v752_v48  ;;  %v717_v55 = vsel %vm9016_vm15, %v707_v51, %v709_v50  ;;  %v1536_v48 = vld [vmem:[#allocation6 + $0x1f0] sm:$0xff]  ;;  %v1537_v49 = vld [vmem:[#allocation6 + $0x1f8] sm:$0xff] }
 0x163   : > { %v724_v6 = vmul.f32 %v720_v58, %v717_v55 }
 0x165   : > { %v713_v56 = vpop.permute.xlu1 %712  ;;  %v711_v57 = vpop.permute.xlu0 %710 }
 0x166   : > { %v718_v59 = vsel %vm9016_vm15, %v713_v56, %v707_v51  ;;  %v715_v60 = vsel %vm9016_vm15, %v711_v57, %v713_v56  ;;  %v716_v61 = vsel %vm9016_vm15, %v709_v50, %v711_v57  ;;  %v1510_v56 = vld [vmem:[#allocation6 + $0x1c0] sm:$0xff]  ;;  %v1511_v57 = vld [vmem:[#allocation6 + $0x1c8] sm:$0xff] }
 0x167   : > { %v725_v62 = vmul.f32 %v721_v52, %v716_v61  ;;  %v727_v63 = vmul.f32 %v723_v53, %v718_v59  ;;  %v726_v4 = vmul.f32 %v722_v54, %v715_v60 }
 0x169   : > { %v683_v7 = vpop.permute.xlu1 %682  ;;  %1086 = vmatprep.subr.mxu0 %v725_v62  ;;  %1157 = vmatprep.subr.mxu1 %v727_v63  ;;  %v681_v8 = vpop.permute.xlu0 %680 }
 0x16a   : > { %1087 = vmatpush2.msra.mxu0 %v724_v6  ;;  %1158 = vmatpush2.msra.mxu1 %v726_v4  ;;  %v691_v12 = vsel %vm9015_vm14, %v681_v8, %v683_v7  ;;  %v1512_v4 = vld [vmem:[#allocation6 + $0x1d0] sm:$0xff]  ;;  %v1513_v6 = vld [vmem:[#allocation6 + $0x1d8] sm:$0xff] }
 0x16b   : > { %v698_v22 = vmul.f32 %v694_v15, %v691_v12 }
 0x16d   : > { %v687_v13 = vpop.permute.xlu1 %686  ;;  %v685_v14 = vpop.permute.xlu0 %684 }
 0x16e   : > { %v692_v16 = vsel %vm9015_vm14, %v687_v13, %v681_v8  ;;  %v689_v17 = vsel %vm9015_vm14, %v685_v14, %v687_v13  ;;  %v690_v18 = vsel %vm9015_vm14, %v683_v7, %v685_v14  ;;  %v1486_v13 = vld [vmem:[#allocation6 + $0x1a0] sm:$0xff]  ;;  %v1487_v14 = vld [vmem:[#allocation6 + $0x1a8] sm:$0xff] }
 0x16f   : > { %v699_v19 = vmul.f32 %v695_v9, %v690_v18  ;;  %v701_v20 = vmul.f32 %v697_v10, %v692_v16  ;;  %v700_v21 = vmul.f32 %v696_v11, %v689_v17 }
 0x171   : > { %1088 = vmatprep.subr.mxu0 %v699_v19  ;;  %1159 = vmatprep.subr.mxu1 %v701_v20 }
 0x172   : > { %1089 = vmatpush2.msra.mxu0 %v698_v22  ;;  %1160 = vmatpush2.msra.mxu1 %v700_v21  ;;  %v1488_v21 = vld [vmem:[#allocation6 + $0x1b0] sm:$0xff]  ;;  %v1489_v22 = vld [vmem:[#allocation6 + $0x1b8] sm:$0xff] }
 0x173   : > { %1091 = vmatmul.mubr.f32.vlgmr.msra.gmra.mxu0 %v914_v23  ;;  %1162 = vmatmul.mubr.f32.vlgmr.msra.gmra.mxu1 %v914_v23 }
 0x17a   : > { %v1020_v24 = vpop.permute.xlu0 %1019 }
 0x233   : > { %v1092_v25 = vpop.f32.mrf.mxu0  ;;  %v1163_v26 = vpop.f32.mrf.mxu1 }
 0x234   : > { %v1093_v28 = vadd.f32 %v1092_v25, %v1020_v24  ;;  %v1164_v29 = vadd.f32 %v1163_v26, %v1020_v24 }
 0x235   : > { %v1094_v30 = vpop.f32.mrf.mxu0  ;;  %v1165_v31 = vpop.f32.mrf.mxu1 }
 0x236   : > { %vm1169_vm14 = vcmp.ge.f32.partialorder %v1093_v28, 0.0  ;;  %vm1171_vm15 = vcmp.ge.f32.partialorder %v1164_v29, 0.0  ;;  %v1095_v32 = vadd.f32 %v1094_v30, %v1020_v24  ;;  %v1174_v33 = vmul.f32 %v1173_v27, %v1093_v28 }
 0x237   : > { %v1176_v34 = vmul.f32 %v1173_v27, %v1164_v29  ;;  %v1166_v37 = vadd.f32 %v1165_v31, %v1020_v24 }
 0x238   : > { %v1175_v35 = vmul.f32 %v1173_v27, %v1095_v32  ;;  %v6880_v36 = vsel %vm1169_vm14, %v1093_v28, %v1174_v33  ;;  %vm1170_vm13 = vcmp.ge.f32.partialorder %v1095_v32, 0.0 }
 0x239   : > { %v6882_v1 = vsel %vm1171_vm15, %v1164_v29, %v1176_v34  ;;  %1522 = vrot.lane.b32.xlu1 %v6880_v36, %s9054_s17  ;;  %v1177_v38 = vmul.f32 %v1173_v27, %v1166_v37  ;;  %vm1172_vm12 = vcmp.ge.f32.partialorder %v1166_v37, 0.0  ;;  %v1459_v29 = vld [vmem:[#allocation6 + $0x168] sm:$0xff]  ;;  %v1458_v34 = vld [vmem:[#allocation6 + $0x160] sm:$0xff] }
 0x23a   : > { %1526 = vrot.lane.b32.xlu0 %v6882_v1, %s9054_s17  ;;  %v6888_v3 = vsel %vm1170_vm13, %v1095_v32, %v1175_v35  ;;  %v1461_v35 = vld [vmem:[#allocation6 + $0x178] sm:$0xff] }
 0x23b   : > { %v6894_v39 = vsel %vm1172_vm12, %v1166_v37, %v1177_v38  ;;  %v1460_v37 = vld [vmem:[#allocation6 + $0x170] sm:$0xff]  ;;  %vm9083_vm12 = vcmp.lt.s32.totalorder %v6571_v5, 31 }
 0x23c   : > { %vm9084_vm13 = vmmov %vm9083_vm12 }
 0x23d   : > { %1524 = vrot.lane.b32.xlu1 %v6888_v3, %s9054_s17  ;;  %vm9085_vm14 = vmmov %vm9083_vm12 }
 0x23e   : > { %1498 = vrot.lane.b32.xlu0 %v6880_v36, %s9052_s18  ;;  %vm9086_vm15 = vmmov %vm9083_vm12 }
 0x241   : > { %1528 = vrot.lane.b32.xlu1 %v6894_v39, %s9054_s17 }
 0x242   : > { %1502 = vrot.lane.b32.xlu0 %v6882_v1, %s9052_s18 }
 0x245   : > { %1500 = vrot.lane.b32.xlu1 %v6888_v3, %s9052_s18 }
 0x246   : > { %1474 = vrot.lane.b32.xlu0 %v6880_v36, %s9050_s19 }
 0x249   : > { %1504 = vrot.lane.b32.xlu1 %v6894_v39, %s9052_s18 }
 0x24a   : > { %1478 = vrot.lane.b32.xlu0 %v6882_v1, %s9050_s19 }
 0x24d   : > { %1476 = vrot.lane.b32.xlu1 %v6888_v3, %s9050_s19 }
 0x24e   : > { %1446 = vrot.lane.b32.xlu0 %v6880_v36, %s9048_s20 }
 0x251   : > { %1480 = vrot.lane.b32.xlu1 %v6894_v39, %s9050_s19 }
 0x252   : > { %1450 = vrot.lane.b32.xlu0 %v6882_v1, %s9048_s20 }
 0x255   : > { %1448 = vrot.lane.b32.xlu1 %v6888_v3, %s9048_s20 }
 0x256   : > { %1422 = vrot.lane.b32.xlu0 %v6880_v36, %s9046_s23 }
 0x259   : > { %1452 = vrot.lane.b32.xlu1 %v6894_v39, %s9048_s20 }
 0x25a   : > { %1426 = vrot.lane.b32.xlu0 %v6882_v1, %s9046_s23 }
 0x25d   : > { %1424 = vrot.lane.b32.xlu1 %v6888_v3, %s9046_s23 }
 0x25e   : > { %1398 = vrot.lane.b32.xlu0 %v6880_v36, %s9044_s24 }
 0x261   : > { %1428 = vrot.lane.b32.xlu1 %v6894_v39, %s9046_s23 }
 0x262   : > { %1402 = vrot.lane.b32.xlu0 %v6882_v1, %s9044_s24 }
 0x265   : > { %1400 = vrot.lane.b32.xlu1 %v6888_v3, %s9044_s24 }
 0x266   : > { %1374 = vrot.lane.b32.xlu0 %v6880_v36, %s9042_s25 }
 0x269   : > { %1404 = vrot.lane.b32.xlu1 %v6894_v39, %s9044_s24 }
 0x26a   : > { %1378 = vrot.lane.b32.xlu0 %v6882_v1, %s9042_s25 }
 0x26d   : > { %1376 = vrot.lane.b32.xlu1 %v6888_v3, %s9042_s25 }
 0x26e   : > { %1350 = vrot.lane.b32.xlu0 %v6880_v36, %s9040_s26 }
 0x271   : > { %1380 = vrot.lane.b32.xlu1 %v6894_v39, %s9042_s25 }
 0x272   : > { %1354 = vrot.lane.b32.xlu0 %v6882_v1, %s9040_s26 }
 0x275   : > { %1352 = vrot.lane.b32.xlu1 %v6888_v3, %s9040_s26 }
 0x276   : > { %1326 = vrot.lane.b32.xlu0 %v6880_v36, %s9038_s27 }
 0x279   : > { %1356 = vrot.lane.b32.xlu1 %v6894_v39, %s9040_s26 }
 0x27a   : > { %1330 = vrot.lane.b32.xlu0 %v6882_v1, %s9038_s27 }
 0x27d   : > { %1328 = vrot.lane.b32.xlu1 %v6888_v3, %s9038_s27 }
 0x27e   : > { %1302 = vrot.lane.b32.xlu0 %v6880_v36, %s9036_s28 }
 0x281   : > { %1332 = vrot.lane.b32.xlu1 %v6894_v39, %s9038_s27 }
 0x282   : > { %1306 = vrot.lane.b32.xlu0 %v6882_v1, %s9036_s28 }
 0x285   : > { %1304 = vrot.lane.b32.xlu1 %v6888_v3, %s9036_s28 }
 0x286   : > { %1278 = vrot.lane.b32.xlu0 %v6880_v36, %s9034_s29 }
 0x289   : > { %1308 = vrot.lane.b32.xlu1 %v6894_v39, %s9036_s28 }
 0x28a   : > { %1282 = vrot.lane.b32.xlu0 %v6882_v1, %s9034_s29 }
 0x28d   : > { %1280 = vrot.lane.b32.xlu1 %v6888_v3, %s9034_s29 }
 0x28e   : > { %1254 = vrot.lane.b32.xlu0 %v6880_v36, %s9032_s30 }
 0x291   : > { %1284 = vrot.lane.b32.xlu1 %v6894_v39, %s9034_s29 }
 0x292   : > { %1258 = vrot.lane.b32.xlu0 %v6882_v1, %s9032_s30 }
 0x295   : > { %1256 = vrot.lane.b32.xlu1 %v6888_v3, %s9032_s30 }
 0x296   : > { %1230 = vrot.lane.b32.xlu0 %v6880_v36, %s9029_s7 }
 0x299   : > { %1260 = vrot.lane.b32.xlu1 %v6894_v39, %s9032_s30 }
 0x29a   : > { %1234 = vrot.lane.b32.xlu0 %v6882_v1, %s9029_s7 }
 0x29d   : > { %1232 = vrot.lane.b32.xlu1 %v6888_v3, %s9029_s7 }
 0x29e   : > { %1206 = vrot.lane.b32.xlu0 %v6880_v36, %s9027_s8 }
 0x2a1   : > { %1236 = vrot.lane.b32.xlu1 %v6894_v39, %s9029_s7  ;;  %s6160_s7 = sld [smem:[#allocation3 + $0x1]] }
 0x2a2   : > { %1210 = vrot.lane.b32.xlu0 %v6882_v1, %s9027_s8 }
 0x2a5   : > { %1208 = vrot.lane.b32.xlu1 %v6888_v3, %s9027_s8 }
 0x2a6   : > { %1182 = vrot.lane.b32.xlu0 %v6880_v36, %s9025_s9 }
 0x2a9   : > { %1212 = vrot.lane.b32.xlu1 %v6894_v39, %s9027_s8  ;;  %s9082_s8 = smov 113  }
 0x2aa   : > { %1186 = vrot.lane.b32.xlu0 %v6882_v1, %s9025_s9 }
 0x2ab   : > { %v1523_v40 = vpop.permute.xlu1 %1522 }
 0x2ac   : > { %v1527_v41 = vpop.permute.xlu0 %1526 }
 0x2ad   : > { %1184 = vrot.lane.b32.xlu1 %v6888_v3, %s9025_s9 }
 0x2ae   : > { %1738 = vrot.lane.b32.xlu0 %v6880_v36, %s9023_s10 }
 0x2af   : > { %v1525_v2 = vpop.permute.xlu1 %1524 }
 0x2b0   : > { %v1499_v0 = vpop.permute.xlu0 %1498  ;;  %v1531_v44 = vsel %vm662_vm0, %v1525_v2, %v1527_v41  ;;  %v1532_v45 = vsel %vm662_vm0, %v1523_v40, %v1525_v2 }
 0x2b1   : > { %v1538_v46 = vmul.f32 %v1534_v42, %v1532_v45  ;;  %1188 = vrot.lane.b32.xlu1 %v6894_v39, %s9025_s9  ;;  %v1539_v47 = vmul.f32 %v1535_v43, %v1531_v44  ;;  %v1435_v45 = vld [vmem:[#allocation6 + $0x148] sm:$0xff]  ;;  %s9137_s9 = smov 34  }
 0x2b2   : > { %1742 = vrot.lane.b32.xlu0 %v6882_v1, %s9023_s10 }
 0x2b3   : > { %1875 = vmatprep.subr.mxu0 %v1539_v47  ;;  %v1529_v50 = vpop.permute.xlu1 %1528 }
 0x2b4   : > { %v1503_v51 = vpop.permute.xlu0 %1502  ;;  %v1530_v52 = vsel %vm662_vm0, %v1527_v41, %v1529_v50  ;;  %v1533_v53 = vsel %vm662_vm0, %v1529_v50, %v1523_v40  ;;  %1876 = vmatpush1.msra.mxu0 %v1538_v46  ;;  %v1434_v50 = vld [vmem:[#allocation6 + $0x140] sm:$0xff] }
 0x2b5   : > { %v1540_v54 = vmul.f32 %v1536_v48, %v1530_v52  ;;  %1740 = vrot.lane.b32.xlu1 %v6888_v3, %s9023_s10  ;;  %v1541_v55 = vmul.f32 %v1537_v49, %v1533_v53  ;;  %v1436_v52 = vld [vmem:[#allocation6 + $0x150] sm:$0xff] }
 0x2b6   : > { %1714 = vrot.lane.b32.xlu0 %v6880_v36, %s9021_s11 }
 0x2b7   : > { %1946 = vmatprep.subr.mxu1 %v1541_v55  ;;  %v1501_v58 = vpop.permute.xlu1 %1500 }
 0x2b8   : > { %v1475_v59 = vpop.permute.xlu0 %1474  ;;  %v1507_v60 = vsel %vm636_vm1, %v1501_v58, %v1503_v51  ;;  %v1508_v61 = vsel %vm636_vm1, %v1499_v0, %v1501_v58  ;;  %1947 = vmatpush1.msra.mxu1 %v1540_v54 }
 0x2b9   : > { %v1514_v62 = vmul.f32 %v1510_v56, %v1508_v61  ;;  %1744 = vrot.lane.b32.xlu1 %v6894_v39, %s9023_s10  ;;  %v1515_v63 = vmul.f32 %v1511_v57, %v1507_v60  ;;  %v1411_v61 = vld [vmem:[#allocation6 + $0x128] sm:$0xff]  ;;  %s9135_s10 = smov 32  }
 0x2ba   : > { %1718 = vrot.lane.b32.xlu0 %v6882_v1, %s9021_s11 }
 0x2bb   : > { %1877 = vmatprep.subr.mxu0 %v1515_v63  ;;  %v1505_v7 = vpop.permute.xlu1 %1504 }
 0x2bc   : > { %v1479_v8 = vpop.permute.xlu0 %1478  ;;  %v1506_v9 = vsel %vm636_vm1, %v1503_v51, %v1505_v7  ;;  %v1509_v10 = vsel %vm636_vm1, %v1505_v7, %v1499_v0  ;;  %1878 = vmatpush1.msra.mxu0 %v1514_v62  ;;  %v1437_v51 = vld [vmem:[#allocation6 + $0x158] sm:$0xff]  ;;  %v1410_v7 = vld [vmem:[#allocation6 + $0x120] sm:$0xff] }
 0x2bd   : > { %v1516_v11 = vmul.f32 %v1512_v4, %v1506_v9  ;;  %1716 = vrot.lane.b32.xlu1 %v6888_v3, %s9021_s11  ;;  %v1517_v12 = vmul.f32 %v1513_v6, %v1509_v10  ;;  %v1412_v9 = vld [vmem:[#allocation6 + $0x130] sm:$0xff] }
 0x2be   : > { %1690 = vrot.lane.b32.xlu0 %v6880_v36, %s9019_s12 }
 0x2bf   : > { %1948 = vmatprep.subr.mxu1 %v1517_v12  ;;  %v1477_v15 = vpop.permute.xlu1 %1476 }
 0x2c0   : > { %v1447_v16 = vpop.permute.xlu0 %1446  ;;  %v1483_v17 = vsel %vm610_vm2, %v1477_v15, %v1479_v8  ;;  %v1484_v18 = vsel %vm610_vm2, %v1475_v59, %v1477_v15  ;;  %1949 = vmatpush1.msra.mxu1 %v1516_v11 }
 0x2c1   : > { %v1490_v19 = vmul.f32 %v1486_v13, %v1484_v18  ;;  %1720 = vrot.lane.b32.xlu1 %v6894_v39, %s9021_s11  ;;  %v1491_v20 = vmul.f32 %v1487_v14, %v1483_v17  ;;  %v1387_v18 = vld [vmem:[#allocation6 + $0x108] sm:$0xff]  ;;  %s9081_s11 = smov 112  }
 0x2c2   : > { %1694 = vrot.lane.b32.xlu0 %v6882_v1, %s9019_s12 }
 0x2c3   : > { %1879 = vmatprep.subr.mxu0 %v1491_v20  ;;  %v1481_v23 = vpop.permute.xlu1 %1480 }
 0x2c4   : > { %v1451_v24 = vpop.permute.xlu0 %1450  ;;  %v1482_v25 = vsel %vm610_vm2, %v1479_v8, %v1481_v23  ;;  %v1485_v26 = vsel %vm610_vm2, %v1481_v23, %v1475_v59  ;;  %1880 = vmatpush1.msra.mxu0 %v1490_v19  ;;  %v1413_v8 = vld [vmem:[#allocation6 + $0x138] sm:$0xff]  ;;  %v1386_v23 = vld [vmem:[#allocation6 + $0x100] sm:$0xff] }
 0x2c5   : > { %v1492_v27 = vmul.f32 %v1488_v21, %v1482_v25  ;;  %1692 = vrot.lane.b32.xlu1 %v6888_v3, %s9019_s12  ;;  %1881 = vmatprep.subr.mxu0 %v6888_v3  ;;  %v1493_v28 = vmul.f32 %v1489_v22, %v1485_v26  ;;  %v1388_v25 = vld [vmem:[#allocation6 + $0x110] sm:$0xff] }
 0x2c6   : > { %1666 = vrot.lane.b32.xlu0 %v6880_v36, %s9077_s14  ;;  %1882 = vmatpush1.msra.mxu0 %v6880_v36 }
 0x2c7   : > { %1950 = vmatprep.subr.mxu1 %v1493_v28  ;;  %v1449_v30 = vpop.permute.xlu1 %1448 }
 0x2c8   : > { %v1423_v31 = vpop.permute.xlu0 %1422  ;;  %v1456_v32 = vsel %vm580_vm3, %v1447_v16, %v1449_v30  ;;  %1951 = vmatpush1.msra.mxu1 %v1492_v27  ;;  %v1455_v38 = vsel %vm580_vm3, %v1449_v30, %v1451_v24 }
 0x2c9   : > { %1696 = vrot.lane.b32.xlu1 %v6894_v39, %s9019_s12  ;;  %1952 = vmatprep.subr.mxu1 %v6894_v39  ;;  %v1463_v33 = vmul.f32 %v1459_v29, %v1456_v32  ;;  %v1464_v44 = vmul.f32 %v1460_v37, %v1455_v38  ;;  %s9080_s12 = smov 111  }
 0x2ca   : > { %1670 = vrot.lane.b32.xlu0 %v6882_v1, %s9077_s14  ;;  %1953 = vmatpush1.msra.mxu1 %v6882_v1 }
 0x2cb   : > { %1883 = vmatprep.subr.mxu0 %v1463_v33  ;;  %v1453_v40 = vpop.permute.xlu1 %1452 }
 0x2cc   : > { %v1427_v41 = vpop.permute.xlu0 %1426  ;;  %v1454_v42 = vsel %vm580_vm3, %v1451_v24, %v1453_v40  ;;  %v1457_v43 = vsel %vm580_vm3, %v1453_v40, %v1447_v16  ;;  %v1389_v24 = vld [vmem:[#allocation6 + $0x118] sm:$0xff] }
 0x2cd   : > { %v1462_v2 = vmul.f32 %v1458_v34, %v1457_v43  ;;  %1668 = vrot.lane.b32.xlu1 %v6888_v3, %s9077_s14  ;;  %v1465_v0 = vmul.f32 %v1461_v35, %v1454_v42  ;;  %v1363_v34 = vld [vmem:[#allocation6 + $0xe8] sm:$0xff]  ;;  %v1365_v42 = vld [vmem:[#allocation6 + $0xf8] sm:$0xff]  ;;  %v1364_v43 = vld [vmem:[#allocation6 + $0xf0] sm:$0xff] }
 0x2ce   : > { %1642 = vrot.lane.b32.xlu0 %v6880_v36, %s9078_s13 }
 0x2cf   : > { %1884 = vmatpush1.msra.mxu0 %v1462_v2  ;;  %1954 = vmatprep.subr.mxu1 %v1465_v0  ;;  %v1425_v46 = vpop.permute.xlu1 %1424 }
 0x2d0   : > { %v1399_v47 = vpop.permute.xlu0 %1398  ;;  %v1432_v48 = vsel %vm554_vm4, %v1423_v31, %v1425_v46  ;;  %1955 = vmatpush1.msra.mxu1 %v1464_v44  ;;  %v1431_v53 = vsel %vm554_vm4, %v1425_v46, %v1427_v41 }
 0x2d1   : > { %1672 = vrot.lane.b32.xlu1 %v6894_v39, %s9077_s14  ;;  %v1439_v49 = vmul.f32 %v1435_v45, %v1432_v48  ;;  %v1440_v60 = vmul.f32 %v1436_v52, %v1431_v53 }
 0x2d2   : > { %1646 = vrot.lane.b32.xlu0 %v6882_v1, %s9078_s13 }
 0x2d3   : > { %1885 = vmatprep.subr.mxu0 %v1439_v49  ;;  %v1429_v54 = vpop.permute.xlu1 %1428 }
 0x2d4   : > { %v1403_v55 = vpop.permute.xlu0 %1402  ;;  %v1430_v56 = vsel %vm554_vm4, %v1427_v41, %v1429_v54  ;;  %v1433_v57 = vsel %vm554_vm4, %v1429_v54, %v1423_v31  ;;  %v1362_v41 = vld [vmem:[#allocation6 + $0xe0] sm:$0xff] }
 0x2d5   : > { %v1438_v58 = vmul.f32 %v1434_v50, %v1433_v57  ;;  %1644 = vrot.lane.b32.xlu1 %v6888_v3, %s9078_s13  ;;  %v1441_v59 = vmul.f32 %v1437_v51, %v1430_v56  ;;  %v1339_v51 = vld [vmem:[#allocation6 + $0xc8] sm:$0xff]  ;;  %v1338_v56 = vld [vmem:[#allocation6 + $0xc0] sm:$0xff]  ;;  %v1341_v57 = vld [vmem:[#allocation6 + $0xd8] sm:$0xff] }
 0x2d6   : > { %1618 = vrot.lane.b32.xlu0 %v6880_v36, %s9079_s15 }
 0x2d7   : > { %1886 = vmatpush1.msra.mxu0 %v1438_v58  ;;  %1956 = vmatprep.subr.mxu1 %v1441_v59  ;;  %v1401_v62 = vpop.permute.xlu1 %1400  ;;  %v1340_v58 = vld [vmem:[#allocation6 + $0xd0] sm:$0xff] }
 0x2d8   : > { %v1375_v63 = vpop.permute.xlu0 %1374  ;;  %v1408_v4 = vsel %vm528_vm5, %v1399_v47, %v1401_v62  ;;  %1957 = vmatpush1.msra.mxu1 %v1440_v60  ;;  %v1407_v10 = vsel %vm528_vm5, %v1401_v62, %v1403_v55 }
 0x2d9   : > { %1648 = vrot.lane.b32.xlu1 %v6894_v39, %s9078_s13  ;;  %v1415_v6 = vmul.f32 %v1411_v61, %v1408_v4  ;;  %v1416_v17 = vmul.f32 %v1412_v9, %v1407_v10  ;;  %v6157_v61 = vld [vmem:[%s8987_s3 + $0x8] sm:$0xff] }
 0x2da   : > { %1622 = vrot.lane.b32.xlu0 %v6882_v1, %s9079_s15  ;;  %v1315_v9 = vld [vmem:[#allocation6 + $0xa8] sm:$0xff] }
 0x2db   : > { %1887 = vmatprep.subr.mxu0 %v1415_v6  ;;  %v1405_v11 = vpop.permute.xlu1 %1404 }
 0x2dc   : > { %v1379_v12 = vpop.permute.xlu0 %1378  ;;  %v1406_v13 = vsel %vm528_vm5, %v1403_v55, %v1405_v11  ;;  %v1409_v14 = vsel %vm528_vm5, %v1405_v11, %v1399_v47  ;;  %v6156_v47 = vld [vmem:[%s8986_s2 + $0x18] sm:$0xff] }
 0x2dd   : > { %v1414_v15 = vmul.f32 %v1410_v7, %v1409_v14  ;;  %1620 = vrot.lane.b32.xlu1 %v6888_v3, %s9079_s15  ;;  %v1417_v16 = vmul.f32 %v1413_v8, %v1406_v13  ;;  %6158 = vmatprep.mubr.msk.f32.mxu0 %vm1022_vm9, %v6156_v47  ;;  %v1314_v14 = vld [vmem:[#allocation6 + $0xa0] sm:$0xff] }
 0x2de   : > { %1594 = vrot.lane.b32.xlu0 %v6880_v36, %s9080_s12  ;;  %6159 = vmatprep.mubr.msk.f32.mxu1 %vm1022_vm9, %v6156_v47  ;;  %v1269_v47 = vld [vmem:[#allocation6 + $0x78] sm:$0xff] }
 0x2df   : > { %1888 = vmatpush1.msra.mxu0 %v1414_v15  ;;  %1958 = vmatprep.subr.mxu1 %v1417_v16  ;;  %v1377_v19 = vpop.permute.xlu1 %1376  ;;  %v1317_v15 = vld [vmem:[#allocation6 + $0xb8] sm:$0xff]  ;;  %v1316_v16 = vld [vmem:[#allocation6 + $0xb0] sm:$0xff] }
 0x2e0   : > { %v1351_v20 = vpop.permute.xlu0 %1350  ;;  %v1384_v21 = vsel %vm502_vm6, %v1375_v63, %v1377_v19  ;;  %1959 = vmatpush1.msra.mxu1 %v1416_v17  ;;  %v1383_v26 = vsel %vm502_vm6, %v1377_v19, %v1379_v12 }
 0x2e1   : > { %1624 = vrot.lane.b32.xlu1 %v6894_v39, %s9079_s15  ;;  %v1391_v22 = vmul.f32 %v1387_v18, %v1384_v21  ;;  %v1392_v33 = vmul.f32 %v1388_v25, %v1383_v26  ;;  %v1291_v25 = vld [vmem:[#allocation6 + $0x88] sm:$0xff] }
 0x2e2   : > { %1598 = vrot.lane.b32.xlu0 %v6882_v1, %s9080_s12 }
 0x2e3   : > { %1889 = vmatprep.subr.mxu0 %v1391_v22  ;;  %v1381_v27 = vpop.permute.xlu1 %1380 }
 0x2e4   : > { %v1355_v28 = vpop.permute.xlu0 %1354  ;;  %v1382_v29 = vsel %vm502_vm6, %v1379_v12, %v1381_v27  ;;  %v1385_v30 = vsel %vm502_vm6, %v1381_v27, %v1375_v63 }
 0x2e5   : > { %v1390_v31 = vmul.f32 %v1386_v23, %v1385_v30  ;;  %1596 = vrot.lane.b32.xlu1 %v6888_v3, %s9080_s12  ;;  %v1393_v32 = vmul.f32 %v1389_v24, %v1382_v29  ;;  %v1290_v30 = vld [vmem:[#allocation6 + $0x80] sm:$0xff] }
 0x2e6   : > { %1570 = vrot.lane.b32.xlu0 %v6880_v36, %s9081_s11 }
 0x2e7   : > { %1890 = vmatpush1.msra.mxu0 %v1390_v31  ;;  %1960 = vmatprep.subr.mxu1 %v1393_v32  ;;  %v1353_v35 = vpop.permute.xlu1 %1352  ;;  %v1293_v31 = vld [vmem:[#allocation6 + $0x98] sm:$0xff]  ;;  %v1292_v32 = vld [vmem:[#allocation6 + $0x90] sm:$0xff] }
 0x2e8   : > { %v1327_v37 = vpop.permute.xlu0 %1326  ;;  %v1360_v38 = vsel %vm476_vm7, %v1351_v20, %v1353_v35  ;;  %1961 = vmatpush1.msra.mxu1 %v1392_v33  ;;  %v1359_v2 = vsel %vm476_vm7, %v1353_v35, %v1355_v28 }
 0x2e9   : > { %1600 = vrot.lane.b32.xlu1 %v6894_v39, %s9080_s12  ;;  %v1367_v40 = vmul.f32 %v1363_v34, %v1360_v38  ;;  %v1368_v50 = vmul.f32 %v1364_v43, %v1359_v2  ;;  %v1267_v43 = vld [vmem:[#allocation6 + $0x68] sm:$0xff] }
 0x2ea   : > { %1574 = vrot.lane.b32.xlu0 %v6882_v1, %s9081_s11 }
 0x2eb   : > { %1891 = vmatprep.subr.mxu0 %v1367_v40  ;;  %v1357_v0 = vpop.permute.xlu1 %1356 }
 0x2ec   : > { %v1331_v44 = vpop.permute.xlu0 %1330  ;;  %v1358_v45 = vsel %vm476_vm7, %v1355_v28, %v1357_v0  ;;  %v1361_v46 = vsel %vm476_vm7, %v1357_v0, %v1351_v20 }
 0x2ed   : > { %v1366_v48 = vmul.f32 %v1362_v41, %v1361_v46  ;;  %1572 = vrot.lane.b32.xlu1 %v6888_v3, %s9081_s11  ;;  %v1369_v49 = vmul.f32 %v1365_v42, %v1358_v45  ;;  %v1266_v46 = vld [vmem:[#allocation6 + $0x60] sm:$0xff] }
 0x2ee   : > { %1546 = vrot.lane.b32.xlu0 %v6880_v36, %s9082_s8 }
 0x2ef   : > { %1892 = vmatpush1.msra.mxu0 %v1366_v48  ;;  %1962 = vmatprep.subr.mxu1 %v1369_v49  ;;  %v1329_v52 = vpop.permute.xlu1 %1328  ;;  %v1268_v48 = vld [vmem:[#allocation6 + $0x70] sm:$0xff] }
 0x2f0   : > { %v1303_v53 = vpop.permute.xlu0 %1302  ;;  %v1336_v54 = vsel %vm450_vm8, %v1327_v37, %v1329_v52  ;;  %1963 = vmatpush1.msra.mxu1 %v1368_v50  ;;  %v1335_v59 = vsel %vm450_vm8, %v1329_v52, %v1331_v44 }
 0x2f1   : > { %1576 = vrot.lane.b32.xlu1 %v6894_v39, %s9081_s11  ;;  %v1343_v55 = vmul.f32 %v1339_v51, %v1336_v54  ;;  %v1344_v8 = vmul.f32 %v1340_v58, %v1335_v59 }
 0x2f2   : > { %1550 = vrot.lane.b32.xlu0 %v6882_v1, %s9082_s8 }
 0x2f3   : > { %1893 = vmatprep.subr.mxu0 %v1343_v55  ;;  %v1333_v60 = vpop.permute.xlu1 %1332 }
 0x2f4   : > { %v1307_v62 = vpop.permute.xlu0 %1306  ;;  %v1334_v63 = vsel %vm450_vm8, %v1331_v44, %v1333_v60  ;;  %v1337_v4 = vsel %vm450_vm8, %v1333_v60, %v1327_v37 }
 0x2f5   : > { %v1342_v6 = vmul.f32 %v1338_v56, %v1337_v4  ;;  %1548 = vrot.lane.b32.xlu1 %v6888_v3, %s9082_s8  ;;  %v1345_v7 = vmul.f32 %v1341_v57, %v1334_v63  ;;  %v1243_v57 = vld [vmem:[#allocation6 + $0x48] sm:$0xff]  ;;  %v1245_v63 = vld [vmem:[#allocation6 + $0x58] sm:$0xff]  ;;  %v1244_v4 = vld [vmem:[#allocation6 + $0x50] sm:$0xff] }
 0x2f6   : > { %1869 = vperm.xlu0 %6258, %v6157_v61  }
 0x2f7   : > { %1894 = vmatpush1.msra.mxu0 %v1342_v6  ;;  %1964 = vmatprep.subr.mxu1 %v1345_v7  ;;  %v1305_v10 = vpop.permute.xlu1 %1304 }
 0x2f8   : > { %v1279_v11 = vpop.permute.xlu0 %1278  ;;  %v1312_v12 = vsel %vm424_vm10, %v1303_v53, %v1305_v10  ;;  %1965 = vmatpush1.msra.mxu1 %v1344_v8  ;;  %v1311_v17 = vsel %vm424_vm10, %v1305_v10, %v1307_v62 }
 0x2f9   : > { %1552 = vrot.lane.b32.xlu1 %v6894_v39, %s9082_s8  ;;  %v1319_v13 = vmul.f32 %v1315_v9, %v1312_v12  ;;  %v1320_v24 = vmul.f32 %v1316_v16, %v1311_v17 }
 0x2fb   : > { %1895 = vmatprep.subr.mxu0 %v1319_v13  ;;  %v1309_v18 = vpop.permute.xlu1 %1308 }
 0x2fc   : > { %v1283_v19 = vpop.permute.xlu0 %1282  ;;  %v1310_v20 = vsel %vm424_vm10, %v1307_v62, %v1309_v18  ;;  %v1313_v21 = vsel %vm424_vm10, %v1309_v18, %v1303_v53  ;;  %v1242_v62 = vld [vmem:[#allocation6 + $0x40] sm:$0xff] }
 0x2fd   : > { %v1318_v22 = vmul.f32 %v1314_v14, %v1313_v21  ;;  %v1321_v23 = vmul.f32 %v1317_v15, %v1310_v20  ;;  %v1219_v14 = vld [vmem:[#allocation6 + $0x28] sm:$0xff]  ;;  %v1221_v20 = vld [vmem:[#allocation6 + $0x38] sm:$0xff]  ;;  %v1220_v21 = vld [vmem:[#allocation6 + $0x30] sm:$0xff] }
 0x2ff   : > { %1896 = vmatpush1.msra.mxu0 %v1318_v22  ;;  %1966 = vmatprep.subr.mxu1 %v1321_v23  ;;  %v1281_v26 = vpop.permute.xlu1 %1280 }
 0x300   : > { %v1255_v27 = vpop.permute.xlu0 %1254  ;;  %v1288_v28 = vsel %vm9031_vm11, %v1279_v11, %v1281_v26  ;;  %1967 = vmatpush1.msra.mxu1 %v1320_v24  ;;  %v1287_v33 = vsel %vm9031_vm11, %v1281_v26, %v1283_v19 }
 0x301   : > { %v1295_v29 = vmul.f32 %v1291_v25, %v1288_v28  ;;  %v1296_v42 = vmul.f32 %v1292_v32, %v1287_v33 }
 0x303   : > { %1897 = vmatprep.subr.mxu0 %v1295_v29  ;;  %v1285_v34 = vpop.permute.xlu1 %1284 }
 0x304   : > { %v1259_v35 = vpop.permute.xlu0 %1258  ;;  %v1286_v37 = vsel %vm9031_vm11, %v1283_v19, %v1285_v34  ;;  %v1289_v38 = vsel %vm9031_vm11, %v1285_v34, %v1279_v11  ;;  %v1218_v19 = vld [vmem:[#allocation6 + $0x20] sm:$0xff]  ;;  %vm2043_vm11 = vcmask 64512  }
 0x305   : > { %v1294_v40 = vmul.f32 %v1290_v30, %v1289_v38  ;;  %v1297_v41 = vmul.f32 %v1293_v31, %v1286_v37  ;;  %v1195_v30 = vld [vmem:[#allocation6 + $0x8] sm:$0xff]  ;;  %v1197_v37 = vld [vmem:[#allocation6 + $0x18] sm:$0xff]  ;;  %v1196_v38 = vld [vmem:[#allocation6 + $0x10] sm:$0xff] }
 0x307   : > { %1898 = vmatpush1.msra.mxu0 %v1294_v40  ;;  %1968 = vmatprep.subr.mxu1 %v1297_v41  ;;  %v1257_v2 = vpop.permute.xlu1 %1256 }
 0x308   : > { %v1231_v0 = vpop.permute.xlu0 %1230  ;;  %v1264_v44 = vsel %vm9083_vm12, %v1255_v27, %v1257_v2  ;;  %1969 = vmatpush1.msra.mxu1 %v1296_v42  ;;  %v1263_v49 = vsel %vm9084_vm13, %v1257_v2, %v1259_v35  ;;  %vm9087_vm12 = vcmp.lt.s32.totalorder %v6571_v5, 32 }
 0x309   : > { %v1271_v45 = vmul.f32 %v1267_v43, %v1264_v44  ;;  %v1272_v56 = vmul.f32 %v1268_v48, %v1263_v49  ;;  %vm9088_vm13 = vmmov %vm9087_vm12 }
 0x30b   : > { %1899 = vmatprep.subr.mxu0 %v1271_v45  ;;  %v1261_v50 = vpop.permute.xlu1 %1260 }
 0x30c   : > { %v1235_v51 = vpop.permute.xlu0 %1234  ;;  %v1262_v52 = vsel %vm9085_vm14, %v1259_v35, %v1261_v50  ;;  %v1265_v53 = vsel %vm9086_vm15, %v1261_v50, %v1255_v27  ;;  %vm9089_vm14 = vmmov %vm9087_vm12  ;;  %v1194_v35 = vld [vmem:[#allocation6] sm:$0xff] }
 0x30d   : > { %v1270_v54 = vmul.f32 %v1266_v46, %v1265_v53  ;;  %v1273_v55 = vmul.f32 %v1269_v47, %v1262_v52  ;;  %vm9090_vm15 = vmmov %vm9087_vm12  ;;  %v1750_v46 = vld [vmem:[#allocation6 + $0x300] sm:$0xff]  ;;  %v1751_v47 = vld [vmem:[#allocation6 + $0x308] sm:$0xff] }
 0x30f   : > { %1900 = vmatpush1.msra.mxu0 %v1270_v54  ;;  %1970 = vmatprep.subr.mxu1 %v1273_v55  ;;  %v1233_v58 = vpop.permute.xlu1 %1232  ;;  %v1752_v54 = vld [vmem:[#allocation6 + $0x310] sm:$0xff]  ;;  %v1753_v55 = vld [vmem:[#allocation6 + $0x318] sm:$0xff] }
 0x310   : > { %v1207_v59 = vpop.permute.xlu0 %1206  ;;  %v1240_v60 = vsel %vm9087_vm12, %v1231_v0, %v1233_v58  ;;  %1971 = vmatpush1.msra.mxu1 %v1272_v56  ;;  %v1239_v6 = vsel %vm9088_vm13, %v1233_v58, %v1235_v51  ;;  %vm9091_vm12 = vcmp.lt.s32.totalorder %v6571_v5, 33 }
 0x311   : > { %v1247_v61 = vmul.f32 %v1243_v57, %v1240_v60  ;;  %v1248_v13 = vmul.f32 %v1244_v4, %v1239_v6  ;;  %vm9092_vm13 = vmmov %vm9091_vm12 }
 0x313   : > { %1901 = vmatprep.subr.mxu0 %v1247_v61  ;;  %v1237_v7 = vpop.permute.xlu1 %1236 }
 0x314   : > { %v1211_v8 = vpop.permute.xlu0 %1210  ;;  %v1238_v9 = vsel %vm9089_vm14, %v1235_v51, %v1237_v7  ;;  %v1241_v10 = vsel %vm9090_vm15, %v1237_v7, %v1231_v0  ;;  %vm9093_vm14 = vmmov %vm9091_vm12 }
 0x315   : > { %v1246_v11 = vmul.f32 %v1242_v62, %v1241_v10  ;;  %v1249_v12 = vmul.f32 %v1245_v63, %v1238_v9  ;;  %vm9094_vm15 = vmmov %vm9091_vm12  ;;  %v1726_v62 = vld [vmem:[#allocation6 + $0x2e0] sm:$0xff]  ;;  %v1727_v63 = vld [vmem:[#allocation6 + $0x2e8] sm:$0xff] }
 0x317   : > { %1902 = vmatpush1.msra.mxu0 %v1246_v11  ;;  %1972 = vmatprep.subr.mxu1 %v1249_v12  ;;  %v1209_v15 = vpop.permute.xlu1 %1208  ;;  %v1728_v11 = vld [vmem:[#allocation6 + $0x2f0] sm:$0xff]  ;;  %v1729_v12 = vld [vmem:[#allocation6 + $0x2f8] sm:$0xff] }
 0x318   : > { %v1183_v16 = vpop.permute.xlu0 %1182  ;;  %v1216_v17 = vsel %vm9091_vm12, %v1207_v59, %v1209_v15  ;;  %1973 = vmatpush1.msra.mxu1 %v1248_v13  ;;  %v1215_v22 = vsel %vm9092_vm13, %v1209_v15, %v1211_v8  ;;  %vm9095_vm12 = vcmp.lt.s32.totalorder %v6571_v5, 34 }
 0x319   : > { %v1223_v18 = vmul.f32 %v1219_v14, %v1216_v17  ;;  %v1224_v29 = vmul.f32 %v1220_v21, %v1215_v22  ;;  %vm9096_vm13 = vmmov %vm9095_vm12 }
 0x31b   : > { %1903 = vmatprep.subr.mxu0 %v1223_v18  ;;  %v1213_v23 = vpop.permute.xlu1 %1212 }
 0x31c   : > { %v1187_v24 = vpop.permute.xlu0 %1186  ;;  %v1214_v25 = vsel %vm9093_vm14, %v1211_v8, %v1213_v23  ;;  %v1217_v26 = vsel %vm9094_vm15, %v1213_v23, %v1207_v59  ;;  %vm9097_vm14 = vmmov %vm9095_vm12 }
 0x31d   : > { %v1222_v27 = vmul.f32 %v1218_v19, %v1217_v26  ;;  %v1225_v28 = vmul.f32 %v1221_v20, %v1214_v25  ;;  %vm9098_vm15 = vmmov %vm9095_vm12  ;;  %v1702_v19 = vld [vmem:[#allocation6 + $0x2c0] sm:$0xff]  ;;  %v1703_v20 = vld [vmem:[#allocation6 + $0x2c8] sm:$0xff] }
 0x31f   : > { %1904 = vmatpush1.msra.mxu0 %v1222_v27  ;;  %1974 = vmatprep.subr.mxu1 %v1225_v28  ;;  %v1185_v31 = vpop.permute.xlu1 %1184  ;;  %v1704_v27 = vld [vmem:[#allocation6 + $0x2d0] sm:$0xff]  ;;  %v1705_v28 = vld [vmem:[#allocation6 + $0x2d8] sm:$0xff] }
 0x320   : > { %v1739_v32 = vpop.permute.xlu0 %1738  ;;  %v1192_v33 = vsel %vm9095_vm12, %v1183_v16, %v1185_v31  ;;  %1975 = vmatpush1.msra.mxu1 %v1224_v29  ;;  %v1191_v40 = vsel %vm9096_vm13, %v1185_v31, %v1187_v24  ;;  %vm9099_vm12 = vcmp.lt.s32.totalorder %v6571_v5, 94 }
 0x321   : > { %v1199_v34 = vmul.f32 %v1195_v30, %v1192_v33  ;;  %v1200_v45 = vmul.f32 %v1196_v38, %v1191_v40  ;;  %vm9100_vm13 = vmmov %vm9099_vm12 }
 0x323   : > { %1905 = vmatprep.subr.mxu0 %v1199_v34  ;;  %v1189_v41 = vpop.permute.xlu1 %1188 }
 0x324   : > { %v1743_v42 = vpop.permute.xlu0 %1742  ;;  %v1190_v43 = vsel %vm9097_vm14, %v1187_v24, %v1189_v41  ;;  %v1193_v2 = vsel %vm9098_vm15, %v1189_v41, %v1183_v16  ;;  %vm9101_vm14 = vmmov %vm9099_vm12 }
 0x325   : > { %v1198_v0 = vmul.f32 %v1194_v35, %v1193_v2  ;;  %v1201_v44 = vmul.f32 %v1197_v37, %v1190_v43  ;;  %vm9102_vm15 = vmmov %vm9099_vm12  ;;  %v1678_v35 = vld [vmem:[#allocation6 + $0x2a0] sm:$0xff]  ;;  %v1679_v37 = vld [vmem:[#allocation6 + $0x2a8] sm:$0xff] }
 0x327   : > { %1906 = vmatpush1.msra.mxu0 %v1198_v0  ;;  %1976 = vmatprep.subr.mxu1 %v1201_v44  ;;  %v1741_v48 = vpop.permute.xlu1 %1740  ;;  %v1680_v0 = vld [vmem:[#allocation6 + $0x2b0] sm:$0xff]  ;;  %v1681_v44 = vld [vmem:[#allocation6 + $0x2b8] sm:$0xff] }
 0x328   : > { %v1715_v49 = vpop.permute.xlu0 %1714  ;;  %v1747_v50 = vsel %vm9099_vm12, %v1741_v48, %v1743_v42  ;;  %v1748_v51 = vsel %vm9100_vm13, %v1739_v32, %v1741_v48  ;;  %1977 = vmatpush1.msra.mxu1 %v1200_v45  ;;  %vm9103_vm12 = vcmp.lt.s32.totalorder %v6571_v5, 95 }
 0x329   : > { %v1754_v52 = vmul.f32 %v1750_v46, %v1748_v51  ;;  %v1755_v53 = vmul.f32 %v1751_v47, %v1747_v50  ;;  %vm9104_vm13 = vmmov %vm9103_vm12  ;;  %v1654_v51 = vld [vmem:[#allocation6 + $0x280] sm:$0xff] }
 0x32b   : > { %1921 = vmatprep.subr.mxu0 %v1755_v53  ;;  %v1745_v56 = vpop.permute.xlu1 %1744 }
 0x32c   : > { %v1719_v57 = vpop.permute.xlu0 %1718  ;;  %v1746_v58 = vsel %vm9101_vm14, %v1743_v42, %v1745_v56  ;;  %v1749_v59 = vsel %vm9102_vm15, %v1745_v56, %v1739_v32  ;;  %1922 = vmatpush2.msra.mxu0 %v1754_v52  ;;  %vm9105_vm14 = vmmov %vm9103_vm12  ;;  %v1655_v52 = vld [vmem:[#allocation6 + $0x288] sm:$0xff] }
 0x32d   : > { %v1756_v60 = vmul.f32 %v1752_v54, %v1746_v58  ;;  %v1757_v61 = vmul.f32 %v1753_v55, %v1749_v59  ;;  %vm9106_vm15 = vmmov %vm9103_vm12  ;;  %v1656_v59 = vld [vmem:[#allocation6 + $0x290] sm:$0xff] }
 0x32f   : > { %1992 = vmatprep.subr.mxu1 %v1757_v61  ;;  %v1717_v4 = vpop.permute.xlu1 %1716 }
 0x330   : > { %v1691_v6 = vpop.permute.xlu0 %1690  ;;  %v1723_v7 = vsel %vm9103_vm12, %v1717_v4, %v1719_v57  ;;  %v1724_v8 = vsel %vm9104_vm13, %v1715_v49, %v1717_v4  ;;  %1993 = vmatpush2.msra.mxu1 %v1756_v60  ;;  %vm9107_vm12 = vcmp.lt.s32.totalorder %v6571_v5, 96  ;;  %v1657_v60 = vld [vmem:[#allocation6 + $0x298] sm:$0xff] }
 0x331   : > { %v1730_v9 = vmul.f32 %v1726_v62, %v1724_v8  ;;  %v1731_v10 = vmul.f32 %v1727_v63, %v1723_v7  ;;  %vm9108_vm13 = vmmov %vm9107_vm12  ;;  %v1630_v8 = vld [vmem:[#allocation6 + $0x260] sm:$0xff] }
 0x333   : > { %1923 = vmatprep.subr.mxu0 %v1731_v10  ;;  %v1721_v13 = vpop.permute.xlu1 %1720 }
 0x334   : > { %v1695_v14 = vpop.permute.xlu0 %1694  ;;  %v1722_v15 = vsel %vm9105_vm14, %v1719_v57, %v1721_v13  ;;  %v1725_v16 = vsel %vm9106_vm15, %v1721_v13, %v1715_v49  ;;  %1924 = vmatpush2.msra.mxu0 %v1730_v9  ;;  %vm9109_vm14 = vmmov %vm9107_vm12  ;;  %v1631_v9 = vld [vmem:[#allocation6 + $0x268] sm:$0xff] }
 0x335   : > { %v1732_v17 = vmul.f32 %v1728_v11, %v1722_v15  ;;  %v1733_v18 = vmul.f32 %v1729_v12, %v1725_v16  ;;  %vm9110_vm15 = vmmov %vm9107_vm12  ;;  %v1632_v16 = vld [vmem:[#allocation6 + $0x270] sm:$0xff] }
 0x337   : > { %1994 = vmatprep.subr.mxu1 %v1733_v18  ;;  %v1693_v21 = vpop.permute.xlu1 %1692 }
 0x338   : > { %v1667_v22 = vpop.permute.xlu0 %1666  ;;  %v1699_v23 = vsel %vm9107_vm12, %v1693_v21, %v1695_v14  ;;  %v1700_v24 = vsel %vm9108_vm13, %v1691_v6, %v1693_v21  ;;  %1995 = vmatpush2.msra.mxu1 %v1732_v17  ;;  %vm9111_vm12 = vcmp.lt.s32.totalorder %v6571_v5, 97  ;;  %v1633_v17 = vld [vmem:[#allocation6 + $0x278] sm:$0xff] }
 0x339   : > { %v1706_v25 = vmul.f32 %v1702_v19, %v1700_v24  ;;  %v1707_v26 = vmul.f32 %v1703_v20, %v1699_v23  ;;  %vm9112_vm13 = vmmov %vm9111_vm12  ;;  %v1606_v24 = vld [vmem:[#allocation6 + $0x240] sm:$0xff] }
 0x33b   : > { %1925 = vmatprep.subr.mxu0 %v1707_v26  ;;  %v1697_v29 = vpop.permute.xlu1 %1696 }
 0x33c   : > { %v1671_v30 = vpop.permute.xlu0 %1670  ;;  %v1698_v31 = vsel %vm9109_vm14, %v1695_v14, %v1697_v29  ;;  %v1701_v32 = vsel %vm9110_vm15, %v1697_v29, %v1691_v6  ;;  %1926 = vmatpush2.msra.mxu0 %v1706_v25  ;;  %vm9113_vm14 = vmmov %vm9111_vm12  ;;  %v1607_v25 = vld [vmem:[#allocation6 + $0x248] sm:$0xff] }
 0x33d   : > { %v1708_v33 = vmul.f32 %v1704_v27, %v1698_v31  ;;  %v1709_v34 = vmul.f32 %v1705_v28, %v1701_v32  ;;  %vm9114_vm15 = vmmov %vm9111_vm12  ;;  %v1608_v32 = vld [vmem:[#allocation6 + $0x250] sm:$0xff] }
 0x33f   : > { %1996 = vmatprep.subr.mxu1 %v1709_v34  ;;  %v1669_v38 = vpop.permute.xlu1 %1668 }
 0x340   : > { %v1643_v40 = vpop.permute.xlu0 %1642  ;;  %v1675_v41 = vsel %vm9111_vm12, %v1669_v38, %v1671_v30  ;;  %v1676_v42 = vsel %vm9112_vm13, %v1667_v22, %v1669_v38  ;;  %1997 = vmatpush2.msra.mxu1 %v1708_v33  ;;  %vm9115_vm12 = vcmp.lt.s32.totalorder %v6571_v5, 98  ;;  %v1609_v33 = vld [vmem:[#allocation6 + $0x258] sm:$0xff] }
 0x341   : > { %v1682_v43 = vmul.f32 %v1678_v35, %v1676_v42  ;;  %v1683_v2 = vmul.f32 %v1679_v37, %v1675_v41  ;;  %vm9116_vm13 = vmmov %vm9115_vm12  ;;  %v1582_v42 = vld [vmem:[#allocation6 + $0x220] sm:$0xff] }
 0x343   : > { %1927 = vmatprep.subr.mxu0 %v1683_v2  ;;  %v1673_v45 = vpop.permute.xlu1 %1672 }
 0x344   : > { %v1647_v46 = vpop.permute.xlu0 %1646  ;;  %v1674_v47 = vsel %vm9113_vm14, %v1671_v30, %v1673_v45  ;;  %v1677_v48 = vsel %vm9114_vm15, %v1673_v45, %v1667_v22  ;;  %1928 = vmatpush2.msra.mxu0 %v1682_v43  ;;  %vm9117_vm14 = vmmov %vm9115_vm12  ;;  %v1583_v43 = vld [vmem:[#allocation6 + $0x228] sm:$0xff] }
 0x345   : > { %v1684_v49 = vmul.f32 %v1680_v0, %v1674_v47  ;;  %v1685_v50 = vmul.f32 %v1681_v44, %v1677_v48  ;;  %vm9118_vm15 = vmmov %vm9115_vm12  ;;  %v1584_v48 = vld [vmem:[#allocation6 + $0x230] sm:$0xff] }
 0x347   : > { %1998 = vmatprep.subr.mxu1 %v1685_v50  ;;  %v1645_v53 = vpop.permute.xlu1 %1644 }
 0x348   : > { %v1619_v54 = vpop.permute.xlu0 %1618  ;;  %v1651_v55 = vsel %vm9115_vm12, %v1645_v53, %v1647_v46  ;;  %v1652_v56 = vsel %vm9116_vm13, %v1643_v40, %v1645_v53  ;;  %1999 = vmatpush2.msra.mxu1 %v1684_v49  ;;  %vm9119_vm12 = vcmp.lt.s32.totalorder %v6571_v5, 110  ;;  %v1585_v49 = vld [vmem:[#allocation6 + $0x238] sm:$0xff] }
 0x349   : > { %v1658_v57 = vmul.f32 %v1654_v51, %v1652_v56  ;;  %v1659_v58 = vmul.f32 %v1655_v52, %v1651_v55  ;;  %vm9120_vm13 = vmmov %vm9119_vm12  ;;  %v1558_v55 = vld [vmem:[#allocation6 + $0x200] sm:$0xff]  ;;  %v1559_v56 = vld [vmem:[#allocation6 + $0x208] sm:$0xff] }
 0x34b   : > { %1929 = vmatprep.subr.mxu0 %v1659_v58  ;;  %v1649_v61 = vpop.permute.xlu1 %1648 }
 0x34c   : > { %v1623_v62 = vpop.permute.xlu0 %1622  ;;  %v1650_v63 = vsel %vm9117_vm14, %v1647_v46, %v1649_v61  ;;  %v1653_v4 = vsel %vm9118_vm15, %v1649_v61, %v1643_v40  ;;  %1930 = vmatpush2.msra.mxu0 %v1658_v57  ;;  %vm9121_vm14 = vmmov %vm9119_vm12 }
 0x34d   : > { %v1660_v6 = vmul.f32 %v1656_v59, %v1650_v63  ;;  %v1661_v7 = vmul.f32 %v1657_v60, %v1653_v4  ;;  %vm9122_vm15 = vmmov %vm9119_vm12  ;;  %v1560_v63 = vld [vmem:[#allocation6 + $0x210] sm:$0xff] }
 0x34e   : > { %v6155_v4 = vld [vmem:[%s8986_s2 + $0x10] sm:$0xff] }
 0x34f   : > { %2000 = vmatprep.subr.mxu1 %v1661_v7  ;;  %v1621_v10 = vpop.permute.xlu1 %1620 }
 0x350   : > { %v1595_v11 = vpop.permute.xlu0 %1594  ;;  %v1627_v12 = vsel %vm9119_vm12, %v1621_v10, %v1623_v62  ;;  %v1628_v13 = vsel %vm9120_vm13, %v1619_v54, %v1621_v10  ;;  %2001 = vmatpush2.msra.mxu1 %v1660_v6  ;;  %vm9123_vm12 = vcmp.lt.s32.totalorder %v6571_v5, 111  ;;  %v1561_v6 = vld [vmem:[#allocation6 + $0x218] sm:$0xff] }
 0x351   : > { %v1634_v14 = vmul.f32 %v1630_v8, %v1628_v13  ;;  %v1635_v15 = vmul.f32 %v1631_v9, %v1627_v12  ;;  %vm9124_vm13 = vmmov %vm9123_vm12  ;;  %v6350_v12 = vmov 0.0   ;;  %v7292_v13 = vld [vmem:[%s8987_s3 + $0x30] sm:$0xff] }
 0x352   : > { %2040 = vperm.xlu1 %6259, %v7292_v13  }
 0x353   : > { %1931 = vmatprep.subr.mxu0 %v1635_v15  ;;  %v1625_v18 = vpop.permute.xlu1 %1624 }
 0x354   : > { %v1599_v19 = vpop.permute.xlu0 %1598  ;;  %v1626_v20 = vsel %vm9121_vm14, %v1623_v62, %v1625_v18  ;;  %v1629_v21 = vsel %vm9122_vm15, %v1625_v18, %v1619_v54  ;;  %1932 = vmatpush2.msra.mxu0 %v1634_v14  ;;  %vm9125_vm14 = vmmov %vm9123_vm12 }
 0x355   : > { %v1636_v22 = vmul.f32 %v1632_v16, %v1626_v20  ;;  %v1637_v23 = vmul.f32 %v1633_v17, %v1629_v21  ;;  %vm9126_vm15 = vmmov %vm9123_vm12  ;;  %v2022_v16 = vstv %s6160_s7  ;;  %s9136_s7 = smov 33  }
 0x357   : > { %2002 = vmatprep.subr.mxu1 %v1637_v23  ;;  %v1597_v26 = vpop.permute.xlu1 %1596 }
 0x358   : > { %v1571_v27 = vpop.permute.xlu0 %1570  ;;  %v1603_v28 = vsel %vm9123_vm12, %v1597_v26, %v1599_v19  ;;  %v1604_v29 = vsel %vm9124_vm13, %v1595_v11, %v1597_v26  ;;  %2003 = vmatpush2.msra.mxu1 %v1636_v22  ;;  %vm9127_vm12 = vcmp.lt.s32.totalorder %v6571_v5, 112 }
 0x359   : > { %v1610_v30 = vmul.f32 %v1606_v24, %v1604_v29  ;;  %v1611_v31 = vmul.f32 %v1607_v25, %v1603_v28  ;;  %vm9128_vm13 = vmmov %vm9127_vm12 }
 0x35b   : > { %1933 = vmatprep.subr.mxu0 %v1611_v31  ;;  %v1601_v34 = vpop.permute.xlu1 %1600 }
 0x35c   : > { %v1575_v35 = vpop.permute.xlu0 %1574  ;;  %v1602_v37 = vsel %vm9125_vm14, %v1599_v19, %v1601_v34  ;;  %v1605_v38 = vsel %vm9126_vm15, %v1601_v34, %v1595_v11  ;;  %1934 = vmatpush2.msra.mxu0 %v1610_v30  ;;  %vm9129_vm14 = vmmov %vm9127_vm12 }
 0x35d   : > { %v1612_v40 = vmul.f32 %v1608_v32, %v1602_v37  ;;  %v1613_v41 = vmul.f32 %v1609_v33, %v1605_v38  ;;  %vm9130_vm15 = vmmov %vm9127_vm12  ;;  %v2035_v32 = vld [vmem:[%s8988_s4] sm:$0xff] }
 0x35f   : > { %2004 = vmatprep.subr.mxu1 %v1613_v41  ;;  %v1573_v2 = vpop.permute.xlu1 %1572 }
 0x360   : > { %v1579_v0 = vsel %vm9127_vm12, %v1573_v2, %v1575_v35  ;;  %v1580_v44 = vsel %vm9128_vm13, %v1571_v27, %v1573_v2  ;;  %2005 = vmatpush2.msra.mxu1 %v1612_v40  ;;  %v1547_v45 = vpop.permute.xlu0 %1546  ;;  %vm9131_vm12 = vcmp.lt.s32.totalorder %v6571_v5, 113 }
 0x361   : > { %v1586_v46 = vmul.f32 %v1582_v42, %v1580_v44  ;;  %v1587_v47 = vmul.f32 %v1583_v43, %v1579_v0  ;;  %vm9132_vm13 = vmmov %vm9131_vm12  ;;  %v2542_v44 = vld [vmem:[#allocation6 + $0x1e8] sm:$0xff] }
 0x363   : > { %1935 = vmatprep.subr.mxu0 %v1587_v47  ;;  %v1577_v50 = vpop.permute.xlu1 %1576 }
 0x364   : > { %v1578_v51 = vsel %vm9129_vm14, %v1575_v35, %v1577_v50  ;;  %v1581_v52 = vsel %vm9130_vm15, %v1577_v50, %v1571_v27  ;;  %1936 = vmatpush2.msra.mxu0 %v1586_v46  ;;  %v1551_v57 = vpop.permute.xlu0 %1550  ;;  %vm9133_vm14 = vmmov %vm9131_vm12  ;;  %v2544_v50 = vld [vmem:[#allocation6 + $0x1f8] sm:$0xff] }
 0x365   : > { %v1588_v53 = vmul.f32 %v1584_v48, %v1578_v51  ;;  %v1589_v54 = vmul.f32 %v1585_v49, %v1581_v52  ;;  %vm9134_vm15 = vmmov %vm9131_vm12  ;;  %v2543_v49 = vld [vmem:[#allocation6 + $0x1f0] sm:$0xff] }
 0x367   : > { %2006 = vmatprep.subr.mxu1 %v1589_v54  ;;  %v1549_v58 = vpop.permute.xlu1 %1548 }
 0x368   : > { %v1555_v59 = vsel %vm9131_vm12, %v1549_v58, %v1551_v57  ;;  %v1556_v60 = vsel %vm9132_vm13, %v1547_v45, %v1549_v58  ;;  %2007 = vmatpush2.msra.mxu1 %v1588_v53 }
 0x369   : > { %v1562_v61 = vmul.f32 %v1558_v55, %v1556_v60  ;;  %v1563_v62 = vmul.f32 %v1559_v56, %v1555_v59  ;;  %v2518_v60 = vld [vmem:[#allocation6 + $0x1c8] sm:$0xff] }
 0x36b   : > { %1937 = vmatprep.subr.mxu0 %v1563_v62  ;;  %v1553_v7 = vpop.permute.xlu1 %1552 }
 0x36c   : > { %v1554_v8 = vsel %vm9133_vm14, %v1551_v57, %v1553_v7  ;;  %v1557_v9 = vsel %vm9134_vm15, %v1553_v7, %v1547_v45  ;;  %1938 = vmatpush2.msra.mxu0 %v1562_v61  ;;  %v2541_v45 = vld [vmem:[#allocation6 + $0x1e0] sm:$0xff]  ;;  %v2520_v7 = vld [vmem:[#allocation6 + $0x1d8] sm:$0xff] }
 0x36d   : > { %v1564_v10 = vmul.f32 %v1560_v63, %v1554_v8  ;;  %1940 = vmatmul.mubr.f32.vlgmr.msra.gmra.mxu0 %v6155_v4  ;;  %v1565_v11 = vmul.f32 %v1561_v6, %v1557_v9  ;;  %v2517_v61 = vld [vmem:[#allocation6 + $0x1c0] sm:$0xff]  ;;  %v2519_v6 = vld [vmem:[#allocation6 + $0x1d0] sm:$0xff] }
 0x36e   : > { %2111 = vmatprep.mubr.f32.mxu0 %v6350_v12 }
 0x36f   : > { %2008 = vmatprep.subr.mxu1 %v1565_v11 }
 0x370   : > { %2009 = vmatpush2.msra.mxu1 %v1564_v10 }
 0x371   : > { %2011 = vmatmul.mubr.f32.vlgmr.msra.gmra.mxu1 %v6155_v4  ;;  %v1870_v14 = vpop.permute.xlu0 %1869 }
 0x372   : > { %2182 = vmatprep.mubr.f32.mxu1 %v6350_v12 }
 0x42d   : > { %v1941_v15 = vpop.f32.mrf.mxu0 }
 0x42e   : > { %v1942_v17 = vadd.f32 %v1941_v15, %v1870_v14 }
 0x42f   : > { %v1943_v18 = vpop.f32.mrf.mxu0 }
 0x430   : > { %vm2018_vm12 = vcmp.ge.f32.partialorder %v1942_v17, 0.0  ;;  %v2023_v19 = vmul.f32 %v2022_v16, %v1942_v17  ;;  %v1944_v20 = vadd.f32 %v1943_v18, %v1870_v14 }
 0x431   : > { %v2012_v21 = vpop.f32.mrf.mxu1 }
 0x432   : > { %vm2019_vm13 = vcmp.ge.f32.partialorder %v1944_v20, 0.0  ;;  %v2024_v22 = vmul.f32 %v2022_v16, %v1944_v20  ;;  %v2013_v23 = vadd.f32 %v2012_v21, %v1870_v14  ;;  %v2027_v24 = vsel %vm2018_vm12, %v1942_v17, %v2023_v19  ;;  %v2494_v19 = vld [vmem:[#allocation6 + $0x1a8] sm:$0xff] }
 0x433   : > { %v2014_v25 = vpop.f32.mrf.mxu1  ;;  %v2031_v30 = vadd.f32 %v2027_v24, %v6880_v36  ;;  %v2041_v36 = vpop.permute.xlu1 %2040  ;;  %v2495_v24 = vld [vmem:[#allocation6 + $0x1b0] sm:$0xff]  ;;  %vm9141_vm12 = vcmp.lt.s32.totalorder %v6571_v5, 30 }
 0x434   : > { %vm2020_vm14 = vcmp.ge.f32.partialorder %v2013_v23, 0.0  ;;  %v2025_v26 = vmul.f32 %v2022_v16, %v2013_v23  ;;  %v2015_v27 = vadd.f32 %v2014_v25, %v1870_v14  ;;  %v2028_v28 = vsel %vm2019_vm13, %v1944_v20, %v2024_v22  ;;  %v2493_v20 = vld [vmem:[#allocation6 + $0x1a0] sm:$0xff]  ;;  %v2496_v25 = vld [vmem:[#allocation6 + $0x1b8] sm:$0xff]  ;;  %vm9142_vm13 = vmmov %vm9141_vm12 }
 0x435   : > { %v2032_v29 = vadd.f32 %v2028_v28, %v6888_v3 }
 0x436   : > { %vm2021_vm15 = vcmp.ge.f32.partialorder %v2015_v27, 0.0  ;;  %v2026_v31 = vmul.f32 %v2022_v16, %v2015_v27  ;;  %v2029_v33 = vsel %vm2020_vm14, %v2013_v23, %v2025_v26  ;;  %vm9143_vm14 = vmmov %vm9141_vm12 }
 0x437   : > { %2077 = vmatprep.subr.mxu0 %v2032_v29  ;;  %v2033_v37 = vadd.f32 %v2029_v33, %v6882_v1 }
 0x438   : > { %2078 = vmatpush1.msra.mxu0 %v2031_v30  ;;  %v2030_v34 = vsel %vm2021_vm15, %v2015_v27, %v2026_v31  ;;  %vm9144_vm15 = vmmov %vm9141_vm12 }
 0x439   : > { %6162 = vmatmul.mubr.msk.f32.vlgmr.msra.gmra.mxu0 %vm2043_vm11, %v2035_v32  ;;  %v2034_v35 = vadd.f32 %v2030_v34, %v6894_v39  ;;  %v2466_v34 = vld [vmem:[#allocation6 + $0x168] sm:$0xff] }
 0x43b   : > { %2148 = vmatprep.subr.mxu1 %v2034_v35 }
 0x43c   : > { %2149 = vmatpush1.msra.mxu1 %v2033_v37 }
 0x43d   : > { %6163 = vmatmul.mubr.msk.f32.vlgmr.msra.gmra.mxu1 %vm2043_vm11, %v2035_v32 }
 0x4f9   : > { %v2113_v3 = vpop.f32.mrf.mxu0 }
 0x4fa   : > { %v7304_v38 = vadd.f32 %v2113_v3, %v2041_v36 }
 0x4fb   : > { %v2115_v40 = vpop.f32.mrf.mxu0 }
 0x4fc   : > { %v7306_v41 = vadd.f32 %v2115_v40, %v2041_v36  ;;  %2529 = vrot.lane.b32.xlu0 %v7304_v38, %s9054_s17  ;;  %v2465_v40 = vld [vmem:[#allocation6 + $0x160] sm:$0xff] }
 0x4fd   : > { %v2184_v42 = vpop.f32.mrf.mxu1 }
 0x4fe   : > { %v7310_v43 = vadd.f32 %v2184_v42, %v2041_v36  ;;  %2531 = vrot.lane.b32.xlu1 %v7306_v41, %s9054_s17  ;;  %v2468_v42 = vld [vmem:[#allocation6 + $0x178] sm:$0xff] }
 0x4ff   : > { %v2186_v1 = vpop.f32.mrf.mxu1 }
 0x500   : > { %v7314_v39 = vadd.f32 %v2186_v1, %v2041_v36  ;;  %2533 = vrot.lane.b32.xlu0 %v7310_v43, %s9054_s17 }
 0x502   : > { %2535 = vrot.lane.b32.xlu1 %v7314_v39, %s9054_s17 }
 0x504   : > { %2505 = vrot.lane.b32.xlu0 %v7304_v38, %s9052_s18 }
 0x506   : > { %2507 = vrot.lane.b32.xlu1 %v7306_v41, %s9052_s18 }
 0x508   : > { %2509 = vrot.lane.b32.xlu0 %v7310_v43, %s9052_s18 }
 0x50a   : > { %2511 = vrot.lane.b32.xlu1 %v7314_v39, %s9052_s18 }
 0x50c   : > { %2481 = vrot.lane.b32.xlu0 %v7304_v38, %s9050_s19 }
 0x50e   : > { %2483 = vrot.lane.b32.xlu1 %v7306_v41, %s9050_s19 }
 0x510   : > { %2485 = vrot.lane.b32.xlu0 %v7310_v43, %s9050_s19 }
 0x512   : > { %2487 = vrot.lane.b32.xlu1 %v7314_v39, %s9050_s19 }
 0x514   : > { %2453 = vrot.lane.b32.xlu0 %v7304_v38, %s9048_s20 }
 0x516   : > { %2455 = vrot.lane.b32.xlu1 %v7306_v41, %s9048_s20 }
 0x518   : > { %2457 = vrot.lane.b32.xlu0 %v7310_v43, %s9048_s20 }
 0x51a   : > { %2459 = vrot.lane.b32.xlu1 %v7314_v39, %s9048_s20 }
 0x51c   : > { %2429 = vrot.lane.b32.xlu0 %v7304_v38, %s9046_s23 }
 0x51e   : > { %2431 = vrot.lane.b32.xlu1 %v7306_v41, %s9046_s23 }
 0x520   : > { %2433 = vrot.lane.b32.xlu0 %v7310_v43, %s9046_s23 }
 0x522   : > { %2435 = vrot.lane.b32.xlu1 %v7314_v39, %s9046_s23 }
 0x524   : > { %2405 = vrot.lane.b32.xlu0 %v7304_v38, %s9044_s24 }
 0x526   : > { %2407 = vrot.lane.b32.xlu1 %v7306_v41, %s9044_s24 }
 0x528   : > { %2409 = vrot.lane.b32.xlu0 %v7310_v43, %s9044_s24 }
 0x52a   : > { %2411 = vrot.lane.b32.xlu1 %v7314_v39, %s9044_s24 }
 0x52c   : > { %2381 = vrot.lane.b32.xlu0 %v7304_v38, %s9042_s25 }
 0x52e   : > { %2383 = vrot.lane.b32.xlu1 %v7306_v41, %s9042_s25 }
 0x530   : > { %2385 = vrot.lane.b32.xlu0 %v7310_v43, %s9042_s25 }
 0x532   : > { %2387 = vrot.lane.b32.xlu1 %v7314_v39, %s9042_s25  ;;  %s6169_s25 = sld [smem:[#allocation3 + $0x2]] }
 0x534   : > { %2357 = vrot.lane.b32.xlu0 %v7304_v38, %s9040_s26 }
 0x536   : > { %2359 = vrot.lane.b32.xlu1 %v7306_v41, %s9040_s26 }
 0x538   : > { %2361 = vrot.lane.b32.xlu0 %v7310_v43, %s9040_s26 }
 0x53a   : > { %2363 = vrot.lane.b32.xlu1 %v7314_v39, %s9040_s26  ;;  %s9199_s26 = smov 17  }
 0x53c   : > { %2333 = vrot.lane.b32.xlu0 %v7304_v38, %s9038_s27 }
 0x53e   : > { %2335 = vrot.lane.b32.xlu1 %v7306_v41, %s9038_s27 }
 0x540   : > { %2337 = vrot.lane.b32.xlu0 %v7310_v43, %s9038_s27 }
 0x542   : > { %2339 = vrot.lane.b32.xlu1 %v7314_v39, %s9038_s27  ;;  %s9197_s27 = smov 15  }
 0x544   : > { %2309 = vrot.lane.b32.xlu0 %v7304_v38, %s9036_s28 }
 0x546   : > { %2311 = vrot.lane.b32.xlu1 %v7306_v41, %s9036_s28 }
 0x548   : > { %2313 = vrot.lane.b32.xlu0 %v7310_v43, %s9036_s28 }
 0x54a   : > { %2315 = vrot.lane.b32.xlu1 %v7314_v39, %s9036_s28  ;;  %s9140_s28 = smov 96  }
 0x54c   : > { %2285 = vrot.lane.b32.xlu0 %v7304_v38, %s9034_s29 }
 0x54e   : > { %2287 = vrot.lane.b32.xlu1 %v7306_v41, %s9034_s29 }
 0x550   : > { %2289 = vrot.lane.b32.xlu0 %v7310_v43, %s9034_s29 }
 0x552   : > { %2291 = vrot.lane.b32.xlu1 %v7314_v39, %s9034_s29  ;;  %s9139_s29 = smov 95  }
 0x554   : > { %2261 = vrot.lane.b32.xlu0 %v7304_v38, %s9032_s30 }
 0x556   : > { %2263 = vrot.lane.b32.xlu1 %v7306_v41, %s9032_s30 }
 0x558   : > { %2265 = vrot.lane.b32.xlu0 %v7310_v43, %s9032_s30 }
 0x55a   : > { %2267 = vrot.lane.b32.xlu1 %v7314_v39, %s9032_s30  ;;  %s9138_s30 = smov 94  }
 0x55c   : > { %2237 = vrot.lane.b32.xlu0 %v7304_v38, %s9135_s10 }
 0x55e   : > { %2239 = vrot.lane.b32.xlu1 %v7306_v41, %s9135_s10 }
 0x560   : > { %2241 = vrot.lane.b32.xlu0 %v7310_v43, %s9135_s10 }
 0x562   : > { %2243 = vrot.lane.b32.xlu1 %v7314_v39, %s9135_s10 }
 0x564   : > { %2213 = vrot.lane.b32.xlu0 %v7304_v38, %s9136_s7 }
 0x566   : > { %2215 = vrot.lane.b32.xlu1 %v7306_v41, %s9136_s7 }
 0x568   : > { %2217 = vrot.lane.b32.xlu0 %v7310_v43, %s9136_s7 }
 0x56a   : > { %2219 = vrot.lane.b32.xlu1 %v7314_v39, %s9136_s7 }
 0x56c   : > { %2189 = vrot.lane.b32.xlu0 %v7304_v38, %s9137_s9 }
 0x56e   : > { %2191 = vrot.lane.b32.xlu1 %v7306_v41, %s9137_s9  ;;  %v2530_v2 = vpop.permute.xlu0 %2529 }
 0x570   : > { %v2532_v0 = vpop.permute.xlu1 %2531  ;;  %2193 = vrot.lane.b32.xlu0 %v7310_v43, %s9137_s9 }
 0x571   : > { %v2539_v46 = vsel %vm662_vm0, %v2530_v2, %v2532_v0 }
 0x572   : > { %2195 = vrot.lane.b32.xlu1 %v7314_v39, %s9137_s9  ;;  %v2534_v47 = vpop.permute.xlu0 %2533  ;;  %v2545_v53 = vmul.f32 %v2541_v45, %v2539_v46 }
 0x573   : > { %v2538_v48 = vsel %vm662_vm0, %v2532_v0, %v2534_v47 }
 0x574   : > { %v2536_v51 = vpop.permute.xlu1 %2535  ;;  %2745 = vrot.lane.b32.xlu0 %v7304_v38, %s9138_s30  ;;  %v2546_v52 = vmul.f32 %v2542_v44, %v2538_v48 }
 0x575   : > { %v2537_v54 = vsel %vm662_vm0, %v2534_v47, %v2536_v51  ;;  %v2540_v55 = vsel %vm662_vm0, %v2536_v51, %v2530_v2  ;;  %v2467_v2 = vld [vmem:[#allocation6 + $0x170] sm:$0xff] }
 0x576   : > { %v2547_v56 = vmul.f32 %v2543_v49, %v2537_v54  ;;  %2747 = vrot.lane.b32.xlu1 %v7306_v41, %s9138_s30  ;;  %2882 = vmatprep.subr.mxu0 %v2546_v52  ;;  %v2506_v57 = vpop.permute.xlu0 %2505  ;;  %v2548_v58 = vmul.f32 %v2544_v50, %v2540_v55  ;;  %v2442_v49 = vld [vmem:[#allocation6 + $0x148] sm:$0xff]  ;;  %v2441_v55 = vld [vmem:[#allocation6 + $0x140] sm:$0xff] }
 0x577   : > { %2883 = vmatpush1.msra.mxu0 %v2545_v53 }
 0x578   : > { %v2508_v59 = vpop.permute.xlu1 %2507  ;;  %2749 = vrot.lane.b32.xlu0 %v7310_v43, %s9138_s30  ;;  %2953 = vmatprep.subr.mxu1 %v2548_v58  ;;  %v2443_v58 = vld [vmem:[#allocation6 + $0x150] sm:$0xff] }
 0x579   : > { %2954 = vmatpush1.msra.mxu1 %v2547_v56  ;;  %v2515_v62 = vsel %vm636_vm1, %v2506_v57, %v2508_v59  ;;  %v2444_v56 = vld [vmem:[#allocation6 + $0x158] sm:$0xff] }
 0x57a   : > { %2751 = vrot.lane.b32.xlu1 %v7314_v39, %s9138_s30  ;;  %v2510_v63 = vpop.permute.xlu0 %2509  ;;  %v2521_v10 = vmul.f32 %v2517_v61, %v2515_v62 }
 0x57b   : > { %v2514_v4 = vsel %vm636_vm1, %v2508_v59, %v2510_v63 }
 0x57c   : > { %v2512_v8 = vpop.permute.xlu1 %2511  ;;  %2721 = vrot.lane.b32.xlu0 %v7304_v38, %s9139_s29  ;;  %v2522_v9 = vmul.f32 %v2518_v60, %v2514_v4 }
 0x57d   : > { %v2513_v11 = vsel %vm636_vm1, %v2510_v63, %v2512_v8  ;;  %v2516_v14 = vsel %vm636_vm1, %v2512_v8, %v2506_v57 }
 0x57e   : > { %v2523_v15 = vmul.f32 %v2519_v6, %v2513_v11  ;;  %2723 = vrot.lane.b32.xlu1 %v7306_v41, %s9139_s29  ;;  %2884 = vmatprep.subr.mxu0 %v2522_v9  ;;  %v2482_v16 = vpop.permute.xlu0 %2481  ;;  %v2524_v17 = vmul.f32 %v2520_v7, %v2516_v14  ;;  %v2418_v6 = vld [vmem:[#allocation6 + $0x128] sm:$0xff]  ;;  %v2417_v14 = vld [vmem:[#allocation6 + $0x120] sm:$0xff] }
 0x57f   : > { %2885 = vmatpush1.msra.mxu0 %v2521_v10 }
 0x580   : > { %v2484_v18 = vpop.permute.xlu1 %2483  ;;  %2725 = vrot.lane.b32.xlu0 %v7310_v43, %s9139_s29  ;;  %2955 = vmatprep.subr.mxu1 %v2524_v17  ;;  %v2419_v17 = vld [vmem:[#allocation6 + $0x130] sm:$0xff] }
 0x581   : > { %2956 = vmatpush1.msra.mxu1 %v2523_v15  ;;  %v2491_v21 = vsel %vm610_vm2, %v2482_v16, %v2484_v18  ;;  %v2420_v15 = vld [vmem:[#allocation6 + $0x138] sm:$0xff] }
 0x582   : > { %2727 = vrot.lane.b32.xlu1 %v7314_v39, %s9139_s29  ;;  %v2486_v22 = vpop.permute.xlu0 %2485  ;;  %v2497_v28 = vmul.f32 %v2493_v20, %v2491_v21 }
 0x583   : > { %v2490_v23 = vsel %vm610_vm2, %v2484_v18, %v2486_v22 }
 0x584   : > { %v2488_v26 = vpop.permute.xlu1 %2487  ;;  %2697 = vrot.lane.b32.xlu0 %v7304_v38, %s9140_s28  ;;  %v2498_v27 = vmul.f32 %v2494_v19, %v2490_v23 }
 0x585   : > { %v2489_v29 = vsel %vm610_vm2, %v2486_v22, %v2488_v26  ;;  %v2492_v30 = vsel %vm610_vm2, %v2488_v26, %v2482_v16 }
 0x586   : > { %v2499_v31 = vmul.f32 %v2495_v24, %v2489_v29  ;;  %2699 = vrot.lane.b32.xlu1 %v7306_v41, %s9140_s28  ;;  %2886 = vmatprep.subr.mxu0 %v2498_v27  ;;  %v2454_v32 = vpop.permute.xlu0 %2453  ;;  %v2500_v33 = vmul.f32 %v2496_v25, %v2492_v30  ;;  %v2394_v24 = vld [vmem:[#allocation6 + $0x108] sm:$0xff]  ;;  %v2393_v30 = vld [vmem:[#allocation6 + $0x100] sm:$0xff] }
 0x587   : > { %2887 = vmatpush1.msra.mxu0 %v2497_v28 }
 0x588   : > { %v2456_v35 = vpop.permute.xlu1 %2455  ;;  %2701 = vrot.lane.b32.xlu0 %v7310_v43, %s9140_s28  ;;  %2888 = vmatprep.subr.mxu0 %v7306_v41 }
 0x589   : > { %v2463_v37 = vsel %vm580_vm3, %v2454_v32, %v2456_v35  ;;  %2957 = vmatprep.subr.mxu1 %v2500_v33  ;;  %2889 = vmatpush1.msra.mxu0 %v7304_v38  ;;  %v2395_v33 = vld [vmem:[#allocation6 + $0x110] sm:$0xff] }
 0x58a   : > { %2958 = vmatpush1.msra.mxu1 %v2499_v31  ;;  %2703 = vrot.lane.b32.xlu1 %v7314_v39, %s9140_s28  ;;  %v2458_v36 = vpop.permute.xlu0 %2457  ;;  %v2470_v3 = vmul.f32 %v2466_v34, %v2463_v37  ;;  %v2396_v31 = vld [vmem:[#allocation6 + $0x118] sm:$0xff] }
 0x58b   : > { %2959 = vmatprep.subr.mxu1 %v7314_v39  ;;  %v2462_v0 = vsel %vm580_vm3, %v2456_v35, %v2458_v36 }
 0x58c   : > { %2960 = vmatpush1.msra.mxu1 %v7310_v43  ;;  %v2460_v1 = vpop.permute.xlu1 %2459  ;;  %2673 = vrot.lane.b32.xlu0 %v7304_v38, %s9077_s14  ;;  %v2471_v50 = vmul.f32 %v2467_v2, %v2462_v0 }
 0x58d   : > { %v2461_v44 = vsel %vm580_vm3, %v2458_v36, %v2460_v1  ;;  %v2464_v45 = vsel %vm580_vm3, %v2460_v1, %v2454_v32  ;;  %2890 = vmatprep.subr.mxu0 %v2470_v3 }
 0x58e   : > { %v2469_v46 = vmul.f32 %v2465_v40, %v2464_v45  ;;  %2675 = vrot.lane.b32.xlu1 %v7306_v41, %s9077_s14  ;;  %v2430_v47 = vpop.permute.xlu0 %2429  ;;  %v2472_v48 = vmul.f32 %v2468_v42, %v2461_v44  ;;  %v2370_v42 = vld [vmem:[#allocation6 + $0xe8] sm:$0xff] }
 0x590   : > { %v2432_v51 = vpop.permute.xlu1 %2431  ;;  %2677 = vrot.lane.b32.xlu0 %v7310_v43, %s9077_s14  ;;  %2891 = vmatpush1.msra.mxu0 %v2469_v46  ;;  %v2369_v46 = vld [vmem:[#allocation6 + $0xe0] sm:$0xff] }
 0x591   : > { %v2439_v52 = vsel %vm554_vm4, %v2430_v47, %v2432_v51  ;;  %2961 = vmatprep.subr.mxu1 %v2472_v48 }
 0x592   : > { %2962 = vmatpush1.msra.mxu1 %v2471_v50  ;;  %2679 = vrot.lane.b32.xlu1 %v7314_v39, %s9077_s14  ;;  %v2434_v53 = vpop.permute.xlu0 %2433  ;;  %v2446_v54 = vmul.f32 %v2442_v49, %v2439_v52  ;;  %v2371_v49 = vld [vmem:[#allocation6 + $0xf0] sm:$0xff] }
 0x593   : > { %v2438_v59 = vsel %vm554_vm4, %v2432_v51, %v2434_v53 }
 0x594   : > { %v2436_v57 = vpop.permute.xlu1 %2435  ;;  %2649 = vrot.lane.b32.xlu0 %v7304_v38, %s9078_s13  ;;  %2892 = vmatprep.subr.mxu0 %v2446_v54  ;;  %v2447_v7 = vmul.f32 %v2443_v58, %v2438_v59 }
 0x595   : > { %v2437_v60 = vsel %vm554_vm4, %v2434_v53, %v2436_v57  ;;  %v2440_v61 = vsel %vm554_vm4, %v2436_v57, %v2430_v47  ;;  %v2372_v47 = vld [vmem:[#allocation6 + $0xf8] sm:$0xff]  ;;  %v6165_v57 = vld [vmem:[%s8986_s2 + $0x28] sm:$0xff] }
 0x596   : > { %v2445_v62 = vmul.f32 %v2441_v55, %v2440_v61  ;;  %2651 = vrot.lane.b32.xlu1 %v7306_v41, %s9078_s13  ;;  %v2406_v63 = vpop.permute.xlu0 %2405  ;;  %v2448_v4 = vmul.f32 %v2444_v56, %v2437_v60  ;;  %v2346_v56 = vld [vmem:[#allocation6 + $0xc8] sm:$0xff]  ;;  %6167 = vmatprep.mubr.msk.f32.mxu0 %vm1022_vm9, %v6165_v57 }
 0x597   : > { %6168 = vmatprep.mubr.msk.f32.mxu1 %vm1022_vm9, %v6165_v57 }
 0x598   : > { %v2408_v8 = vpop.permute.xlu1 %2407  ;;  %2653 = vrot.lane.b32.xlu0 %v7310_v43, %s9078_s13  ;;  %2893 = vmatpush1.msra.mxu0 %v2445_v62 }
 0x599   : > { %v2415_v9 = vsel %vm528_vm5, %v2406_v63, %v2408_v8  ;;  %2963 = vmatprep.subr.mxu1 %v2448_v4  ;;  %v2348_v4 = vld [vmem:[#allocation6 + $0xd8] sm:$0xff] }
 0x59a   : > { %2964 = vmatpush1.msra.mxu1 %v2447_v7  ;;  %2655 = vrot.lane.b32.xlu1 %v7314_v39, %s9078_s13  ;;  %v2410_v10 = vpop.permute.xlu0 %2409  ;;  %v2422_v11 = vmul.f32 %v2418_v6, %v2415_v9  ;;  %v2347_v7 = vld [vmem:[#allocation6 + $0xd0] sm:$0xff] }
 0x59b   : > { %v2414_v18 = vsel %vm528_vm5, %v2408_v8, %v2410_v10 }
 0x59c   : > { %v2412_v16 = vpop.permute.xlu1 %2411  ;;  %2625 = vrot.lane.b32.xlu0 %v7304_v38, %s9079_s15  ;;  %2894 = vmatprep.subr.mxu0 %v2422_v11  ;;  %v2423_v25 = vmul.f32 %v2419_v17, %v2414_v18 }
 0x59d   : > { %v2413_v19 = vsel %vm528_vm5, %v2410_v10, %v2412_v16  ;;  %v2416_v20 = vsel %vm528_vm5, %v2412_v16, %v2406_v63  ;;  %v2345_v63 = vld [vmem:[#allocation6 + $0xc0] sm:$0xff]  ;;  %v2322_v16 = vld [vmem:[#allocation6 + $0xa8] sm:$0xff] }
 0x59e   : > { %v2421_v21 = vmul.f32 %v2417_v14, %v2416_v20  ;;  %2627 = vrot.lane.b32.xlu1 %v7306_v41, %s9079_s15  ;;  %v2382_v22 = vpop.permute.xlu0 %2381  ;;  %v2424_v23 = vmul.f32 %v2420_v15, %v2413_v19  ;;  %v6166_v20 = vld [vmem:[%s8987_s3 + $0x10] sm:$0xff] }
 0x5a0   : > { %v2384_v26 = vpop.permute.xlu1 %2383  ;;  %2629 = vrot.lane.b32.xlu0 %v7310_v43, %s9079_s15  ;;  %2895 = vmatpush1.msra.mxu0 %v2421_v21 }
 0x5a1   : > { %v2391_v27 = vsel %vm502_vm6, %v2382_v22, %v2384_v26  ;;  %2965 = vmatprep.subr.mxu1 %v2424_v23  ;;  %v2321_v23 = vld [vmem:[#allocation6 + $0xa0] sm:$0xff] }
 0x5a2   : > { %2966 = vmatpush1.msra.mxu1 %v2423_v25  ;;  %2631 = vrot.lane.b32.xlu1 %v7314_v39, %s9079_s15  ;;  %v2386_v28 = vpop.permute.xlu0 %2385  ;;  %v2398_v29 = vmul.f32 %v2394_v24, %v2391_v27  ;;  %v2324_v24 = vld [vmem:[#allocation6 + $0xb8] sm:$0xff]  ;;  %v2323_v25 = vld [vmem:[#allocation6 + $0xb0] sm:$0xff] }
 0x5a3   : > { %v2390_v34 = vsel %vm502_vm6, %v2384_v26, %v2386_v28 }
 0x5a4   : > { %v2388_v32 = vpop.permute.xlu1 %2387  ;;  %2601 = vrot.lane.b32.xlu0 %v7304_v38, %s9080_s12  ;;  %2896 = vmatprep.subr.mxu0 %v2398_v29  ;;  %v2399_v1 = vmul.f32 %v2395_v33, %v2390_v34  ;;  %v2298_v34 = vld [vmem:[#allocation6 + $0x88] sm:$0xff] }
 0x5a5   : > { %v2389_v35 = vsel %vm502_vm6, %v2386_v28, %v2388_v32  ;;  %v2392_v37 = vsel %vm502_vm6, %v2388_v32, %v2382_v22 }
 0x5a6   : > { %v2397_v36 = vmul.f32 %v2393_v30, %v2392_v37  ;;  %2603 = vrot.lane.b32.xlu1 %v7306_v41, %s9080_s12  ;;  %v2358_v3 = vpop.permute.xlu0 %2357  ;;  %v2400_v40 = vmul.f32 %v2396_v31, %v2389_v35 }
 0x5a8   : > { %v2360_v2 = vpop.permute.xlu1 %2359  ;;  %2605 = vrot.lane.b32.xlu0 %v7310_v43, %s9080_s12  ;;  %2897 = vmatpush1.msra.mxu0 %v2397_v36 }
 0x5a9   : > { %v2367_v0 = vsel %vm476_vm7, %v2358_v3, %v2360_v2  ;;  %2967 = vmatprep.subr.mxu1 %v2400_v40  ;;  %v2297_v40 = vld [vmem:[#allocation6 + $0x80] sm:$0xff] }
 0x5aa   : > { %2968 = vmatpush1.msra.mxu1 %v2399_v1  ;;  %2607 = vrot.lane.b32.xlu1 %v7314_v39, %s9080_s12  ;;  %v2362_v44 = vpop.permute.xlu0 %2361  ;;  %v2374_v45 = vmul.f32 %v2370_v42, %v2367_v0  ;;  %v2300_v42 = vld [vmem:[#allocation6 + $0x98] sm:$0xff]  ;;  %v2299_v1 = vld [vmem:[#allocation6 + $0x90] sm:$0xff] }
 0x5ab   : > { %v2366_v50 = vsel %vm476_vm7, %v2360_v2, %v2362_v44 }
 0x5ac   : > { %v2364_v48 = vpop.permute.xlu1 %2363  ;;  %2577 = vrot.lane.b32.xlu0 %v7304_v38, %s9081_s11  ;;  %2898 = vmatprep.subr.mxu0 %v2374_v45  ;;  %v2375_v58 = vmul.f32 %v2371_v49, %v2366_v50  ;;  %v2274_v49 = vld [vmem:[#allocation6 + $0x68] sm:$0xff] }
 0x5ad   : > { %v2365_v51 = vsel %vm476_vm7, %v2362_v44, %v2364_v48  ;;  %v2368_v52 = vsel %vm476_vm7, %v2364_v48, %v2358_v3 }
 0x5ae   : > { %v2373_v53 = vmul.f32 %v2369_v46, %v2368_v52  ;;  %2579 = vrot.lane.b32.xlu1 %v7306_v41, %s9081_s11  ;;  %v2334_v54 = vpop.permute.xlu0 %2333  ;;  %v2376_v55 = vmul.f32 %v2372_v47, %v2365_v51 }
 0x5b0   : > { %v2336_v59 = vpop.permute.xlu1 %2335  ;;  %2581 = vrot.lane.b32.xlu0 %v7310_v43, %s9081_s11  ;;  %2899 = vmatpush1.msra.mxu0 %v2373_v53 }
 0x5b1   : > { %v2343_v60 = vsel %vm450_vm8, %v2334_v54, %v2336_v59  ;;  %2969 = vmatprep.subr.mxu1 %v2376_v55  ;;  %v2276_v55 = vld [vmem:[#allocation6 + $0x78] sm:$0xff] }
 0x5b2   : > { %2970 = vmatpush1.msra.mxu1 %v2375_v58  ;;  %2583 = vrot.lane.b32.xlu1 %v7314_v39, %s9081_s11  ;;  %v2338_v61 = vpop.permute.xlu0 %2337  ;;  %v2350_v62 = vmul.f32 %v2346_v56, %v2343_v60  ;;  %v2275_v56 = vld [vmem:[#allocation6 + $0x70] sm:$0xff] }
 0x5b3   : > { %v2342_v8 = vsel %vm450_vm8, %v2336_v59, %v2338_v61 }
 0x5b4   : > { %v2340_v6 = vpop.permute.xlu1 %2339  ;;  %2553 = vrot.lane.b32.xlu0 %v7304_v38, %s9082_s8  ;;  %2900 = vmatprep.subr.mxu0 %v2350_v62  ;;  %v2351_v17 = vmul.f32 %v2347_v7, %v2342_v8 }
 0x5b5   : > { %v2341_v9 = vsel %vm450_vm8, %v2338_v61, %v2340_v6  ;;  %v2344_v10 = vsel %vm450_vm8, %v2340_v6, %v2334_v54  ;;  %v2273_v54 = vld [vmem:[#allocation6 + $0x60] sm:$0xff]  ;;  %v2250_v6 = vld [vmem:[#allocation6 + $0x48] sm:$0xff] }
 0x5b6   : > { %v2349_v11 = vmul.f32 %v2345_v63, %v2344_v10  ;;  %2555 = vrot.lane.b32.xlu1 %v7306_v41, %s9082_s8  ;;  %v2310_v14 = vpop.permute.xlu0 %2309  ;;  %v2352_v15 = vmul.f32 %v2348_v4, %v2341_v9 }
 0x5b8   : > { %v2312_v18 = vpop.permute.xlu1 %2311  ;;  %2557 = vrot.lane.b32.xlu0 %v7310_v43, %s9082_s8  ;;  %2901 = vmatpush1.msra.mxu0 %v2349_v11  ;;  %v2249_v11 = vld [vmem:[#allocation6 + $0x40] sm:$0xff] }
 0x5b9   : > { %v2319_v19 = vsel %vm424_vm10, %v2310_v14, %v2312_v18  ;;  %2971 = vmatprep.subr.mxu1 %v2352_v15  ;;  %v2251_v15 = vld [vmem:[#allocation6 + $0x50] sm:$0xff] }
 0x5ba   : > { %2972 = vmatpush1.msra.mxu1 %v2351_v17  ;;  %2559 = vrot.lane.b32.xlu1 %v7314_v39, %s9082_s8  ;;  %v2314_v21 = vpop.permute.xlu0 %2313  ;;  %v2326_v22 = vmul.f32 %v2322_v16, %v2319_v19 }
 0x5bb   : > { %v2318_v26 = vsel %vm424_vm10, %v2312_v18, %v2314_v21 }
 0x5bc   : > { %v2316_v27 = vpop.permute.xlu1 %2315  ;;  %2876 = vperm.xlu0 %6258, %v6166_v20   ;;  %2902 = vmatprep.subr.mxu0 %v2326_v22  ;;  %v2327_v33 = vmul.f32 %v2323_v25, %v2318_v26 }
 0x5bd   : > { %v2317_v28 = vsel %vm424_vm10, %v2314_v21, %v2316_v27  ;;  %v2320_v29 = vsel %vm424_vm10, %v2316_v27, %v2310_v14  ;;  %v2252_v14 = vld [vmem:[#allocation6 + $0x58] sm:$0xff] }
 0x5be   : > { %v2325_v30 = vmul.f32 %v2321_v23, %v2320_v29  ;;  %3046 = vperm.xlu1 %6259, %v7292_v13   ;;  %v2286_v31 = vpop.permute.xlu0 %2285  ;;  %v2328_v32 = vmul.f32 %v2324_v24, %v2317_v28  ;;  %v2226_v24 = vld [vmem:[#allocation6 + $0x28] sm:$0xff]  ;;  %v2225_v29 = vld [vmem:[#allocation6 + $0x20] sm:$0xff] }
 0x5c0   : > { %v2288_v35 = vpop.permute.xlu1 %2287  ;;  %2903 = vmatpush1.msra.mxu0 %v2325_v30  ;;  %2973 = vmatprep.subr.mxu1 %v2328_v32  ;;  %v2228_v30 = vld [vmem:[#allocation6 + $0x38] sm:$0xff] }
 0x5c1   : > { %v2295_v37 = vsel %vm9141_vm12, %v2286_v31, %v2288_v35  ;;  %2974 = vmatpush1.msra.mxu1 %v2327_v33  ;;  %vm9145_vm12 = vcmp.lt.s32.totalorder %v6571_v5, 31 }
 0x5c2   : > { %v2290_v36 = vpop.permute.xlu0 %2289  ;;  %v2302_v3 = vmul.f32 %v2298_v34, %v2295_v37 }
 0x5c3   : > { %v2294_v2 = vsel %vm9142_vm13, %v2288_v35, %v2290_v36  ;;  %vm9146_vm13 = vmmov %vm9145_vm12 }
 0x5c4   : > { %v2292_v13 = vpop.permute.xlu1 %2291  ;;  %2904 = vmatprep.subr.mxu0 %v2302_v3  ;;  %v2303_v48 = vmul.f32 %v2299_v1, %v2294_v2 }
 0x5c5   : > { %v2293_v0 = vsel %vm9143_vm14, %v2290_v36, %v2292_v13  ;;  %v2296_v44 = vsel %vm9144_vm15, %v2292_v13, %v2286_v31  ;;  %vm9147_vm14 = vmmov %vm9145_vm12  ;;  %v2227_v31 = vld [vmem:[#allocation6 + $0x30] sm:$0xff] }
 0x5c6   : > { %v2301_v45 = vmul.f32 %v2297_v40, %v2296_v44  ;;  %v2262_v46 = vpop.permute.xlu0 %2261  ;;  %v2304_v47 = vmul.f32 %v2300_v42, %v2293_v0  ;;  %vm9148_vm15 = vmmov %vm9145_vm12  ;;  %v2202_v42 = vld [vmem:[#allocation6 + $0x8] sm:$0xff]  ;;  %v2201_v44 = vld [vmem:[#allocation6] sm:$0xff] }
 0x5c8   : > { %v2264_v50 = vpop.permute.xlu1 %2263  ;;  %2905 = vmatpush1.msra.mxu0 %v2301_v45  ;;  %2975 = vmatprep.subr.mxu1 %v2304_v47  ;;  %v2204_v45 = vld [vmem:[#allocation6 + $0x18] sm:$0xff] }
 0x5c9   : > { %v2271_v51 = vsel %vm9145_vm12, %v2262_v46, %v2264_v50  ;;  %2976 = vmatpush1.msra.mxu1 %v2303_v48  ;;  %vm9149_vm12 = vcmp.lt.s32.totalorder %v6571_v5, 32 }
 0x5ca   : > { %v2266_v52 = vpop.permute.xlu0 %2265  ;;  %v2278_v53 = vmul.f32 %v2274_v49, %v2271_v51 }
 0x5cb   : > { %v2270_v57 = vsel %vm9146_vm13, %v2264_v50, %v2266_v52  ;;  %vm9150_vm13 = vmmov %vm9149_vm12 }
 0x5cc   : > { %v2268_v58 = vpop.permute.xlu1 %2267  ;;  %2906 = vmatprep.subr.mxu0 %v2278_v53  ;;  %v2279_v4 = vmul.f32 %v2275_v56, %v2270_v57  ;;  %v2758_v56 = vld [vmem:[#allocation6 + $0x308] sm:$0xff]  ;;  %v2757_v57 = vld [vmem:[#allocation6 + $0x300] sm:$0xff] }
 0x5cd   : > { %v2269_v59 = vsel %vm9147_vm14, %v2266_v52, %v2268_v58  ;;  %v2272_v60 = vsel %vm9148_vm15, %v2268_v58, %v2262_v46  ;;  %vm9151_vm14 = vmmov %vm9149_vm12  ;;  %v2203_v46 = vld [vmem:[#allocation6 + $0x10] sm:$0xff] }
 0x5ce   : > { %v2277_v61 = vmul.f32 %v2273_v54, %v2272_v60  ;;  %v2238_v62 = vpop.permute.xlu0 %2237  ;;  %v2280_v63 = vmul.f32 %v2276_v55, %v2269_v59  ;;  %vm9152_vm15 = vmmov %vm9149_vm12 }
 0x5d0   : > { %v2240_v7 = vpop.permute.xlu1 %2239  ;;  %2907 = vmatpush1.msra.mxu0 %v2277_v61  ;;  %2977 = vmatprep.subr.mxu1 %v2280_v63  ;;  %v2759_v61 = vld [vmem:[#allocation6 + $0x310] sm:$0xff] }
 0x5d1   : > { %v2247_v8 = vsel %vm9149_vm12, %v2238_v62, %v2240_v7  ;;  %2978 = vmatpush1.msra.mxu1 %v2279_v4  ;;  %vm9153_vm12 = vcmp.lt.s32.totalorder %v6571_v5, 33 }
 0x5d2   : > { %v2242_v9 = vpop.permute.xlu0 %2241  ;;  %v2254_v10 = vmul.f32 %v2250_v6, %v2247_v8 }
 0x5d3   : > { %v2246_v16 = vsel %vm9150_vm13, %v2240_v7, %v2242_v9  ;;  %vm9154_vm13 = vmmov %vm9153_vm12 }
 0x5d4   : > { %v2244_v17 = vpop.permute.xlu1 %2243  ;;  %2908 = vmatprep.subr.mxu0 %v2254_v10  ;;  %v2255_v23 = vmul.f32 %v2251_v15, %v2246_v16  ;;  %v2734_v15 = vld [vmem:[#allocation6 + $0x2e8] sm:$0xff]  ;;  %v2733_v16 = vld [vmem:[#allocation6 + $0x2e0] sm:$0xff] }
 0x5d5   : > { %v2245_v18 = vsel %vm9151_vm14, %v2242_v9, %v2244_v17  ;;  %v2248_v19 = vsel %vm9152_vm15, %v2244_v17, %v2238_v62  ;;  %vm9155_vm14 = vmmov %vm9153_vm12  ;;  %v2760_v62 = vld [vmem:[#allocation6 + $0x318] sm:$0xff] }
 0x5d6   : > { %v2253_v20 = vmul.f32 %v2249_v11, %v2248_v19  ;;  %v2214_v21 = vpop.permute.xlu0 %2213  ;;  %v2256_v22 = vmul.f32 %v2252_v14, %v2245_v18  ;;  %vm9156_vm15 = vmmov %vm9153_vm12 }
 0x5d8   : > { %v2216_v25 = vpop.permute.xlu1 %2215  ;;  %2909 = vmatpush1.msra.mxu0 %v2253_v20  ;;  %2979 = vmatprep.subr.mxu1 %v2256_v22  ;;  %v2735_v20 = vld [vmem:[#allocation6 + $0x2f0] sm:$0xff] }
 0x5d9   : > { %v2223_v26 = vsel %vm9153_vm12, %v2214_v21, %v2216_v25  ;;  %2980 = vmatpush1.msra.mxu1 %v2255_v23  ;;  %vm9157_vm12 = vcmp.lt.s32.totalorder %v6571_v5, 34 }
 0x5da   : > { %v2218_v27 = vpop.permute.xlu0 %2217  ;;  %v2230_v28 = vmul.f32 %v2226_v24, %v2223_v26 }
 0x5db   : > { %v2222_v32 = vsel %vm9154_vm13, %v2216_v25, %v2218_v27  ;;  %vm9158_vm13 = vmmov %vm9157_vm12 }
 0x5dc   : > { %v2220_v33 = vpop.permute.xlu1 %2219  ;;  %2910 = vmatprep.subr.mxu0 %v2230_v28  ;;  %v2231_v40 = vmul.f32 %v2227_v31, %v2222_v32  ;;  %v2710_v31 = vld [vmem:[#allocation6 + $0x2c8] sm:$0xff]  ;;  %v2709_v32 = vld [vmem:[#allocation6 + $0x2c0] sm:$0xff] }
 0x5dd   : > { %v2221_v34 = vsel %vm9155_vm14, %v2218_v27, %v2220_v33  ;;  %v2224_v35 = vsel %vm9156_vm15, %v2220_v33, %v2214_v21  ;;  %vm9159_vm14 = vmmov %vm9157_vm12  ;;  %v2736_v21 = vld [vmem:[#allocation6 + $0x2f8] sm:$0xff] }
 0x5de   : > { %v2229_v37 = vmul.f32 %v2225_v29, %v2224_v35  ;;  %v2190_v36 = vpop.permute.xlu0 %2189  ;;  %v2232_v3 = vmul.f32 %v2228_v30, %v2221_v34  ;;  %vm9160_vm15 = vmmov %vm9157_vm12 }
 0x5e0   : > { %v2192_v1 = vpop.permute.xlu1 %2191  ;;  %2911 = vmatpush1.msra.mxu0 %v2229_v37  ;;  %2981 = vmatprep.subr.mxu1 %v2232_v3  ;;  %v2711_v37 = vld [vmem:[#allocation6 + $0x2d0] sm:$0xff] }
 0x5e1   : > { %v2199_v2 = vsel %vm9157_vm12, %v2190_v36, %v2192_v1  ;;  %2982 = vmatpush1.msra.mxu1 %v2231_v40  ;;  %vm9161_vm12 = vcmp.lt.s32.totalorder %v6571_v5, 94 }
 0x5e2   : > { %v2194_v13 = vpop.permute.xlu0 %2193  ;;  %v2206_v0 = vmul.f32 %v2202_v42, %v2199_v2 }
 0x5e3   : > { %v2198_v47 = vsel %vm9158_vm13, %v2192_v1, %v2194_v13  ;;  %vm9162_vm13 = vmmov %vm9161_vm12 }
 0x5e4   : > { %v2196_v48 = vpop.permute.xlu1 %2195  ;;  %2912 = vmatprep.subr.mxu0 %v2206_v0  ;;  %v2207_v54 = vmul.f32 %v2203_v46, %v2198_v47  ;;  %v2686_v46 = vld [vmem:[#allocation6 + $0x2a8] sm:$0xff]  ;;  %v2685_v47 = vld [vmem:[#allocation6 + $0x2a0] sm:$0xff] }
 0x5e5   : > { %v2197_v49 = vsel %vm9159_vm14, %v2194_v13, %v2196_v48  ;;  %v2200_v50 = vsel %vm9160_vm15, %v2196_v48, %v2190_v36  ;;  %vm9163_vm14 = vmmov %vm9161_vm12  ;;  %v2712_v36 = vld [vmem:[#allocation6 + $0x2d8] sm:$0xff] }
 0x5e6   : > { %v2205_v51 = vmul.f32 %v2201_v44, %v2200_v50  ;;  %v2746_v52 = vpop.permute.xlu0 %2745  ;;  %v2208_v53 = vmul.f32 %v2204_v45, %v2197_v49  ;;  %vm9164_vm15 = vmmov %vm9161_vm12 }
 0x5e8   : > { %v2748_v55 = vpop.permute.xlu1 %2747  ;;  %2913 = vmatpush1.msra.mxu0 %v2205_v51  ;;  %2983 = vmatprep.subr.mxu1 %v2208_v53  ;;  %v2687_v51 = vld [vmem:[#allocation6 + $0x2b0] sm:$0xff] }
 0x5e9   : > { %2984 = vmatpush1.msra.mxu1 %v2207_v54  ;;  %v2755_v58 = vsel %vm9161_vm12, %v2746_v52, %v2748_v55  ;;  %vm9165_vm12 = vcmp.lt.s32.totalorder %v6571_v5, 95 }
 0x5ea   : > { %v2750_v59 = vpop.permute.xlu0 %2749  ;;  %v2761_v6 = vmul.f32 %v2757_v57, %v2755_v58 }
 0x5eb   : > { %v2754_v60 = vsel %vm9162_vm13, %v2748_v55, %v2750_v59  ;;  %vm9166_vm13 = vmmov %vm9165_vm12 }
 0x5ec   : > { %v2752_v63 = vpop.permute.xlu1 %2751  ;;  %v2762_v4 = vmul.f32 %v2758_v56, %v2754_v60 }
 0x5ed   : > { %v2753_v7 = vsel %vm9163_vm14, %v2750_v59, %v2752_v63  ;;  %v2756_v8 = vsel %vm9164_vm15, %v2752_v63, %v2746_v52  ;;  %vm9167_vm14 = vmmov %vm9165_vm12  ;;  %v2688_v52 = vld [vmem:[#allocation6 + $0x2b8] sm:$0xff]  ;;  %v2661_v63 = vld [vmem:[#allocation6 + $0x280] sm:$0xff] }
 0x5ee   : > { %v2763_v9 = vmul.f32 %v2759_v61, %v2753_v7  ;;  %2928 = vmatprep.subr.mxu0 %v2762_v4  ;;  %v2722_v10 = vpop.permute.xlu0 %2721  ;;  %v2764_v11 = vmul.f32 %v2760_v62, %v2756_v8  ;;  %vm9168_vm15 = vmmov %vm9165_vm12  ;;  %v2662_v62 = vld [vmem:[#allocation6 + $0x288] sm:$0xff]  ;;  %v2663_v8 = vld [vmem:[#allocation6 + $0x290] sm:$0xff] }
 0x5ef   : > { %2929 = vmatpush2.msra.mxu0 %v2761_v6 }
 0x5f0   : > { %v2724_v14 = vpop.permute.xlu1 %2723  ;;  %2999 = vmatprep.subr.mxu1 %v2764_v11 }
 0x5f1   : > { %3000 = vmatpush2.msra.mxu1 %v2763_v9  ;;  %v2731_v17 = vsel %vm9165_vm12, %v2722_v10, %v2724_v14  ;;  %vm9169_vm12 = vcmp.lt.s32.totalorder %v6571_v5, 96  ;;  %v2664_v9 = vld [vmem:[#allocation6 + $0x298] sm:$0xff] }
 0x5f2   : > { %v2726_v18 = vpop.permute.xlu0 %2725  ;;  %v2737_v24 = vmul.f32 %v2733_v16, %v2731_v17 }
 0x5f3   : > { %v2730_v19 = vsel %vm9166_vm13, %v2724_v14, %v2726_v18  ;;  %vm9170_vm13 = vmmov %vm9169_vm12 }
 0x5f4   : > { %v2728_v22 = vpop.permute.xlu1 %2727  ;;  %v2738_v23 = vmul.f32 %v2734_v15, %v2730_v19 }
 0x5f5   : > { %v2729_v25 = vsel %vm9167_vm14, %v2726_v18, %v2728_v22  ;;  %v2732_v26 = vsel %vm9168_vm15, %v2728_v22, %v2722_v10  ;;  %vm9171_vm14 = vmmov %vm9169_vm12  ;;  %v2637_v22 = vld [vmem:[#allocation6 + $0x260] sm:$0xff] }
 0x5f6   : > { %v2739_v27 = vmul.f32 %v2735_v20, %v2729_v25  ;;  %2930 = vmatprep.subr.mxu0 %v2738_v23  ;;  %v2698_v28 = vpop.permute.xlu0 %2697  ;;  %v2740_v29 = vmul.f32 %v2736_v21, %v2732_v26  ;;  %vm9172_vm15 = vmmov %vm9169_vm12  ;;  %v2638_v21 = vld [vmem:[#allocation6 + $0x268] sm:$0xff]  ;;  %v2639_v26 = vld [vmem:[#allocation6 + $0x270] sm:$0xff] }
 0x5f7   : > { %2931 = vmatpush2.msra.mxu0 %v2737_v24 }
 0x5f8   : > { %v2700_v30 = vpop.permute.xlu1 %2699  ;;  %3001 = vmatprep.subr.mxu1 %v2740_v29 }
 0x5f9   : > { %3002 = vmatpush2.msra.mxu1 %v2739_v27  ;;  %v2707_v33 = vsel %vm9169_vm12, %v2698_v28, %v2700_v30  ;;  %vm9173_vm12 = vcmp.lt.s32.totalorder %v6571_v5, 97  ;;  %v2640_v27 = vld [vmem:[#allocation6 + $0x278] sm:$0xff] }
 0x5fa   : > { %v2702_v34 = vpop.permute.xlu0 %2701  ;;  %v2713_v42 = vmul.f32 %v2709_v32, %v2707_v33 }
 0x5fb   : > { %v2706_v35 = vsel %vm9170_vm13, %v2700_v30, %v2702_v34  ;;  %vm9174_vm13 = vmmov %vm9173_vm12 }
 0x5fc   : > { %v2704_v3 = vpop.permute.xlu1 %2703  ;;  %v2714_v40 = vmul.f32 %v2710_v31, %v2706_v35 }
 0x5fd   : > { %v2705_v1 = vsel %vm9171_vm14, %v2702_v34, %v2704_v3  ;;  %v2708_v2 = vsel %vm9172_vm15, %v2704_v3, %v2698_v28  ;;  %vm9175_vm14 = vmmov %vm9173_vm12  ;;  %v2613_v3 = vld [vmem:[#allocation6 + $0x240] sm:$0xff] }
 0x5fe   : > { %v2715_v13 = vmul.f32 %v2711_v37, %v2705_v1  ;;  %2932 = vmatprep.subr.mxu0 %v2714_v40  ;;  %v2674_v0 = vpop.permute.xlu0 %2673  ;;  %v2716_v44 = vmul.f32 %v2712_v36, %v2708_v2  ;;  %vm9176_vm15 = vmmov %vm9173_vm12  ;;  %v2614_v36 = vld [vmem:[#allocation6 + $0x248] sm:$0xff]  ;;  %v2615_v2 = vld [vmem:[#allocation6 + $0x250] sm:$0xff] }
 0x5ff   : > { %2933 = vmatpush2.msra.mxu0 %v2713_v42 }
 0x600   : > { %v2676_v45 = vpop.permute.xlu1 %2675  ;;  %3003 = vmatprep.subr.mxu1 %v2716_v44 }
 0x601   : > { %3004 = vmatpush2.msra.mxu1 %v2715_v13  ;;  %v2683_v48 = vsel %vm9173_vm12, %v2674_v0, %v2676_v45  ;;  %vm9177_vm12 = vcmp.lt.s32.totalorder %v6571_v5, 98  ;;  %v2616_v13 = vld [vmem:[#allocation6 + $0x258] sm:$0xff] }
 0x602   : > { %v2678_v49 = vpop.permute.xlu0 %2677  ;;  %v2689_v55 = vmul.f32 %v2685_v47, %v2683_v48 }
 0x603   : > { %v2682_v50 = vsel %vm9174_vm13, %v2676_v45, %v2678_v49  ;;  %vm9178_vm13 = vmmov %vm9177_vm12 }
 0x604   : > { %v2680_v53 = vpop.permute.xlu1 %2679  ;;  %v2690_v54 = vmul.f32 %v2686_v46, %v2682_v50 }
 0x605   : > { %v2681_v56 = vsel %vm9175_vm14, %v2678_v49, %v2680_v53  ;;  %v2684_v57 = vsel %vm9176_vm15, %v2680_v53, %v2674_v0  ;;  %vm9179_vm14 = vmmov %vm9177_vm12  ;;  %v2589_v53 = vld [vmem:[#allocation6 + $0x220] sm:$0xff] }
 0x606   : > { %v2691_v58 = vmul.f32 %v2687_v51, %v2681_v56  ;;  %2934 = vmatprep.subr.mxu0 %v2690_v54  ;;  %v2650_v59 = vpop.permute.xlu0 %2649  ;;  %v2692_v60 = vmul.f32 %v2688_v52, %v2684_v57  ;;  %vm9180_vm15 = vmmov %vm9177_vm12  ;;  %v2590_v52 = vld [vmem:[#allocation6 + $0x228] sm:$0xff]  ;;  %v2591_v57 = vld [vmem:[#allocation6 + $0x230] sm:$0xff] }
 0x607   : > { %2935 = vmatpush2.msra.mxu0 %v2689_v55 }
 0x608   : > { %v2652_v61 = vpop.permute.xlu1 %2651  ;;  %3005 = vmatprep.subr.mxu1 %v2692_v60 }
 0x609   : > { %3006 = vmatpush2.msra.mxu1 %v2691_v58  ;;  %v2659_v4 = vsel %vm9177_vm12, %v2650_v59, %v2652_v61  ;;  %vm9181_vm12 = vcmp.lt.s32.totalorder %v6571_v5, 110  ;;  %v2592_v58 = vld [vmem:[#allocation6 + $0x238] sm:$0xff] }
 0x60a   : > { %v2654_v6 = vpop.permute.xlu0 %2653  ;;  %v2665_v14 = vmul.f32 %v2661_v63, %v2659_v4 }
 0x60b   : > { %v2658_v7 = vsel %vm9178_vm13, %v2652_v61, %v2654_v6  ;;  %vm9182_vm13 = vmmov %vm9181_vm12 }
 0x60c   : > { %v2656_v10 = vpop.permute.xlu1 %2655  ;;  %v2666_v11 = vmul.f32 %v2662_v62, %v2658_v7 }
 0x60d   : > { %v2657_v15 = vsel %vm9179_vm14, %v2654_v6, %v2656_v10  ;;  %v2660_v16 = vsel %vm9180_vm15, %v2656_v10, %v2650_v59  ;;  %vm9183_vm14 = vmmov %vm9181_vm12  ;;  %v2565_v10 = vld [vmem:[#allocation6 + $0x200] sm:$0xff] }
 0x60e   : > { %v2667_v17 = vmul.f32 %v2663_v8, %v2657_v15  ;;  %2936 = vmatprep.subr.mxu0 %v2666_v11  ;;  %v2626_v18 = vpop.permute.xlu0 %2625  ;;  %v2668_v19 = vmul.f32 %v2664_v9, %v2660_v16  ;;  %vm9184_vm15 = vmmov %vm9181_vm12  ;;  %v2566_v9 = vld [vmem:[#allocation6 + $0x208] sm:$0xff]  ;;  %v2567_v16 = vld [vmem:[#allocation6 + $0x210] sm:$0xff] }
 0x60f   : > { %2937 = vmatpush2.msra.mxu0 %v2665_v14 }
 0x610   : > { %v2628_v20 = vpop.permute.xlu1 %2627  ;;  %3007 = vmatprep.subr.mxu1 %v2668_v19 }
 0x611   : > { %3008 = vmatpush2.msra.mxu1 %v2667_v17  ;;  %v2635_v23 = vsel %vm9181_vm12, %v2626_v18, %v2628_v20  ;;  %vm9185_vm12 = vcmp.lt.s32.totalorder %v6571_v5, 111  ;;  %v2568_v17 = vld [vmem:[#allocation6 + $0x218] sm:$0xff] }
 0x612   : > { %v2630_v24 = vpop.permute.xlu0 %2629  ;;  %v2641_v30 = vmul.f32 %v2637_v22, %v2635_v23  ;;  %v6164_v23 = vld [vmem:[%s8986_s2 + $0x20] sm:$0xff] }
 0x613   : > { %v2634_v25 = vsel %vm9182_vm13, %v2628_v20, %v2630_v24  ;;  %vm9186_vm13 = vmmov %vm9185_vm12 }
 0x614   : > { %v2632_v28 = vpop.permute.xlu1 %2631  ;;  %v2642_v29 = vmul.f32 %v2638_v21, %v2634_v25 }
 0x615   : > { %v2633_v31 = vsel %vm9183_vm14, %v2630_v24, %v2632_v28  ;;  %v2636_v32 = vsel %vm9184_vm15, %v2632_v28, %v2626_v18  ;;  %vm9187_vm14 = vmmov %vm9185_vm12  ;;  %v3029_v28 = vstv %s6169_s25  ;;  %s9198_s25 = smov 16  }
 0x616   : > { %v2643_v33 = vmul.f32 %v2639_v26, %v2633_v31  ;;  %2938 = vmatprep.subr.mxu0 %v2642_v29  ;;  %v2602_v34 = vpop.permute.xlu0 %2601  ;;  %v2644_v35 = vmul.f32 %v2640_v27, %v2636_v32  ;;  %vm9188_vm15 = vmmov %vm9185_vm12 }
 0x617   : > { %2939 = vmatpush2.msra.mxu0 %v2641_v30 }
 0x618   : > { %v2604_v37 = vpop.permute.xlu1 %2603  ;;  %3009 = vmatprep.subr.mxu1 %v2644_v35 }
 0x619   : > { %3010 = vmatpush2.msra.mxu1 %v2643_v33  ;;  %v2611_v40 = vsel %vm9185_vm12, %v2602_v34, %v2604_v37  ;;  %vm9189_vm12 = vcmp.lt.s32.totalorder %v6571_v5, 112 }
 0x61a   : > { %v2606_v42 = vpop.permute.xlu0 %2605  ;;  %v2617_v45 = vmul.f32 %v2613_v3, %v2611_v40 }
 0x61b   : > { %v2610_v1 = vsel %vm9186_vm13, %v2604_v37, %v2606_v42  ;;  %vm9190_vm13 = vmmov %vm9189_vm12 }
 0x61c   : > { %v2608_v0 = vpop.permute.xlu1 %2607  ;;  %v2618_v44 = vmul.f32 %v2614_v36, %v2610_v1 }
 0x61d   : > { %v2609_v46 = vsel %vm9187_vm14, %v2606_v42, %v2608_v0  ;;  %v2612_v47 = vsel %vm9188_vm15, %v2608_v0, %v2602_v34  ;;  %vm9191_vm14 = vmmov %vm9189_vm12 }
 0x61e   : > { %v2619_v48 = vmul.f32 %v2615_v2, %v2609_v46  ;;  %2940 = vmatprep.subr.mxu0 %v2618_v44  ;;  %v2578_v49 = vpop.permute.xlu0 %2577  ;;  %v2620_v50 = vmul.f32 %v2616_v13, %v2612_v47  ;;  %vm9192_vm15 = vmmov %vm9189_vm12  ;;  %v3042_v44 = vld [vmem:[%s8988_s4] sm:$0xff] }
 0x61f   : > { %2941 = vmatpush2.msra.mxu0 %v2617_v45 }
 0x620   : > { %v2580_v51 = vpop.permute.xlu1 %2579  ;;  %3011 = vmatprep.subr.mxu1 %v2620_v50 }
 0x621   : > { %3012 = vmatpush2.msra.mxu1 %v2619_v48  ;;  %v2587_v54 = vsel %vm9189_vm12, %v2578_v49, %v2580_v51  ;;  %vm9193_vm12 = vcmp.lt.s32.totalorder %v6571_v5, 113 }
 0x622   : > { %v2582_v55 = vpop.permute.xlu0 %2581  ;;  %v2593_v61 = vmul.f32 %v2589_v53, %v2587_v54 }
 0x623   : > { %v2586_v56 = vsel %vm9190_vm13, %v2580_v51, %v2582_v55  ;;  %vm9194_vm13 = vmmov %vm9193_vm12 }
 0x624   : > { %v2584_v59 = vpop.permute.xlu1 %2583  ;;  %v2594_v60 = vmul.f32 %v2590_v52, %v2586_v56  ;;  %v3546_v56 = vld [vmem:[#allocation6 + $0x1e0] sm:$0xff] }
 0x625   : > { %v2585_v62 = vsel %vm9191_vm14, %v2582_v55, %v2584_v59  ;;  %v2588_v63 = vsel %vm9192_vm15, %v2584_v59, %v2578_v49  ;;  %vm9195_vm14 = vmmov %vm9193_vm12  ;;  %v3547_v55 = vld [vmem:[#allocation6 + $0x1e8] sm:$0xff] }
 0x626   : > { %v2595_v4 = vmul.f32 %v2591_v57, %v2585_v62  ;;  %2942 = vmatprep.subr.mxu0 %v2594_v60  ;;  %v2554_v6 = vpop.permute.xlu0 %2553  ;;  %v2596_v7 = vmul.f32 %v2592_v58, %v2588_v63  ;;  %vm9196_vm15 = vmmov %vm9193_vm12  ;;  %v3548_v60 = vld [vmem:[#allocation6 + $0x1f0] sm:$0xff] }
 0x627   : > { %2943 = vmatpush2.msra.mxu0 %v2593_v61  ;;  %v3549_v61 = vld [vmem:[#allocation6 + $0x1f8] sm:$0xff] }
 0x628   : > { %v2556_v8 = vpop.permute.xlu1 %2555  ;;  %3013 = vmatprep.subr.mxu1 %v2596_v7 }
 0x629   : > { %3014 = vmatpush2.msra.mxu1 %v2595_v4  ;;  %v2563_v11 = vsel %vm9193_vm12, %v2554_v6, %v2556_v8 }
 0x62a   : > { %v2558_v14 = vpop.permute.xlu0 %2557  ;;  %v2569_v20 = vmul.f32 %v2565_v10, %v2563_v11 }
 0x62b   : > { %v2562_v15 = vsel %vm9194_vm13, %v2556_v8, %v2558_v14 }
 0x62c   : > { %v2560_v18 = vpop.permute.xlu1 %2559  ;;  %v2570_v19 = vmul.f32 %v2566_v9, %v2562_v15  ;;  %v3522_v15 = vld [vmem:[#allocation6 + $0x1c0] sm:$0xff] }
 0x62d   : > { %v2561_v21 = vsel %vm9195_vm14, %v2558_v14, %v2560_v18  ;;  %v2564_v22 = vsel %vm9196_vm15, %v2560_v18, %v2554_v6  ;;  %v3523_v14 = vld [vmem:[#allocation6 + $0x1c8] sm:$0xff] }
 0x62e   : > { %v2571_v24 = vmul.f32 %v2567_v16, %v2561_v21  ;;  %2944 = vmatprep.subr.mxu0 %v2570_v19  ;;  %v2572_v25 = vmul.f32 %v2568_v17, %v2564_v22  ;;  %v3524_v19 = vld [vmem:[#allocation6 + $0x1d0] sm:$0xff] }
 0x62f   : > { %2945 = vmatpush2.msra.mxu0 %v2569_v20  ;;  %v3525_v20 = vld [vmem:[#allocation6 + $0x1d8] sm:$0xff] }
 0x630   : > { %2947 = vmatmul.mubr.f32.vlgmr.msra.gmra.mxu0 %v6164_v23  ;;  %3015 = vmatprep.subr.mxu1 %v2572_v25 }
 0x631   : > { %3016 = vmatpush2.msra.mxu1 %v2571_v24  ;;  %3116 = vmatprep.mubr.f32.mxu0 %v6350_v12 }
 0x632   : > { %3018 = vmatmul.mubr.f32.vlgmr.msra.gmra.mxu1 %v6164_v23 }
 0x633   : > { %3187 = vmatprep.mubr.f32.mxu1 %v6350_v12 }
 0x637   : > { %v2877_v26 = vpop.permute.xlu0 %2876 }
 0x6f0   : > { %v2948_v27 = vpop.f32.mrf.mxu0 }
 0x6f1   : > { %v2949_v29 = vadd.f32 %v2948_v27, %v2877_v26 }
 0x6f2   : > { %v2950_v30 = vpop.f32.mrf.mxu0  ;;  %v3019_v31 = vpop.f32.mrf.mxu1 }
 0x6f3   : > { %vm3025_vm12 = vcmp.ge.f32.partialorder %v2949_v29, 0.0  ;;  %v3030_v32 = vmul.f32 %v3029_v28, %v2949_v29  ;;  %v2951_v33 = vadd.f32 %v2950_v30, %v2877_v26  ;;  %v3020_v34 = vadd.f32 %v3019_v31, %v2877_v26  ;;  %v3499_v30 = vld [vmem:[#allocation6 + $0x1a8] sm:$0xff]  ;;  %v3498_v31 = vld [vmem:[#allocation6 + $0x1a0] sm:$0xff] }
 0x6f4   : > { %v3021_v35 = vpop.f32.mrf.mxu1 }
 0x6f5   : > { %vm3026_vm13 = vcmp.ge.f32.partialorder %v2951_v33, 0.0  ;;  %v3031_v37 = vmul.f32 %v3029_v28, %v2951_v33  ;;  %v3034_v36 = vsel %vm3025_vm12, %v2949_v29, %v3030_v32  ;;  %vm3027_vm14 = vcmp.ge.f32.partialorder %v3020_v34, 0.0 }
 0x6f6   : > { %v3032_v3 = vmul.f32 %v3029_v28, %v3020_v34  ;;  %v3022_v40 = vadd.f32 %v3021_v35, %v2877_v26  ;;  %v3038_v13 = vadd.f32 %v3034_v36, %v7304_v38  ;;  %v3500_v35 = vld [vmem:[#allocation6 + $0x1b0] sm:$0xff]  ;;  %vm9203_vm12 = vcmp.lt.s32.totalorder %v6571_v5, 30 }
 0x6f7   : > { %v3035_v42 = vsel %vm3026_vm13, %v2951_v33, %v3031_v37  ;;  %v3501_v37 = vld [vmem:[#allocation6 + $0x1b8] sm:$0xff]  ;;  %vm9204_vm13 = vmmov %vm9203_vm12 }
 0x6f8   : > { %vm3028_vm15 = vcmp.ge.f32.partialorder %v3022_v40, 0.0  ;;  %v3033_v1 = vmul.f32 %v3029_v28, %v3022_v40  ;;  %v3039_v2 = vadd.f32 %v3035_v42, %v7306_v41  ;;  %v3036_v0 = vsel %vm3027_vm14, %v3020_v34, %v3032_v3  ;;  %v3047_v41 = vpop.permute.xlu1 %3046  ;;  %vm9205_vm14 = vmmov %vm9203_vm12 }
 0x6f9   : > { %v3040_v47 = vadd.f32 %v3036_v0, %v7310_v43 }
 0x6fa   : > { %3082 = vmatprep.subr.mxu0 %v3039_v2  ;;  %v3037_v45 = vsel %vm3028_vm15, %v3022_v40, %v3033_v1  ;;  %vm9206_vm15 = vmmov %vm9203_vm12 }
 0x6fb   : > { %3083 = vmatpush1.msra.mxu0 %v3038_v13  ;;  %v3041_v46 = vadd.f32 %v3037_v45, %v7314_v39 }
 0x6fc   : > { %6171 = vmatmul.mubr.msk.f32.vlgmr.msra.gmra.mxu0 %vm2043_vm11, %v3042_v44 }
 0x6fd   : > { %3153 = vmatprep.subr.mxu1 %v3041_v46 }
 0x6fe   : > { %3154 = vmatpush1.msra.mxu1 %v3040_v47 }
 0x6ff   : > { %6172 = vmatmul.mubr.msk.f32.vlgmr.msra.gmra.mxu1 %vm2043_vm11, %v3042_v44  ;;  %v3471_v44 = vld [vmem:[#allocation6 + $0x168] sm:$0xff] }
 0x7bc   : > { %v3118_v38 = vpop.f32.mrf.mxu0 }
 0x7bd   : > { %v7723_v48 = vadd.f32 %v3118_v38, %v3047_v41  ;;  %v3470_v38 = vld [vmem:[#allocation6 + $0x160] sm:$0xff] }
 0x7be   : > { %v3120_v49 = vpop.f32.mrf.mxu0 }
 0x7bf   : > { %v7725_v50 = vadd.f32 %v3120_v49, %v3047_v41  ;;  %v3189_v51 = vpop.f32.mrf.mxu1  ;;  %3534 = vrot.lane.b32.xlu0 %v7723_v48, %s9054_s17  ;;  %v3473_v49 = vld [vmem:[#allocation6 + $0x178] sm:$0xff] }
 0x7c0   : > { %v7729_v39 = vadd.f32 %v3189_v51, %v3047_v41 }
 0x7c1   : > { %v3191_v43 = vpop.f32.mrf.mxu1  ;;  %3536 = vrot.lane.b32.xlu1 %v7725_v50, %s9054_s17 }
 0x7c2   : > { %v7733_v52 = vadd.f32 %v3191_v43, %v3047_v41  ;;  %v3472_v43 = vld [vmem:[#allocation6 + $0x170] sm:$0xff] }
 0x7c3   : > { %3538 = vrot.lane.b32.xlu0 %v7729_v39, %s9054_s17 }
 0x7c5   : > { %3540 = vrot.lane.b32.xlu1 %v7733_v52, %s9054_s17  ;;  %s9259_s17 = smov 114  }
 0x7c7   : > { %3510 = vrot.lane.b32.xlu0 %v7723_v48, %s9052_s18 }
 0x7c9   : > { %3512 = vrot.lane.b32.xlu1 %v7725_v50, %s9052_s18 }
 0x7cb   : > { %3514 = vrot.lane.b32.xlu0 %v7729_v39, %s9052_s18 }
 0x7cd   : > { %3516 = vrot.lane.b32.xlu1 %v7733_v52, %s9052_s18  ;;  %s6178_s18 = sld [smem:[#allocation3 + $0x3]] }
 0x7cf   : > { %3486 = vrot.lane.b32.xlu0 %v7723_v48, %s9050_s19 }
 0x7d1   : > { %3488 = vrot.lane.b32.xlu1 %v7725_v50, %s9050_s19 }
 0x7d3   : > { %3490 = vrot.lane.b32.xlu0 %v7729_v39, %s9050_s19 }
 0x7d5   : > { %3492 = vrot.lane.b32.xlu1 %v7733_v52, %s9050_s19  ;;  %s9261_s19 = smov 127  }
 0x7d7   : > { %3458 = vrot.lane.b32.xlu0 %v7723_v48, %s9048_s20 }
 0x7d9   : > { %3460 = vrot.lane.b32.xlu1 %v7725_v50, %s9048_s20 }
 0x7db   : > { %3462 = vrot.lane.b32.xlu0 %v7729_v39, %s9048_s20 }
 0x7dd   : > { %3464 = vrot.lane.b32.xlu1 %v7733_v52, %s9048_s20  ;;  %s9202_s20 = smov 31  }
 0x7df   : > { %3434 = vrot.lane.b32.xlu0 %v7723_v48, %s9046_s23 }
 0x7e1   : > { %3436 = vrot.lane.b32.xlu1 %v7725_v50, %s9046_s23 }
 0x7e3   : > { %3438 = vrot.lane.b32.xlu0 %v7729_v39, %s9046_s23 }
 0x7e5   : > { %3440 = vrot.lane.b32.xlu1 %v7733_v52, %s9046_s23  ;;  %s9201_s23 = smov 30  }
 0x7e7   : > { %3410 = vrot.lane.b32.xlu0 %v7723_v48, %s9044_s24 }
 0x7e9   : > { %3412 = vrot.lane.b32.xlu1 %v7725_v50, %s9044_s24 }
 0x7eb   : > { %3414 = vrot.lane.b32.xlu0 %v7729_v39, %s9044_s24 }
 0x7ed   : > { %3416 = vrot.lane.b32.xlu1 %v7733_v52, %s9044_s24  ;;  %s9200_s24 = smov 18  }
 0x7ef   : > { %3386 = vrot.lane.b32.xlu0 %v7723_v48, %s9197_s27 }
 0x7f1   : > { %3388 = vrot.lane.b32.xlu1 %v7725_v50, %s9197_s27 }
 0x7f3   : > { %3390 = vrot.lane.b32.xlu0 %v7729_v39, %s9197_s27 }
 0x7f5   : > { %3392 = vrot.lane.b32.xlu1 %v7733_v52, %s9197_s27 }
 0x7f7   : > { %3362 = vrot.lane.b32.xlu0 %v7723_v48, %s9198_s25 }
 0x7f9   : > { %3364 = vrot.lane.b32.xlu1 %v7725_v50, %s9198_s25 }
 0x7fb   : > { %3366 = vrot.lane.b32.xlu0 %v7729_v39, %s9198_s25 }
 0x7fd   : > { %3368 = vrot.lane.b32.xlu1 %v7733_v52, %s9198_s25 }
 0x7ff   : > { %3338 = vrot.lane.b32.xlu0 %v7723_v48, %s9199_s26 }
 0x801   : > { %3340 = vrot.lane.b32.xlu1 %v7725_v50, %s9199_s26 }
 0x803   : > { %3342 = vrot.lane.b32.xlu0 %v7729_v39, %s9199_s26 }
 0x805   : > { %3344 = vrot.lane.b32.xlu1 %v7733_v52, %s9199_s26 }
 0x807   : > { %3314 = vrot.lane.b32.xlu0 %v7723_v48, %s9200_s24 }
 0x809   : > { %3316 = vrot.lane.b32.xlu1 %v7725_v50, %s9200_s24 }
 0x80b   : > { %3318 = vrot.lane.b32.xlu0 %v7729_v39, %s9200_s24 }
 0x80d   : > { %3320 = vrot.lane.b32.xlu1 %v7733_v52, %s9200_s24 }
 0x80f   : > { %3290 = vrot.lane.b32.xlu0 %v7723_v48, %s9201_s23 }
 0x811   : > { %3292 = vrot.lane.b32.xlu1 %v7725_v50, %s9201_s23 }
 0x813   : > { %3294 = vrot.lane.b32.xlu0 %v7729_v39, %s9201_s23 }
 0x815   : > { %3296 = vrot.lane.b32.xlu1 %v7733_v52, %s9201_s23 }
 0x817   : > { %3266 = vrot.lane.b32.xlu0 %v7723_v48, %s9202_s20 }
 0x819   : > { %3268 = vrot.lane.b32.xlu1 %v7725_v50, %s9202_s20 }
 0x81b   : > { %3270 = vrot.lane.b32.xlu0 %v7729_v39, %s9202_s20 }
 0x81d   : > { %3272 = vrot.lane.b32.xlu1 %v7733_v52, %s9202_s20 }
 0x81f   : > { %3242 = vrot.lane.b32.xlu0 %v7723_v48, %s9135_s10 }
 0x821   : > { %3244 = vrot.lane.b32.xlu1 %v7725_v50, %s9135_s10 }
 0x823   : > { %3246 = vrot.lane.b32.xlu0 %v7729_v39, %s9135_s10 }
 0x825   : > { %3248 = vrot.lane.b32.xlu1 %v7733_v52, %s9135_s10 }
 0x827   : > { %3218 = vrot.lane.b32.xlu0 %v7723_v48, %s9136_s7 }
 0x829   : > { %3220 = vrot.lane.b32.xlu1 %v7725_v50, %s9136_s7 }
 0x82b   : > { %3222 = vrot.lane.b32.xlu0 %v7729_v39, %s9136_s7 }
 0x82d   : > { %3224 = vrot.lane.b32.xlu1 %v7733_v52, %s9136_s7 }
 0x82f   : > { %3194 = vrot.lane.b32.xlu0 %v7723_v48, %s9137_s9 }
 0x831   : > { %3196 = vrot.lane.b32.xlu1 %v7725_v50, %s9137_s9  ;;  %v3535_v53 = vpop.permute.xlu0 %3534 }
 0x833   : > { %v3537_v54 = vpop.permute.xlu1 %3536  ;;  %3198 = vrot.lane.b32.xlu0 %v7729_v39, %s9137_s9 }
 0x834   : > { %v3544_v57 = vsel %vm662_vm0, %v3535_v53, %v3537_v54 }
 0x835   : > { %3200 = vrot.lane.b32.xlu1 %v7733_v52, %s9137_s9  ;;  %v3539_v58 = vpop.permute.xlu0 %3538  ;;  %v3550_v4 = vmul.f32 %v3546_v56, %v3544_v57 }
 0x836   : > { %v3543_v59 = vsel %vm662_vm0, %v3537_v54, %v3539_v58 }
 0x837   : > { %v3541_v62 = vpop.permute.xlu1 %3540  ;;  %3750 = vrot.lane.b32.xlu0 %v7723_v48, %s9138_s30  ;;  %v3551_v63 = vmul.f32 %v3547_v55, %v3543_v59  ;;  %v3447_v59 = vld [vmem:[#allocation6 + $0x148] sm:$0xff] }
 0x838   : > { %v3542_v6 = vsel %vm662_vm0, %v3539_v58, %v3541_v62  ;;  %v3545_v7 = vsel %vm662_vm0, %v3541_v62, %v3535_v53 }
 0x839   : > { %v3552_v8 = vmul.f32 %v3548_v60, %v3542_v6  ;;  %3752 = vrot.lane.b32.xlu1 %v7725_v50, %s9138_s30  ;;  %3887 = vmatprep.subr.mxu0 %v3551_v63  ;;  %v3511_v9 = vpop.permute.xlu0 %3510  ;;  %v3553_v10 = vmul.f32 %v3549_v61, %v3545_v7  ;;  %v3446_v6 = vld [vmem:[#allocation6 + $0x140] sm:$0xff]  ;;  %v3449_v7 = vld [vmem:[#allocation6 + $0x158] sm:$0xff] }
 0x83a   : > { %3888 = vmatpush1.msra.mxu0 %v3550_v4 }
 0x83b   : > { %v3513_v11 = vpop.permute.xlu1 %3512  ;;  %3754 = vrot.lane.b32.xlu0 %v7729_v39, %s9138_s30  ;;  %3958 = vmatprep.subr.mxu1 %v3553_v10 }
 0x83c   : > { %3959 = vmatpush1.msra.mxu1 %v3552_v8  ;;  %v3520_v16 = vsel %vm636_vm1, %v3511_v9, %v3513_v11 }
 0x83d   : > { %3756 = vrot.lane.b32.xlu1 %v7733_v52, %s9138_s30  ;;  %v3515_v17 = vpop.permute.xlu0 %3514  ;;  %v3526_v23 = vmul.f32 %v3522_v15, %v3520_v16 }
 0x83e   : > { %v3519_v18 = vsel %vm636_vm1, %v3513_v11, %v3515_v17 }
 0x83f   : > { %v3517_v21 = vpop.permute.xlu1 %3516  ;;  %3726 = vrot.lane.b32.xlu0 %v7723_v48, %s9139_s29  ;;  %v3527_v22 = vmul.f32 %v3523_v14, %v3519_v18  ;;  %v3423_v18 = vld [vmem:[#allocation6 + $0x128] sm:$0xff] }
 0x840   : > { %v3518_v24 = vsel %vm636_vm1, %v3515_v17, %v3517_v21  ;;  %v3521_v25 = vsel %vm636_vm1, %v3517_v21, %v3511_v9  ;;  %v3448_v9 = vld [vmem:[#allocation6 + $0x150] sm:$0xff] }
 0x841   : > { %v3528_v26 = vmul.f32 %v3524_v19, %v3518_v24  ;;  %3728 = vrot.lane.b32.xlu1 %v7725_v50, %s9139_s29  ;;  %3889 = vmatprep.subr.mxu0 %v3527_v22  ;;  %v3487_v27 = vpop.permute.xlu0 %3486  ;;  %v3529_v28 = vmul.f32 %v3525_v20, %v3521_v25  ;;  %v3422_v24 = vld [vmem:[#allocation6 + $0x120] sm:$0xff]  ;;  %v3425_v25 = vld [vmem:[#allocation6 + $0x138] sm:$0xff] }
 0x842   : > { %3890 = vmatpush1.msra.mxu0 %v3526_v23 }
 0x843   : > { %v3489_v29 = vpop.permute.xlu1 %3488  ;;  %3730 = vrot.lane.b32.xlu0 %v7729_v39, %s9139_s29  ;;  %3960 = vmatprep.subr.mxu1 %v3529_v28 }
 0x844   : > { %3961 = vmatpush1.msra.mxu1 %v3528_v26  ;;  %v3496_v32 = vsel %vm610_vm2, %v3487_v27, %v3489_v29 }
 0x845   : > { %3732 = vrot.lane.b32.xlu1 %v7733_v52, %s9139_s29  ;;  %v3491_v33 = vpop.permute.xlu0 %3490  ;;  %v3502_v40 = vmul.f32 %v3498_v31, %v3496_v32 }
 0x846   : > { %v3495_v34 = vsel %vm610_vm2, %v3489_v29, %v3491_v33 }
 0x847   : > { %v3493_v36 = vpop.permute.xlu1 %3492  ;;  %3702 = vrot.lane.b32.xlu0 %v7723_v48, %s9140_s28  ;;  %v3503_v3 = vmul.f32 %v3499_v30, %v3495_v34  ;;  %v3399_v34 = vld [vmem:[#allocation6 + $0x108] sm:$0xff] }
 0x848   : > { %v3494_v42 = vsel %vm610_vm2, %v3491_v33, %v3493_v36  ;;  %v3497_v1 = vsel %vm610_vm2, %v3493_v36, %v3487_v27  ;;  %v3424_v27 = vld [vmem:[#allocation6 + $0x130] sm:$0xff] }
 0x849   : > { %v3504_v2 = vmul.f32 %v3500_v35, %v3494_v42  ;;  %3704 = vrot.lane.b32.xlu1 %v7725_v50, %s9140_s28  ;;  %3891 = vmatprep.subr.mxu0 %v3503_v3  ;;  %v3459_v13 = vpop.permute.xlu0 %3458  ;;  %v3505_v0 = vmul.f32 %v3501_v37, %v3497_v1  ;;  %v3398_v42 = vld [vmem:[#allocation6 + $0x100] sm:$0xff]  ;;  %v3401_v1 = vld [vmem:[#allocation6 + $0x118] sm:$0xff] }
 0x84a   : > { %3892 = vmatpush1.msra.mxu0 %v3502_v40 }
 0x84b   : > { %v3461_v45 = vpop.permute.xlu1 %3460  ;;  %3706 = vrot.lane.b32.xlu0 %v7729_v39, %s9140_s28  ;;  %3893 = vmatprep.subr.mxu0 %v7725_v50 }
 0x84c   : > { %v3468_v46 = vsel %vm580_vm3, %v3459_v13, %v3461_v45  ;;  %3962 = vmatprep.subr.mxu1 %v3505_v0  ;;  %3894 = vmatpush1.msra.mxu0 %v7723_v48 }
 0x84d   : > { %3963 = vmatpush1.msra.mxu1 %v3504_v2  ;;  %3708 = vrot.lane.b32.xlu1 %v7733_v52, %s9140_s28  ;;  %v3463_v47 = vpop.permute.xlu0 %3462  ;;  %v3475_v41 = vmul.f32 %v3471_v44, %v3468_v46 }
 0x84e   : > { %3964 = vmatprep.subr.mxu1 %v7733_v52  ;;  %v3467_v53 = vsel %vm580_vm3, %v3461_v45, %v3463_v47 }
 0x84f   : > { %3965 = vmatpush1.msra.mxu1 %v7729_v39  ;;  %v3465_v51 = vpop.permute.xlu1 %3464  ;;  %3678 = vrot.lane.b32.xlu0 %v7723_v48, %s9077_s14  ;;  %v3476_v60 = vmul.f32 %v3472_v43, %v3467_v53 }
 0x850   : > { %v3466_v54 = vsel %vm580_vm3, %v3463_v47, %v3465_v51  ;;  %v3469_v55 = vsel %vm580_vm3, %v3465_v51, %v3459_v13  ;;  %3895 = vmatprep.subr.mxu0 %v3475_v41  ;;  %v3400_v13 = vld [vmem:[#allocation6 + $0x110] sm:$0xff] }
 0x851   : > { %v3474_v56 = vmul.f32 %v3470_v38, %v3469_v55  ;;  %3680 = vrot.lane.b32.xlu1 %v7725_v50, %s9077_s14  ;;  %v3435_v57 = vpop.permute.xlu0 %3434  ;;  %v3477_v58 = vmul.f32 %v3473_v49, %v3466_v54  ;;  %v3375_v38 = vld [vmem:[#allocation6 + $0xe8] sm:$0xff]  ;;  %v3374_v55 = vld [vmem:[#allocation6 + $0xe0] sm:$0xff] }
 0x853   : > { %v3437_v61 = vpop.permute.xlu1 %3436  ;;  %3682 = vrot.lane.b32.xlu0 %v7729_v39, %s9077_s14  ;;  %3896 = vmatpush1.msra.mxu0 %v3474_v56  ;;  %v3377_v56 = vld [vmem:[#allocation6 + $0xf8] sm:$0xff] }
 0x854   : > { %v3444_v62 = vsel %vm554_vm4, %v3435_v57, %v3437_v61  ;;  %3966 = vmatprep.subr.mxu1 %v3477_v58  ;;  %v3376_v58 = vld [vmem:[#allocation6 + $0xf0] sm:$0xff] }
 0x855   : > { %3967 = vmatpush1.msra.mxu1 %v3476_v60  ;;  %3684 = vrot.lane.b32.xlu1 %v7733_v52, %s9077_s14  ;;  %v3439_v63 = vpop.permute.xlu0 %3438  ;;  %v3451_v4 = vmul.f32 %v3447_v59, %v3444_v62 }
 0x856   : > { %v3443_v10 = vsel %vm554_vm4, %v3437_v61, %v3439_v63 }
 0x857   : > { %v3441_v8 = vpop.permute.xlu1 %3440  ;;  %3654 = vrot.lane.b32.xlu0 %v7723_v48, %s9078_s13  ;;  %3897 = vmatprep.subr.mxu0 %v3451_v4  ;;  %v3452_v19 = vmul.f32 %v3448_v9, %v3443_v10 }
 0x858   : > { %v3442_v11 = vsel %vm554_vm4, %v3439_v63, %v3441_v8  ;;  %v3445_v14 = vsel %vm554_vm4, %v3441_v8, %v3435_v57 }
 0x859   : > { %v3450_v15 = vmul.f32 %v3446_v6, %v3445_v14  ;;  %3656 = vrot.lane.b32.xlu1 %v7725_v50, %s9078_s13  ;;  %v3411_v16 = vpop.permute.xlu0 %3410  ;;  %v3453_v17 = vmul.f32 %v3449_v7, %v3442_v11  ;;  %v3351_v6 = vld [vmem:[#allocation6 + $0xc8] sm:$0xff]  ;;  %v6174_v7 = vld [vmem:[%s8986_s2 + $0x38] sm:$0xff] }
 0x85a   : > { %6176 = vmatprep.mubr.msk.f32.mxu0 %vm1022_vm9, %v6174_v7  ;;  %6177 = vmatprep.mubr.msk.f32.mxu1 %vm1022_vm9, %v6174_v7  ;;  %v3280_v7 = vld [vmem:[#allocation6 + $0x70] sm:$0xff] }
 0x85b   : > { %v3413_v20 = vpop.permute.xlu1 %3412  ;;  %3658 = vrot.lane.b32.xlu0 %v7729_v39, %s9078_s13  ;;  %3898 = vmatpush1.msra.mxu0 %v3450_v15  ;;  %v3350_v15 = vld [vmem:[#allocation6 + $0xc0] sm:$0xff] }
 0x85c   : > { %v3420_v21 = vsel %vm528_vm5, %v3411_v16, %v3413_v20  ;;  %3968 = vmatprep.subr.mxu1 %v3453_v17 }
 0x85d   : > { %3969 = vmatpush1.msra.mxu1 %v3452_v19  ;;  %3660 = vrot.lane.b32.xlu1 %v7733_v52, %s9078_s13  ;;  %v3415_v22 = vpop.permute.xlu0 %3414  ;;  %v3427_v23 = vmul.f32 %v3423_v18, %v3420_v21  ;;  %v3352_v18 = vld [vmem:[#allocation6 + $0xd0] sm:$0xff] }
 0x85e   : > { %v3419_v28 = vsel %vm528_vm5, %v3413_v20, %v3415_v22 }
 0x85f   : > { %v3417_v26 = vpop.permute.xlu1 %3416  ;;  %3630 = vrot.lane.b32.xlu0 %v7723_v48, %s9079_s15  ;;  %3899 = vmatprep.subr.mxu0 %v3427_v23  ;;  %v3428_v35 = vmul.f32 %v3424_v27, %v3419_v28 }
 0x860   : > { %v3418_v29 = vsel %vm528_vm5, %v3415_v22, %v3417_v26  ;;  %v3421_v30 = vsel %vm528_vm5, %v3417_v26, %v3411_v16  ;;  %v3353_v16 = vld [vmem:[#allocation6 + $0xd8] sm:$0xff] }
 0x861   : > { %v3426_v31 = vmul.f32 %v3422_v24, %v3421_v30  ;;  %3632 = vrot.lane.b32.xlu1 %v7725_v50, %s9079_s15  ;;  %v3387_v32 = vpop.permute.xlu0 %3386  ;;  %v3429_v33 = vmul.f32 %v3425_v25, %v3418_v29  ;;  %v3327_v25 = vld [vmem:[#allocation6 + $0xa8] sm:$0xff]  ;;  %v6175_v29 = vld [vmem:[%s8987_s3 + $0x18] sm:$0xff] }
 0x863   : > { %v3389_v37 = vpop.permute.xlu1 %3388  ;;  %3634 = vrot.lane.b32.xlu0 %v7729_v39, %s9079_s15  ;;  %3900 = vmatpush1.msra.mxu0 %v3426_v31 }
 0x864   : > { %v3396_v36 = vsel %vm502_vm6, %v3387_v32, %v3389_v37  ;;  %3970 = vmatprep.subr.mxu1 %v3429_v33  ;;  %v6179_v33 = vld [vmem:[%s8987_s3 + $0x30] sm:$0xff] }
 0x865   : > { %3971 = vmatpush1.msra.mxu1 %v3428_v35  ;;  %3636 = vrot.lane.b32.xlu1 %v7733_v52, %s9079_s15  ;;  %v3391_v3 = vpop.permute.xlu0 %3390  ;;  %v3403_v40 = vmul.f32 %v3399_v34, %v3396_v36  ;;  %v3329_v34 = vld [vmem:[#allocation6 + $0xb8] sm:$0xff]  ;;  %v3328_v35 = vld [vmem:[#allocation6 + $0xb0] sm:$0xff] }
 0x866   : > { %v3395_v0 = vsel %vm502_vm6, %v3389_v37, %v3391_v3 }
 0x867   : > { %v3393_v2 = vpop.permute.xlu1 %3392  ;;  %3606 = vrot.lane.b32.xlu0 %v7723_v48, %s9080_s12  ;;  %3901 = vmatprep.subr.mxu0 %v3403_v40  ;;  %v3404_v49 = vmul.f32 %v3400_v13, %v3395_v0  ;;  %v3303_v0 = vld [vmem:[#allocation6 + $0x88] sm:$0xff] }
 0x868   : > { %v3394_v44 = vsel %vm502_vm6, %v3391_v3, %v3393_v2  ;;  %v3397_v45 = vsel %vm502_vm6, %v3393_v2, %v3387_v32  ;;  %v3326_v32 = vld [vmem:[#allocation6 + $0xa0] sm:$0xff] }
 0x869   : > { %v3402_v46 = vmul.f32 %v3398_v42, %v3397_v45  ;;  %3608 = vrot.lane.b32.xlu1 %v7725_v50, %s9080_s12  ;;  %v3363_v47 = vpop.permute.xlu0 %3362  ;;  %v3405_v41 = vmul.f32 %v3401_v1, %v3394_v44 }
 0x86b   : > { %v3365_v51 = vpop.permute.xlu1 %3364  ;;  %3610 = vrot.lane.b32.xlu0 %v7729_v39, %s9080_s12  ;;  %3902 = vmatpush1.msra.mxu0 %v3402_v46 }
 0x86c   : > { %v3372_v43 = vsel %vm476_vm7, %v3363_v47, %v3365_v51  ;;  %3972 = vmatprep.subr.mxu1 %v3405_v41  ;;  %v3302_v41 = vld [vmem:[#allocation6 + $0x80] sm:$0xff] }
 0x86d   : > { %3973 = vmatpush1.msra.mxu1 %v3404_v49  ;;  %3612 = vrot.lane.b32.xlu1 %v7733_v52, %s9080_s12  ;;  %v3367_v53 = vpop.permute.xlu0 %3366  ;;  %v3379_v54 = vmul.f32 %v3375_v38, %v3372_v43  ;;  %v3305_v38 = vld [vmem:[#allocation6 + $0x98] sm:$0xff]  ;;  %v3304_v49 = vld [vmem:[#allocation6 + $0x90] sm:$0xff] }
 0x86e   : > { %v3371_v59 = vsel %vm476_vm7, %v3365_v51, %v3367_v53 }
 0x86f   : > { %v3369_v57 = vpop.permute.xlu1 %3368  ;;  %3582 = vrot.lane.b32.xlu0 %v7723_v48, %s9081_s11  ;;  %3903 = vmatprep.subr.mxu0 %v3379_v54  ;;  %v3380_v8 = vmul.f32 %v3376_v58, %v3371_v59  ;;  %v3279_v59 = vld [vmem:[#allocation6 + $0x68] sm:$0xff] }
 0x870   : > { %v3370_v60 = vsel %vm476_vm7, %v3367_v53, %v3369_v57  ;;  %v3373_v61 = vsel %vm476_vm7, %v3369_v57, %v3363_v47 }
 0x871   : > { %v3378_v62 = vmul.f32 %v3374_v55, %v3373_v61  ;;  %3584 = vrot.lane.b32.xlu1 %v7725_v50, %s9081_s11  ;;  %v3339_v63 = vpop.permute.xlu0 %3338  ;;  %v3381_v4 = vmul.f32 %v3377_v56, %v3370_v60 }
 0x873   : > { %v3341_v9 = vpop.permute.xlu1 %3340  ;;  %3586 = vrot.lane.b32.xlu0 %v7729_v39, %s9081_s11  ;;  %3904 = vmatpush1.msra.mxu0 %v3378_v62 }
 0x874   : > { %v3348_v10 = vsel %vm450_vm8, %v3339_v63, %v3341_v9  ;;  %3974 = vmatprep.subr.mxu1 %v3381_v4  ;;  %v3278_v4 = vld [vmem:[#allocation6 + $0x60] sm:$0xff] }
 0x875   : > { %3975 = vmatpush1.msra.mxu1 %v3380_v8  ;;  %3588 = vrot.lane.b32.xlu1 %v7733_v52, %s9081_s11  ;;  %v3343_v11 = vpop.permute.xlu0 %3342  ;;  %v3355_v14 = vmul.f32 %v3351_v6, %v3348_v10  ;;  %v3281_v6 = vld [vmem:[#allocation6 + $0x78] sm:$0xff] }
 0x876   : > { %v3347_v19 = vsel %vm450_vm8, %v3341_v9, %v3343_v11 }
 0x877   : > { %v3345_v17 = vpop.permute.xlu1 %3344  ;;  %3558 = vrot.lane.b32.xlu0 %v7723_v48, %s9082_s8  ;;  %3905 = vmatprep.subr.mxu0 %v3355_v14  ;;  %v3356_v26 = vmul.f32 %v3352_v18, %v3347_v19  ;;  %v3255_v18 = vld [vmem:[#allocation6 + $0x48] sm:$0xff] }
 0x878   : > { %v3346_v20 = vsel %vm450_vm8, %v3343_v11, %v3345_v17  ;;  %v3349_v21 = vsel %vm450_vm8, %v3345_v17, %v3339_v63 }
 0x879   : > { %v3354_v22 = vmul.f32 %v3350_v15, %v3349_v21  ;;  %3560 = vrot.lane.b32.xlu1 %v7725_v50, %s9082_s8  ;;  %v3315_v23 = vpop.permute.xlu0 %3314  ;;  %v3357_v24 = vmul.f32 %v3353_v16, %v3346_v20 }
 0x87b   : > { %v3317_v27 = vpop.permute.xlu1 %3316  ;;  %3562 = vrot.lane.b32.xlu0 %v7729_v39, %s9082_s8  ;;  %3906 = vmatpush1.msra.mxu0 %v3354_v22 }
 0x87c   : > { %v3324_v28 = vsel %vm424_vm10, %v3315_v23, %v3317_v27  ;;  %3976 = vmatprep.subr.mxu1 %v3357_v24  ;;  %v3257_v24 = vld [vmem:[#allocation6 + $0x58] sm:$0xff] }
 0x87d   : > { %3977 = vmatpush1.msra.mxu1 %v3356_v26  ;;  %3564 = vrot.lane.b32.xlu1 %v7733_v52, %s9082_s8  ;;  %v3319_v30 = vpop.permute.xlu0 %3318  ;;  %v3331_v31 = vmul.f32 %v3327_v25, %v3324_v28  ;;  %v3256_v25 = vld [vmem:[#allocation6 + $0x50] sm:$0xff] }
 0x87e   : > { %v3323_v37 = vsel %vm424_vm10, %v3317_v27, %v3319_v30 }
 0x87f   : > { %v3321_v36 = vpop.permute.xlu1 %3320  ;;  %3881 = vperm.xlu0 %6258, %v6175_v29   ;;  %3907 = vmatprep.subr.mxu0 %v3331_v31  ;;  %v3332_v13 = vmul.f32 %v3328_v35, %v3323_v37 }
 0x880   : > { %v3322_v3 = vsel %vm424_vm10, %v3319_v30, %v3321_v36  ;;  %v3325_v40 = vsel %vm424_vm10, %v3321_v36, %v3315_v23  ;;  %v3254_v23 = vld [vmem:[#allocation6 + $0x40] sm:$0xff] }
 0x881   : > { %v3330_v42 = vmul.f32 %v3326_v32, %v3325_v40  ;;  %4051 = vperm.xlu1 %6259, %v6179_v33   ;;  %v3291_v1 = vpop.permute.xlu0 %3290  ;;  %v3333_v2 = vmul.f32 %v3329_v34, %v3322_v3  ;;  %v3231_v34 = vld [vmem:[#allocation6 + $0x28] sm:$0xff]  ;;  %v3230_v40 = vld [vmem:[#allocation6 + $0x20] sm:$0xff] }
 0x883   : > { %v3293_v44 = vpop.permute.xlu1 %3292  ;;  %3908 = vmatpush1.msra.mxu0 %v3330_v42  ;;  %3978 = vmatprep.subr.mxu1 %v3333_v2  ;;  %v3233_v42 = vld [vmem:[#allocation6 + $0x38] sm:$0xff] }
 0x884   : > { %v3300_v45 = vsel %vm9203_vm12, %v3291_v1, %v3293_v44  ;;  %3979 = vmatpush1.msra.mxu1 %v3332_v13  ;;  %vm9207_vm12 = vcmp.lt.s32.totalorder %v6571_v5, 31 }
 0x885   : > { %v3295_v46 = vpop.permute.xlu0 %3294  ;;  %v3307_v47 = vmul.f32 %v3303_v0, %v3300_v45 }
 0x886   : > { %v3299_v51 = vsel %vm9204_vm13, %v3293_v44, %v3295_v46  ;;  %vm9208_vm13 = vmmov %vm9207_vm12 }
 0x887   : > { %v3297_v43 = vpop.permute.xlu1 %3296  ;;  %3909 = vmatprep.subr.mxu0 %v3307_v47  ;;  %v3308_v58 = vmul.f32 %v3304_v49, %v3299_v51 }
 0x888   : > { %v3298_v53 = vsel %vm9205_vm14, %v3295_v46, %v3297_v43  ;;  %v3301_v54 = vsel %vm9206_vm15, %v3297_v43, %v3291_v1  ;;  %vm9209_vm14 = vmmov %vm9207_vm12  ;;  %v3232_v1 = vld [vmem:[#allocation6 + $0x30] sm:$0xff] }
 0x889   : > { %v3306_v55 = vmul.f32 %v3302_v41, %v3301_v54  ;;  %v3267_v56 = vpop.permute.xlu0 %3266  ;;  %v3309_v57 = vmul.f32 %v3305_v38, %v3298_v53  ;;  %vm9210_vm15 = vmmov %vm9207_vm12  ;;  %v3207_v38 = vld [vmem:[#allocation6 + $0x8] sm:$0xff]  ;;  %v3206_v54 = vld [vmem:[#allocation6] sm:$0xff] }
 0x88b   : > { %v3269_v60 = vpop.permute.xlu1 %3268  ;;  %3910 = vmatpush1.msra.mxu0 %v3306_v55  ;;  %3980 = vmatprep.subr.mxu1 %v3309_v57  ;;  %v3209_v55 = vld [vmem:[#allocation6 + $0x18] sm:$0xff] }
 0x88c   : > { %v3276_v61 = vsel %vm9207_vm12, %v3267_v56, %v3269_v60  ;;  %3981 = vmatpush1.msra.mxu1 %v3308_v58  ;;  %vm9211_vm12 = vcmp.lt.s32.totalorder %v6571_v5, 32 }
 0x88d   : > { %v3271_v62 = vpop.permute.xlu0 %3270  ;;  %v3283_v63 = vmul.f32 %v3279_v59, %v3276_v61 }
 0x88e   : > { %v3275_v8 = vsel %vm9208_vm13, %v3269_v60, %v3271_v62  ;;  %vm9212_vm13 = vmmov %vm9211_vm12 }
 0x88f   : > { %v3273_v9 = vpop.permute.xlu1 %3272  ;;  %3911 = vmatprep.subr.mxu0 %v3283_v63  ;;  %v3284_v17 = vmul.f32 %v3280_v7, %v3275_v8  ;;  %v3763_v7 = vld [vmem:[#allocation6 + $0x308] sm:$0xff]  ;;  %v3762_v8 = vld [vmem:[#allocation6 + $0x300] sm:$0xff] }
 0x890   : > { %v3274_v10 = vsel %vm9209_vm14, %v3271_v62, %v3273_v9  ;;  %v3277_v11 = vsel %vm9210_vm15, %v3273_v9, %v3267_v56  ;;  %vm9213_vm14 = vmmov %vm9211_vm12  ;;  %v3208_v56 = vld [vmem:[#allocation6 + $0x10] sm:$0xff] }
 0x891   : > { %v3282_v14 = vmul.f32 %v3278_v4, %v3277_v11  ;;  %v3243_v15 = vpop.permute.xlu0 %3242  ;;  %v3285_v16 = vmul.f32 %v3281_v6, %v3274_v10  ;;  %vm9214_vm15 = vmmov %vm9211_vm12 }
 0x893   : > { %v3245_v19 = vpop.permute.xlu1 %3244  ;;  %3912 = vmatpush1.msra.mxu0 %v3282_v14  ;;  %3982 = vmatprep.subr.mxu1 %v3285_v16  ;;  %v3764_v14 = vld [vmem:[#allocation6 + $0x310] sm:$0xff] }
 0x894   : > { %v3252_v20 = vsel %vm9211_vm12, %v3243_v15, %v3245_v19  ;;  %3983 = vmatpush1.msra.mxu1 %v3284_v17  ;;  %vm9215_vm12 = vcmp.lt.s32.totalorder %v6571_v5, 33 }
 0x895   : > { %v3247_v21 = vpop.permute.xlu0 %3246  ;;  %v3259_v22 = vmul.f32 %v3255_v18, %v3252_v20 }
 0x896   : > { %v3251_v26 = vsel %vm9212_vm13, %v3245_v19, %v3247_v21  ;;  %vm9216_vm13 = vmmov %vm9215_vm12 }
 0x897   : > { %v3249_v27 = vpop.permute.xlu1 %3248  ;;  %3913 = vmatprep.subr.mxu0 %v3259_v22  ;;  %v3260_v33 = vmul.f32 %v3256_v25, %v3251_v26  ;;  %v3739_v25 = vld [vmem:[#allocation6 + $0x2e8] sm:$0xff]  ;;  %v3738_v26 = vld [vmem:[#allocation6 + $0x2e0] sm:$0xff] }
 0x898   : > { %v3250_v28 = vsel %vm9213_vm14, %v3247_v21, %v3249_v27  ;;  %v3253_v29 = vsel %vm9214_vm15, %v3249_v27, %v3243_v15  ;;  %vm9217_vm14 = vmmov %vm9215_vm12  ;;  %v3765_v15 = vld [vmem:[#allocation6 + $0x318] sm:$0xff] }
 0x899   : > { %v3258_v30 = vmul.f32 %v3254_v23, %v3253_v29  ;;  %v3219_v31 = vpop.permute.xlu0 %3218  ;;  %v3261_v32 = vmul.f32 %v3257_v24, %v3250_v28  ;;  %vm9218_vm15 = vmmov %vm9215_vm12 }
 0x89b   : > { %v3221_v35 = vpop.permute.xlu1 %3220  ;;  %3914 = vmatpush1.msra.mxu0 %v3258_v30  ;;  %3984 = vmatprep.subr.mxu1 %v3261_v32  ;;  %v3740_v30 = vld [vmem:[#allocation6 + $0x2f0] sm:$0xff] }
 0x89c   : > { %v3228_v37 = vsel %vm9215_vm12, %v3219_v31, %v3221_v35  ;;  %3985 = vmatpush1.msra.mxu1 %v3260_v33  ;;  %vm9219_vm12 = vcmp.lt.s32.totalorder %v6571_v5, 34 }
 0x89d   : > { %v3223_v36 = vpop.permute.xlu0 %3222  ;;  %v3235_v3 = vmul.f32 %v3231_v34, %v3228_v37 }
 0x89e   : > { %v3227_v2 = vsel %vm9216_vm13, %v3221_v35, %v3223_v36  ;;  %vm9220_vm13 = vmmov %vm9219_vm12 }
 0x89f   : > { %v3225_v13 = vpop.permute.xlu1 %3224  ;;  %3915 = vmatprep.subr.mxu0 %v3235_v3  ;;  %v3236_v41 = vmul.f32 %v3232_v1, %v3227_v2  ;;  %v3715_v1 = vld [vmem:[#allocation6 + $0x2c8] sm:$0xff]  ;;  %v3714_v2 = vld [vmem:[#allocation6 + $0x2c0] sm:$0xff] }
 0x8a0   : > { %v3226_v0 = vsel %vm9217_vm14, %v3223_v36, %v3225_v13  ;;  %v3229_v44 = vsel %vm9218_vm15, %v3225_v13, %v3219_v31  ;;  %vm9221_vm14 = vmmov %vm9219_vm12  ;;  %v3741_v31 = vld [vmem:[#allocation6 + $0x2f8] sm:$0xff] }
 0x8a1   : > { %v3234_v45 = vmul.f32 %v3230_v40, %v3229_v44  ;;  %v3195_v46 = vpop.permute.xlu0 %3194  ;;  %v3237_v47 = vmul.f32 %v3233_v42, %v3226_v0  ;;  %vm9222_vm15 = vmmov %vm9219_vm12 }
 0x8a3   : > { %v3197_v49 = vpop.permute.xlu1 %3196  ;;  %3916 = vmatpush1.msra.mxu0 %v3234_v45  ;;  %3986 = vmatprep.subr.mxu1 %v3237_v47  ;;  %v3716_v45 = vld [vmem:[#allocation6 + $0x2d0] sm:$0xff] }
 0x8a4   : > { %v3204_v51 = vsel %vm9219_vm12, %v3195_v46, %v3197_v49  ;;  %3987 = vmatpush1.msra.mxu1 %v3236_v41  ;;  %vm9223_vm12 = vcmp.lt.s32.totalorder %v6571_v5, 94 }
 0x8a5   : > { %v3199_v43 = vpop.permute.xlu0 %3198  ;;  %v3211_v53 = vmul.f32 %v3207_v38, %v3204_v51 }
 0x8a6   : > { %v3203_v57 = vsel %vm9220_vm13, %v3197_v49, %v3199_v43  ;;  %vm9224_vm13 = vmmov %vm9223_vm12 }
 0x8a7   : > { %v3201_v58 = vpop.permute.xlu1 %3200  ;;  %3917 = vmatprep.subr.mxu0 %v3211_v53  ;;  %v3212_v4 = vmul.f32 %v3208_v56, %v3203_v57  ;;  %v3691_v56 = vld [vmem:[#allocation6 + $0x2a8] sm:$0xff]  ;;  %v3690_v57 = vld [vmem:[#allocation6 + $0x2a0] sm:$0xff] }
 0x8a8   : > { %v3202_v59 = vsel %vm9221_vm14, %v3199_v43, %v3201_v58  ;;  %v3205_v60 = vsel %vm9222_vm15, %v3201_v58, %v3195_v46  ;;  %vm9225_vm14 = vmmov %vm9223_vm12  ;;  %v3717_v46 = vld [vmem:[#allocation6 + $0x2d8] sm:$0xff] }
 0x8a9   : > { %v3210_v61 = vmul.f32 %v3206_v54, %v3205_v60  ;;  %v3751_v62 = vpop.permute.xlu0 %3750  ;;  %v3213_v63 = vmul.f32 %v3209_v55, %v3202_v59  ;;  %vm9226_vm15 = vmmov %vm9223_vm12 }
 0x8ab   : > { %v3753_v6 = vpop.permute.xlu1 %3752  ;;  %3918 = vmatpush1.msra.mxu0 %v3210_v61  ;;  %3988 = vmatprep.subr.mxu1 %v3213_v63  ;;  %v3692_v61 = vld [vmem:[#allocation6 + $0x2b0] sm:$0xff] }
 0x8ac   : > { %3989 = vmatpush1.msra.mxu1 %v3212_v4  ;;  %v3760_v9 = vsel %vm9223_vm12, %v3751_v62, %v3753_v6  ;;  %vm9227_vm12 = vcmp.lt.s32.totalorder %v6571_v5, 95 }
 0x8ad   : > { %v3755_v10 = vpop.permute.xlu0 %3754  ;;  %v3766_v18 = vmul.f32 %v3762_v8, %v3760_v9 }
 0x8ae   : > { %v3759_v11 = vsel %vm9224_vm13, %v3753_v6, %v3755_v10  ;;  %vm9228_vm13 = vmmov %vm9227_vm12 }
 0x8af   : > { %v3757_v16 = vpop.permute.xlu1 %3756  ;;  %v3767_v17 = vmul.f32 %v3763_v7, %v3759_v11 }
 0x8b0   : > { %v3758_v19 = vsel %vm9225_vm14, %v3755_v10, %v3757_v16  ;;  %v3761_v20 = vsel %vm9226_vm15, %v3757_v16, %v3751_v62  ;;  %vm9229_vm14 = vmmov %vm9227_vm12  ;;  %v3693_v62 = vld [vmem:[#allocation6 + $0x2b8] sm:$0xff]  ;;  %v3666_v16 = vld [vmem:[#allocation6 + $0x280] sm:$0xff] }
 0x8b1   : > { %v3768_v21 = vmul.f32 %v3764_v14, %v3758_v19  ;;  %3933 = vmatprep.subr.mxu0 %v3767_v17  ;;  %v3727_v22 = vpop.permute.xlu0 %3726  ;;  %v3769_v23 = vmul.f32 %v3765_v15, %v3761_v20  ;;  %vm9230_vm15 = vmmov %vm9227_vm12  ;;  %v3667_v15 = vld [vmem:[#allocation6 + $0x288] sm:$0xff]  ;;  %v3668_v20 = vld [vmem:[#allocation6 + $0x290] sm:$0xff] }
 0x8b2   : > { %3934 = vmatpush2.msra.mxu0 %v3766_v18 }
 0x8b3   : > { %v3729_v24 = vpop.permute.xlu1 %3728  ;;  %4004 = vmatprep.subr.mxu1 %v3769_v23 }
 0x8b4   : > { %4005 = vmatpush2.msra.mxu1 %v3768_v21  ;;  %v3736_v27 = vsel %vm9227_vm12, %v3727_v22, %v3729_v24  ;;  %vm9231_vm12 = vcmp.lt.s32.totalorder %v6571_v5, 96  ;;  %v3669_v21 = vld [vmem:[#allocation6 + $0x298] sm:$0xff] }
 0x8b5   : > { %v3731_v28 = vpop.permute.xlu0 %3730  ;;  %v3742_v34 = vmul.f32 %v3738_v26, %v3736_v27 }
 0x8b6   : > { %v3735_v29 = vsel %vm9228_vm13, %v3729_v24, %v3731_v28  ;;  %vm9232_vm13 = vmmov %vm9231_vm12 }
 0x8b7   : > { %v3733_v32 = vpop.permute.xlu1 %3732  ;;  %v3743_v33 = vmul.f32 %v3739_v25, %v3735_v29 }
 0x8b8   : > { %v3734_v35 = vsel %vm9229_vm14, %v3731_v28, %v3733_v32  ;;  %v3737_v37 = vsel %vm9230_vm15, %v3733_v32, %v3727_v22  ;;  %vm9233_vm14 = vmmov %vm9231_vm12  ;;  %v3642_v32 = vld [vmem:[#allocation6 + $0x260] sm:$0xff] }
 0x8b9   : > { %v3744_v36 = vmul.f32 %v3740_v30, %v3734_v35  ;;  %3935 = vmatprep.subr.mxu0 %v3743_v33  ;;  %v3703_v3 = vpop.permute.xlu0 %3702  ;;  %v3745_v40 = vmul.f32 %v3741_v31, %v3737_v37  ;;  %vm9234_vm15 = vmmov %vm9231_vm12  ;;  %v3643_v31 = vld [vmem:[#allocation6 + $0x268] sm:$0xff]  ;;  %v3644_v37 = vld [vmem:[#allocation6 + $0x270] sm:$0xff] }
 0x8ba   : > { %3936 = vmatpush2.msra.mxu0 %v3742_v34 }
 0x8bb   : > { %v3705_v42 = vpop.permute.xlu1 %3704  ;;  %4006 = vmatprep.subr.mxu1 %v3745_v40 }
 0x8bc   : > { %4007 = vmatpush2.msra.mxu1 %v3744_v36  ;;  %v3712_v13 = vsel %vm9231_vm12, %v3703_v3, %v3705_v42  ;;  %vm9235_vm12 = vcmp.lt.s32.totalorder %v6571_v5, 97  ;;  %v3645_v36 = vld [vmem:[#allocation6 + $0x278] sm:$0xff] }
 0x8bd   : > { %v3707_v0 = vpop.permute.xlu0 %3706  ;;  %v3718_v38 = vmul.f32 %v3714_v2, %v3712_v13 }
 0x8be   : > { %v3711_v44 = vsel %vm9232_vm13, %v3705_v42, %v3707_v0  ;;  %vm9236_vm13 = vmmov %vm9235_vm12 }
 0x8bf   : > { %v3709_v47 = vpop.permute.xlu1 %3708  ;;  %v3719_v41 = vmul.f32 %v3715_v1, %v3711_v44 }
 0x8c0   : > { %v3710_v49 = vsel %vm9233_vm14, %v3707_v0, %v3709_v47  ;;  %v3713_v51 = vsel %vm9234_vm15, %v3709_v47, %v3703_v3  ;;  %vm9237_vm14 = vmmov %vm9235_vm12  ;;  %v3618_v47 = vld [vmem:[#allocation6 + $0x240] sm:$0xff] }
 0x8c1   : > { %v3720_v43 = vmul.f32 %v3716_v45, %v3710_v49  ;;  %3937 = vmatprep.subr.mxu0 %v3719_v41  ;;  %v3679_v53 = vpop.permute.xlu0 %3678  ;;  %v3721_v54 = vmul.f32 %v3717_v46, %v3713_v51  ;;  %vm9238_vm15 = vmmov %vm9235_vm12  ;;  %v3619_v46 = vld [vmem:[#allocation6 + $0x248] sm:$0xff]  ;;  %v3620_v51 = vld [vmem:[#allocation6 + $0x250] sm:$0xff] }
 0x8c2   : > { %3938 = vmatpush2.msra.mxu0 %v3718_v38 }
 0x8c3   : > { %v3681_v55 = vpop.permute.xlu1 %3680  ;;  %4008 = vmatprep.subr.mxu1 %v3721_v54 }
 0x8c4   : > { %4009 = vmatpush2.msra.mxu1 %v3720_v43  ;;  %v3688_v58 = vsel %vm9235_vm12, %v3679_v53, %v3681_v55  ;;  %vm9239_vm12 = vcmp.lt.s32.totalorder %v6571_v5, 98  ;;  %v3621_v43 = vld [vmem:[#allocation6 + $0x258] sm:$0xff] }
 0x8c5   : > { %v3683_v59 = vpop.permute.xlu0 %3682  ;;  %v3694_v6 = vmul.f32 %v3690_v57, %v3688_v58 }
 0x8c6   : > { %v3687_v60 = vsel %vm9236_vm13, %v3681_v55, %v3683_v59  ;;  %vm9240_vm13 = vmmov %vm9239_vm12 }
 0x8c7   : > { %v3685_v63 = vpop.permute.xlu1 %3684  ;;  %v3695_v4 = vmul.f32 %v3691_v56, %v3687_v60 }
 0x8c8   : > { %v3686_v7 = vsel %vm9237_vm14, %v3683_v59, %v3685_v63  ;;  %v3689_v8 = vsel %vm9238_vm15, %v3685_v63, %v3679_v53  ;;  %vm9241_vm14 = vmmov %vm9239_vm12  ;;  %v3594_v63 = vld [vmem:[#allocation6 + $0x220] sm:$0xff] }
 0x8c9   : > { %v3696_v9 = vmul.f32 %v3692_v61, %v3686_v7  ;;  %3939 = vmatprep.subr.mxu0 %v3695_v4  ;;  %v3655_v10 = vpop.permute.xlu0 %3654  ;;  %v3697_v11 = vmul.f32 %v3693_v62, %v3689_v8  ;;  %vm9242_vm15 = vmmov %vm9239_vm12  ;;  %v3595_v62 = vld [vmem:[#allocation6 + $0x228] sm:$0xff]  ;;  %v3596_v8 = vld [vmem:[#allocation6 + $0x230] sm:$0xff] }
 0x8ca   : > { %3940 = vmatpush2.msra.mxu0 %v3694_v6 }
 0x8cb   : > { %v3657_v14 = vpop.permute.xlu1 %3656  ;;  %4010 = vmatprep.subr.mxu1 %v3697_v11 }
 0x8cc   : > { %4011 = vmatpush2.msra.mxu1 %v3696_v9  ;;  %v3664_v17 = vsel %vm9239_vm12, %v3655_v10, %v3657_v14  ;;  %vm9243_vm12 = vcmp.lt.s32.totalorder %v6571_v5, 110  ;;  %v3597_v9 = vld [vmem:[#allocation6 + $0x238] sm:$0xff] }
 0x8cd   : > { %v3659_v18 = vpop.permute.xlu0 %3658  ;;  %v3670_v24 = vmul.f32 %v3666_v16, %v3664_v17 }
 0x8ce   : > { %v3663_v19 = vsel %vm9240_vm13, %v3657_v14, %v3659_v18  ;;  %vm9244_vm13 = vmmov %vm9243_vm12 }
 0x8cf   : > { %v3661_v22 = vpop.permute.xlu1 %3660  ;;  %v3671_v23 = vmul.f32 %v3667_v15, %v3663_v19 }
 0x8d0   : > { %v3662_v25 = vsel %vm9241_vm14, %v3659_v18, %v3661_v22  ;;  %v3665_v26 = vsel %vm9242_vm15, %v3661_v22, %v3655_v10  ;;  %vm9245_vm14 = vmmov %vm9243_vm12  ;;  %v3570_v22 = vld [vmem:[#allocation6 + $0x200] sm:$0xff] }
 0x8d1   : > { %v3672_v27 = vmul.f32 %v3668_v20, %v3662_v25  ;;  %3941 = vmatprep.subr.mxu0 %v3671_v23  ;;  %v3631_v28 = vpop.permute.xlu0 %3630  ;;  %v3673_v29 = vmul.f32 %v3669_v21, %v3665_v26  ;;  %vm9246_vm15 = vmmov %vm9243_vm12  ;;  %v3571_v21 = vld [vmem:[#allocation6 + $0x208] sm:$0xff]  ;;  %v3572_v26 = vld [vmem:[#allocation6 + $0x210] sm:$0xff] }
 0x8d2   : > { %3942 = vmatpush2.msra.mxu0 %v3670_v24 }
 0x8d3   : > { %v3633_v30 = vpop.permute.xlu1 %3632  ;;  %4012 = vmatprep.subr.mxu1 %v3673_v29 }
 0x8d4   : > { %4013 = vmatpush2.msra.mxu1 %v3672_v27  ;;  %v3640_v33 = vsel %vm9243_vm12, %v3631_v28, %v3633_v30  ;;  %vm9247_vm12 = vcmp.lt.s32.totalorder %v6571_v5, 111  ;;  %v3573_v27 = vld [vmem:[#allocation6 + $0x218] sm:$0xff] }
 0x8d5   : > { %v3635_v34 = vpop.permute.xlu0 %3634  ;;  %v3646_v42 = vmul.f32 %v3642_v32, %v3640_v33  ;;  %v6173_v33 = vld [vmem:[%s8986_s2 + $0x30] sm:$0xff] }
 0x8d6   : > { %v3639_v35 = vsel %vm9244_vm13, %v3633_v30, %v3635_v34  ;;  %vm9248_vm13 = vmmov %vm9247_vm12 }
 0x8d7   : > { %v3637_v3 = vpop.permute.xlu1 %3636  ;;  %v3647_v40 = vmul.f32 %v3643_v31, %v3639_v35 }
 0x8d8   : > { %v3638_v1 = vsel %vm9245_vm14, %v3635_v34, %v3637_v3  ;;  %v3641_v2 = vsel %vm9246_vm15, %v3637_v3, %v3631_v28  ;;  %vm9249_vm14 = vmmov %vm9247_vm12  ;;  %v4034_v3 = vstv %s6178_s18  ;;  %s9260_s18 = smov 126  }
 0x8d9   : > { %v3648_v13 = vmul.f32 %v3644_v37, %v3638_v1  ;;  %3943 = vmatprep.subr.mxu0 %v3647_v40  ;;  %v3607_v0 = vpop.permute.xlu0 %3606  ;;  %v3649_v44 = vmul.f32 %v3645_v36, %v3641_v2  ;;  %vm9250_vm15 = vmmov %vm9247_vm12 }
 0x8da   : > { %3944 = vmatpush2.msra.mxu0 %v3646_v42 }
 0x8db   : > { %v3609_v45 = vpop.permute.xlu1 %3608  ;;  %4014 = vmatprep.subr.mxu1 %v3649_v44 }
 0x8dc   : > { %4015 = vmatpush2.msra.mxu1 %v3648_v13  ;;  %v3616_v41 = vsel %vm9247_vm12, %v3607_v0, %v3609_v45  ;;  %vm9251_vm12 = vcmp.lt.s32.totalorder %v6571_v5, 112 }
 0x8dd   : > { %v3611_v38 = vpop.permute.xlu0 %3610  ;;  %v3622_v55 = vmul.f32 %v3618_v47, %v3616_v41 }
 0x8de   : > { %v3615_v49 = vsel %vm9248_vm13, %v3609_v45, %v3611_v38  ;;  %vm9252_vm13 = vmmov %vm9251_vm12 }
 0x8df   : > { %v3613_v53 = vpop.permute.xlu1 %3612  ;;  %v3623_v54 = vmul.f32 %v3619_v46, %v3615_v49 }
 0x8e0   : > { %v3614_v56 = vsel %vm9249_vm14, %v3611_v38, %v3613_v53  ;;  %v3617_v57 = vsel %vm9250_vm15, %v3613_v53, %v3607_v0  ;;  %vm9253_vm14 = vmmov %vm9251_vm12 }
 0x8e1   : > { %v3624_v58 = vmul.f32 %v3620_v51, %v3614_v56  ;;  %3945 = vmatprep.subr.mxu0 %v3623_v54  ;;  %v3583_v59 = vpop.permute.xlu0 %3582  ;;  %v3625_v60 = vmul.f32 %v3621_v43, %v3617_v57  ;;  %vm9254_vm15 = vmmov %vm9251_vm12  ;;  %v4047_v54 = vld [vmem:[%s8988_s4] sm:$0xff] }
 0x8e2   : > { %3946 = vmatpush2.msra.mxu0 %v3622_v55 }
 0x8e3   : > { %v3585_v61 = vpop.permute.xlu1 %3584  ;;  %4016 = vmatprep.subr.mxu1 %v3625_v60 }
 0x8e4   : > { %4017 = vmatpush2.msra.mxu1 %v3624_v58  ;;  %v3592_v4 = vsel %vm9251_vm12, %v3583_v59, %v3585_v61  ;;  %vm9255_vm12 = vcmp.lt.s32.totalorder %v6571_v5, 113 }
 0x8e5   : > { %v3587_v6 = vpop.permute.xlu0 %3586  ;;  %v3598_v14 = vmul.f32 %v3594_v63, %v3592_v4 }
 0x8e6   : > { %v3591_v7 = vsel %vm9252_vm13, %v3585_v61, %v3587_v6  ;;  %vm9256_vm13 = vmmov %vm9255_vm12 }
 0x8e7   : > { %v3589_v10 = vpop.permute.xlu1 %3588  ;;  %v3599_v11 = vmul.f32 %v3595_v62, %v3591_v7  ;;  %v4551_v7 = vld [vmem:[#allocation6 + $0x1e0] sm:$0xff] }
 0x8e8   : > { %v3590_v15 = vsel %vm9253_vm14, %v3587_v6, %v3589_v10  ;;  %v3593_v16 = vsel %vm9254_vm15, %v3589_v10, %v3583_v59  ;;  %vm9257_vm14 = vmmov %vm9255_vm12  ;;  %v4552_v6 = vld [vmem:[#allocation6 + $0x1e8] sm:$0xff] }
 0x8e9   : > { %v3600_v17 = vmul.f32 %v3596_v8, %v3590_v15  ;;  %3947 = vmatprep.subr.mxu0 %v3599_v11  ;;  %v3559_v18 = vpop.permute.xlu0 %3558  ;;  %v3601_v19 = vmul.f32 %v3597_v9, %v3593_v16  ;;  %vm9258_vm15 = vmmov %vm9255_vm12  ;;  %v4553_v11 = vld [vmem:[#allocation6 + $0x1f0] sm:$0xff] }
 0x8ea   : > { %3948 = vmatpush2.msra.mxu0 %v3598_v14  ;;  %v4554_v14 = vld [vmem:[#allocation6 + $0x1f8] sm:$0xff] }
 0x8eb   : > { %v3561_v20 = vpop.permute.xlu1 %3560  ;;  %4018 = vmatprep.subr.mxu1 %v3601_v19 }
 0x8ec   : > { %4019 = vmatpush2.msra.mxu1 %v3600_v17  ;;  %v3568_v23 = vsel %vm9255_vm12, %v3559_v18, %v3561_v20 }
 0x8ed   : > { %v3563_v24 = vpop.permute.xlu0 %3562  ;;  %v3574_v30 = vmul.f32 %v3570_v22, %v3568_v23 }
 0x8ee   : > { %v3567_v25 = vsel %vm9256_vm13, %v3561_v20, %v3563_v24 }
 0x8ef   : > { %v3565_v28 = vpop.permute.xlu1 %3564  ;;  %v3575_v29 = vmul.f32 %v3571_v21, %v3567_v25  ;;  %v4527_v25 = vld [vmem:[#allocation6 + $0x1c0] sm:$0xff] }
 0x8f0   : > { %v3566_v31 = vsel %vm9257_vm14, %v3563_v24, %v3565_v28  ;;  %v3569_v32 = vsel %vm9258_vm15, %v3565_v28, %v3559_v18  ;;  %v4528_v24 = vld [vmem:[#allocation6 + $0x1c8] sm:$0xff] }
 0x8f1   : > { %v3576_v34 = vmul.f32 %v3572_v26, %v3566_v31  ;;  %3949 = vmatprep.subr.mxu0 %v3575_v29  ;;  %v3577_v35 = vmul.f32 %v3573_v27, %v3569_v32  ;;  %v4529_v29 = vld [vmem:[#allocation6 + $0x1d0] sm:$0xff] }
 0x8f2   : > { %3950 = vmatpush2.msra.mxu0 %v3574_v30  ;;  %v4530_v30 = vld [vmem:[#allocation6 + $0x1d8] sm:$0xff] }
 0x8f3   : > { %3952 = vmatmul.mubr.f32.vlgmr.msra.gmra.mxu0 %v6173_v33  ;;  %4020 = vmatprep.subr.mxu1 %v3577_v35 }
 0x8f4   : > { %4021 = vmatpush2.msra.mxu1 %v3576_v34  ;;  %4121 = vmatprep.mubr.f32.mxu0 %v6350_v12 }
 0x8f5   : > { %4023 = vmatmul.mubr.f32.vlgmr.msra.gmra.mxu1 %v6173_v33 }
 0x8f6   : > { %4192 = vmatprep.mubr.f32.mxu1 %v6350_v12 }
 0x8fa   : > { %v3882_v37 = vpop.permute.xlu0 %3881 }
 0x9b3   : > { %v3953_v36 = vpop.f32.mrf.mxu0 }
 0x9b4   : > { %v3954_v40 = vadd.f32 %v3953_v36, %v3882_v37 }
 0x9b5   : > { %v3955_v42 = vpop.f32.mrf.mxu0  ;;  %v4024_v1 = vpop.f32.mrf.mxu1 }
 0x9b6   : > { %vm4030_vm12 = vcmp.ge.f32.partialorder %v3954_v40, 0.0  ;;  %v4035_v2 = vmul.f32 %v4034_v3, %v3954_v40  ;;  %v3956_v13 = vadd.f32 %v3955_v42, %v3882_v37  ;;  %v4025_v0 = vadd.f32 %v4024_v1, %v3882_v37  ;;  %v4504_v42 = vld [vmem:[#allocation6 + $0x1a8] sm:$0xff]  ;;  %v4503_v1 = vld [vmem:[#allocation6 + $0x1a0] sm:$0xff] }
 0x9b7   : > { %v4026_v44 = vpop.f32.mrf.mxu1 }
 0x9b8   : > { %vm4031_vm13 = vcmp.ge.f32.partialorder %v3956_v13, 0.0  ;;  %v4036_v45 = vmul.f32 %v4034_v3, %v3956_v13  ;;  %v4039_v46 = vsel %vm4030_vm12, %v3954_v40, %v4035_v2  ;;  %vm4032_vm14 = vcmp.ge.f32.partialorder %v4025_v0, 0.0 }
 0x9b9   : > { %v4037_v47 = vmul.f32 %v4034_v3, %v4025_v0  ;;  %v4027_v41 = vadd.f32 %v4026_v44, %v3882_v37  ;;  %v4043_v43 = vadd.f32 %v4039_v46, %v7723_v48  ;;  %v4505_v44 = vld [vmem:[#allocation6 + $0x1b0] sm:$0xff]  ;;  %vm9265_vm12 = vcmp.lt.s32.totalorder %v6571_v5, 30 }
 0x9ba   : > { %v4040_v38 = vsel %vm4031_vm13, %v3956_v13, %v4036_v45  ;;  %v4506_v45 = vld [vmem:[#allocation6 + $0x1b8] sm:$0xff]  ;;  %vm9266_vm13 = vmmov %vm9265_vm12 }
 0x9bb   : > { %vm4033_vm15 = vcmp.ge.f32.partialorder %v4027_v41, 0.0  ;;  %v4038_v49 = vmul.f32 %v4034_v3, %v4027_v41  ;;  %v4044_v51 = vadd.f32 %v4040_v38, %v7725_v50  ;;  %v4041_v53 = vsel %vm4032_vm14, %v4025_v0, %v4037_v47  ;;  %v4052_v50 = vpop.permute.xlu1 %4051  ;;  %vm9267_vm14 = vmmov %vm9265_vm12 }
 0x9bc   : > { %v4045_v57 = vadd.f32 %v4041_v53, %v7729_v39 }
 0x9bd   : > { %4087 = vmatprep.subr.mxu0 %v4044_v51  ;;  %v4042_v55 = vsel %vm4033_vm15, %v4027_v41, %v4038_v49  ;;  %vm9268_vm15 = vmmov %vm9265_vm12 }
 0x9be   : > { %4088 = vmatpush1.msra.mxu0 %v4043_v43  ;;  %v4046_v56 = vadd.f32 %v4042_v55, %v7733_v52 }
 0x9bf   : > { %6180 = vmatmul.mubr.msk.f32.vlgmr.msra.gmra.mxu0 %vm2043_vm11, %v4047_v54 }
 0x9c0   : > { %4158 = vmatprep.subr.mxu1 %v4046_v56 }
 0x9c1   : > { %4159 = vmatpush1.msra.mxu1 %v4045_v57 }
 0x9c2   : > { %6181 = vmatmul.mubr.msk.f32.vlgmr.msra.gmra.mxu1 %vm2043_vm11, %v4047_v54  ;;  %v4476_v54 = vld [vmem:[#allocation6 + $0x168] sm:$0xff] }
 0xa7f   : > { %v4123_v48 = vpop.f32.mrf.mxu0 }
 0xa80   : > { %v8144_v58 = vadd.f32 %v4123_v48, %v4052_v50  ;;  %v4475_v48 = vld [vmem:[#allocation6 + $0x160] sm:$0xff] }
 0xa81   : > { %v4125_v59 = vpop.f32.mrf.mxu0 }
 0xa82   : > { %v8146_v60 = vadd.f32 %v4125_v59, %v4052_v50  ;;  %v4194_v61 = vpop.f32.mrf.mxu1  ;;  %4539 = vrot.lane.b32.xlu0 %v8144_v58, %s9259_s17  ;;  %v4478_v59 = vld [vmem:[#allocation6 + $0x178] sm:$0xff] }
 0xa83   : > { %v8150_v52 = vadd.f32 %v4194_v61, %v4052_v50 }
 0xa84   : > { %v4196_v39 = vpop.f32.mrf.mxu1  ;;  %4541 = vrot.lane.b32.xlu1 %v8146_v60, %s9259_s17 }
 0xa85   : > { %v8154_v62 = vadd.f32 %v4196_v39, %v4052_v50  ;;  %v4477_v39 = vld [vmem:[#allocation6 + $0x170] sm:$0xff] }
 0xa86   : > { %4543 = vrot.lane.b32.xlu0 %v8150_v52, %s9259_s17 }
 0xa88   : > { %4545 = vrot.lane.b32.xlu1 %v8154_v62, %s9259_s17 }
 0xa8a   : > { %4515 = vrot.lane.b32.xlu0 %v8144_v58, %s9260_s18 }
 0xa8c   : > { %4517 = vrot.lane.b32.xlu1 %v8146_v60, %s9260_s18 }
 0xa8e   : > { %4519 = vrot.lane.b32.xlu0 %v8150_v52, %s9260_s18 }
 0xa90   : > { %4521 = vrot.lane.b32.xlu1 %v8154_v62, %s9260_s18 }
 0xa92   : > { %4491 = vrot.lane.b32.xlu0 %v8144_v58, %s9261_s19 }
 0xa94   : > { %4493 = vrot.lane.b32.xlu1 %v8146_v60, %s9261_s19 }
 0xa96   : > { %4495 = vrot.lane.b32.xlu0 %v8150_v52, %s9261_s19 }
 0xa98   : > { %4497 = vrot.lane.b32.xlu1 %v8154_v62, %s9261_s19 }
 0xa9a   : > { %4463 = vrot.lane.b32.xlu0 %v8144_v58, %s9262_s0 }
 0xa9c   : > { %4465 = vrot.lane.b32.xlu1 %v8146_v60, %s9262_s0 }
 0xa9e   : > { %4467 = vrot.lane.b32.xlu0 %v8150_v52, %s9262_s0 }
 0xaa0   : > { %4469 = vrot.lane.b32.xlu1 %v8154_v62, %s9262_s0 }
 0xaa2   : > { %4439 = vrot.lane.b32.xlu0 %v8144_v58, %s9263_s1 }
 0xaa4   : > { %4441 = vrot.lane.b32.xlu1 %v8146_v60, %s9263_s1 }
 0xaa6   : > { %4443 = vrot.lane.b32.xlu0 %v8150_v52, %s9263_s1 }
 0xaa8   : > { %4445 = vrot.lane.b32.xlu1 %v8154_v62, %s9263_s1 }
 0xaaa   : > { %4415 = vrot.lane.b32.xlu0 %v8144_v58, %s9264_s5 }
 0xaac   : > { %4417 = vrot.lane.b32.xlu1 %v8146_v60, %s9264_s5 }
 0xaae   : > { %4419 = vrot.lane.b32.xlu0 %v8150_v52, %s9264_s5 }
 0xab0   : > { %4421 = vrot.lane.b32.xlu1 %v8154_v62, %s9264_s5 }
 0xab2   : > { %4391 = vrot.lane.b32.xlu0 %v8144_v58, %s9197_s27 }
 0xab4   : > { %4393 = vrot.lane.b32.xlu1 %v8146_v60, %s9197_s27 }
 0xab6   : > { %4395 = vrot.lane.b32.xlu0 %v8150_v52, %s9197_s27 }
 0xab8   : > { %4397 = vrot.lane.b32.xlu1 %v8154_v62, %s9197_s27 }
 0xaba   : > { %4367 = vrot.lane.b32.xlu0 %v8144_v58, %s9198_s25 }
 0xabc   : > { %4369 = vrot.lane.b32.xlu1 %v8146_v60, %s9198_s25 }
 0xabe   : > { %4371 = vrot.lane.b32.xlu0 %v8150_v52, %s9198_s25 }
 0xac0   : > { %4373 = vrot.lane.b32.xlu1 %v8154_v62, %s9198_s25 }
 0xac2   : > { %4343 = vrot.lane.b32.xlu0 %v8144_v58, %s9199_s26 }
 0xac4   : > { %4345 = vrot.lane.b32.xlu1 %v8146_v60, %s9199_s26 }
 0xac6   : > { %4347 = vrot.lane.b32.xlu0 %v8150_v52, %s9199_s26 }
 0xac8   : > { %4349 = vrot.lane.b32.xlu1 %v8154_v62, %s9199_s26 }
 0xaca   : > { %4319 = vrot.lane.b32.xlu0 %v8144_v58, %s9200_s24 }
 0xacc   : > { %4321 = vrot.lane.b32.xlu1 %v8146_v60, %s9200_s24 }
 0xace   : > { %4323 = vrot.lane.b32.xlu0 %v8150_v52, %s9200_s24 }
 0xad0   : > { %4325 = vrot.lane.b32.xlu1 %v8154_v62, %s9200_s24 }
 0xad2   : > { %4295 = vrot.lane.b32.xlu0 %v8144_v58, %s9201_s23 }
 0xad4   : > { %4297 = vrot.lane.b32.xlu1 %v8146_v60, %s9201_s23 }
 0xad6   : > { %4299 = vrot.lane.b32.xlu0 %v8150_v52, %s9201_s23 }
 0xad8   : > { %4301 = vrot.lane.b32.xlu1 %v8154_v62, %s9201_s23 }
 0xada   : > { %4271 = vrot.lane.b32.xlu0 %v8144_v58, %s9202_s20 }
 0xadc   : > { %4273 = vrot.lane.b32.xlu1 %v8146_v60, %s9202_s20 }
 0xade   : > { %4275 = vrot.lane.b32.xlu0 %v8150_v52, %s9202_s20 }
 0xae0   : > { %4277 = vrot.lane.b32.xlu1 %v8154_v62, %s9202_s20 }
 0xae2   : > { %4247 = vrot.lane.b32.xlu0 %v8144_v58, %s9135_s10 }
 0xae4   : > { %4249 = vrot.lane.b32.xlu1 %v8146_v60, %s9135_s10 }
 0xae6   : > { %4251 = vrot.lane.b32.xlu0 %v8150_v52, %s9135_s10 }
 0xae8   : > { %4253 = vrot.lane.b32.xlu1 %v8154_v62, %s9135_s10 }
 0xaea   : > { %4223 = vrot.lane.b32.xlu0 %v8144_v58, %s9136_s7 }
 0xaec   : > { %4225 = vrot.lane.b32.xlu1 %v8146_v60, %s9136_s7 }
 0xaee   : > { %4227 = vrot.lane.b32.xlu0 %v8150_v52, %s9136_s7 }
 0xaf0   : > { %4229 = vrot.lane.b32.xlu1 %v8154_v62, %s9136_s7 }
 0xaf2   : > { %4199 = vrot.lane.b32.xlu0 %v8144_v58, %s9137_s9 }
 0xaf4   : > { %4201 = vrot.lane.b32.xlu1 %v8146_v60, %s9137_s9  ;;  %v4540_v63 = vpop.permute.xlu0 %4539 }
 0xaf6   : > { %v4542_v4 = vpop.permute.xlu1 %4541  ;;  %4203 = vrot.lane.b32.xlu0 %v8150_v52, %s9137_s9 }
 0xaf7   : > { %v4549_v8 = vsel %vm662_vm0, %v4540_v63, %v4542_v4 }
 0xaf8   : > { %4205 = vrot.lane.b32.xlu1 %v8154_v62, %s9137_s9  ;;  %v4544_v9 = vpop.permute.xlu0 %4543  ;;  %v4555_v17 = vmul.f32 %v4551_v7, %v4549_v8 }
 0xaf9   : > { %v4548_v10 = vsel %vm662_vm0, %v4542_v4, %v4544_v9 }
 0xafa   : > { %v4546_v15 = vpop.permute.xlu1 %4545  ;;  %4755 = vrot.lane.b32.xlu0 %v8144_v58, %s9138_s30  ;;  %v4556_v16 = vmul.f32 %v4552_v6, %v4548_v10  ;;  %v4452_v10 = vld [vmem:[#allocation6 + $0x148] sm:$0xff] }
 0xafb   : > { %v4547_v18 = vsel %vm662_vm0, %v4544_v9, %v4546_v15  ;;  %v4550_v19 = vsel %vm662_vm0, %v4546_v15, %v4540_v63 }
 0xafc   : > { %v4557_v20 = vmul.f32 %v4553_v11, %v4547_v18  ;;  %4757 = vrot.lane.b32.xlu1 %v8146_v60, %s9138_s30  ;;  %4892 = vmatprep.subr.mxu0 %v4556_v16  ;;  %v4516_v21 = vpop.permute.xlu0 %4515  ;;  %v4558_v22 = vmul.f32 %v4554_v14, %v4550_v19  ;;  %v4451_v18 = vld [vmem:[#allocation6 + $0x140] sm:$0xff]  ;;  %v4454_v19 = vld [vmem:[#allocation6 + $0x158] sm:$0xff] }
 0xafd   : > { %4893 = vmatpush1.msra.mxu0 %v4555_v17 }
 0xafe   : > { %v4518_v23 = vpop.permute.xlu1 %4517  ;;  %4759 = vrot.lane.b32.xlu0 %v8150_v52, %s9138_s30  ;;  %4963 = vmatprep.subr.mxu1 %v4558_v22 }
 0xaff   : > { %4964 = vmatpush1.msra.mxu1 %v4557_v20  ;;  %v4525_v26 = vsel %vm636_vm1, %v4516_v21, %v4518_v23 }
 0xb00   : > { %4761 = vrot.lane.b32.xlu1 %v8154_v62, %s9138_s30  ;;  %v4520_v27 = vpop.permute.xlu0 %4519  ;;  %v4531_v33 = vmul.f32 %v4527_v25, %v4525_v26 }
 0xb01   : > { %v4524_v28 = vsel %vm636_vm1, %v4518_v23, %v4520_v27 }
 0xb02   : > { %v4522_v31 = vpop.permute.xlu1 %4521  ;;  %4731 = vrot.lane.b32.xlu0 %v8144_v58, %s9139_s29  ;;  %v4532_v32 = vmul.f32 %v4528_v24, %v4524_v28  ;;  %v4428_v28 = vld [vmem:[#allocation6 + $0x128] sm:$0xff] }
 0xb03   : > { %v4523_v34 = vsel %vm636_vm1, %v4520_v27, %v4522_v31  ;;  %v4526_v35 = vsel %vm636_vm1, %v4522_v31, %v4516_v21  ;;  %v4453_v21 = vld [vmem:[#allocation6 + $0x150] sm:$0xff] }
 0xb04   : > { %v4533_v37 = vmul.f32 %v4529_v29, %v4523_v34  ;;  %4733 = vrot.lane.b32.xlu1 %v8146_v60, %s9139_s29  ;;  %4894 = vmatprep.subr.mxu0 %v4532_v32  ;;  %v4492_v36 = vpop.permute.xlu0 %4491  ;;  %v4534_v3 = vmul.f32 %v4530_v30, %v4526_v35  ;;  %v4427_v34 = vld [vmem:[#allocation6 + $0x120] sm:$0xff]  ;;  %v4430_v35 = vld [vmem:[#allocation6 + $0x138] sm:$0xff] }
 0xb05   : > { %4895 = vmatpush1.msra.mxu0 %v4531_v33 }
 0xb06   : > { %v4494_v40 = vpop.permute.xlu1 %4493  ;;  %4735 = vrot.lane.b32.xlu0 %v8150_v52, %s9139_s29  ;;  %4965 = vmatprep.subr.mxu1 %v4534_v3 }
 0xb07   : > { %4966 = vmatpush1.msra.mxu1 %v4533_v37  ;;  %v4501_v2 = vsel %vm610_vm2, %v4492_v36, %v4494_v40 }
 0xb08   : > { %4737 = vrot.lane.b32.xlu1 %v8154_v62, %s9139_s29  ;;  %v4496_v13 = vpop.permute.xlu0 %4495  ;;  %v4507_v41 = vmul.f32 %v4503_v1, %v4501_v2 }
 0xb09   : > { %v4500_v0 = vsel %vm610_vm2, %v4494_v40, %v4496_v13 }
 0xb0a   : > { %v4498_v46 = vpop.permute.xlu1 %4497  ;;  %4707 = vrot.lane.b32.xlu0 %v8144_v58, %s9140_s28  ;;  %v4508_v47 = vmul.f32 %v4504_v42, %v4500_v0  ;;  %v4404_v0 = vld [vmem:[#allocation6 + $0x108] sm:$0xff] }
 0xb0b   : > { %v4499_v38 = vsel %vm610_vm2, %v4496_v13, %v4498_v46  ;;  %v4502_v49 = vsel %vm610_vm2, %v4498_v46, %v4492_v36  ;;  %v4429_v36 = vld [vmem:[#allocation6 + $0x130] sm:$0xff] }
 0xb0c   : > { %v4509_v51 = vmul.f32 %v4505_v44, %v4499_v38  ;;  %4709 = vrot.lane.b32.xlu1 %v8146_v60, %s9140_s28  ;;  %4896 = vmatprep.subr.mxu0 %v4508_v47  ;;  %v4464_v43 = vpop.permute.xlu0 %4463  ;;  %v4510_v53 = vmul.f32 %v4506_v45, %v4502_v49  ;;  %v4403_v38 = vld [vmem:[#allocation6 + $0x100] sm:$0xff]  ;;  %v4406_v49 = vld [vmem:[#allocation6 + $0x118] sm:$0xff] }
 0xb0d   : > { %4897 = vmatpush1.msra.mxu0 %v4507_v41 }
 0xb0e   : > { %v4466_v55 = vpop.permute.xlu1 %4465  ;;  %4711 = vrot.lane.b32.xlu0 %v8150_v52, %s9140_s28  ;;  %4898 = vmatprep.subr.mxu0 %v8146_v60 }
 0xb0f   : > { %v4473_v56 = vsel %vm580_vm3, %v4464_v43, %v4466_v55  ;;  %4967 = vmatprep.subr.mxu1 %v4510_v53  ;;  %4899 = vmatpush1.msra.mxu0 %v8144_v58 }
 0xb10   : > { %4968 = vmatpush1.msra.mxu1 %v4509_v51  ;;  %4713 = vrot.lane.b32.xlu1 %v8154_v62, %s9140_s28  ;;  %v4468_v57 = vpop.permute.xlu0 %4467  ;;  %v4480_v50 = vmul.f32 %v4476_v54, %v4473_v56 }
 0xb11   : > { %4969 = vmatprep.subr.mxu1 %v8154_v62  ;;  %v4472_v63 = vsel %vm580_vm3, %v4466_v55, %v4468_v57 }
 0xb12   : > { %4970 = vmatpush1.msra.mxu1 %v8150_v52  ;;  %v4470_v61 = vpop.permute.xlu1 %4469  ;;  %4683 = vrot.lane.b32.xlu0 %v8144_v58, %s9077_s14  ;;  %v4481_v11 = vmul.f32 %v4477_v39, %v4472_v63 }
 0xb13   : > { %v4471_v4 = vsel %vm580_vm3, %v4468_v57, %v4470_v61  ;;  %v4474_v6 = vsel %vm580_vm3, %v4470_v61, %v4464_v43  ;;  %4900 = vmatprep.subr.mxu0 %v4480_v50  ;;  %v4405_v43 = vld [vmem:[#allocation6 + $0x110] sm:$0xff] }
 0xb14   : > { %v4479_v7 = vmul.f32 %v4475_v48, %v4474_v6  ;;  %4685 = vrot.lane.b32.xlu1 %v8146_v60, %s9077_s14  ;;  %v4440_v8 = vpop.permute.xlu0 %4439  ;;  %v4482_v9 = vmul.f32 %v4478_v59, %v4471_v4  ;;  %v4380_v48 = vld [vmem:[#allocation6 + $0xe8] sm:$0xff]  ;;  %v4379_v6 = vld [vmem:[#allocation6 + $0xe0] sm:$0xff] }
 0xb16   : > { %v4442_v14 = vpop.permute.xlu1 %4441  ;;  %4687 = vrot.lane.b32.xlu0 %v8150_v52, %s9077_s14  ;;  %4901 = vmatpush1.msra.mxu0 %v4479_v7  ;;  %v4382_v7 = vld [vmem:[#allocation6 + $0xf8] sm:$0xff] }
 0xb17   : > { %v4449_v15 = vsel %vm554_vm4, %v4440_v8, %v4442_v14  ;;  %4971 = vmatprep.subr.mxu1 %v4482_v9  ;;  %v4381_v9 = vld [vmem:[#allocation6 + $0xf0] sm:$0xff] }
 0xb18   : > { %4972 = vmatpush1.msra.mxu1 %v4481_v11  ;;  %4689 = vrot.lane.b32.xlu1 %v8154_v62, %s9077_s14  ;;  %v4444_v16 = vpop.permute.xlu0 %4443  ;;  %v4456_v17 = vmul.f32 %v4452_v10, %v4449_v15 }
 0xb19   : > { %v4448_v22 = vsel %vm554_vm4, %v4442_v14, %v4444_v16 }
 0xb1a   : > { %v4446_v20 = vpop.permute.xlu1 %4445  ;;  %4659 = vrot.lane.b32.xlu0 %v8144_v58, %s9078_s13  ;;  %4902 = vmatprep.subr.mxu0 %v4456_v17  ;;  %v4457_v29 = vmul.f32 %v4453_v21, %v4448_v22 }
 0xb1b   : > { %v4447_v23 = vsel %vm554_vm4, %v4444_v16, %v4446_v20  ;;  %v4450_v24 = vsel %vm554_vm4, %v4446_v20, %v4440_v8 }
 0xb1c   : > { %v4455_v25 = vmul.f32 %v4451_v18, %v4450_v24  ;;  %4661 = vrot.lane.b32.xlu1 %v8146_v60, %s9078_s13  ;;  %v4416_v26 = vpop.permute.xlu0 %4415  ;;  %v4458_v27 = vmul.f32 %v4454_v19, %v4447_v23  ;;  %v4356_v18 = vld [vmem:[#allocation6 + $0xc8] sm:$0xff] }
 0xb1d   : > { %v6183_v19 = vld [vmem:[%s8986_s2 + $0x48] sm:$0xff] }
 0xb1e   : > { %v4418_v30 = vpop.permute.xlu1 %4417  ;;  %4663 = vrot.lane.b32.xlu0 %v8150_v52, %s9078_s13  ;;  %4903 = vmatpush1.msra.mxu0 %v4455_v25  ;;  %v4355_v25 = vld [vmem:[#allocation6 + $0xc0] sm:$0xff] }
 0xb1f   : > { %v4425_v31 = vsel %vm528_vm5, %v4416_v26, %v4418_v30  ;;  %4973 = vmatprep.subr.mxu1 %v4458_v27  ;;  %6185 = vmatprep.mubr.msk.f32.mxu0 %vm1022_vm9, %v6183_v19 }
 0xb20   : > { %4974 = vmatpush1.msra.mxu1 %v4457_v29  ;;  %4665 = vrot.lane.b32.xlu1 %v8154_v62, %s9078_s13  ;;  %v4420_v32 = vpop.permute.xlu0 %4419  ;;  %v4432_v33 = vmul.f32 %v4428_v28, %v4425_v31  ;;  %v4357_v28 = vld [vmem:[#allocation6 + $0xd0] sm:$0xff] }
 0xb21   : > { %v4424_v3 = vsel %vm528_vm5, %v4418_v30, %v4420_v32  ;;  %6186 = vmatprep.mubr.msk.f32.mxu1 %vm1022_vm9, %v6183_v19  ;;  %v4285_v19 = vld [vmem:[#allocation6 + $0x70] sm:$0xff] }
 0xb22   : > { %v4422_v37 = vpop.permute.xlu1 %4421  ;;  %4635 = vrot.lane.b32.xlu0 %v8144_v58, %s9079_s15  ;;  %4904 = vmatprep.subr.mxu0 %v4432_v33  ;;  %v4433_v44 = vmul.f32 %v4429_v36, %v4424_v3 }
 0xb23   : > { %v4423_v40 = vsel %vm528_vm5, %v4420_v32, %v4422_v37  ;;  %v4426_v42 = vsel %vm528_vm5, %v4422_v37, %v4416_v26  ;;  %v4358_v26 = vld [vmem:[#allocation6 + $0xd8] sm:$0xff] }
 0xb24   : > { %v4431_v1 = vmul.f32 %v4427_v34, %v4426_v42  ;;  %4637 = vrot.lane.b32.xlu1 %v8146_v60, %s9079_s15  ;;  %v4392_v2 = vpop.permute.xlu0 %4391  ;;  %v4434_v13 = vmul.f32 %v4430_v35, %v4423_v40  ;;  %v4332_v35 = vld [vmem:[#allocation6 + $0xa8] sm:$0xff]  ;;  %v6184_v40 = vld [vmem:[%s8987_s3 + $0x20] sm:$0xff] }
 0xb26   : > { %v4394_v45 = vpop.permute.xlu1 %4393  ;;  %4639 = vrot.lane.b32.xlu0 %v8150_v52, %s9079_s15  ;;  %4905 = vmatpush1.msra.mxu0 %v4431_v1 }
 0xb27   : > { %v4401_v46 = vsel %vm502_vm6, %v4392_v2, %v4394_v45  ;;  %4975 = vmatprep.subr.mxu1 %v4434_v13  ;;  %v6188_v13 = vld [vmem:[%s8987_s3 + $0x30] sm:$0xff] }
 0xb28   : > { %4976 = vmatpush1.msra.mxu1 %v4433_v44  ;;  %4641 = vrot.lane.b32.xlu1 %v8154_v62, %s9079_s15  ;;  %v4396_v47 = vpop.permute.xlu0 %4395  ;;  %v4408_v41 = vmul.f32 %v4404_v0, %v4401_v46  ;;  %v4334_v0 = vld [vmem:[#allocation6 + $0xb8] sm:$0xff]  ;;  %v4333_v44 = vld [vmem:[#allocation6 + $0xb0] sm:$0xff] }
 0xb29   : > { %v4400_v53 = vsel %vm502_vm6, %v4394_v45, %v4396_v47 }
 0xb2a   : > { %v4398_v51 = vpop.permute.xlu1 %4397  ;;  %4611 = vrot.lane.b32.xlu0 %v8144_v58, %s9080_s12  ;;  %4906 = vmatprep.subr.mxu0 %v4408_v41  ;;  %v4409_v59 = vmul.f32 %v4405_v43, %v4400_v53  ;;  %v4308_v53 = vld [vmem:[#allocation6 + $0x88] sm:$0xff] }
 0xb2b   : > { %v4399_v54 = vsel %vm502_vm6, %v4396_v47, %v4398_v51  ;;  %v4402_v55 = vsel %vm502_vm6, %v4398_v51, %v4392_v2  ;;  %v4331_v2 = vld [vmem:[#allocation6 + $0xa0] sm:$0xff] }
 0xb2c   : > { %v4407_v56 = vmul.f32 %v4403_v38, %v4402_v55  ;;  %4613 = vrot.lane.b32.xlu1 %v8146_v60, %s9080_s12  ;;  %v4368_v57 = vpop.permute.xlu0 %4367  ;;  %v4410_v50 = vmul.f32 %v4406_v49, %v4399_v54 }
 0xb2e   : > { %v4370_v61 = vpop.permute.xlu1 %4369  ;;  %4615 = vrot.lane.b32.xlu0 %v8150_v52, %s9080_s12  ;;  %4907 = vmatpush1.msra.mxu0 %v4407_v56 }
 0xb2f   : > { %v4377_v39 = vsel %vm476_vm7, %v4368_v57, %v4370_v61  ;;  %4977 = vmatprep.subr.mxu1 %v4410_v50  ;;  %v4307_v50 = vld [vmem:[#allocation6 + $0x80] sm:$0xff] }
 0xb30   : > { %4978 = vmatpush1.msra.mxu1 %v4409_v59  ;;  %4617 = vrot.lane.b32.xlu1 %v8154_v62, %s9080_s12  ;;  %v4372_v63 = vpop.permute.xlu0 %4371  ;;  %v4384_v4 = vmul.f32 %v4380_v48, %v4377_v39  ;;  %v4310_v48 = vld [vmem:[#allocation6 + $0x98] sm:$0xff]  ;;  %v4309_v59 = vld [vmem:[#allocation6 + $0x90] sm:$0xff] }
 0xb31   : > { %v4376_v10 = vsel %vm476_vm7, %v4370_v61, %v4372_v63 }
 0xb32   : > { %v4374_v8 = vpop.permute.xlu1 %4373  ;;  %4587 = vrot.lane.b32.xlu0 %v8144_v58, %s9081_s11  ;;  %4908 = vmatprep.subr.mxu0 %v4384_v4  ;;  %v4385_v20 = vmul.f32 %v4381_v9, %v4376_v10  ;;  %v4284_v10 = vld [vmem:[#allocation6 + $0x68] sm:$0xff] }
 0xb33   : > { %v4375_v11 = vsel %vm476_vm7, %v4372_v63, %v4374_v8  ;;  %v4378_v14 = vsel %vm476_vm7, %v4374_v8, %v4368_v57 }
 0xb34   : > { %v4383_v15 = vmul.f32 %v4379_v6, %v4378_v14  ;;  %4589 = vrot.lane.b32.xlu1 %v8146_v60, %s9081_s11  ;;  %v4344_v16 = vpop.permute.xlu0 %4343  ;;  %v4386_v17 = vmul.f32 %v4382_v7, %v4375_v11 }
 0xb36   : > { %v4346_v21 = vpop.permute.xlu1 %4345  ;;  %4591 = vrot.lane.b32.xlu0 %v8150_v52, %s9081_s11  ;;  %4909 = vmatpush1.msra.mxu0 %v4383_v15 }
 0xb37   : > { %v4353_v22 = vsel %vm450_vm8, %v4344_v16, %v4346_v21  ;;  %4979 = vmatprep.subr.mxu1 %v4386_v17  ;;  %v4283_v17 = vld [vmem:[#allocation6 + $0x60] sm:$0xff] }
 0xb38   : > { %4980 = vmatpush1.msra.mxu1 %v4385_v20  ;;  %4593 = vrot.lane.b32.xlu1 %v8154_v62, %s9081_s11  ;;  %v4348_v23 = vpop.permute.xlu0 %4347  ;;  %v4360_v24 = vmul.f32 %v4356_v18, %v4353_v22  ;;  %v4286_v18 = vld [vmem:[#allocation6 + $0x78] sm:$0xff] }
 0xb39   : > { %v4352_v29 = vsel %vm450_vm8, %v4346_v21, %v4348_v23 }
 0xb3a   : > { %v4350_v27 = vpop.permute.xlu1 %4349  ;;  %4563 = vrot.lane.b32.xlu0 %v8144_v58, %s9082_s8  ;;  %4910 = vmatprep.subr.mxu0 %v4360_v24  ;;  %v4361_v37 = vmul.f32 %v4357_v28, %v4352_v29  ;;  %v4260_v28 = vld [vmem:[#allocation6 + $0x48] sm:$0xff] }
 0xb3b   : > { %v4351_v30 = vsel %vm450_vm8, %v4348_v23, %v4350_v27  ;;  %v4354_v31 = vsel %vm450_vm8, %v4350_v27, %v4344_v16 }
 0xb3c   : > { %v4359_v32 = vmul.f32 %v4355_v25, %v4354_v31  ;;  %4565 = vrot.lane.b32.xlu1 %v8146_v60, %s9082_s8  ;;  %v4320_v33 = vpop.permute.xlu0 %4319  ;;  %v4362_v34 = vmul.f32 %v4358_v26, %v4351_v30 }
 0xb3e   : > { %v4322_v36 = vpop.permute.xlu1 %4321  ;;  %4567 = vrot.lane.b32.xlu0 %v8150_v52, %s9082_s8  ;;  %4911 = vmatpush1.msra.mxu0 %v4359_v32 }
 0xb3f   : > { %v4329_v3 = vsel %vm424_vm10, %v4320_v33, %v4322_v36  ;;  %4981 = vmatprep.subr.mxu1 %v4362_v34  ;;  %v4262_v34 = vld [vmem:[#allocation6 + $0x58] sm:$0xff] }
 0xb40   : > { %4982 = vmatpush1.msra.mxu1 %v4361_v37  ;;  %4569 = vrot.lane.b32.xlu1 %v8154_v62, %s9082_s8  ;;  %v4324_v42 = vpop.permute.xlu0 %4323  ;;  %v4336_v1 = vmul.f32 %v4332_v35, %v4329_v3  ;;  %v4261_v35 = vld [vmem:[#allocation6 + $0x50] sm:$0xff] }
 0xb41   : > { %v4328_v45 = vsel %vm424_vm10, %v4322_v36, %v4324_v42 }
 0xb42   : > { %v4326_v46 = vpop.permute.xlu1 %4325  ;;  %4886 = vperm.xlu0 %6258, %v6184_v40   ;;  %4912 = vmatprep.subr.mxu0 %v4336_v1  ;;  %v4337_v43 = vmul.f32 %v4333_v44, %v4328_v45 }
 0xb43   : > { %v4327_v47 = vsel %vm424_vm10, %v4324_v42, %v4326_v46  ;;  %v4330_v41 = vsel %vm424_vm10, %v4326_v46, %v4320_v33  ;;  %v4259_v33 = vld [vmem:[#allocation6 + $0x40] sm:$0xff] }
 0xb44   : > { %v4335_v38 = vmul.f32 %v4331_v2, %v4330_v41  ;;  %5056 = vperm.xlu1 %6259, %v6188_v13   ;;  %v4296_v49 = vpop.permute.xlu0 %4295  ;;  %v4338_v51 = vmul.f32 %v4334_v0, %v4327_v47  ;;  %v4236_v0 = vld [vmem:[#allocation6 + $0x28] sm:$0xff]  ;;  %v4235_v41 = vld [vmem:[#allocation6 + $0x20] sm:$0xff] }
 0xb46   : > { %v4298_v54 = vpop.permute.xlu1 %4297  ;;  %4913 = vmatpush1.msra.mxu0 %v4335_v38  ;;  %4983 = vmatprep.subr.mxu1 %v4338_v51  ;;  %v4238_v38 = vld [vmem:[#allocation6 + $0x38] sm:$0xff] }
 0xb47   : > { %v4305_v55 = vsel %vm9265_vm12, %v4296_v49, %v4298_v54  ;;  %4984 = vmatpush1.msra.mxu1 %v4337_v43  ;;  %vm9269_vm12 = vcmp.lt.s32.totalorder %v6571_v5, 31 }
 0xb48   : > { %v4300_v56 = vpop.permute.xlu0 %4299  ;;  %v4312_v57 = vmul.f32 %v4308_v53, %v4305_v55 }
 0xb49   : > { %v4304_v61 = vsel %vm9266_vm13, %v4298_v54, %v4300_v56  ;;  %vm9270_vm13 = vmmov %vm9269_vm12 }
 0xb4a   : > { %v4302_v39 = vpop.permute.xlu1 %4301  ;;  %4914 = vmatprep.subr.mxu0 %v4312_v57  ;;  %v4313_v9 = vmul.f32 %v4309_v59, %v4304_v61 }
 0xb4b   : > { %v4303_v63 = vsel %vm9267_vm14, %v4300_v56, %v4302_v39  ;;  %v4306_v4 = vsel %vm9268_vm15, %v4302_v39, %v4296_v49  ;;  %vm9271_vm14 = vmmov %vm9269_vm12  ;;  %v4237_v49 = vld [vmem:[#allocation6 + $0x30] sm:$0xff] }
 0xb4c   : > { %v4311_v6 = vmul.f32 %v4307_v50, %v4306_v4  ;;  %v4272_v7 = vpop.permute.xlu0 %4271  ;;  %v4314_v8 = vmul.f32 %v4310_v48, %v4303_v63  ;;  %vm9272_vm15 = vmmov %vm9269_vm12  ;;  %v4212_v48 = vld [vmem:[#allocation6 + $0x8] sm:$0xff]  ;;  %v4211_v4 = vld [vmem:[#allocation6] sm:$0xff] }
 0xb4e   : > { %v4274_v11 = vpop.permute.xlu1 %4273  ;;  %4915 = vmatpush1.msra.mxu0 %v4311_v6  ;;  %4985 = vmatprep.subr.mxu1 %v4314_v8  ;;  %v4214_v6 = vld [vmem:[#allocation6 + $0x18] sm:$0xff] }
 0xb4f   : > { %v4281_v14 = vsel %vm9269_vm12, %v4272_v7, %v4274_v11  ;;  %4986 = vmatpush1.msra.mxu1 %v4313_v9  ;;  %vm9273_vm12 = vcmp.lt.s32.totalorder %v6571_v5, 32 }
 0xb50   : > { %v4276_v15 = vpop.permute.xlu0 %4275  ;;  %v4288_v16 = vmul.f32 %v4284_v10, %v4281_v14 }
 0xb51   : > { %v4280_v20 = vsel %vm9270_vm13, %v4274_v11, %v4276_v15  ;;  %vm9274_vm13 = vmmov %vm9273_vm12 }
 0xb52   : > { %v4278_v21 = vpop.permute.xlu1 %4277  ;;  %4916 = vmatprep.subr.mxu0 %v4288_v16  ;;  %v4289_v27 = vmul.f32 %v4285_v19, %v4280_v20  ;;  %v4768_v19 = vld [vmem:[#allocation6 + $0x308] sm:$0xff]  ;;  %v4767_v20 = vld [vmem:[#allocation6 + $0x300] sm:$0xff] }
 0xb53   : > { %v4279_v22 = vsel %vm9271_vm14, %v4276_v15, %v4278_v21  ;;  %v4282_v23 = vsel %vm9272_vm15, %v4278_v21, %v4272_v7  ;;  %vm9275_vm14 = vmmov %vm9273_vm12  ;;  %v4213_v7 = vld [vmem:[#allocation6 + $0x10] sm:$0xff] }
 0xb54   : > { %v4287_v24 = vmul.f32 %v4283_v17, %v4282_v23  ;;  %v4248_v25 = vpop.permute.xlu0 %4247  ;;  %v4290_v26 = vmul.f32 %v4286_v18, %v4279_v22  ;;  %vm9276_vm15 = vmmov %vm9273_vm12 }
 0xb56   : > { %v4250_v29 = vpop.permute.xlu1 %4249  ;;  %4917 = vmatpush1.msra.mxu0 %v4287_v24  ;;  %4987 = vmatprep.subr.mxu1 %v4290_v26  ;;  %v4769_v24 = vld [vmem:[#allocation6 + $0x310] sm:$0xff] }
 0xb57   : > { %v4257_v30 = vsel %vm9273_vm12, %v4248_v25, %v4250_v29  ;;  %4988 = vmatpush1.msra.mxu1 %v4289_v27  ;;  %vm9277_vm12 = vcmp.lt.s32.totalorder %v6571_v5, 33 }
 0xb58   : > { %v4252_v31 = vpop.permute.xlu0 %4251  ;;  %v4264_v32 = vmul.f32 %v4260_v28, %v4257_v30 }
 0xb59   : > { %v4256_v37 = vsel %vm9274_vm13, %v4250_v29, %v4252_v31  ;;  %vm9278_vm13 = vmmov %vm9277_vm12 }
 0xb5a   : > { %v4254_v36 = vpop.permute.xlu1 %4253  ;;  %4918 = vmatprep.subr.mxu0 %v4264_v32  ;;  %v4265_v13 = vmul.f32 %v4261_v35, %v4256_v37  ;;  %v4744_v35 = vld [vmem:[#allocation6 + $0x2e8] sm:$0xff]  ;;  %v4743_v37 = vld [vmem:[#allocation6 + $0x2e0] sm:$0xff] }
 0xb5b   : > { %v4255_v3 = vsel %vm9275_vm14, %v4252_v31, %v4254_v36  ;;  %v4258_v40 = vsel %vm9276_vm15, %v4254_v36, %v4248_v25  ;;  %vm9279_vm14 = vmmov %vm9277_vm12  ;;  %v4770_v25 = vld [vmem:[#allocation6 + $0x318] sm:$0xff] }
 0xb5c   : > { %v4263_v42 = vmul.f32 %v4259_v33, %v4258_v40  ;;  %v4224_v1 = vpop.permute.xlu0 %4223  ;;  %v4266_v2 = vmul.f32 %v4262_v34, %v4255_v3  ;;  %vm9280_vm15 = vmmov %vm9277_vm12 }
 0xb5e   : > { %v4226_v44 = vpop.permute.xlu1 %4225  ;;  %4919 = vmatpush1.msra.mxu0 %v4263_v42  ;;  %4989 = vmatprep.subr.mxu1 %v4266_v2  ;;  %v4745_v42 = vld [vmem:[#allocation6 + $0x2f0] sm:$0xff] }
 0xb5f   : > { %v4233_v45 = vsel %vm9277_vm12, %v4224_v1, %v4226_v44  ;;  %4990 = vmatpush1.msra.mxu1 %v4265_v13  ;;  %vm9281_vm12 = vcmp.lt.s32.totalorder %v6571_v5, 34 }
 0xb60   : > { %v4228_v46 = vpop.permute.xlu0 %4227  ;;  %v4240_v47 = vmul.f32 %v4236_v0, %v4233_v45 }
 0xb61   : > { %v4232_v51 = vsel %vm9278_vm13, %v4226_v44, %v4228_v46  ;;  %vm9282_vm13 = vmmov %vm9281_vm12 }
 0xb62   : > { %v4230_v43 = vpop.permute.xlu1 %4229  ;;  %4920 = vmatprep.subr.mxu0 %v4240_v47  ;;  %v4241_v50 = vmul.f32 %v4237_v49, %v4232_v51  ;;  %v4720_v49 = vld [vmem:[#allocation6 + $0x2c8] sm:$0xff]  ;;  %v4719_v51 = vld [vmem:[#allocation6 + $0x2c0] sm:$0xff] }
 0xb63   : > { %v4231_v53 = vsel %vm9279_vm14, %v4228_v46, %v4230_v43  ;;  %v4234_v54 = vsel %vm9280_vm15, %v4230_v43, %v4224_v1  ;;  %vm9283_vm14 = vmmov %vm9281_vm12  ;;  %v4746_v1 = vld [vmem:[#allocation6 + $0x2f8] sm:$0xff] }
 0xb64   : > { %v4239_v55 = vmul.f32 %v4235_v41, %v4234_v54  ;;  %v4200_v56 = vpop.permute.xlu0 %4199  ;;  %v4242_v57 = vmul.f32 %v4238_v38, %v4231_v53  ;;  %vm9284_vm15 = vmmov %vm9281_vm12 }
 0xb66   : > { %v4202_v59 = vpop.permute.xlu1 %4201  ;;  %4921 = vmatpush1.msra.mxu0 %v4239_v55  ;;  %4991 = vmatprep.subr.mxu1 %v4242_v57  ;;  %v4721_v55 = vld [vmem:[#allocation6 + $0x2d0] sm:$0xff] }
 0xb67   : > { %v4209_v61 = vsel %vm9281_vm12, %v4200_v56, %v4202_v59  ;;  %4992 = vmatpush1.msra.mxu1 %v4241_v50  ;;  %vm9285_vm12 = vcmp.lt.s32.totalorder %v6571_v5, 94 }
 0xb68   : > { %v4204_v39 = vpop.permute.xlu0 %4203  ;;  %v4216_v63 = vmul.f32 %v4212_v48, %v4209_v61 }
 0xb69   : > { %v4208_v8 = vsel %vm9282_vm13, %v4202_v59, %v4204_v39  ;;  %vm9286_vm13 = vmmov %vm9285_vm12 }
 0xb6a   : > { %v4206_v9 = vpop.permute.xlu1 %4205  ;;  %4922 = vmatprep.subr.mxu0 %v4216_v63  ;;  %v4217_v17 = vmul.f32 %v4213_v7, %v4208_v8  ;;  %v4696_v7 = vld [vmem:[#allocation6 + $0x2a8] sm:$0xff]  ;;  %v4695_v8 = vld [vmem:[#allocation6 + $0x2a0] sm:$0xff] }
 0xb6b   : > { %v4207_v10 = vsel %vm9283_vm14, %v4204_v39, %v4206_v9  ;;  %v4210_v11 = vsel %vm9284_vm15, %v4206_v9, %v4200_v56  ;;  %vm9287_vm14 = vmmov %vm9285_vm12  ;;  %v4722_v56 = vld [vmem:[#allocation6 + $0x2d8] sm:$0xff] }
 0xb6c   : > { %v4215_v14 = vmul.f32 %v4211_v4, %v4210_v11  ;;  %v4756_v15 = vpop.permute.xlu0 %4755  ;;  %v4218_v16 = vmul.f32 %v4214_v6, %v4207_v10  ;;  %vm9288_vm15 = vmmov %vm9285_vm12 }
 0xb6e   : > { %v4758_v18 = vpop.permute.xlu1 %4757  ;;  %4923 = vmatpush1.msra.mxu0 %v4215_v14  ;;  %4993 = vmatprep.subr.mxu1 %v4218_v16  ;;  %v4697_v14 = vld [vmem:[#allocation6 + $0x2b0] sm:$0xff] }
 0xb6f   : > { %4994 = vmatpush1.msra.mxu1 %v4217_v17  ;;  %v4765_v21 = vsel %vm9285_vm12, %v4756_v15, %v4758_v18  ;;  %vm9289_vm12 = vcmp.lt.s32.totalorder %v6571_v5, 95 }
 0xb70   : > { %v4760_v22 = vpop.permute.xlu0 %4759  ;;  %v4771_v28 = vmul.f32 %v4767_v20, %v4765_v21 }
 0xb71   : > { %v4764_v23 = vsel %vm9286_vm13, %v4758_v18, %v4760_v22  ;;  %vm9290_vm13 = vmmov %vm9289_vm12 }
 0xb72   : > { %v4762_v26 = vpop.permute.xlu1 %4761  ;;  %v4772_v27 = vmul.f32 %v4768_v19, %v4764_v23 }
 0xb73   : > { %v4763_v29 = vsel %vm9287_vm14, %v4760_v22, %v4762_v26  ;;  %v4766_v30 = vsel %vm9288_vm15, %v4762_v26, %v4756_v15  ;;  %vm9291_vm14 = vmmov %vm9289_vm12  ;;  %v4698_v15 = vld [vmem:[#allocation6 + $0x2b8] sm:$0xff]  ;;  %v4671_v26 = vld [vmem:[#allocation6 + $0x280] sm:$0xff] }
 0xb74   : > { %v4773_v31 = vmul.f32 %v4769_v24, %v4763_v29  ;;  %4938 = vmatprep.subr.mxu0 %v4772_v27  ;;  %v4732_v32 = vpop.permute.xlu0 %4731  ;;  %v4774_v33 = vmul.f32 %v4770_v25, %v4766_v30  ;;  %vm9292_vm15 = vmmov %vm9289_vm12  ;;  %v4672_v25 = vld [vmem:[#allocation6 + $0x288] sm:$0xff]  ;;  %v4673_v30 = vld [vmem:[#allocation6 + $0x290] sm:$0xff] }
 0xb75   : > { %4939 = vmatpush2.msra.mxu0 %v4771_v28 }
 0xb76   : > { %v4734_v34 = vpop.permute.xlu1 %4733  ;;  %5009 = vmatprep.subr.mxu1 %v4774_v33 }
 0xb77   : > { %5010 = vmatpush2.msra.mxu1 %v4773_v31  ;;  %v4741_v36 = vsel %vm9289_vm12, %v4732_v32, %v4734_v34  ;;  %vm9293_vm12 = vcmp.lt.s32.totalorder %v6571_v5, 96  ;;  %v4674_v31 = vld [vmem:[#allocation6 + $0x298] sm:$0xff] }
 0xb78   : > { %v4736_v3 = vpop.permute.xlu0 %4735  ;;  %v4747_v0 = vmul.f32 %v4743_v37, %v4741_v36 }
 0xb79   : > { %v4740_v40 = vsel %vm9290_vm13, %v4734_v34, %v4736_v3  ;;  %vm9294_vm13 = vmmov %vm9293_vm12 }
 0xb7a   : > { %v4738_v2 = vpop.permute.xlu1 %4737  ;;  %v4748_v13 = vmul.f32 %v4744_v35, %v4740_v40 }
 0xb7b   : > { %v4739_v44 = vsel %vm9291_vm14, %v4736_v3, %v4738_v2  ;;  %v4742_v45 = vsel %vm9292_vm15, %v4738_v2, %v4732_v32  ;;  %vm9295_vm14 = vmmov %vm9293_vm12  ;;  %v4647_v2 = vld [vmem:[#allocation6 + $0x260] sm:$0xff] }
 0xb7c   : > { %v4749_v46 = vmul.f32 %v4745_v42, %v4739_v44  ;;  %4940 = vmatprep.subr.mxu0 %v4748_v13  ;;  %v4708_v47 = vpop.permute.xlu0 %4707  ;;  %v4750_v41 = vmul.f32 %v4746_v1, %v4742_v45  ;;  %vm9296_vm15 = vmmov %vm9293_vm12  ;;  %v4648_v1 = vld [vmem:[#allocation6 + $0x268] sm:$0xff]  ;;  %v4649_v45 = vld [vmem:[#allocation6 + $0x270] sm:$0xff] }
 0xb7d   : > { %4941 = vmatpush2.msra.mxu0 %v4747_v0 }
 0xb7e   : > { %v4710_v38 = vpop.permute.xlu1 %4709  ;;  %5011 = vmatprep.subr.mxu1 %v4750_v41 }
 0xb7f   : > { %5012 = vmatpush2.msra.mxu1 %v4749_v46  ;;  %v4717_v43 = vsel %vm9293_vm12, %v4708_v47, %v4710_v38  ;;  %vm9297_vm12 = vcmp.lt.s32.totalorder %v6571_v5, 97  ;;  %v4650_v46 = vld [vmem:[#allocation6 + $0x278] sm:$0xff] }
 0xb80   : > { %v4712_v53 = vpop.permute.xlu0 %4711  ;;  %v4723_v48 = vmul.f32 %v4719_v51, %v4717_v43 }
 0xb81   : > { %v4716_v54 = vsel %vm9294_vm13, %v4710_v38, %v4712_v53  ;;  %vm9298_vm13 = vmmov %vm9297_vm12 }
 0xb82   : > { %v4714_v57 = vpop.permute.xlu1 %4713  ;;  %v4724_v50 = vmul.f32 %v4720_v49, %v4716_v54 }
 0xb83   : > { %v4715_v59 = vsel %vm9295_vm14, %v4712_v53, %v4714_v57  ;;  %v4718_v61 = vsel %vm9296_vm15, %v4714_v57, %v4708_v47  ;;  %vm9299_vm14 = vmmov %vm9297_vm12  ;;  %v4623_v57 = vld [vmem:[#allocation6 + $0x240] sm:$0xff] }
 0xb84   : > { %v4725_v39 = vmul.f32 %v4721_v55, %v4715_v59  ;;  %4942 = vmatprep.subr.mxu0 %v4724_v50  ;;  %v4684_v63 = vpop.permute.xlu0 %4683  ;;  %v4726_v4 = vmul.f32 %v4722_v56, %v4718_v61  ;;  %vm9300_vm15 = vmmov %vm9297_vm12  ;;  %v4624_v56 = vld [vmem:[#allocation6 + $0x248] sm:$0xff]  ;;  %v4625_v61 = vld [vmem:[#allocation6 + $0x250] sm:$0xff] }
 0xb85   : > { %4943 = vmatpush2.msra.mxu0 %v4723_v48 }
 0xb86   : > { %v4686_v6 = vpop.permute.xlu1 %4685  ;;  %5013 = vmatprep.subr.mxu1 %v4726_v4 }
 0xb87   : > { %5014 = vmatpush2.msra.mxu1 %v4725_v39  ;;  %v4693_v9 = vsel %vm9297_vm12, %v4684_v63, %v4686_v6  ;;  %vm9301_vm12 = vcmp.lt.s32.totalorder %v6571_v5, 98  ;;  %v4626_v39 = vld [vmem:[#allocation6 + $0x258] sm:$0xff] }
 0xb88   : > { %v4688_v10 = vpop.permute.xlu0 %4687  ;;  %v4699_v18 = vmul.f32 %v4695_v8, %v4693_v9 }
 0xb89   : > { %v4692_v11 = vsel %vm9298_vm13, %v4686_v6, %v4688_v10  ;;  %vm9302_vm13 = vmmov %vm9301_vm12 }
 0xb8a   : > { %v4690_v16 = vpop.permute.xlu1 %4689  ;;  %v4700_v17 = vmul.f32 %v4696_v7, %v4692_v11 }
 0xb8b   : > { %v4691_v19 = vsel %vm9299_vm14, %v4688_v10, %v4690_v16  ;;  %v4694_v20 = vsel %vm9300_vm15, %v4690_v16, %v4684_v63  ;;  %vm9303_vm14 = vmmov %vm9301_vm12  ;;  %v4599_v16 = vld [vmem:[#allocation6 + $0x220] sm:$0xff] }
 0xb8c   : > { %v4701_v21 = vmul.f32 %v4697_v14, %v4691_v19  ;;  %4944 = vmatprep.subr.mxu0 %v4700_v17  ;;  %v4660_v22 = vpop.permute.xlu0 %4659  ;;  %v4702_v23 = vmul.f32 %v4698_v15, %v4694_v20  ;;  %vm9304_vm15 = vmmov %vm9301_vm12  ;;  %v4600_v15 = vld [vmem:[#allocation6 + $0x228] sm:$0xff]  ;;  %v4601_v20 = vld [vmem:[#allocation6 + $0x230] sm:$0xff] }
 0xb8d   : > { %4945 = vmatpush2.msra.mxu0 %v4699_v18 }
 0xb8e   : > { %v4662_v24 = vpop.permute.xlu1 %4661  ;;  %5015 = vmatprep.subr.mxu1 %v4702_v23 }
 0xb8f   : > { %5016 = vmatpush2.msra.mxu1 %v4701_v21  ;;  %v4669_v27 = vsel %vm9301_vm12, %v4660_v22, %v4662_v24  ;;  %vm9305_vm12 = vcmp.lt.s32.totalorder %v6571_v5, 110  ;;  %v4602_v21 = vld [vmem:[#allocation6 + $0x238] sm:$0xff] }
 0xb90   : > { %v4664_v28 = vpop.permute.xlu0 %4663  ;;  %v4675_v34 = vmul.f32 %v4671_v26, %v4669_v27 }
 0xb91   : > { %v4668_v29 = vsel %vm9302_vm13, %v4662_v24, %v4664_v28  ;;  %vm9306_vm13 = vmmov %vm9305_vm12 }
 0xb92   : > { %v4666_v32 = vpop.permute.xlu1 %4665  ;;  %v4676_v33 = vmul.f32 %v4672_v25, %v4668_v29 }
 0xb93   : > { %v4667_v35 = vsel %vm9303_vm14, %v4664_v28, %v4666_v32  ;;  %v4670_v37 = vsel %vm9304_vm15, %v4666_v32, %v4660_v22  ;;  %vm9307_vm14 = vmmov %vm9305_vm12  ;;  %v4575_v32 = vld [vmem:[#allocation6 + $0x200] sm:$0xff] }
 0xb94   : > { %v4677_v36 = vmul.f32 %v4673_v30, %v4667_v35  ;;  %4946 = vmatprep.subr.mxu0 %v4676_v33  ;;  %v4636_v3 = vpop.permute.xlu0 %4635  ;;  %v4678_v40 = vmul.f32 %v4674_v31, %v4670_v37  ;;  %vm9308_vm15 = vmmov %vm9305_vm12  ;;  %v4576_v31 = vld [vmem:[#allocation6 + $0x208] sm:$0xff]  ;;  %v4577_v37 = vld [vmem:[#allocation6 + $0x210] sm:$0xff] }
 0xb95   : > { %4947 = vmatpush2.msra.mxu0 %v4675_v34 }
 0xb96   : > { %v4638_v42 = vpop.permute.xlu1 %4637  ;;  %5017 = vmatprep.subr.mxu1 %v4678_v40 }
 0xb97   : > { %5018 = vmatpush2.msra.mxu1 %v4677_v36  ;;  %v4645_v13 = vsel %vm9305_vm12, %v4636_v3, %v4638_v42  ;;  %vm9309_vm12 = vcmp.lt.s32.totalorder %v6571_v5, 111  ;;  %v4578_v36 = vld [vmem:[#allocation6 + $0x218] sm:$0xff] }
 0xb98   : > { %v4640_v0 = vpop.permute.xlu0 %4639  ;;  %v4651_v38 = vmul.f32 %v4647_v2, %v4645_v13  ;;  %v6182_v13 = vld [vmem:[%s8986_s2 + $0x40] sm:$0xff] }
 0xb99   : > { %v4644_v44 = vsel %vm9306_vm13, %v4638_v42, %v4640_v0  ;;  %vm9310_vm13 = vmmov %vm9309_vm12 }
 0xb9a   : > { %v4642_v47 = vpop.permute.xlu1 %4641  ;;  %v4652_v41 = vmul.f32 %v4648_v1, %v4644_v44 }
 0xb9b   : > { %v4643_v49 = vsel %vm9307_vm14, %v4640_v0, %v4642_v47  ;;  %v4646_v51 = vsel %vm9308_vm15, %v4642_v47, %v4636_v3  ;;  %vm9311_vm14 = vmmov %vm9309_vm12  ;;  %v5039_v47 = vstv %s6187_s6 }
 0xb9c   : > { %v4653_v43 = vmul.f32 %v4649_v45, %v4643_v49  ;;  %4948 = vmatprep.subr.mxu0 %v4652_v41  ;;  %v4612_v53 = vpop.permute.xlu0 %4611  ;;  %v4654_v54 = vmul.f32 %v4650_v46, %v4646_v51  ;;  %vm9312_vm15 = vmmov %vm9309_vm12 }
 0xb9d   : > { %4949 = vmatpush2.msra.mxu0 %v4651_v38 }
 0xb9e   : > { %v4614_v55 = vpop.permute.xlu1 %4613  ;;  %5019 = vmatprep.subr.mxu1 %v4654_v54 }
 0xb9f   : > { %5020 = vmatpush2.msra.mxu1 %v4653_v43  ;;  %v4621_v50 = vsel %vm9309_vm12, %v4612_v53, %v4614_v55  ;;  %vm9313_vm12 = vcmp.lt.s32.totalorder %v6571_v5, 112 }
 0xba0   : > { %v4616_v48 = vpop.permute.xlu0 %4615  ;;  %v4627_v6 = vmul.f32 %v4623_v57, %v4621_v50 }
 0xba1   : > { %v4620_v59 = vsel %vm9310_vm13, %v4614_v55, %v4616_v48  ;;  %vm9314_vm13 = vmmov %vm9313_vm12 }
 0xba2   : > { %v4618_v63 = vpop.permute.xlu1 %4617  ;;  %v4628_v4 = vmul.f32 %v4624_v56, %v4620_v59 }
 0xba3   : > { %v4619_v7 = vsel %vm9311_vm14, %v4616_v48, %v4618_v63  ;;  %v4622_v8 = vsel %vm9312_vm15, %v4618_v63, %v4612_v53  ;;  %vm9315_vm14 = vmmov %vm9313_vm12  ;;  %v5052_v63 = vld [vmem:[%s8988_s4] sm:$0xff] }
 0xba4   : > { %v4629_v9 = vmul.f32 %v4625_v61, %v4619_v7  ;;  %4950 = vmatprep.subr.mxu0 %v4628_v4  ;;  %v4588_v10 = vpop.permute.xlu0 %4587  ;;  %v4630_v11 = vmul.f32 %v4626_v39, %v4622_v8  ;;  %vm9316_vm15 = vmmov %vm9313_vm12 }
 0xba5   : > { %4951 = vmatpush2.msra.mxu0 %v4627_v6 }
 0xba6   : > { %v4590_v14 = vpop.permute.xlu1 %4589  ;;  %5021 = vmatprep.subr.mxu1 %v4630_v11 }
 0xba7   : > { %5022 = vmatpush2.msra.mxu1 %v4629_v9  ;;  %v4597_v17 = vsel %vm9313_vm12, %v4588_v10, %v4590_v14  ;;  %vm9317_vm12 = vcmp.lt.s32.totalorder %v6571_v5, 113 }
 0xba8   : > { %v4592_v18 = vpop.permute.xlu0 %4591  ;;  %v4603_v24 = vmul.f32 %v4599_v16, %v4597_v17  ;;  %v5557_v17 = vld [vmem:[#allocation6 + $0x1e8] sm:$0xff] }
 0xba9   : > { %v4596_v19 = vsel %vm9314_vm13, %v4590_v14, %v4592_v18  ;;  %vm9318_vm13 = vmmov %vm9317_vm12 }
 0xbaa   : > { %v4594_v22 = vpop.permute.xlu1 %4593  ;;  %v4604_v23 = vmul.f32 %v4600_v15, %v4596_v19 }
 0xbab   : > { %v4595_v25 = vsel %vm9315_vm14, %v4592_v18, %v4594_v22  ;;  %v4598_v26 = vsel %vm9316_vm15, %v4594_v22, %v4588_v10  ;;  %vm9319_vm14 = vmmov %vm9317_vm12  ;;  %v5556_v18 = vld [vmem:[#allocation6 + $0x1e0] sm:$0xff]  ;;  %v5558_v22 = vld [vmem:[#allocation6 + $0x1f0] sm:$0xff] }
 0xbac   : > { %v4605_v27 = vmul.f32 %v4601_v20, %v4595_v25  ;;  %4952 = vmatprep.subr.mxu0 %v4604_v23  ;;  %v4564_v28 = vpop.permute.xlu0 %4563  ;;  %v4606_v29 = vmul.f32 %v4602_v21, %v4598_v26  ;;  %vm9320_vm15 = vmmov %vm9317_vm12  ;;  %v5559_v23 = vld [vmem:[#allocation6 + $0x1f8] sm:$0xff] }
 0xbad   : > { %4953 = vmatpush2.msra.mxu0 %v4603_v24 }
 0xbae   : > { %v4566_v30 = vpop.permute.xlu1 %4565  ;;  %5023 = vmatprep.subr.mxu1 %v4606_v29 }
 0xbaf   : > { %5024 = vmatpush2.msra.mxu1 %v4605_v27  ;;  %v4573_v33 = vsel %vm9317_vm12, %v4564_v28, %v4566_v30 }
 0xbb0   : > { %v4568_v34 = vpop.permute.xlu0 %4567  ;;  %v4579_v42 = vmul.f32 %v4575_v32, %v4573_v33  ;;  %v5533_v33 = vld [vmem:[#allocation6 + $0x1c8] sm:$0xff] }
 0xbb1   : > { %v4572_v35 = vsel %vm9318_vm13, %v4566_v30, %v4568_v34 }
 0xbb2   : > { %v4570_v3 = vpop.permute.xlu1 %4569  ;;  %v4580_v40 = vmul.f32 %v4576_v31, %v4572_v35 }
 0xbb3   : > { %v4571_v1 = vsel %vm9319_vm14, %v4568_v34, %v4570_v3  ;;  %v4574_v2 = vsel %vm9320_vm15, %v4570_v3, %v4564_v28  ;;  %v5532_v34 = vld [vmem:[#allocation6 + $0x1c0] sm:$0xff]  ;;  %v5534_v3 = vld [vmem:[#allocation6 + $0x1d0] sm:$0xff] }
 0xbb4   : > { %v4581_v0 = vmul.f32 %v4577_v37, %v4571_v1  ;;  %4954 = vmatprep.subr.mxu0 %v4580_v40  ;;  %v4582_v44 = vmul.f32 %v4578_v36, %v4574_v2  ;;  %v5535_v40 = vld [vmem:[#allocation6 + $0x1d8] sm:$0xff] }
 0xbb5   : > { %4955 = vmatpush2.msra.mxu0 %v4579_v42 }
 0xbb6   : > { %4957 = vmatmul.mubr.f32.vlgmr.msra.gmra.mxu0 %v6182_v13  ;;  %5025 = vmatprep.subr.mxu1 %v4582_v44 }
 0xbb7   : > { %5026 = vmatpush2.msra.mxu1 %v4581_v0  ;;  %5126 = vmatprep.mubr.f32.mxu0 %v6350_v12 }
 0xbb8   : > { %5028 = vmatmul.mubr.f32.vlgmr.msra.gmra.mxu1 %v6182_v13 }
 0xbb9   : > { %5197 = vmatprep.mubr.f32.mxu1 %v6350_v12 }
 0xbbd   : > { %v4887_v45 = vpop.permute.xlu0 %4886 }
 0xc76   : > { %v4958_v46 = vpop.f32.mrf.mxu0 }
 0xc77   : > { %v4959_v41 = vadd.f32 %v4958_v46, %v4887_v45 }
 0xc78   : > { %v4960_v38 = vpop.f32.mrf.mxu0  ;;  %v5029_v49 = vpop.f32.mrf.mxu1 }
 0xc79   : > { %vm5035_vm12 = vcmp.ge.f32.partialorder %v4959_v41, 0.0  ;;  %v5040_v51 = vmul.f32 %v5039_v47, %v4959_v41  ;;  %v4961_v43 = vadd.f32 %v4960_v38, %v4887_v45  ;;  %v5030_v53 = vadd.f32 %v5029_v49, %v4887_v45  ;;  %v5508_v38 = vld [vmem:[#allocation6 + $0x1a0] sm:$0xff] }
 0xc7a   : > { %v5031_v54 = vpop.f32.mrf.mxu1 }
 0xc7b   : > { %vm5036_vm13 = vcmp.ge.f32.partialorder %v4961_v43, 0.0  ;;  %v5041_v55 = vmul.f32 %v5039_v47, %v4961_v43  ;;  %v5044_v56 = vsel %vm5035_vm12, %v4959_v41, %v5040_v51  ;;  %vm5037_vm14 = vcmp.ge.f32.partialorder %v5030_v53, 0.0  ;;  %v5509_v41 = vld [vmem:[#allocation6 + $0x1a8] sm:$0xff] }
 0xc7c   : > { %v5042_v57 = vmul.f32 %v5039_v47, %v5030_v53  ;;  %v5032_v50 = vadd.f32 %v5031_v54, %v4887_v45  ;;  %v5048_v61 = vadd.f32 %v5044_v56, %v8144_v58  ;;  %v5511_v54 = vld [vmem:[#allocation6 + $0x1b8] sm:$0xff]  ;;  %vm9333_vm12 = vcmp.lt.s32.totalorder %v6571_v5, 33 }
 0xc7d   : > { %v5045_v48 = vsel %vm5036_vm13, %v4961_v43, %v5041_v55  ;;  %vm9334_vm13 = vmmov %vm9333_vm12 }
 0xc7e   : > { %vm5038_vm15 = vcmp.ge.f32.partialorder %v5032_v50, 0.0  ;;  %v5043_v12 = vmul.f32 %v5039_v47, %v5032_v50  ;;  %v5049_v59 = vadd.f32 %v5045_v48, %v8146_v60  ;;  %v5046_v39 = vsel %vm5037_vm14, %v5030_v53, %v5042_v57  ;;  %v5057_v60 = vpop.permute.xlu1 %5056  ;;  %v5510_v53 = vld [vmem:[#allocation6 + $0x1b0] sm:$0xff]  ;;  %vm9335_vm14 = vmmov %vm9333_vm12 }
 0xc7f   : > { %v5050_v7 = vadd.f32 %v5046_v39, %v8150_v52  ;;  %v5481_v39 = vld [vmem:[#allocation6 + $0x168] sm:$0xff] }
 0xc80   : > { %5092 = vmatprep.subr.mxu0 %v5049_v59  ;;  %v5047_v4 = vsel %vm5038_vm15, %v5032_v50, %v5043_v12  ;;  %vm9336_vm15 = vmmov %vm9333_vm12 }
 0xc81   : > { %5093 = vmatpush1.msra.mxu0 %v5048_v61  ;;  %v5051_v6 = vadd.f32 %v5047_v4, %v8154_v62 }
 0xc82   : > { %6189 = vmatmul.mubr.msk.f32.vlgmr.msra.gmra.mxu0 %vm2043_vm11, %v5052_v63 }
 0xc83   : > { %5163 = vmatprep.subr.mxu1 %v5051_v6 }
 0xc84   : > { %5164 = vmatpush1.msra.mxu1 %v5050_v7 }
 0xc85   : > { %6190 = vmatmul.mubr.msk.f32.vlgmr.msra.gmra.mxu1 %vm2043_vm11, %v5052_v63 }
 0xd42   : > { %v5128_v58 = vpop.f32.mrf.mxu0 }
 0xd43   : > { %v8565_v8 = vadd.f32 %v5128_v58, %v5057_v60  ;;  %v5483_v58 = vld [vmem:[#allocation6 + $0x178] sm:$0xff] }
 0xd44   : > { %v5130_v9 = vpop.f32.mrf.mxu0 }
 0xd45   : > { %v8567_v10 = vadd.f32 %v5130_v9, %v5057_v60  ;;  %v5199_v11 = vpop.f32.mrf.mxu1  ;;  %5544 = vrot.lane.b32.xlu0 %v8565_v8, %s9259_s17 }
 0xd46   : > { %v8571_v62 = vadd.f32 %v5199_v11, %v5057_v60  ;;  %v5482_v11 = vld [vmem:[#allocation6 + $0x170] sm:$0xff] }
 0xd47   : > { %v5201_v52 = vpop.f32.mrf.mxu1  ;;  %5546 = vrot.lane.b32.xlu1 %v8567_v10, %s9259_s17 }
 0xd48   : > { %v8575_v14 = vadd.f32 %v5201_v52, %v5057_v60  ;;  %v5480_v60 = vld [vmem:[#allocation6 + $0x160] sm:$0xff] }
 0xd49   : > { %5548 = vrot.lane.b32.xlu0 %v8571_v62, %s9259_s17 }
 0xd4b   : > { %5550 = vrot.lane.b32.xlu1 %v8575_v14, %s9259_s17 }
 0xd4d   : > { %5520 = vrot.lane.b32.xlu0 %v8565_v8, %s9260_s18 }
 0xd4f   : > { %5522 = vrot.lane.b32.xlu1 %v8567_v10, %s9260_s18 }
 0xd51   : > { %5524 = vrot.lane.b32.xlu0 %v8571_v62, %s9260_s18 }
 0xd53   : > { %5526 = vrot.lane.b32.xlu1 %v8575_v14, %s9260_s18 }
 0xd55   : > { %5496 = vrot.lane.b32.xlu0 %v8565_v8, %s9261_s19 }
 0xd57   : > { %5498 = vrot.lane.b32.xlu1 %v8567_v10, %s9261_s19 }
 0xd59   : > { %5500 = vrot.lane.b32.xlu0 %v8571_v62, %s9261_s19 }
 0xd5b   : > { %5502 = vrot.lane.b32.xlu1 %v8575_v14, %s9261_s19 }
 0xd5d   : > { %5468 = vrot.lane.b32.xlu0 %v8565_v8, %s9262_s0 }
 0xd5f   : > { %5470 = vrot.lane.b32.xlu1 %v8567_v10, %s9262_s0 }
 0xd61   : > { %5472 = vrot.lane.b32.xlu0 %v8571_v62, %s9262_s0 }
 0xd63   : > { %5474 = vrot.lane.b32.xlu1 %v8575_v14, %s9262_s0 }
 0xd65   : > { %5444 = vrot.lane.b32.xlu0 %v8565_v8, %s9263_s1 }
 0xd67   : > { %5446 = vrot.lane.b32.xlu1 %v8567_v10, %s9263_s1 }
 0xd69   : > { %5448 = vrot.lane.b32.xlu0 %v8571_v62, %s9263_s1 }
 0xd6b   : > { %5450 = vrot.lane.b32.xlu1 %v8575_v14, %s9263_s1 }
 0xd6d   : > { %5420 = vrot.lane.b32.xlu0 %v8565_v8, %s9264_s5 }
 0xd6f   : > { %5422 = vrot.lane.b32.xlu1 %v8567_v10, %s9264_s5 }
 0xd71   : > { %5424 = vrot.lane.b32.xlu0 %v8571_v62, %s9264_s5 }
 0xd73   : > { %5426 = vrot.lane.b32.xlu1 %v8575_v14, %s9264_s5 }
 0xd75   : > { %5396 = vrot.lane.b32.xlu0 %v8565_v8, %s9197_s27 }
 0xd77   : > { %5398 = vrot.lane.b32.xlu1 %v8567_v10, %s9197_s27 }
 0xd79   : > { %5400 = vrot.lane.b32.xlu0 %v8571_v62, %s9197_s27 }
 0xd7b   : > { %5402 = vrot.lane.b32.xlu1 %v8575_v14, %s9197_s27 }
 0xd7d   : > { %5372 = vrot.lane.b32.xlu0 %v8565_v8, %s9198_s25 }
 0xd7f   : > { %5374 = vrot.lane.b32.xlu1 %v8567_v10, %s9198_s25 }
 0xd81   : > { %5376 = vrot.lane.b32.xlu0 %v8571_v62, %s9198_s25 }
 0xd83   : > { %5378 = vrot.lane.b32.xlu1 %v8575_v14, %s9198_s25 }
 0xd85   : > { %5348 = vrot.lane.b32.xlu0 %v8565_v8, %s9199_s26 }
 0xd87   : > { %5350 = vrot.lane.b32.xlu1 %v8567_v10, %s9199_s26 }
 0xd89   : > { %5352 = vrot.lane.b32.xlu0 %v8571_v62, %s9199_s26 }
 0xd8b   : > { %5354 = vrot.lane.b32.xlu1 %v8575_v14, %s9199_s26 }
 0xd8d   : > { %5324 = vrot.lane.b32.xlu0 %v8565_v8, %s9200_s24 }
 0xd8f   : > { %5326 = vrot.lane.b32.xlu1 %v8567_v10, %s9200_s24 }
 0xd91   : > { %5328 = vrot.lane.b32.xlu0 %v8571_v62, %s9200_s24 }
 0xd93   : > { %5330 = vrot.lane.b32.xlu1 %v8575_v14, %s9200_s24 }
 0xd95   : > { %5300 = vrot.lane.b32.xlu0 %v8565_v8, %s9201_s23 }
 0xd97   : > { %5302 = vrot.lane.b32.xlu1 %v8567_v10, %s9201_s23 }
 0xd99   : > { %5304 = vrot.lane.b32.xlu0 %v8571_v62, %s9201_s23 }
 0xd9b   : > { %5306 = vrot.lane.b32.xlu1 %v8575_v14, %s9201_s23 }
 0xd9d   : > { %5276 = vrot.lane.b32.xlu0 %v8565_v8, %s9202_s20 }
 0xd9f   : > { %5278 = vrot.lane.b32.xlu1 %v8567_v10, %s9202_s20 }
 0xda1   : > { %5280 = vrot.lane.b32.xlu0 %v8571_v62, %s9202_s20 }
 0xda3   : > { %5282 = vrot.lane.b32.xlu1 %v8575_v14, %s9202_s20 }
 0xda5   : > { %5252 = vrot.lane.b32.xlu0 %v8565_v8, %s9135_s10 }
 0xda7   : > { %5254 = vrot.lane.b32.xlu1 %v8567_v10, %s9135_s10 }
 0xda9   : > { %5256 = vrot.lane.b32.xlu0 %v8571_v62, %s9135_s10 }
 0xdab   : > { %5258 = vrot.lane.b32.xlu1 %v8575_v14, %s9135_s10 }
 0xdad   : > { %5228 = vrot.lane.b32.xlu0 %v8565_v8, %s9136_s7 }
 0xdaf   : > { %5230 = vrot.lane.b32.xlu1 %v8567_v10, %s9136_s7 }
 0xdb1   : > { %5232 = vrot.lane.b32.xlu0 %v8571_v62, %s9136_s7 }
 0xdb3   : > { %5234 = vrot.lane.b32.xlu1 %v8575_v14, %s9136_s7 }
 0xdb5   : > { %5204 = vrot.lane.b32.xlu0 %v8565_v8, %s9137_s9 }
 0xdb7   : > { %5206 = vrot.lane.b32.xlu1 %v8567_v10, %s9137_s9  ;;  %v5545_v15 = vpop.permute.xlu0 %5544 }
 0xdb9   : > { %v5547_v16 = vpop.permute.xlu1 %5546  ;;  %5208 = vrot.lane.b32.xlu0 %v8571_v62, %s9137_s9 }
 0xdba   : > { %v5554_v19 = vsel %vm662_vm0, %v5545_v15, %v5547_v16 }
 0xdbb   : > { %5210 = vrot.lane.b32.xlu1 %v8575_v14, %s9137_s9  ;;  %v5549_v20 = vpop.permute.xlu0 %5548  ;;  %v5560_v26 = vmul.f32 %v5556_v18, %v5554_v19 }
 0xdbc   : > { %v5553_v21 = vsel %vm662_vm0, %v5547_v16, %v5549_v20 }
 0xdbd   : > { %v5561_v24 = vmul.f32 %v5557_v17, %v5553_v21  ;;  %v5551_v25 = vpop.permute.xlu1 %5550  ;;  %5760 = vrot.lane.b32.xlu0 %v8565_v8, %s9138_s30 }
 0xdbe   : > { %v5552_v27 = vsel %vm662_vm0, %v5549_v20, %v5551_v25  ;;  %v5555_v28 = vsel %vm662_vm0, %v5551_v25, %v5545_v15  ;;  %v5457_v20 = vld [vmem:[#allocation6 + $0x148] sm:$0xff]  ;;  %vm9321_vm0 = vcmp.lt.s32.totalorder %v6571_v5, 30 }
 0xdbf   : > { %v5562_v29 = vmul.f32 %v5558_v22, %v5552_v27  ;;  %v5563_v30 = vmul.f32 %v5559_v23, %v5555_v28  ;;  %5762 = vrot.lane.b32.xlu1 %v8567_v10, %s9138_s30  ;;  %5897 = vmatprep.subr.mxu0 %v5561_v24  ;;  %v5521_v31 = vpop.permute.xlu0 %5520  ;;  %v5459_v27 = vld [vmem:[#allocation6 + $0x158] sm:$0xff] }
 0xdc0   : > { %5898 = vmatpush1.msra.mxu0 %v5560_v26  ;;  %v5456_v26 = vld [vmem:[#allocation6 + $0x140] sm:$0xff] }
 0xdc1   : > { %v5523_v32 = vpop.permute.xlu1 %5522  ;;  %5764 = vrot.lane.b32.xlu0 %v8571_v62, %s9138_s30  ;;  %5968 = vmatprep.subr.mxu1 %v5563_v30 }
 0xdc2   : > { %5969 = vmatpush1.msra.mxu1 %v5562_v29  ;;  %v5530_v35 = vsel %vm636_vm1, %v5521_v31, %v5523_v32  ;;  %v5458_v29 = vld [vmem:[#allocation6 + $0x150] sm:$0xff] }
 0xdc3   : > { %5766 = vrot.lane.b32.xlu1 %v8575_v14, %s9138_s30  ;;  %v5525_v37 = vpop.permute.xlu0 %5524  ;;  %v5536_v2 = vmul.f32 %v5532_v34, %v5530_v35  ;;  %s6196_s30 = sld [smem:[#allocation3 + $0x5]] }
 0xdc4   : > { %v5529_v36 = vsel %vm636_vm1, %v5523_v32, %v5525_v37 }
 0xdc5   : > { %v5537_v42 = vmul.f32 %v5533_v33, %v5529_v36  ;;  %v5527_v1 = vpop.permute.xlu1 %5526  ;;  %5736 = vrot.lane.b32.xlu0 %v8565_v8, %s9139_s29 }
 0xdc6   : > { %v5528_v13 = vsel %vm636_vm1, %v5525_v37, %v5527_v1  ;;  %v5531_v0 = vsel %vm636_vm1, %v5527_v1, %v5521_v31  ;;  %v5433_v37 = vld [vmem:[#allocation6 + $0x128] sm:$0xff]  ;;  %vm9322_vm1 = vmmov %vm9321_vm0 }
 0xdc7   : > { %v5538_v44 = vmul.f32 %v5534_v3, %v5528_v13  ;;  %v5539_v45 = vmul.f32 %v5535_v40, %v5531_v0  ;;  %5738 = vrot.lane.b32.xlu1 %v8567_v10, %s9139_s29  ;;  %5899 = vmatprep.subr.mxu0 %v5537_v42  ;;  %v5497_v46 = vpop.permute.xlu0 %5496  ;;  %v5435_v13 = vld [vmem:[#allocation6 + $0x138] sm:$0xff] }
 0xdc8   : > { %5900 = vmatpush1.msra.mxu0 %v5536_v2  ;;  %v5432_v2 = vld [vmem:[#allocation6 + $0x120] sm:$0xff] }
 0xdc9   : > { %v5499_v47 = vpop.permute.xlu1 %5498  ;;  %5740 = vrot.lane.b32.xlu0 %v8571_v62, %s9139_s29  ;;  %5970 = vmatprep.subr.mxu1 %v5539_v45 }
 0xdca   : > { %5971 = vmatpush1.msra.mxu1 %v5538_v44  ;;  %v5506_v49 = vsel %vm610_vm2, %v5497_v46, %v5499_v47  ;;  %v5434_v44 = vld [vmem:[#allocation6 + $0x130] sm:$0xff] }
 0xdcb   : > { %5742 = vrot.lane.b32.xlu1 %v8575_v14, %s9139_s29  ;;  %v5501_v51 = vpop.permute.xlu0 %5500  ;;  %v5512_v57 = vmul.f32 %v5508_v38, %v5506_v49  ;;  %s9377_s29 = sld [smem:[#allocation10_spill]] }
 0xdcc   : > { %v5505_v43 = vsel %vm610_vm2, %v5499_v47, %v5501_v51 }
 0xdcd   : > { %v5513_v55 = vmul.f32 %v5509_v41, %v5505_v43  ;;  %v5503_v56 = vpop.permute.xlu1 %5502  ;;  %5712 = vrot.lane.b32.xlu0 %v8565_v8, %s9140_s28 }
 0xdce   : > { %v5504_v50 = vsel %vm610_vm2, %v5501_v51, %v5503_v56  ;;  %v5507_v48 = vsel %vm610_vm2, %v5503_v56, %v5497_v46  ;;  %v5409_v51 = vld [vmem:[#allocation6 + $0x108] sm:$0xff]  ;;  %vm9323_vm2 = vmmov %vm9321_vm0 }
 0xdcf   : > { %v5514_v12 = vmul.f32 %v5510_v53, %v5504_v50  ;;  %v5515_v59 = vmul.f32 %v5511_v54, %v5507_v48  ;;  %5714 = vrot.lane.b32.xlu1 %v8567_v10, %s9140_s28  ;;  %5901 = vmatprep.subr.mxu0 %v5513_v55  ;;  %v5469_v61 = vpop.permute.xlu0 %5468  ;;  %v5411_v50 = vld [vmem:[#allocation6 + $0x118] sm:$0xff] }
 0xdd0   : > { %5902 = vmatpush1.msra.mxu0 %v5512_v57  ;;  %v5408_v57 = vld [vmem:[#allocation6 + $0x100] sm:$0xff] }
 0xdd1   : > { %v5471_v63 = vpop.permute.xlu1 %5470  ;;  %5716 = vrot.lane.b32.xlu0 %v8571_v62, %s9140_s28  ;;  %5903 = vmatprep.subr.mxu0 %v8567_v10 }
 0xdd2   : > { %v5478_v4 = vsel %vm580_vm3, %v5469_v61, %v5471_v63  ;;  %5972 = vmatprep.subr.mxu1 %v5515_v59  ;;  %5904 = vmatpush1.msra.mxu0 %v8565_v8 }
 0xdd3   : > { %v5485_v6 = vmul.f32 %v5481_v39, %v5478_v4  ;;  %5973 = vmatpush1.msra.mxu1 %v5514_v12  ;;  %5718 = vrot.lane.b32.xlu1 %v8575_v14, %s9140_s28  ;;  %v5473_v7 = vpop.permute.xlu0 %5472  ;;  %v5410_v12 = vld [vmem:[#allocation6 + $0x110] sm:$0xff] }
 0xdd4   : > { %5974 = vmatprep.subr.mxu1 %v8575_v14  ;;  %v5477_v52 = vsel %vm580_vm3, %v5471_v63, %v5473_v7 }
 0xdd5   : > { %5975 = vmatpush1.msra.mxu1 %v8571_v62  ;;  %v5475_v9 = vpop.permute.xlu1 %5474  ;;  %5688 = vrot.lane.b32.xlu0 %v8565_v8, %s9077_s14  ;;  %v5486_v21 = vmul.f32 %v5482_v11, %v5477_v52 }
 0xdd6   : > { %v5476_v15 = vsel %vm580_vm3, %v5473_v7, %v5475_v9  ;;  %v5479_v16 = vsel %vm580_vm3, %v5475_v9, %v5469_v61  ;;  %5905 = vmatprep.subr.mxu0 %v5485_v6  ;;  %v5385_v7 = vld [vmem:[#allocation6 + $0xe8] sm:$0xff]  ;;  %vm9324_vm3 = vmmov %vm9321_vm0 }
 0xdd7   : > { %v5484_v17 = vmul.f32 %v5480_v60, %v5479_v16  ;;  %v5487_v18 = vmul.f32 %v5483_v58, %v5476_v15  ;;  %5690 = vrot.lane.b32.xlu1 %v8567_v10, %s9077_s14  ;;  %v5445_v19 = vpop.permute.xlu0 %5444  ;;  %v5384_v15 = vld [vmem:[#allocation6 + $0xe0] sm:$0xff]  ;;  %v5387_v16 = vld [vmem:[#allocation6 + $0xf8] sm:$0xff] }
 0xdd9   : > { %v5447_v22 = vpop.permute.xlu1 %5446  ;;  %5692 = vrot.lane.b32.xlu0 %v8571_v62, %s9077_s14  ;;  %5906 = vmatpush1.msra.mxu0 %v5484_v17 }
 0xdda   : > { %v5454_v23 = vsel %vm554_vm4, %v5445_v19, %v5447_v22  ;;  %5976 = vmatprep.subr.mxu1 %v5487_v18  ;;  %v5386_v18 = vld [vmem:[#allocation6 + $0xf0] sm:$0xff] }
 0xddb   : > { %v5461_v24 = vmul.f32 %v5457_v20, %v5454_v23  ;;  %5977 = vmatpush1.msra.mxu1 %v5486_v21  ;;  %5694 = vrot.lane.b32.xlu1 %v8575_v14, %s9077_s14  ;;  %v5449_v25 = vpop.permute.xlu0 %5448 }
 0xddc   : > { %v5453_v30 = vsel %vm554_vm4, %v5447_v22, %v5449_v25 }
 0xddd   : > { %v5451_v28 = vpop.permute.xlu1 %5450  ;;  %5664 = vrot.lane.b32.xlu0 %v8565_v8, %s9078_s13  ;;  %5907 = vmatprep.subr.mxu0 %v5461_v24  ;;  %v5462_v36 = vmul.f32 %v5458_v29, %v5453_v30 }
 0xdde   : > { %v5452_v31 = vsel %vm554_vm4, %v5449_v25, %v5451_v28  ;;  %v5455_v32 = vsel %vm554_vm4, %v5451_v28, %v5445_v19  ;;  %v5361_v25 = vld [vmem:[#allocation6 + $0xc8] sm:$0xff]  ;;  %vm9325_vm4 = vcmp.lt.s32.totalorder %v6571_v5, 31 }
 0xddf   : > { %v5460_v33 = vmul.f32 %v5456_v26, %v5455_v32  ;;  %v5463_v34 = vmul.f32 %v5459_v27, %v5452_v31  ;;  %5666 = vrot.lane.b32.xlu1 %v8567_v10, %s9078_s13  ;;  %v5421_v35 = vpop.permute.xlu0 %5420  ;;  %v6192_v26 = vld [vmem:[%s8986_s2 + $0x58] sm:$0xff]  ;;  %v5360_v32 = vld [vmem:[#allocation6 + $0xc0] sm:$0xff] }
 0xde0   : > { %6194 = vmatprep.mubr.msk.f32.mxu0 %vm1022_vm9, %v6192_v26  ;;  %6195 = vmatprep.mubr.msk.f32.mxu1 %vm1022_vm9, %v6192_v26 }
 0xde1   : > { %v5423_v3 = vpop.permute.xlu1 %5422  ;;  %5668 = vrot.lane.b32.xlu0 %v8571_v62, %s9078_s13  ;;  %5908 = vmatpush1.msra.mxu0 %v5460_v33  ;;  %v5363_v33 = vld [vmem:[#allocation6 + $0xd8] sm:$0xff] }
 0xde2   : > { %v5430_v40 = vsel %vm528_vm5, %v5421_v35, %v5423_v3  ;;  %5978 = vmatprep.subr.mxu1 %v5463_v34 }
 0xde3   : > { %v5437_v42 = vmul.f32 %v5433_v37, %v5430_v40  ;;  %5979 = vmatpush1.msra.mxu1 %v5462_v36  ;;  %5670 = vrot.lane.b32.xlu1 %v8575_v14, %s9078_s13  ;;  %v5425_v1 = vpop.permute.xlu0 %5424  ;;  %s9380_s13 = sld [smem:[#allocation15_spill]] }
 0xde4   : > { %v5429_v45 = vsel %vm528_vm5, %v5423_v3, %v5425_v1 }
 0xde5   : > { %v5427_v0 = vpop.permute.xlu1 %5426  ;;  %5640 = vrot.lane.b32.xlu0 %v8565_v8, %s9079_s15  ;;  %5909 = vmatprep.subr.mxu0 %v5437_v42  ;;  %v5438_v43 = vmul.f32 %v5434_v44, %v5429_v45  ;;  %v6193_v44 = vld [vmem:[%s8987_s3 + $0x28] sm:$0xff] }
 0xde6   : > { %v5428_v46 = vsel %vm528_vm5, %v5425_v1, %v5427_v0  ;;  %v5431_v47 = vsel %vm528_vm5, %v5427_v0, %v5421_v35  ;;  %v5362_v35 = vld [vmem:[#allocation6 + $0xd0] sm:$0xff]  ;;  %vm9326_vm5 = vmmov %vm9325_vm4 }
 0xde7   : > { %v5436_v41 = vmul.f32 %v5432_v2, %v5431_v47  ;;  %v5439_v38 = vmul.f32 %v5435_v13, %v5428_v46  ;;  %5642 = vrot.lane.b32.xlu1 %v8567_v10, %s9079_s15  ;;  %v5397_v49 = vpop.permute.xlu0 %5396  ;;  %v5337_v2 = vld [vmem:[#allocation6 + $0xa8] sm:$0xff]  ;;  %v5336_v46 = vld [vmem:[#allocation6 + $0xa0] sm:$0xff]  ;;  %v5339_v47 = vld [vmem:[#allocation6 + $0xb8] sm:$0xff] }
 0xde9   : > { %v5399_v53 = vpop.permute.xlu1 %5398  ;;  %5644 = vrot.lane.b32.xlu0 %v8571_v62, %s9079_s15  ;;  %5910 = vmatpush1.msra.mxu0 %v5436_v41  ;;  %v5338_v41 = vld [vmem:[#allocation6 + $0xb0] sm:$0xff] }
 0xdea   : > { %v5406_v54 = vsel %vm502_vm6, %v5397_v49, %v5399_v53  ;;  %5980 = vmatprep.subr.mxu1 %v5439_v38 }
 0xdeb   : > { %v5413_v55 = vmul.f32 %v5409_v51, %v5406_v54  ;;  %5981 = vmatpush1.msra.mxu1 %v5438_v43  ;;  %5646 = vrot.lane.b32.xlu1 %v8575_v14, %s9079_s15  ;;  %v5401_v56 = vpop.permute.xlu0 %5400 }
 0xdec   : > { %v5405_v59 = vsel %vm502_vm6, %v5399_v53, %v5401_v56 }
 0xded   : > { %v5403_v48 = vpop.permute.xlu1 %5402  ;;  %5616 = vrot.lane.b32.xlu0 %v8565_v8, %s9080_s12  ;;  %5911 = vmatprep.subr.mxu0 %v5413_v55  ;;  %v5414_v60 = vmul.f32 %v5410_v12, %v5405_v59  ;;  %v5313_v55 = vld [vmem:[#allocation6 + $0x88] sm:$0xff]  ;;  %v5312_v12 = vld [vmem:[#allocation6 + $0x80] sm:$0xff]  ;;  %v5315_v59 = vld [vmem:[#allocation6 + $0x98] sm:$0xff] }
 0xdee   : > { %v5404_v61 = vsel %vm502_vm6, %v5401_v56, %v5403_v48  ;;  %v5407_v39 = vsel %vm502_vm6, %v5403_v48, %v5397_v49  ;;  %vm9327_vm6 = vmmov %vm9325_vm4 }
 0xdef   : > { %v5412_v63 = vmul.f32 %v5408_v57, %v5407_v39  ;;  %v5415_v4 = vmul.f32 %v5411_v50, %v5404_v61  ;;  %5618 = vrot.lane.b32.xlu1 %v8567_v10, %s9080_s12  ;;  %v5373_v6 = vpop.permute.xlu0 %5372  ;;  %v5314_v61 = vld [vmem:[#allocation6 + $0x90] sm:$0xff] }
 0xdf1   : > { %v5375_v58 = vpop.permute.xlu1 %5374  ;;  %5620 = vrot.lane.b32.xlu0 %v8571_v62, %s9080_s12  ;;  %5912 = vmatpush1.msra.mxu0 %v5412_v63 }
 0xdf2   : > { %v5382_v9 = vsel %vm476_vm7, %v5373_v6, %v5375_v58  ;;  %5982 = vmatprep.subr.mxu1 %v5415_v4 }
 0xdf3   : > { %v5389_v11 = vmul.f32 %v5385_v7, %v5382_v9  ;;  %5983 = vmatpush1.msra.mxu1 %v5414_v60  ;;  %5622 = vrot.lane.b32.xlu1 %v8575_v14, %s9080_s12  ;;  %v5377_v52 = vpop.permute.xlu0 %5376 }
 0xdf4   : > { %v5381_v19 = vsel %vm476_vm7, %v5375_v58, %v5377_v52 }
 0xdf5   : > { %v5379_v17 = vpop.permute.xlu1 %5378  ;;  %5592 = vrot.lane.b32.xlu0 %v8565_v8, %s9081_s11  ;;  %5913 = vmatprep.subr.mxu0 %v5389_v11  ;;  %v5390_v27 = vmul.f32 %v5386_v18, %v5381_v19  ;;  %v5289_v11 = vld [vmem:[#allocation6 + $0x68] sm:$0xff]  ;;  %v5288_v18 = vld [vmem:[#allocation6 + $0x60] sm:$0xff]  ;;  %v5291_v19 = vld [vmem:[#allocation6 + $0x78] sm:$0xff] }
 0xdf6   : > { %v5380_v20 = vsel %vm476_vm7, %v5377_v52, %v5379_v17  ;;  %v5383_v21 = vsel %vm476_vm7, %v5379_v17, %v5373_v6  ;;  %vm9328_vm7 = vmmov %vm9325_vm4 }
 0xdf7   : > { %v5388_v22 = vmul.f32 %v5384_v15, %v5383_v21  ;;  %v5391_v23 = vmul.f32 %v5387_v16, %v5380_v20  ;;  %5594 = vrot.lane.b32.xlu1 %v8567_v10, %s9081_s11  ;;  %v5349_v24 = vpop.permute.xlu0 %5348  ;;  %v5290_v20 = vld [vmem:[#allocation6 + $0x70] sm:$0xff] }
 0xdf9   : > { %v5351_v28 = vpop.permute.xlu1 %5350  ;;  %5596 = vrot.lane.b32.xlu0 %v8571_v62, %s9081_s11  ;;  %5914 = vmatpush1.msra.mxu0 %v5388_v22 }
 0xdfa   : > { %v5358_v29 = vsel %vm450_vm8, %v5349_v24, %v5351_v28  ;;  %5984 = vmatprep.subr.mxu1 %v5391_v23 }
 0xdfb   : > { %v5365_v30 = vmul.f32 %v5361_v25, %v5358_v29  ;;  %5985 = vmatpush1.msra.mxu1 %v5390_v27  ;;  %5598 = vrot.lane.b32.xlu1 %v8575_v14, %s9081_s11  ;;  %v5353_v31 = vpop.permute.xlu0 %5352  ;;  %v5265_v29 = vld [vmem:[#allocation6 + $0x48] sm:$0xff]  ;;  %s9379_s11 = sshll.u32 %s9377_s29, 5 }
 0xdfc   : > { %v5357_v37 = vsel %vm450_vm8, %v5351_v28, %v5353_v31  ;;  %s280_s15 = scalar_lea.vmem %s9380_s13, %s9379_s11 }
 0xdfd   : > { %v5355_v34 = vpop.permute.xlu1 %5354  ;;  %5568 = vrot.lane.b32.xlu0 %v8565_v8, %s9082_s8  ;;  %5915 = vmatprep.subr.mxu0 %v5365_v30  ;;  %v5366_v13 = vmul.f32 %v5362_v35, %v5357_v37  ;;  %v5267_v35 = vld [vmem:[#allocation6 + $0x58] sm:$0xff]  ;;  %v5266_v37 = vld [vmem:[#allocation6 + $0x50] sm:$0xff] }
 0xdfe   : > { %v5356_v36 = vsel %vm450_vm8, %v5353_v31, %v5355_v34  ;;  %v5359_v3 = vsel %vm450_vm8, %v5355_v34, %v5349_v24  ;;  %vm9329_vm8 = vcmp.lt.s32.totalorder %v6571_v5, 32  ;;  %v5264_v34 = vld [vmem:[#allocation6 + $0x40] sm:$0xff] }
 0xdff   : > { %v5364_v40 = vmul.f32 %v5360_v32, %v5359_v3  ;;  %v5367_v42 = vmul.f32 %v5363_v33, %v5356_v36  ;;  %5570 = vrot.lane.b32.xlu1 %v8567_v10, %s9082_s8  ;;  %v5325_v1 = vpop.permute.xlu0 %5324  ;;  %vm9330_vm9 = vmmov %vm9329_vm8 }
 0xe00   : > { %vm9332_vm11 = vmmov %vm9329_vm8 }
 0xe01   : > { %v5327_v8 = vpop.permute.xlu1 %5326  ;;  %5572 = vrot.lane.b32.xlu0 %v8571_v62, %s9082_s8  ;;  %5916 = vmatpush1.msra.mxu0 %v5364_v40 }
 0xe02   : > { %v5334_v0 = vsel %vm424_vm10, %v5325_v1, %v5327_v8  ;;  %5986 = vmatprep.subr.mxu1 %v5367_v42 }
 0xe03   : > { %v5341_v45 = vmul.f32 %v5337_v2, %v5334_v0  ;;  %5987 = vmatpush1.msra.mxu1 %v5366_v13  ;;  %5574 = vrot.lane.b32.xlu1 %v8575_v14, %s9082_s8  ;;  %v5329_v10 = vpop.permute.xlu0 %5328  ;;  %v5241_v0 = vld [vmem:[#allocation6 + $0x28] sm:$0xff]  ;;  %s9378_s8 = sld [smem:[#allocation11_spill]] }
 0xe04   : > { %v5333_v62 = vsel %vm424_vm10, %v5327_v8, %v5329_v10 }
 0xe05   : > { %v5331_v38 = vpop.permute.xlu1 %5330  ;;  %5891 = vperm.xlu0 %6258, %v6193_v44   ;;  %5917 = vmatprep.subr.mxu0 %v5341_v45  ;;  %v5342_v14 = vmul.f32 %v5338_v41, %v5333_v62  ;;  %v5243_v41 = vld [vmem:[#allocation6 + $0x38] sm:$0xff]  ;;  %v5242_v62 = vld [vmem:[#allocation6 + $0x30] sm:$0xff] }
 0xe06   : > { %v5332_v49 = vsel %vm424_vm10, %v5329_v10, %v5331_v38  ;;  %v5335_v51 = vsel %vm424_vm10, %v5331_v38, %v5325_v1  ;;  %vm9331_vm10 = vmmov %vm9329_vm8 }
 0xe07   : > { %v5340_v43 = vmul.f32 %v5336_v46, %v5335_v51  ;;  %v5343_v53 = vmul.f32 %v5339_v47, %v5332_v49  ;;  %v5301_v54 = vpop.permute.xlu0 %5300  ;;  %v5240_v47 = vld [vmem:[#allocation6 + $0x20] sm:$0xff] }
 0xe09   : > { %v5303_v56 = vpop.permute.xlu1 %5302  ;;  %5918 = vmatpush1.msra.mxu0 %v5340_v43  ;;  %5988 = vmatprep.subr.mxu1 %v5343_v53 }
 0xe0a   : > { %v5310_v57 = vsel %vm9321_vm0, %v5301_v54, %v5303_v56  ;;  %5989 = vmatpush1.msra.mxu1 %v5342_v14  ;;  %vm9337_vm0 = vcmp.lt.s32.totalorder %v6571_v5, 34 }
 0xe0b   : > { %v5317_v50 = vmul.f32 %v5313_v55, %v5310_v57  ;;  %v5305_v48 = vpop.permute.xlu0 %5304 }
 0xe0c   : > { %v5309_v39 = vsel %vm9322_vm1, %v5303_v56, %v5305_v48  ;;  %v5217_v56 = vld [vmem:[#allocation6 + $0x8] sm:$0xff]  ;;  %vm9338_vm1 = vmmov %vm9337_vm0 }
 0xe0d   : > { %v5307_v63 = vpop.permute.xlu1 %5306  ;;  %5919 = vmatprep.subr.mxu0 %v5317_v50  ;;  %v5318_v9 = vmul.f32 %v5314_v61, %v5309_v39  ;;  %v5219_v61 = vld [vmem:[#allocation6 + $0x18] sm:$0xff]  ;;  %v5218_v39 = vld [vmem:[#allocation6 + $0x10] sm:$0xff] }
 0xe0e   : > { %v5308_v4 = vsel %vm9323_vm2, %v5305_v48, %v5307_v63  ;;  %v5311_v6 = vsel %vm9324_vm3, %v5307_v63, %v5301_v54  ;;  %vm9339_vm2 = vmmov %vm9337_vm0 }
 0xe0f   : > { %v5316_v7 = vmul.f32 %v5312_v12, %v5311_v6  ;;  %v5319_v60 = vmul.f32 %v5315_v59, %v5308_v4  ;;  %v5277_v58 = vpop.permute.xlu0 %5276  ;;  %v5216_v59 = vld [vmem:[#allocation6] sm:$0xff]  ;;  %vm9340_vm3 = vmmov %vm9337_vm0 }
 0xe11   : > { %v5279_v52 = vpop.permute.xlu1 %5278  ;;  %5920 = vmatpush1.msra.mxu0 %v5316_v7  ;;  %5990 = vmatprep.subr.mxu1 %v5319_v60 }
 0xe12   : > { %v5286_v15 = vsel %vm9325_vm4, %v5277_v58, %v5279_v52  ;;  %5991 = vmatpush1.msra.mxu1 %v5318_v9  ;;  %vm9341_vm4 = vcmp.lt.s32.totalorder %v6571_v5, 94 }
 0xe13   : > { %v5293_v16 = vmul.f32 %v5289_v11, %v5286_v15  ;;  %v5281_v17 = vpop.permute.xlu0 %5280  ;;  %v5773_v15 = vld [vmem:[#allocation6 + $0x308] sm:$0xff] }
 0xe14   : > { %v5285_v21 = vsel %vm9326_vm5, %v5279_v52, %v5281_v17  ;;  %vm9342_vm5 = vmmov %vm9341_vm4 }
 0xe15   : > { %v5283_v22 = vpop.permute.xlu1 %5282  ;;  %5921 = vmatprep.subr.mxu0 %v5293_v16  ;;  %v5294_v28 = vmul.f32 %v5290_v20, %v5285_v21  ;;  %v5772_v16 = vld [vmem:[#allocation6 + $0x300] sm:$0xff]  ;;  %v5774_v20 = vld [vmem:[#allocation6 + $0x310] sm:$0xff]  ;;  %v5775_v21 = vld [vmem:[#allocation6 + $0x318] sm:$0xff] }
 0xe16   : > { %v5284_v23 = vsel %vm9327_vm6, %v5281_v17, %v5283_v22  ;;  %v5287_v24 = vsel %vm9328_vm7, %v5283_v22, %v5277_v58  ;;  %vm9343_vm6 = vmmov %vm9341_vm4 }
 0xe17   : > { %v5292_v25 = vmul.f32 %v5288_v18, %v5287_v24  ;;  %v5295_v26 = vmul.f32 %v5291_v19, %v5284_v23  ;;  %v5253_v27 = vpop.permute.xlu0 %5252  ;;  %vm9344_vm7 = vmmov %vm9341_vm4 }
 0xe19   : > { %v5255_v30 = vpop.permute.xlu1 %5254  ;;  %5922 = vmatpush1.msra.mxu0 %v5292_v25  ;;  %5992 = vmatprep.subr.mxu1 %v5295_v26 }
 0xe1a   : > { %v5262_v31 = vsel %vm9329_vm8, %v5253_v27, %v5255_v30  ;;  %5993 = vmatpush1.msra.mxu1 %v5294_v28  ;;  %vm9345_vm8 = vcmp.lt.s32.totalorder %v6571_v5, 95 }
 0xe1b   : > { %v5269_v32 = vmul.f32 %v5265_v29, %v5262_v31  ;;  %v5257_v33 = vpop.permute.xlu0 %5256  ;;  %v5749_v31 = vld [vmem:[#allocation6 + $0x2e8] sm:$0xff] }
 0xe1c   : > { %v5261_v36 = vsel %vm9330_vm9, %v5255_v30, %v5257_v33  ;;  %vm9346_vm9 = vmmov %vm9345_vm8 }
 0xe1d   : > { %v5259_v3 = vpop.permute.xlu1 %5258  ;;  %5923 = vmatprep.subr.mxu0 %v5269_v32  ;;  %v5270_v8 = vmul.f32 %v5266_v37, %v5261_v36  ;;  %v5748_v32 = vld [vmem:[#allocation6 + $0x2e0] sm:$0xff]  ;;  %v5750_v37 = vld [vmem:[#allocation6 + $0x2f0] sm:$0xff]  ;;  %v5751_v36 = vld [vmem:[#allocation6 + $0x2f8] sm:$0xff] }
 0xe1e   : > { %v5260_v40 = vsel %vm9331_vm10, %v5257_v33, %v5259_v3  ;;  %v5263_v42 = vsel %vm9332_vm11, %v5259_v3, %v5253_v27  ;;  %vm9347_vm10 = vmmov %vm9345_vm8 }
 0xe1f   : > { %v5268_v1 = vmul.f32 %v5264_v34, %v5263_v42  ;;  %v5271_v2 = vmul.f32 %v5267_v35, %v5260_v40  ;;  %v5229_v13 = vpop.permute.xlu0 %5228  ;;  %vm9348_vm11 = vmmov %vm9345_vm8 }
 0xe21   : > { %v5231_v44 = vpop.permute.xlu1 %5230  ;;  %5924 = vmatpush1.msra.mxu0 %v5268_v1  ;;  %5994 = vmatprep.subr.mxu1 %v5271_v2 }
 0xe22   : > { %v5238_v45 = vsel %vm9333_vm12, %v5229_v13, %v5231_v44  ;;  %5995 = vmatpush1.msra.mxu1 %v5270_v8  ;;  %vm9349_vm12 = vcmp.lt.s32.totalorder %v6571_v5, 96 }
 0xe23   : > { %v5245_v10 = vmul.f32 %v5241_v0, %v5238_v45  ;;  %v5233_v46 = vpop.permute.xlu0 %5232  ;;  %v5725_v45 = vld [vmem:[#allocation6 + $0x2c8] sm:$0xff] }
 0xe24   : > { %v5237_v38 = vsel %vm9334_vm13, %v5231_v44, %v5233_v46  ;;  %vm9350_vm13 = vmmov %vm9349_vm12 }
 0xe25   : > { %v5235_v49 = vpop.permute.xlu1 %5234  ;;  %5925 = vmatprep.subr.mxu0 %v5245_v10  ;;  %v5246_v55 = vmul.f32 %v5242_v62, %v5237_v38  ;;  %v5724_v10 = vld [vmem:[#allocation6 + $0x2c0] sm:$0xff]  ;;  %v5726_v62 = vld [vmem:[#allocation6 + $0x2d0] sm:$0xff]  ;;  %v5727_v38 = vld [vmem:[#allocation6 + $0x2d8] sm:$0xff] }
 0xe26   : > { %v5236_v51 = vsel %vm9335_vm14, %v5233_v46, %v5235_v49  ;;  %v5239_v43 = vsel %vm9336_vm15, %v5235_v49, %v5229_v13  ;;  %vm9351_vm14 = vmmov %vm9349_vm12 }
 0xe27   : > { %v5244_v53 = vmul.f32 %v5240_v47, %v5239_v43  ;;  %v5247_v54 = vmul.f32 %v5243_v41, %v5236_v51  ;;  %v5205_v14 = vpop.permute.xlu0 %5204  ;;  %vm9352_vm15 = vmmov %vm9349_vm12 }
 0xe29   : > { %v5207_v57 = vpop.permute.xlu1 %5206  ;;  %5926 = vmatpush1.msra.mxu0 %v5244_v53  ;;  %5996 = vmatprep.subr.mxu1 %v5247_v54 }
 0xe2a   : > { %v5214_v50 = vsel %vm9337_vm0, %v5205_v14, %v5207_v57  ;;  %5997 = vmatpush1.msra.mxu1 %v5246_v55  ;;  %vm9353_vm0 = vcmp.lt.s32.totalorder %v6571_v5, 97 }
 0xe2b   : > { %v5221_v48 = vmul.f32 %v5217_v56, %v5214_v50  ;;  %v5209_v12 = vpop.permute.xlu0 %5208  ;;  %v5701_v50 = vld [vmem:[#allocation6 + $0x2a8] sm:$0xff] }
 0xe2c   : > { %v5213_v63 = vsel %vm9338_vm1, %v5207_v57, %v5209_v12  ;;  %vm9354_vm1 = vmmov %vm9353_vm0 }
 0xe2d   : > { %v5211_v4 = vpop.permute.xlu1 %5210  ;;  %5927 = vmatprep.subr.mxu0 %v5221_v48  ;;  %v5222_v11 = vmul.f32 %v5218_v39, %v5213_v63  ;;  %v5700_v48 = vld [vmem:[#allocation6 + $0x2a0] sm:$0xff]  ;;  %v5702_v39 = vld [vmem:[#allocation6 + $0x2b0] sm:$0xff]  ;;  %v5703_v63 = vld [vmem:[#allocation6 + $0x2b8] sm:$0xff] }
 0xe2e   : > { %v5212_v6 = vsel %vm9339_vm2, %v5209_v12, %v5211_v4  ;;  %v5215_v7 = vsel %vm9340_vm3, %v5211_v4, %v5205_v14  ;;  %vm9355_vm2 = vmmov %vm9353_vm0 }
 0xe2f   : > { %v5220_v60 = vmul.f32 %v5216_v59, %v5215_v7  ;;  %v5223_v58 = vmul.f32 %v5219_v61, %v5212_v6  ;;  %v5761_v9 = vpop.permute.xlu0 %5760  ;;  %vm9356_vm3 = vmmov %vm9353_vm0 }
 0xe31   : > { %v5763_v52 = vpop.permute.xlu1 %5762  ;;  %5928 = vmatpush1.msra.mxu0 %v5220_v60  ;;  %5998 = vmatprep.subr.mxu1 %v5223_v58 }
 0xe32   : > { %5999 = vmatpush1.msra.mxu1 %v5222_v11  ;;  %v5770_v17 = vsel %vm9341_vm4, %v5761_v9, %v5763_v52  ;;  %vm9357_vm4 = vcmp.lt.s32.totalorder %v6571_v5, 98 }
 0xe33   : > { %v5765_v18 = vpop.permute.xlu0 %5764  ;;  %v5776_v24 = vmul.f32 %v5772_v16, %v5770_v17  ;;  %v5677_v16 = vld [vmem:[#allocation6 + $0x288] sm:$0xff]  ;;  %v5676_v17 = vld [vmem:[#allocation6 + $0x280] sm:$0xff] }
 0xe34   : > { %v5769_v19 = vsel %vm9342_vm5, %v5763_v52, %v5765_v18  ;;  %vm9358_vm5 = vmmov %vm9357_vm4 }
 0xe35   : > { %v5777_v22 = vmul.f32 %v5773_v15, %v5769_v19  ;;  %v5767_v23 = vpop.permute.xlu1 %5766 }
 0xe36   : > { %v5768_v25 = vsel %vm9343_vm6, %v5765_v18, %v5767_v23  ;;  %v5771_v26 = vsel %vm9344_vm7, %v5767_v23, %v5761_v9  ;;  %vm9359_vm6 = vmmov %vm9357_vm4 }
 0xe37   : > { %v5778_v27 = vmul.f32 %v5774_v20, %v5768_v25  ;;  %v5779_v28 = vmul.f32 %v5775_v21, %v5771_v26  ;;  %5943 = vmatprep.subr.mxu0 %v5777_v22  ;;  %v5737_v29 = vpop.permute.xlu0 %5736  ;;  %v5678_v21 = vld [vmem:[#allocation6 + $0x290] sm:$0xff]  ;;  %v5679_v22 = vld [vmem:[#allocation6 + $0x298] sm:$0xff]  ;;  %vm9360_vm7 = vmmov %vm9357_vm4 }
 0xe38   : > { %5944 = vmatpush2.msra.mxu0 %v5776_v24 }
 0xe39   : > { %v5739_v30 = vpop.permute.xlu1 %5738  ;;  %6014 = vmatprep.subr.mxu1 %v5779_v28 }
 0xe3a   : > { %6015 = vmatpush2.msra.mxu1 %v5778_v27  ;;  %v5746_v33 = vsel %vm9345_vm8, %v5737_v29, %v5739_v30  ;;  %vm9361_vm8 = vcmp.lt.s32.totalorder %v6571_v5, 110 }
 0xe3b   : > { %v5741_v34 = vpop.permute.xlu0 %5740  ;;  %v5752_v42 = vmul.f32 %v5748_v32, %v5746_v33  ;;  %v5653_v32 = vld [vmem:[#allocation6 + $0x268] sm:$0xff]  ;;  %v5652_v33 = vld [vmem:[#allocation6 + $0x260] sm:$0xff] }
 0xe3c   : > { %v5745_v35 = vsel %vm9346_vm9, %v5739_v30, %v5741_v34  ;;  %vm9362_vm9 = vmmov %vm9361_vm8 }
 0xe3d   : > { %v5753_v3 = vmul.f32 %v5749_v31, %v5745_v35  ;;  %v5743_v40 = vpop.permute.xlu1 %5742 }
 0xe3e   : > { %v5744_v1 = vsel %vm9347_vm10, %v5741_v34, %v5743_v40  ;;  %v5747_v2 = vsel %vm9348_vm11, %v5743_v40, %v5737_v29  ;;  %vm9363_vm10 = vmmov %vm9361_vm8 }
 0xe3f   : > { %v5754_v13 = vmul.f32 %v5750_v37, %v5744_v1  ;;  %v5755_v8 = vmul.f32 %v5751_v36, %v5747_v2  ;;  %5945 = vmatprep.subr.mxu0 %v5753_v3  ;;  %v5713_v0 = vpop.permute.xlu0 %5712  ;;  %v5654_v36 = vld [vmem:[#allocation6 + $0x270] sm:$0xff]  ;;  %v5655_v3 = vld [vmem:[#allocation6 + $0x278] sm:$0xff]  ;;  %vm9364_vm11 = vmmov %vm9361_vm8 }
 0xe40   : > { %5946 = vmatpush2.msra.mxu0 %v5752_v42 }
 0xe41   : > { %v5715_v44 = vpop.permute.xlu1 %5714  ;;  %6016 = vmatprep.subr.mxu1 %v5755_v8 }
 0xe42   : > { %6017 = vmatpush2.msra.mxu1 %v5754_v13  ;;  %v5722_v46 = vsel %vm9349_vm12, %v5713_v0, %v5715_v44  ;;  %vm9365_vm12 = vcmp.lt.s32.totalorder %v6571_v5, 111 }
 0xe43   : > { %v5717_v47 = vpop.permute.xlu0 %5716  ;;  %v5728_v43 = vmul.f32 %v5724_v10, %v5722_v46  ;;  %v5629_v10 = vld [vmem:[#allocation6 + $0x248] sm:$0xff]  ;;  %v5628_v46 = vld [vmem:[#allocation6 + $0x240] sm:$0xff] }
 0xe44   : > { %v5721_v41 = vsel %vm9350_vm13, %v5715_v44, %v5717_v47  ;;  %vm9366_vm13 = vmmov %vm9365_vm12 }
 0xe45   : > { %v5729_v49 = vmul.f32 %v5725_v45, %v5721_v41  ;;  %v5719_v51 = vpop.permute.xlu1 %5718 }
 0xe46   : > { %v5720_v53 = vsel %vm9351_vm14, %v5717_v47, %v5719_v51  ;;  %v5723_v54 = vsel %vm9352_vm15, %v5719_v51, %v5713_v0  ;;  %vm9367_vm14 = vmmov %vm9365_vm12 }
 0xe47   : > { %v5730_v14 = vmul.f32 %v5726_v62, %v5720_v53  ;;  %v5731_v55 = vmul.f32 %v5727_v38, %v5723_v54  ;;  %5947 = vmatprep.subr.mxu0 %v5729_v49  ;;  %v5689_v56 = vpop.permute.xlu0 %5688  ;;  %v5630_v38 = vld [vmem:[#allocation6 + $0x250] sm:$0xff]  ;;  %v5631_v49 = vld [vmem:[#allocation6 + $0x258] sm:$0xff]  ;;  %vm9368_vm15 = vmmov %vm9365_vm12 }
 0xe48   : > { %5948 = vmatpush2.msra.mxu0 %v5728_v43 }
 0xe49   : > { %v5691_v57 = vpop.permute.xlu1 %5690  ;;  %6018 = vmatprep.subr.mxu1 %v5731_v55 }
 0xe4a   : > { %6019 = vmatpush2.msra.mxu1 %v5730_v14  ;;  %v5698_v12 = vsel %vm9353_vm0, %v5689_v56, %v5691_v57  ;;  %vm9369_vm0 = vcmp.lt.s32.totalorder %v6571_v5, 112 }
 0xe4b   : > { %v5693_v59 = vpop.permute.xlu0 %5692  ;;  %v5704_v7 = vmul.f32 %v5700_v48, %v5698_v12  ;;  %v5605_v48 = vld [vmem:[#allocation6 + $0x228] sm:$0xff]  ;;  %v5604_v12 = vld [vmem:[#allocation6 + $0x220] sm:$0xff] }
 0xe4c   : > { %v5697_v61 = vsel %vm9354_vm1, %v5691_v57, %v5693_v59  ;;  %vm9370_vm1 = vmmov %vm9369_vm0 }
 0xe4d   : > { %v5705_v4 = vmul.f32 %v5701_v50, %v5697_v61  ;;  %v5695_v6 = vpop.permute.xlu1 %5694 }
 0xe4e   : > { %v5696_v60 = vsel %vm9355_vm2, %v5693_v59, %v5695_v6  ;;  %v5699_v58 = vsel %vm9356_vm3, %v5695_v6, %v5689_v56  ;;  %vm9371_vm2 = vmmov %vm9369_vm0 }
 0xe4f   : > { %v5706_v9 = vmul.f32 %v5702_v39, %v5696_v60  ;;  %v5707_v11 = vmul.f32 %v5703_v63, %v5699_v58  ;;  %5949 = vmatprep.subr.mxu0 %v5705_v4  ;;  %v5665_v52 = vpop.permute.xlu0 %5664  ;;  %v5606_v63 = vld [vmem:[#allocation6 + $0x230] sm:$0xff]  ;;  %v5607_v4 = vld [vmem:[#allocation6 + $0x238] sm:$0xff]  ;;  %vm9372_vm3 = vmmov %vm9369_vm0 }
 0xe50   : > { %5950 = vmatpush2.msra.mxu0 %v5704_v7 }
 0xe51   : > { %v5667_v15 = vpop.permute.xlu1 %5666  ;;  %6020 = vmatprep.subr.mxu1 %v5707_v11 }
 0xe52   : > { %6021 = vmatpush2.msra.mxu1 %v5706_v9  ;;  %v5674_v18 = vsel %vm9357_vm4, %v5665_v52, %v5667_v15  ;;  %vm9373_vm4 = vcmp.lt.s32.totalorder %v6571_v5, 113 }
 0xe53   : > { %v5669_v19 = vpop.permute.xlu0 %5668  ;;  %v5680_v25 = vmul.f32 %v5676_v17, %v5674_v18  ;;  %v5581_v17 = vld [vmem:[#allocation6 + $0x208] sm:$0xff]  ;;  %v5580_v18 = vld [vmem:[#allocation6 + $0x200] sm:$0xff] }
 0xe54   : > { %v5673_v20 = vsel %vm9358_vm5, %v5667_v15, %v5669_v19  ;;  %vm9374_vm5 = vmmov %vm9373_vm4 }
 0xe55   : > { %v5681_v23 = vmul.f32 %v5677_v16, %v5673_v20  ;;  %v5671_v24 = vpop.permute.xlu1 %5670 }
 0xe56   : > { %v5672_v26 = vsel %vm9359_vm6, %v5669_v19, %v5671_v24  ;;  %v5675_v27 = vsel %vm9360_vm7, %v5671_v24, %v5665_v52  ;;  %vm9375_vm6 = vmmov %vm9373_vm4 }
 0xe57   : > { %v5682_v28 = vmul.f32 %v5678_v21, %v5672_v26  ;;  %v5683_v29 = vmul.f32 %v5679_v22, %v5675_v27  ;;  %5951 = vmatprep.subr.mxu0 %v5681_v23  ;;  %v5641_v30 = vpop.permute.xlu0 %5640  ;;  %v5582_v22 = vld [vmem:[#allocation6 + $0x210] sm:$0xff]  ;;  %v5583_v23 = vld [vmem:[#allocation6 + $0x218] sm:$0xff]  ;;  %vm9376_vm7 = vmmov %vm9373_vm4 }
 0xe58   : > { %5952 = vmatpush2.msra.mxu0 %v5680_v25 }
 0xe59   : > { %v5643_v31 = vpop.permute.xlu1 %5642  ;;  %6022 = vmatprep.subr.mxu1 %v5683_v29  ;;  %v6191_v29 = vld [vmem:[%s8986_s2 + $0x50] sm:$0xff] }
 0xe5a   : > { %6023 = vmatpush2.msra.mxu1 %v5682_v28  ;;  %v5650_v34 = vsel %vm9361_vm8, %v5641_v30, %v5643_v31 }
 0xe5b   : > { %v5645_v35 = vpop.permute.xlu0 %5644  ;;  %v5656_v1 = vmul.f32 %v5652_v33, %v5650_v34  ;;  %v6044_v34 = vstv %s6196_s30 }
 0xe5c   : > { %v5649_v37 = vsel %vm9362_vm9, %v5643_v31, %v5645_v35 }
 0xe5d   : > { %v5657_v40 = vmul.f32 %v5653_v32, %v5649_v37  ;;  %v5647_v42 = vpop.permute.xlu1 %5646 }
 0xe5e   : > { %v5648_v2 = vsel %vm9363_vm10, %v5645_v35, %v5647_v42  ;;  %v5651_v13 = vsel %vm9364_vm11, %v5647_v42, %v5641_v30 }
 0xe5f   : > { %v5658_v8 = vmul.f32 %v5654_v36, %v5648_v2  ;;  %v5659_v0 = vmul.f32 %v5655_v3, %v5651_v13  ;;  %5953 = vmatprep.subr.mxu0 %v5657_v40  ;;  %v5617_v44 = vpop.permute.xlu0 %5616  ;;  %v6260_v13 = vld [vmem:[%s9378_s8] sm:$0xff] }
 0xe60   : > { %5954 = vmatpush2.msra.mxu0 %v5656_v1 }
 0xe61   : > { %v5619_v45 = vpop.permute.xlu1 %5618  ;;  %6024 = vmatprep.subr.mxu1 %v5659_v0 }
 0xe62   : > { %6025 = vmatpush2.msra.mxu1 %v5658_v8  ;;  %v5626_v47 = vsel %vm9365_vm12, %v5617_v44, %v5619_v45 }
 0xe63   : > { %v5621_v41 = vpop.permute.xlu0 %5620  ;;  %v5632_v53 = vmul.f32 %v5628_v46, %v5626_v47 }
 0xe64   : > { %v5625_v62 = vsel %vm9366_vm13, %v5619_v45, %v5621_v41 }
 0xe65   : > { %v5633_v51 = vmul.f32 %v5629_v10, %v5625_v62  ;;  %v5623_v43 = vpop.permute.xlu1 %5622  ;;  %v6261_v10 = vld [vmem:[%s9378_s8 + $0x8] sm:$0xff]  ;;  %v6262_v62 = vld [vmem:[%s9378_s8 + $0x10] sm:$0xff] }
 0xe66   : > { %v5624_v54 = vsel %vm9367_vm14, %v5621_v41, %v5623_v43  ;;  %v5627_v14 = vsel %vm9368_vm15, %v5623_v43, %v5617_v44 }
 0xe67   : > { %v5634_v55 = vmul.f32 %v5630_v38, %v5624_v54  ;;  %v5635_v56 = vmul.f32 %v5631_v49, %v5627_v14  ;;  %5955 = vmatprep.subr.mxu0 %v5633_v51  ;;  %v5593_v57 = vpop.permute.xlu0 %5592  ;;  %v6263_v51 = vld [vmem:[%s9378_s8 + $0x18] sm:$0xff] }
 0xe68   : > { %5956 = vmatpush2.msra.mxu0 %v5632_v53 }
 0xe69   : > { %v5595_v50 = vpop.permute.xlu1 %5594  ;;  %6026 = vmatprep.subr.mxu1 %v5635_v56 }
 0xe6a   : > { %6027 = vmatpush2.msra.mxu1 %v5634_v55  ;;  %v5602_v59 = vsel %vm9369_vm0, %v5593_v57, %v5595_v50 }
 0xe6b   : > { %v5597_v61 = vpop.permute.xlu0 %5596  ;;  %v5608_v60 = vmul.f32 %v5604_v12, %v5602_v59 }
 0xe6c   : > { %v5601_v39 = vsel %vm9370_vm1, %v5595_v50, %v5597_v61 }
 0xe6d   : > { %v5609_v6 = vmul.f32 %v5605_v48, %v5601_v39  ;;  %v5599_v7 = vpop.permute.xlu1 %5598 }
 0xe6e   : > { %v5600_v58 = vsel %vm9371_vm2, %v5597_v61, %v5599_v7  ;;  %v5603_v9 = vsel %vm9372_vm3, %v5599_v7, %v5593_v57 }
 0xe6f   : > { %v5610_v11 = vmul.f32 %v5606_v63, %v5600_v58  ;;  %v5611_v52 = vmul.f32 %v5607_v4, %v5603_v9  ;;  %5957 = vmatprep.subr.mxu0 %v5609_v6  ;;  %v5569_v15 = vpop.permute.xlu0 %5568 }
 0xe70   : > { %5958 = vmatpush2.msra.mxu0 %v5608_v60 }
 0xe71   : > { %v5571_v16 = vpop.permute.xlu1 %5570  ;;  %6028 = vmatprep.subr.mxu1 %v5611_v52 }
 0xe72   : > { %6029 = vmatpush2.msra.mxu1 %v5610_v11  ;;  %v5578_v19 = vsel %vm9373_vm4, %v5569_v15, %v5571_v16 }
 0xe73   : > { %v5573_v20 = vpop.permute.xlu0 %5572  ;;  %v5584_v26 = vmul.f32 %v5580_v18, %v5578_v19 }
 0xe74   : > { %v5577_v21 = vsel %vm9374_vm5, %v5571_v16, %v5573_v20 }
 0xe75   : > { %v5585_v24 = vmul.f32 %v5581_v17, %v5577_v21  ;;  %v5575_v25 = vpop.permute.xlu1 %5574 }
 0xe76   : > { %v5576_v27 = vsel %vm9375_vm6, %v5573_v20, %v5575_v25  ;;  %v5579_v28 = vsel %vm9376_vm7, %v5575_v25, %v5569_v15 }
 0xe77   : > { %v5586_v30 = vmul.f32 %v5582_v22, %v5576_v27  ;;  %v5587_v31 = vmul.f32 %v5583_v23, %v5579_v28  ;;  %5959 = vmatprep.subr.mxu0 %v5585_v24 }
 0xe78   : > { %5960 = vmatpush2.msra.mxu0 %v5584_v26 }
 0xe79   : > { %5962 = vmatmul.mubr.f32.vlgmr.msra.gmra.mxu0 %v6191_v29  ;;  %6030 = vmatprep.subr.mxu1 %v5587_v31 }
 0xe7a   : > { %6031 = vmatpush2.msra.mxu1 %v5586_v30 }
 0xe7b   : > { %6033 = vmatmul.mubr.f32.vlgmr.msra.gmra.mxu1 %v6191_v29 }
 0xe80   : > { %v5892_v32 = vpop.permute.xlu0 %5891 }
 0xf39   : > { %v5963_v33 = vpop.f32.mrf.mxu0 }
 0xf3a   : > { %v5964_v5 = vadd.f32 %v5963_v33, %v5892_v32 }
 0xf3b   : > { %v5965_v35 = vpop.f32.mrf.mxu0  ;;  %v6034_v37 = vpop.f32.mrf.mxu1 }
 0xf3c   : > { %vm6040_vm8 = vcmp.ge.f32.partialorder %v5964_v5, 0.0  ;;  %v6045_v36 = vmul.f32 %v6044_v34, %v5964_v5  ;;  %v5966_v3 = vadd.f32 %v5965_v35, %v5892_v32  ;;  %v6035_v40 = vadd.f32 %v6034_v37, %v5892_v32 }
 0xf3d   : > { %v6036_v42 = vpop.f32.mrf.mxu1 }
 0xf3e   : > { %v6049_v1 = vsel %vm6040_vm8, %v5964_v5, %v6045_v36  ;;  %vm6041_vm9 = vcmp.ge.f32.partialorder %v5966_v3, 0.0  ;;  %v6046_v2 = vmul.f32 %v6044_v34, %v5966_v3  ;;  %vm6042_vm10 = vcmp.ge.f32.partialorder %v6035_v40, 0.0 }
 0xf3f   : > { %v6053_v8 = vadd.f32 %v6260_v13, %v6049_v1  ;;  %v6047_v0 = vmul.f32 %v6044_v34, %v6035_v40  ;;  %v6037_v44 = vadd.f32 %v6036_v42, %v5892_v32 }
 0xf40   : > { %v6050_v45 = vsel %vm6041_vm9, %v5966_v3, %v6046_v2 }
 0xf41   : > { %6057 = vst [vmem:[%s280_s15] sm:$0xff] %v6053_v8  ;;  %v6054_v46 = vadd.f32 %v6261_v10, %v6050_v45  ;;  %v6051_v47 = vsel %vm6042_vm10, %v6035_v40, %v6047_v0  ;;  %vm6043_vm11 = vcmp.ge.f32.partialorder %v6037_v44, 0.0  ;;  %v6048_v41 = vmul.f32 %v6044_v34, %v6037_v44 }
 0xf42   : > { %v6055_v38 = vadd.f32 %v6262_v62, %v6051_v47 }
 0xf43   : > { %6058 = vst [vmem:[%s280_s15 + $0x8] sm:$0xff] %v6054_v46  ;;  %v6052_v49 = vsel %vm6043_vm11, %v6037_v44, %v6048_v41 }
 0xf44   : > { %6059 = vst [vmem:[%s280_s15 + $0x10] sm:$0xff] %v6055_v38  ;;  %v6056_v43 = vadd.f32 %v6263_v51, %v6052_v49 }
 0xf46   : > { %6060 = vst [vmem:[%s280_s15 + $0x18] sm:$0xff] %v6056_v43 }
 0xf47 PF: > { %s9381_s10 = sld [smem:[#allocation9_spill]] }
 0xf4d   : > { %s18_s21 = sadd.s32 1, %s9381_s10  }
 0xf4e   : > { %p15_p5 = scmp.ge.s32.totalorder %s18_s21, 4  }
 0xf50   :  { %17 = sbr.rel (!%p15_p5) target bundleno = 7 (0x7), region = 118 }
 0xf55   :  { %6082 = vsyncpa [#allocation4], 1 }
 0xf56   :  { %6084 = vsyncpa [#allocation4 + $0x1], 1 }
 0xf57   :  { %6085 = vsyncpa [#allocation5], 1 }
 0xf58   :  { %6087 = vsyncpa [#allocation5 + $0x1], 1 }

</bundles_post_ra>
